<compile_context>
chip_gen: v6e
topology: v6e:2x2x1
jax: 0.10.0
libtpu: 0.0.40
codegen_flags: <defaults>
</compile_context>

<pallas_src>
import functools

import jax
import jax.numpy as jnp
from jax.experimental import pallas as pl
from jax.experimental.pallas import tpu as pltpu

VMEM_LIMIT = 32 * 1024 * 1024          # scoped-VMEM budget valid on v5e/v6e/v7x
_SPATIAL_BLOCK_BYTES = 4 * 1024 * 1024  # target bytes for the activation block


def _pick_tile(extent, bytes_per_unit, budget=_SPATIAL_BLOCK_BYTES):
    """Largest tile (full extent, or a multiple of 8) that keeps the block under budget."""
    if extent <= 8 or extent * bytes_per_unit <= budget:
        return int(extent)
    t = (budget // bytes_per_unit) // 8 * 8
    return int(max(8, min(t, extent)))


# -----------------------------------------------------------------------------
# Fused separable SAConv kernel (3x1 / 1x3, stride 1, dilated)
#   y = [relu]( conv(x * m) + bias_bnfolded [+ residual] )
# -----------------------------------------------------------------------------
def _sepconv_kernel(*refs, axis, dil, relu, use_res):
    if use_res:
        x_ref, m_ref, w_ref, b_ref, r_ref, o_ref = refs
    else:
        x_ref, m_ref, w_ref, b_ref, o_ref = refs
        r_ref = None

    xm = x_ref[0] * m_ref[0]                      # sparsity mask fused at load (f32)
    _, o0, o1, cout = o_ref.shape
    cin = xm.shape[-1]
    rows = o0 * o1

    acc = jnp.zeros((rows, cout), jnp.float32)
    for t in range(3):                            # in-kernel tap accumulation (no im2col)
        if axis == 0:                             # taps along H (3x1 conv)
            sl = xm[t * dil: t * dil + o0, :, :]
        else:                                     # taps along W (1x3 conv)
            sl = xm[:, t * dil: t * dil + o1, :]
        a = sl.reshape(rows, cin).astype(jnp.bfloat16)
        acc = acc + jnp.dot(a, w_ref[t], preferred_element_type=jnp.float32)

    y = acc + b_ref[...]                          # BN-folded bias (f32 epilogue)
    if use_res:
        y = y + r_ref[0].reshape(rows, cout)
    if relu:
        y = jnp.maximum(y, 0.0)
    o_ref[0] = y.reshape(o0, o1, cout).astype(o_ref.dtype)


def sepconv(x, m, w3, b, *, dil, axis, relu, residual=None):
    """x: [N,H,W,C], m: [N,H,W,1], w3: [3,C,Cout] bf16 (BN folded), b: [1,Cout]."""
    n, h, w, c = x.shape
    cout = w3.shape[-1]
    use_res = residual is not None

    if axis == "h":                               # 3x1 conv: taps along H, tile W
        xp = jnp.pad(x, ((0, 0), (dil, dil), (0, 0), (0, 0)))
        mp = jnp.pad(m, ((0, 0), (dil, dil), (0, 0), (0, 0)))
        hp = h + 2 * dil
        tw = _pick_tile(w, hp * c * 4)
        grid = (n, pl.cdiv(w, tw))
        x_spec = pl.BlockSpec((1, hp, tw, c), lambda i, j: (i, 0, j, 0))
        m_spec = pl.BlockSpec((1, hp, tw, 1), lambda i, j: (i, 0, j, 0))
        o_spec = pl.BlockSpec((1, h, tw, cout), lambda i, j: (i, 0, j, 0))
        kaxis = 0
    else:                                         # 1x3 conv: taps along W, tile H
        xp = jnp.pad(x, ((0, 0), (0, 0), (dil, dil), (0, 0)))
        mp = jnp.pad(m, ((0, 0), (0, 0), (dil, dil), (0, 0)))
        wp = w + 2 * dil
        th = _pick_tile(h, wp * c * 4)
        grid = (n, pl.cdiv(h, th))
        x_spec = pl.BlockSpec((1, th, wp, c), lambda i, j: (i, j, 0, 0))
        m_spec = pl.BlockSpec((1, th, wp, 1), lambda i, j: (i, j, 0, 0))
        o_spec = pl.BlockSpec((1, th, w, cout), lambda i, j: (i, j, 0, 0))
        kaxis = 1

    w_spec = pl.BlockSpec((3, c, cout), lambda i, j: (0, 0, 0))   # resident weights
    b_spec = pl.BlockSpec((1, cout), lambda i, j: (0, 0))

    args = [xp, mp, w3, b]
    in_specs = [x_spec, m_spec, w_spec, b_spec]
    if use_res:
        args.append(residual)
        in_specs.append(o_spec)                   # residual tiled like the output

    return pl.pallas_call(
        functools.partial(_sepconv_kernel, axis=kaxis, dil=dil, relu=relu,
                          use_res=use_res),
        out_shape=jax.ShapeDtypeStruct((n, h, w, cout), jnp.float32),
        grid=grid,
        in_specs=in_specs,
        out_specs=o_spec,
        compiler_params=pltpu.CompilerParams(
            dimension_semantics=("parallel", "parallel"),
            vmem_limit_bytes=VMEM_LIMIT),
    )(*args)


# -----------------------------------------------------------------------------
# Fused DownsamplerBlock kernel:
#   out = relu( bn( cat[ conv3x3_s2(x*m)+bias , maxpool2x2(x) ] ) )
# stride-2 conv done via the 4 stride-2 phases of the 1-padded input (no
# duplicated patches); pool branch placed into its lane range via a constant
# matmul so the store stays one lane-dense [*, Cout] slab.
# -----------------------------------------------------------------------------
def _downsampler_kernel(xph_ref, mph_ref, w_ref, pm_ref, b_ref, o_ref):
    xph = xph_ref[0]                              # (4, Ho+1, Wo+1, Cin) f32
    xm = xph * mph_ref[0]                         # mask fused into the conv branch
    _, ho, wo, cout = o_ref.shape
    cin = xph.shape[-1]
    rows = ho * wo

    acc = jnp.zeros((rows, cout), jnp.float32)
    for i in range(3):                            # 3x3 / stride-2 taps
        for j in range(3):
            p = (i % 2) * 2 + (j % 2)             # phase holding rows 2*oh+i, cols 2*ow+j
            sl = xm[p, i // 2: i // 2 + ho, j // 2: j // 2 + wo, :]
            a = sl.reshape(rows, cin).astype(jnp.bfloat16)
            acc = acc + jnp.dot(a, w_ref[i * 3 + j],
                                preferred_element_type=jnp.float32)

    # 2x2 / stride-2 max-pool of the un-masked input, from the same phases
    # (indices never touch the zero padding).
    pool = jnp.maximum(
        jnp.maximum(xph[3, 0:ho, 0:wo, :], xph[2, 0:ho, 1:1 + wo, :]),
        jnp.maximum(xph[1, 1:1 + ho, 0:wo, :], xph[0, 1:1 + ho, 1:1 + wo, :]))
    acc = acc + jnp.dot(pool.reshape(rows, cin), pm_ref[...],
                        preferred_element_type=jnp.float32)

    y = jnp.maximum(acc + b_ref[...], 0.0)        # folded BN shift + ReLU
    o_ref[0] = y.reshape(ho, wo, cout).astype(o_ref.dtype)


def downsampler(x, m, w9, pool_mat, b):
    n, h, w, c = x.shape
    cout = w9.shape[-1]
    ho, wo = h // 2, w // 2

    xp = jnp.pad(x, ((0, 0), (1, 1), (1, 1), (0, 0)))
    mp = jnp.pad(m, ((0, 0), (1, 1), (1, 1), (0, 0)))

    def phases(a):                                # 4 stride-2 phases, each (Ho+1, Wo+1, .)
        return jnp.stack([a[:, 0::2, 0::2], a[:, 0::2, 1::2],
                          a[:, 1::2, 0::2], a[:, 1::2, 1::2]], axis=1)

    xph, mph = phases(xp), phases(mp)
    hq, wq = ho + 1, wo + 1

    # TODO(synk): at very large resolutions this per-image block should also be H-tiled.
    return pl.pallas_call(
        _downsampler_kernel,
        out_shape=jax.ShapeDtypeStruct((n, ho, wo, cout), jnp.float32),
        grid=(n,),
        in_specs=[
            pl.BlockSpec((1, 4, hq, wq, c), lambda i: (i, 0, 0, 0, 0)),
            pl.BlockSpec((1, 4, hq, wq, 1), lambda i: (i, 0, 0, 0, 0)),
            pl.BlockSpec((9, c, cout), lambda i: (0, 0, 0)),
            pl.BlockSpec((c, cout), lambda i: (0, 0)),
            pl.BlockSpec((1, cout), lambda i: (0, 0)),
        ],
        out_specs=pl.BlockSpec((1, ho, wo, cout), lambda i: (i, 0, 0, 0)),
        compiler_params=pltpu.CompilerParams(
            dimension_semantics=("parallel",),
            vmem_limit_bytes=VMEM_LIMIT),
    )(xph, mph, w9, pool_mat, b)


# -----------------------------------------------------------------------------
# Mask max-pool (1-channel, tiny) — plain XLA reduce_window, -inf padding.
# -----------------------------------------------------------------------------
def _mask_pool(m, kernel, stride, padding):
    return jax.lax.reduce_window(
        m, -jnp.inf, jax.lax.max,
        window_dimensions=(1, kernel[0], kernel[1], 1),
        window_strides=(1, stride[0], stride[1], 1),
        padding=((0, 0), (padding[0], padding[0]), (padding[1], padding[1]), (0, 0)))


# -----------------------------------------------------------------------------
# Module forward functions
# -----------------------------------------------------------------------------
def downsampler_fwd(p, x, m):
    out = downsampler(x, m, p["w"], p["pool_mat"], p["b"])
    m = _mask_pool(m, (3, 3), (2, 2), (1, 1))     # SAConv's MaxPool(3, s2, p1) on the mask
    return out, m


def non_bottleneck_fwd(p, x, m, d):
    out = sepconv(x, m, p["w1"], p["b1"], dil=1, axis="h", relu=True)
    m = _mask_pool(m, (3, 1), (1, 1), (1, 0))
    out = sepconv(out, m, p["w2"], p["b2"], dil=1, axis="w", relu=True)       # bn1 fused
    m = _mask_pool(m, (1, 3), (1, 1), (0, 1))
    out = sepconv(out, m, p["w3"], p["b3"], dil=d, axis="h", relu=True)
    out = sepconv(out, m, p["w4"], p["b4"], dil=d, axis="w", relu=True,
                  residual=x)                                                 # bn2 + add fused
    # TODO(synk): Dropout2d(p=0.1) is identity in eval mode; no stochastic drop applied.
    return out, m


def encoder_fwd(params, x, m):
    out, m = downsampler_fwd(params["initial"], x, m)
    for kind, p, arg in params["layers"]:
        if kind == "down":
            out, m = downsampler_fwd(p, out, m)
        else:
            out, m = non_bottleneck_fwd(p, out, m, arg)
    return out, m


def encoder_apply(params, x_nchw, m_nchw):
    x = jnp.transpose(x_nchw, (0, 2, 3, 1))       # NCHW -> NHWC
    m = jnp.transpose(m_nchw, (0, 2, 3, 1))
    out, m_out = encoder_fwd(params, x, m)
    return jnp.transpose(out, (0, 3, 1, 2)), jnp.transpose(m_out, (0, 3, 1, 2))


# -----------------------------------------------------------------------------
# Deterministic parameter init (BN folded, weights pre-transposed, bf16)
# -----------------------------------------------------------------------------
def _kaiming_conv(key, cout, cin, kh, kw):
    std = (2.0 / (cout * kh * kw)) ** 0.5         # kaiming_normal_, fan_out, relu
    return std * jax.random.normal(key, (cout, cin, kh, kw), jnp.float32)


def _bn_affine(c, eps=1e-3):
    # Eval-mode BatchNorm (gamma=1, beta=0, running_mean=0, running_var=1, eps=1e-3).
    gamma = jnp.ones((c,), jnp.float32)
    beta = jnp.zeros((c,), jnp.float32)
    mean = jnp.zeros((c,), jnp.float32)
    var = jnp.ones((c,), jnp.float32)
    scale = gamma / jnp.sqrt(var + eps)
    shift = beta - mean * scale
    return scale, shift


def init_sepconv(key, cin, cout, orient, bn=None):
    kh, kw = (3, 1) if orient == "h" else (1, 3)
    w = _kaiming_conv(key, cout, cin, kh, kw)
    b = jnp.zeros((cout,), jnp.float32)
    wt = w[:, :, :, 0] if orient == "h" else w[:, :, 0, :]    # (cout, cin, 3)
    w3 = jnp.transpose(wt, (2, 1, 0))                          # (3, cin, cout)
    if bn is not None:
        scale, shift = bn
        w3 = w3 * scale[None, None, :]
        b = b * scale + shift
    return w3.astype(jnp.bfloat16), b.reshape(1, cout)


def init_non_bottleneck(key, chann):
    k1, k2, k3, k4 = jax.random.split(key, 4)
    w1, b1 = init_sepconv(k1, chann, chann, "h")
    w2, b2 = init_sepconv(k2, chann, chann, "w", bn=_bn_affine(chann))   # bn1 folded
    w3, b3 = init_sepconv(k3, chann, chann, "h")
    w4, b4 = init_sepconv(k4, chann, chann, "w", bn=_bn_affine(chann))   # bn2 folded
    return {"w1": w1, "b1": b1, "w2": w2, "b2": b2,
            "w3": w3, "b3": b3, "w4": w4, "b4": b4}


def init_downsampler(key, cin, cout):
    cconv = cout - cin
    w = _kaiming_conv(key, cconv, cin, 3, 3)
    b = jnp.zeros((cconv,), jnp.float32)
    scale, shift = _bn_affine(cout)
    # Conv branch: fold BN scale/shift, zero-pad output channels to the full lane-dense width.
    w9 = jnp.transpose(w, (2, 3, 1, 0)).reshape(9, cin, cconv) * scale[None, None, :cconv]
    w9 = jnp.concatenate([w9, jnp.zeros((9, cin, cin), jnp.float32)], axis=-1)
    b_full = jnp.concatenate([b * scale[:cconv] + shift[:cconv], shift[cconv:]])
    # Pool branch: constant placement matrix scattering BN-scaled pooled channels
    # into output lanes [cconv, cout) (keeps the store one dense slab, no concat).
    pool_mat = jnp.concatenate(
        [jnp.zeros((cin, cconv), jnp.float32), jnp.diag(scale[cconv:])], axis=-1)
    return {"w": w9.astype(jnp.bfloat16), "pool_mat": pool_mat,
            "b": b_full.reshape(1, cout)}


def init_encoder(key, in_channels):
    keys = jax.random.split(key, 32)
    ki = iter(range(32))
    params = {"initial": init_downsampler(keys[next(ki)], in_channels, 16),
              "layers": []}
    params["layers"].append(("down", init_downsampler(keys[next(ki)], 16, 64), None))
    for _ in range(5):
        params["layers"].append(("nb", init_non_bottleneck(keys[next(ki)], 64), 1))
    params["layers"].append(("down", init_downsampler(keys[next(ki)], 64, 128), None))
    for _ in range(2):
        for d in (2, 4, 8, 16):
            params["layers"].append(("nb", init_non_bottleneck(keys[next(ki)], 128), d))
    return params


# -----------------------------------------------------------------------------
# Main
# -----------------------------------------------------------------------------
if __name__ == "__main__":
    key = jax.random.PRNGKey(0)
    k_param, k_x, k_m = jax.random.split(key, 3)

    batch, in_channels, spatial = 2, 4, 16
    x = jax.random.normal(k_x, (batch, in_channels, spatial, spatial), jnp.float32)
    m = (jax.random.uniform(k_m, (batch, 1, spatial, spatial)) > 0.5).astype(jnp.float32)

    params = init_encoder(k_param, in_channels)

    fwd = jax.jit(lambda xx, mm: encoder_apply(params, xx, mm))
    out, m_out = fwd(x, m)
    jax.block_until_ready(out)
    jax.block_until_ready(m_out)

    assert out.shape == (batch, 128, spatial // 8, spatial // 8), out.shape
    assert m_out.shape == (batch, 1, spatial // 8, spatial // 8), m_out.shape
    print("KERNEL_OK")
</pallas_src>

<mosaic_0001>
module attributes {stable_mosaic.version = 11 : i64} {
  func.func @_downsampler_kernel(%arg0: i32, %arg1: memref<1x4x9x9x4xf32, #tpu.memory_space<vmem>>, %arg2: memref<1x4x9x9x1xf32, #tpu.memory_space<vmem>>, %arg3: memref<9x4x16xbf16, #tpu.memory_space<vmem>>, %arg4: memref<4x16xf32, #tpu.memory_space<vmem>>, %arg5: memref<1x16xf32, #tpu.memory_space<vmem>>, %arg6: memref<1x8x8x16xf32, #tpu.memory_space<vmem>>) attributes {dimension_semantics = [#tpu.dimension_semantics<parallel>], iteration_bounds = array<i64: 2>, scalar_prefetch = 0 : i64, scratch_operands = 0 : i64, tpu.core_type = #tpu.core_type<tc>, window_params = [{transform_indices = @transform_0, window_bounds = array<i64: 1, 4, 9, 9, 4>}, {transform_indices = @transform_1, window_bounds = array<i64: 1, 4, 9, 9, 1>}, {pipeline_mode = #tpu.pipeline_mode<synchronous>, transform_indices = @transform_2, window_bounds = array<i64: 9, 4, 16>}, {pipeline_mode = #tpu.pipeline_mode<synchronous>, transform_indices = @transform_3, window_bounds = array<i64: 4, 16>}, {pipeline_mode = #tpu.pipeline_mode<synchronous>, transform_indices = @transform_4, window_bounds = array<i64: 1, 16>}, {transform_indices = @transform_5, window_bounds = array<i64: 1, 8, 8, 16>}]} {
    %c0 = arith.constant 0 : index
    %c0_0 = arith.constant 0 : index
    %c0_1 = arith.constant 0 : index
    %c0_2 = arith.constant 0 : index
    %c0_3 = arith.constant 0 : index
    %0 = vector.load %arg1[%c0, %c0_0, %c0_1, %c0_2, %c0_3] : memref<1x4x9x9x4xf32, #tpu.memory_space<vmem>>, vector<1x4x9x9x4xf32>
    %1 = vector.shape_cast %0 : vector<1x4x9x9x4xf32> to vector<4x9x9x4xf32>
    %c0_4 = arith.constant 0 : index
    %c0_5 = arith.constant 0 : index
    %c0_6 = arith.constant 0 : index
    %c0_7 = arith.constant 0 : index
    %c0_8 = arith.constant 0 : index
    %2 = vector.load %arg2[%c0_4, %c0_5, %c0_6, %c0_7, %c0_8] : memref<1x4x9x9x1xf32, #tpu.memory_space<vmem>>, vector<1x4x9x9x1xf32>
    %3 = vector.shape_cast %2 : vector<1x4x9x9x1xf32> to vector<4x9x9x1xf32>
    %4 = vector.broadcast %3 : vector<4x9x9x1xf32> to vector<4x9x9x4xf32>
    %5 = arith.mulf %1, %4 : vector<4x9x9x4xf32>
    %cst = arith.constant 0.000000e+00 : f32
    %6 = vector.broadcast %cst : f32 to vector<64x16xf32>
    %7 = vector.extract_strided_slice %5 {offsets = [0, 0, 0, 0], sizes = [1, 8, 8, 4], strides = [1, 1, 1, 1]} : vector<4x9x9x4xf32> to vector<1x8x8x4xf32>
    %8 = vector.shape_cast %7 : vector<1x8x8x4xf32> to vector<8x8x4xf32>
    %9 = vector.shape_cast %8 : vector<8x8x4xf32> to vector<64x4xf32>
    %10 = arith.truncf %9 : vector<64x4xf32> to vector<64x4xbf16>
    %c0_9 = arith.constant 0 : index
    %c0_10 = arith.constant 0 : index
    %c0_11 = arith.constant 0 : index
    %11 = vector.load %arg3[%c0_9, %c0_10, %c0_11] : memref<9x4x16xbf16, #tpu.memory_space<vmem>>, vector<1x4x16xbf16>
    %12 = vector.shape_cast %11 : vector<1x4x16xbf16> to vector<4x16xbf16>
    %cst_12 = arith.constant dense<0.000000e+00> : vector<64x16xf32>
    %13 = tpu.matmul %10, %12, %cst_12 {dimension_numbers = #tpu.dot_dimension_numbers<[1], [0], [0], [1], [0, 0, 1, 1], [], []>} : vector<64x4xbf16>, vector<4x16xbf16>, vector<64x16xf32> -> vector<64x16xf32>
    %14 = arith.addf %6, %13 : vector<64x16xf32>
    %15 = vector.extract_strided_slice %5 {offsets = [1, 0, 0, 0], sizes = [1, 8, 8, 4], strides = [1, 1, 1, 1]} : vector<4x9x9x4xf32> to vector<1x8x8x4xf32>
    %16 = vector.shape_cast %15 : vector<1x8x8x4xf32> to vector<8x8x4xf32>
    %17 = vector.shape_cast %16 : vector<8x8x4xf32> to vector<64x4xf32>
    %18 = arith.truncf %17 : vector<64x4xf32> to vector<64x4xbf16>
    %c1 = arith.constant 1 : index
    %c0_13 = arith.constant 0 : index
    %c0_14 = arith.constant 0 : index
    %19 = vector.load %arg3[%c1, %c0_13, %c0_14] : memref<9x4x16xbf16, #tpu.memory_space<vmem>>, vector<1x4x16xbf16>
    %20 = vector.shape_cast %19 : vector<1x4x16xbf16> to vector<4x16xbf16>
    %cst_15 = arith.constant dense<0.000000e+00> : vector<64x16xf32>
    %21 = tpu.matmul %18, %20, %cst_15 {dimension_numbers = #tpu.dot_dimension_numbers<[1], [0], [0], [1], [0, 0, 1, 1], [], []>} : vector<64x4xbf16>, vector<4x16xbf16>, vector<64x16xf32> -> vector<64x16xf32>
    %22 = arith.addf %14, %21 : vector<64x16xf32>
    %23 = vector.extract_strided_slice %5 {offsets = [0, 0, 1, 0], sizes = [1, 8, 8, 4], strides = [1, 1, 1, 1]} : vector<4x9x9x4xf32> to vector<1x8x8x4xf32>
    %24 = vector.shape_cast %23 : vector<1x8x8x4xf32> to vector<8x8x4xf32>
    %25 = vector.shape_cast %24 : vector<8x8x4xf32> to vector<64x4xf32>
    %26 = arith.truncf %25 : vector<64x4xf32> to vector<64x4xbf16>
    %c2 = arith.constant 2 : index
    %c0_16 = arith.constant 0 : index
    %c0_17 = arith.constant 0 : index
    %27 = vector.load %arg3[%c2, %c0_16, %c0_17] : memref<9x4x16xbf16, #tpu.memory_space<vmem>>, vector<1x4x16xbf16>
    %28 = vector.shape_cast %27 : vector<1x4x16xbf16> to vector<4x16xbf16>
    %cst_18 = arith.constant dense<0.000000e+00> : vector<64x16xf32>
    %29 = tpu.matmul %26, %28, %cst_18 {dimension_numbers = #tpu.dot_dimension_numbers<[1], [0], [0], [1], [0, 0, 1, 1], [], []>} : vector<64x4xbf16>, vector<4x16xbf16>, vector<64x16xf32> -> vector<64x16xf32>
    %30 = arith.addf %22, %29 : vector<64x16xf32>
    %31 = vector.extract_strided_slice %5 {offsets = [2, 0, 0, 0], sizes = [1, 8, 8, 4], strides = [1, 1, 1, 1]} : vector<4x9x9x4xf32> to vector<1x8x8x4xf32>
    %32 = vector.shape_cast %31 : vector<1x8x8x4xf32> to vector<8x8x4xf32>
    %33 = vector.shape_cast %32 : vector<8x8x4xf32> to vector<64x4xf32>
    %34 = arith.truncf %33 : vector<64x4xf32> to vector<64x4xbf16>
    %c3 = arith.constant 3 : index
    %c0_19 = arith.constant 0 : index
    %c0_20 = arith.constant 0 : index
    %35 = vector.load %arg3[%c3, %c0_19, %c0_20] : memref<9x4x16xbf16, #tpu.memory_space<vmem>>, vector<1x4x16xbf16>
    %36 = vector.shape_cast %35 : vector<1x4x16xbf16> to vector<4x16xbf16>
    %cst_21 = arith.constant dense<0.000000e+00> : vector<64x16xf32>
    %37 = tpu.matmul %34, %36, %cst_21 {dimension_numbers = #tpu.dot_dimension_numbers<[1], [0], [0], [1], [0, 0, 1, 1], [], []>} : vector<64x4xbf16>, vector<4x16xbf16>, vector<64x16xf32> -> vector<64x16xf32>
    %38 = arith.addf %30, %37 : vector<64x16xf32>
    %39 = vector.extract_strided_slice %5 {offsets = [3, 0, 0, 0], sizes = [1, 8, 8, 4], strides = [1, 1, 1, 1]} : vector<4x9x9x4xf32> to vector<1x8x8x4xf32>
    %40 = vector.shape_cast %39 : vector<1x8x8x4xf32> to vector<8x8x4xf32>
    %41 = vector.shape_cast %40 : vector<8x8x4xf32> to vector<64x4xf32>
    %42 = arith.truncf %41 : vector<64x4xf32> to vector<64x4xbf16>
    %c4 = arith.constant 4 : index
    %c0_22 = arith.constant 0 : index
    %c0_23 = arith.constant 0 : index
    %43 = vector.load %arg3[%c4, %c0_22, %c0_23] : memref<9x4x16xbf16, #tpu.memory_space<vmem>>, vector<1x4x16xbf16>
    %44 = vector.shape_cast %43 : vector<1x4x16xbf16> to vector<4x16xbf16>
    %cst_24 = arith.constant dense<0.000000e+00> : vector<64x16xf32>
    %45 = tpu.matmul %42, %44, %cst_24 {dimension_numbers = #tpu.dot_dimension_numbers<[1], [0], [0], [1], [0, 0, 1, 1], [], []>} : vector<64x4xbf16>, vector<4x16xbf16>, vector<64x16xf32> -> vector<64x16xf32>
    %46 = arith.addf %38, %45 : vector<64x16xf32>
    %47 = vector.extract_strided_slice %5 {offsets = [2, 0, 1, 0], sizes = [1, 8, 8, 4], strides = [1, 1, 1, 1]} : vector<4x9x9x4xf32> to vector<1x8x8x4xf32>
    %48 = vector.shape_cast %47 : vector<1x8x8x4xf32> to vector<8x8x4xf32>
    %49 = vector.shape_cast %48 : vector<8x8x4xf32> to vector<64x4xf32>
    %50 = arith.truncf %49 : vector<64x4xf32> to vector<64x4xbf16>
    %c5 = arith.constant 5 : index
    %c0_25 = arith.constant 0 : index
    %c0_26 = arith.constant 0 : index
    %51 = vector.load %arg3[%c5, %c0_25, %c0_26] : memref<9x4x16xbf16, #tpu.memory_space<vmem>>, vector<1x4x16xbf16>
    %52 = vector.shape_cast %51 : vector<1x4x16xbf16> to vector<4x16xbf16>
    %cst_27 = arith.constant dense<0.000000e+00> : vector<64x16xf32>
    %53 = tpu.matmul %50, %52, %cst_27 {dimension_numbers = #tpu.dot_dimension_numbers<[1], [0], [0], [1], [0, 0, 1, 1], [], []>} : vector<64x4xbf16>, vector<4x16xbf16>, vector<64x16xf32> -> vector<64x16xf32>
    %54 = arith.addf %46, %53 : vector<64x16xf32>
    %55 = vector.extract_strided_slice %5 {offsets = [0, 1, 0, 0], sizes = [1, 8, 8, 4], strides = [1, 1, 1, 1]} : vector<4x9x9x4xf32> to vector<1x8x8x4xf32>
    %56 = vector.shape_cast %55 : vector<1x8x8x4xf32> to vector<8x8x4xf32>
    %57 = vector.shape_cast %56 : vector<8x8x4xf32> to vector<64x4xf32>
    %58 = arith.truncf %57 : vector<64x4xf32> to vector<64x4xbf16>
    %c6 = arith.constant 6 : index
    %c0_28 = arith.constant 0 : index
    %c0_29 = arith.constant 0 : index
    %59 = vector.load %arg3[%c6, %c0_28, %c0_29] : memref<9x4x16xbf16, #tpu.memory_space<vmem>>, vector<1x4x16xbf16>
    %60 = vector.shape_cast %59 : vector<1x4x16xbf16> to vector<4x16xbf16>
    %cst_30 = arith.constant dense<0.000000e+00> : vector<64x16xf32>
    %61 = tpu.matmul %58, %60, %cst_30 {dimension_numbers = #tpu.dot_dimension_numbers<[1], [0], [0], [1], [0, 0, 1, 1], [], []>} : vector<64x4xbf16>, vector<4x16xbf16>, vector<64x16xf32> -> vector<64x16xf32>
    %62 = arith.addf %54, %61 : vector<64x16xf32>
    %63 = vector.extract_strided_slice %5 {offsets = [1, 1, 0, 0], sizes = [1, 8, 8, 4], strides = [1, 1, 1, 1]} : vector<4x9x9x4xf32> to vector<1x8x8x4xf32>
    %64 = vector.shape_cast %63 : vector<1x8x8x4xf32> to vector<8x8x4xf32>
    %65 = vector.shape_cast %64 : vector<8x8x4xf32> to vector<64x4xf32>
    %66 = arith.truncf %65 : vector<64x4xf32> to vector<64x4xbf16>
    %c7 = arith.constant 7 : index
    %c0_31 = arith.constant 0 : index
    %c0_32 = arith.constant 0 : index
    %67 = vector.load %arg3[%c7, %c0_31, %c0_32] : memref<9x4x16xbf16, #tpu.memory_space<vmem>>, vector<1x4x16xbf16>
    %68 = vector.shape_cast %67 : vector<1x4x16xbf16> to vector<4x16xbf16>
    %cst_33 = arith.constant dense<0.000000e+00> : vector<64x16xf32>
    %69 = tpu.matmul %66, %68, %cst_33 {dimension_numbers = #tpu.dot_dimension_numbers<[1], [0], [0], [1], [0, 0, 1, 1], [], []>} : vector<64x4xbf16>, vector<4x16xbf16>, vector<64x16xf32> -> vector<64x16xf32>
    %70 = arith.addf %62, %69 : vector<64x16xf32>
    %71 = vector.extract_strided_slice %5 {offsets = [0, 1, 1, 0], sizes = [1, 8, 8, 4], strides = [1, 1, 1, 1]} : vector<4x9x9x4xf32> to vector<1x8x8x4xf32>
    %72 = vector.shape_cast %71 : vector<1x8x8x4xf32> to vector<8x8x4xf32>
    %73 = vector.shape_cast %72 : vector<8x8x4xf32> to vector<64x4xf32>
    %74 = arith.truncf %73 : vector<64x4xf32> to vector<64x4xbf16>
    %c8 = arith.constant 8 : index
    %c0_34 = arith.constant 0 : index
    %c0_35 = arith.constant 0 : index
    %75 = vector.load %arg3[%c8, %c0_34, %c0_35] : memref<9x4x16xbf16, #tpu.memory_space<vmem>>, vector<1x4x16xbf16>
    %76 = vector.shape_cast %75 : vector<1x4x16xbf16> to vector<4x16xbf16>
    %cst_36 = arith.constant dense<0.000000e+00> : vector<64x16xf32>
    %77 = tpu.matmul %74, %76, %cst_36 {dimension_numbers = #tpu.dot_dimension_numbers<[1], [0], [0], [1], [0, 0, 1, 1], [], []>} : vector<64x4xbf16>, vector<4x16xbf16>, vector<64x16xf32> -> vector<64x16xf32>
    %78 = arith.addf %70, %77 : vector<64x16xf32>
    %79 = vector.extract_strided_slice %1 {offsets = [3, 0, 0, 0], sizes = [1, 8, 8, 4], strides = [1, 1, 1, 1]} : vector<4x9x9x4xf32> to vector<1x8x8x4xf32>
    %80 = vector.shape_cast %79 : vector<1x8x8x4xf32> to vector<8x8x4xf32>
    %81 = vector.extract_strided_slice %1 {offsets = [2, 0, 1, 0], sizes = [1, 8, 8, 4], strides = [1, 1, 1, 1]} : vector<4x9x9x4xf32> to vector<1x8x8x4xf32>
    %82 = vector.shape_cast %81 : vector<1x8x8x4xf32> to vector<8x8x4xf32>
    %83 = arith.maximumf %80, %82 : vector<8x8x4xf32>
    %84 = vector.extract_strided_slice %1 {offsets = [1, 1, 0, 0], sizes = [1, 8, 8, 4], strides = [1, 1, 1, 1]} : vector<4x9x9x4xf32> to vector<1x8x8x4xf32>
    %85 = vector.shape_cast %84 : vector<1x8x8x4xf32> to vector<8x8x4xf32>
    %86 = vector.extract_strided_slice %1 {offsets = [0, 1, 1, 0], sizes = [1, 8, 8, 4], strides = [1, 1, 1, 1]} : vector<4x9x9x4xf32> to vector<1x8x8x4xf32>
    %87 = vector.shape_cast %86 : vector<1x8x8x4xf32> to vector<8x8x4xf32>
    %88 = arith.maximumf %85, %87 : vector<8x8x4xf32>
    %89 = arith.maximumf %83, %88 : vector<8x8x4xf32>
    %90 = vector.shape_cast %89 : vector<8x8x4xf32> to vector<64x4xf32>
    %c0_37 = arith.constant 0 : index
    %c0_38 = arith.constant 0 : index
    %91 = vector.load %arg4[%c0_37, %c0_38] : memref<4x16xf32, #tpu.memory_space<vmem>>, vector<4x16xf32>
    %cst_39 = arith.constant dense<0.000000e+00> : vector<64x16xf32>
    %92 = tpu.matmul %90, %91, %cst_39 {dimension_numbers = #tpu.dot_dimension_numbers<[1], [0], [0], [1], [0, 0, 1, 1], [], []>} : vector<64x4xf32>, vector<4x16xf32>, vector<64x16xf32> -> vector<64x16xf32>
    %93 = arith.addf %78, %92 : vector<64x16xf32>
    %c0_40 = arith.constant 0 : index
    %c0_41 = arith.constant 0 : index
    %94 = vector.load %arg5[%c0_40, %c0_41] : memref<1x16xf32, #tpu.memory_space<vmem>>, vector<1x16xf32>
    %95 = vector.broadcast %94 : vector<1x16xf32> to vector<64x16xf32>
    %96 = arith.addf %93, %95 : vector<64x16xf32>
    %cst_42 = arith.constant 0.000000e+00 : f32
    %97 = vector.broadcast %cst_42 : f32 to vector<64x16xf32>
    %98 = arith.maximumf %96, %97 : vector<64x16xf32>
    %99 = vector.shape_cast %98 : vector<64x16xf32> to vector<8x8x16xf32>
    %c0_43 = arith.constant 0 : index
    %c0_44 = arith.constant 0 : index
    %c0_45 = arith.constant 0 : index
    %c0_46 = arith.constant 0 : index
    %100 = vector.load %arg6[%c0_43, %c0_44, %c0_45, %c0_46] : memref<1x8x8x16xf32, #tpu.memory_space<vmem>>, vector<1x8x8x16xf32>
    %101 = vector.shape_cast %100 : vector<1x8x8x16xf32> to vector<8x8x16xf32>
    %102 = vector.shape_cast %99 : vector<8x8x16xf32> to vector<1x8x8x16xf32>
    tpu.vector_store %arg6[%c0_43, %c0_44, %c0_45, %c0_46], %102 {strides = array<i32>} : memref<1x8x8x16xf32, #tpu.memory_space<vmem>>, vector<1x8x8x16xf32>,
    return
  }
  func.func @transform_0(%arg0: i32) -> (i32, i32, i32, i32, i32) {
    %c0_i32 = arith.constant 0 : i32
    %c0_i32_0 = arith.constant 0 : i32
    %c0_i32_1 = arith.constant 0 : i32
    %c0_i32_2 = arith.constant 0 : i32
    %c0_i32_3 = arith.constant 0 : i32
    return %arg0, %c0_i32, %c0_i32_0, %c0_i32_1, %c0_i32_2 : i32, i32, i32, i32, i32
  }
  func.func @transform_1(%arg0: i32) -> (i32, i32, i32, i32, i32) {
    %c0_i32 = arith.constant 0 : i32
    %c0_i32_0 = arith.constant 0 : i32
    %c0_i32_1 = arith.constant 0 : i32
    %c0_i32_2 = arith.constant 0 : i32
    %c0_i32_3 = arith.constant 0 : i32
    return %arg0, %c0_i32, %c0_i32_0, %c0_i32_1, %c0_i32_2 : i32, i32, i32, i32, i32
  }
  func.func @transform_2(%arg0: i32) -> (i32, i32, i32) {
    %c0_i32 = arith.constant 0 : i32
    %c0_i32_0 = arith.constant 0 : i32
    %c0_i32_1 = arith.constant 0 : i32
    %c0_i32_2 = arith.constant 0 : i32
    return %c0_i32, %c0_i32_0, %c0_i32_1 : i32, i32, i32
  }
  func.func @transform_3(%arg0: i32) -> (i32, i32) {
    %c0_i32 = arith.constant 0 : i32
    %c0_i32_0 = arith.constant 0 : i32
    %c0_i32_1 = arith.constant 0 : i32
    return %c0_i32, %c0_i32_0 : i32, i32
  }
  func.func @transform_4(%arg0: i32) -> (i32, i32) {
    %c0_i32 = arith.constant 0 : i32
    %c0_i32_0 = arith.constant 0 : i32
    %c0_i32_1 = arith.constant 0 : i32
    return %c0_i32, %c0_i32_0 : i32, i32
  }
  func.func @transform_5(%arg0: i32) -> (i32, i32, i32, i32) {
    %c0_i32 = arith.constant 0 : i32
    %c0_i32_0 = arith.constant 0 : i32
    %c0_i32_1 = arith.constant 0 : i32
    %c0_i32_2 = arith.constant 0 : i32
    return %arg0, %c0_i32, %c0_i32_0, %c0_i32_1 : i32, i32, i32, i32
  }
}

module attributes {stable_mosaic.version = 11 : i64} {
  func.func @_downsampler_kernel(%arg0: i32, %arg1: memref<1x4x5x5x16xf32, #tpu.memory_space<vmem>>, %arg2: memref<1x4x5x5x1xf32, #tpu.memory_space<vmem>>, %arg3: memref<9x16x64xbf16, #tpu.memory_space<vmem>>, %arg4: memref<16x64xf32, #tpu.memory_space<vmem>>, %arg5: memref<1x64xf32, #tpu.memory_space<vmem>>, %arg6: memref<1x4x4x64xf32, #tpu.memory_space<vmem>>) attributes {dimension_semantics = [#tpu.dimension_semantics<parallel>], iteration_bounds = array<i64: 2>, scalar_prefetch = 0 : i64, scratch_operands = 0 : i64, tpu.core_type = #tpu.core_type<tc>, window_params = [{transform_indices = @transform_0, window_bounds = array<i64: 1, 4, 5, 5, 16>}, {transform_indices = @transform_1, window_bounds = array<i64: 1, 4, 5, 5, 1>}, {pipeline_mode = #tpu.pipeline_mode<synchronous>, transform_indices = @transform_2, window_bounds = array<i64: 9, 16, 64>}, {pipeline_mode = #tpu.pipeline_mode<synchronous>, transform_indices = @transform_3, window_bounds = array<i64: 16, 64>}, {pipeline_mode = #tpu.pipeline_mode<synchronous>, transform_indices = @transform_4, window_bounds = array<i64: 1, 64>}, {transform_indices = @transform_5, window_bounds = array<i64: 1, 4, 4, 64>}]} {
    %c0 = arith.constant 0 : index
    %c0_0 = arith.constant 0 : index
    %c0_1 = arith.constant 0 : index
    %c0_2 = arith.constant 0 : index
    %c0_3 = arith.constant 0 : index
    %0 = vector.load %arg1[%c0, %c0_0, %c0_1, %c0_2, %c0_3] : memref<1x4x5x5x16xf32, #tpu.memory_space<vmem>>, vector<1x4x5x5x16xf32>
    %1 = vector.shape_cast %0 : vector<1x4x5x5x16xf32> to vector<4x5x5x16xf32>
    %c0_4 = arith.constant 0 : index
    %c0_5 = arith.constant 0 : index
    %c0_6 = arith.constant 0 : index
    %c0_7 = arith.constant 0 : index
    %c0_8 = arith.constant 0 : index
    %2 = vector.load %arg2[%c0_4, %c0_5, %c0_6, %c0_7, %c0_8] : memref<1x4x5x5x1xf32, #tpu.memory_space<vmem>>, vector<1x4x5x5x1xf32>
    %3 = vector.shape_cast %2 : vector<1x4x5x5x1xf32> to vector<4x5x5x1xf32>
    %4 = vector.broadcast %3 : vector<4x5x5x1xf32> to vector<4x5x5x16xf32>
    %5 = arith.mulf %1, %4 : vector<4x5x5x16xf32>
    %cst = arith.constant 0.000000e+00 : f32
    %6 = vector.broadcast %cst : f32 to vector<16x64xf32>
    %7 = vector.extract_strided_slice %5 {offsets = [0, 0, 0, 0], sizes = [1, 4, 4, 16], strides = [1, 1, 1, 1]} : vector<4x5x5x16xf32> to vector<1x4x4x16xf32>
    %8 = vector.shape_cast %7 : vector<1x4x4x16xf32> to vector<4x4x16xf32>
    %9 = vector.shape_cast %8 : vector<4x4x16xf32> to vector<16x16xf32>
    %10 = arith.truncf %9 : vector<16x16xf32> to vector<16x16xbf16>
    %c0_9 = arith.constant 0 : index
    %c0_10 = arith.constant 0 : index
    %c0_11 = arith.constant 0 : index
    %11 = vector.load %arg3[%c0_9, %c0_10, %c0_11] : memref<9x16x64xbf16, #tpu.memory_space<vmem>>, vector<1x16x64xbf16>
    %12 = vector.shape_cast %11 : vector<1x16x64xbf16> to vector<16x64xbf16>
    %cst_12 = arith.constant dense<0.000000e+00> : vector<16x64xf32>
    %13 = tpu.matmul %10, %12, %cst_12 {dimension_numbers = #tpu.dot_dimension_numbers<[1], [0], [0], [1], [0, 0, 1, 1], [], []>} : vector<16x16xbf16>, vector<16x64xbf16>, vector<16x64xf32> -> vector<16x64xf32>
    %14 = arith.addf %6, %13 : vector<16x64xf32>
    %15 = vector.extract_strided_slice %5 {offsets = [1, 0, 0, 0], sizes = [1, 4, 4, 16], strides = [1, 1, 1, 1]} : vector<4x5x5x16xf32> to vector<1x4x4x16xf32>
    %16 = vector.shape_cast %15 : vector<1x4x4x16xf32> to vector<4x4x16xf32>
    %17 = vector.shape_cast %16 : vector<4x4x16xf32> to vector<16x16xf32>
    %18 = arith.truncf %17 : vector<16x16xf32> to vector<16x16xbf16>
    %c1 = arith.constant 1 : index
    %c0_13 = arith.constant 0 : index
    %c0_14 = arith.constant 0 : index
    %19 = vector.load %arg3[%c1, %c0_13, %c0_14] : memref<9x16x64xbf16, #tpu.memory_space<vmem>>, vector<1x16x64xbf16>
    %20 = vector.shape_cast %19 : vector<1x16x64xbf16> to vector<16x64xbf16>
    %cst_15 = arith.constant dense<0.000000e+00> : vector<16x64xf32>
    %21 = tpu.matmul %18, %20, %cst_15 {dimension_numbers = #tpu.dot_dimension_numbers<[1], [0], [0], [1], [0, 0, 1, 1], [], []>} : vector<16x16xbf16>, vector<16x64xbf16>, vector<16x64xf32> -> vector<16x64xf32>
    %22 = arith.addf %14, %21 : vector<16x64xf32>
    %23 = vector.extract_strided_slice %5 {offsets = [0, 0, 1, 0], sizes = [1, 4, 4, 16], strides = [1, 1, 1, 1]} : vector<4x5x5x16xf32> to vector<1x4x4x16xf32>
    %24 = vector.shape_cast %23 : vector<1x4x4x16xf32> to vector<4x4x16xf32>
    %25 = vector.shape_cast %24 : vector<4x4x16xf32> to vector<16x16xf32>
    %26 = arith.truncf %25 : vector<16x16xf32> to vector<16x16xbf16>
    %c2 = arith.constant 2 : index
    %c0_16 = arith.constant 0 : index
    %c0_17 = arith.constant 0 : index
    %27 = vector.load %arg3[%c2, %c0_16, %c0_17] : memref<9x16x64xbf16, #tpu.memory_space<vmem>>, vector<1x16x64xbf16>
    %28 = vector.shape_cast %27 : vector<1x16x64xbf16> to vector<16x64xbf16>
    %cst_18 = arith.constant dense<0.000000e+00> : vector<16x64xf32>
    %29 = tpu.matmul %26, %28, %cst_18 {dimension_numbers = #tpu.dot_dimension_numbers<[1], [0], [0], [1], [0, 0, 1, 1], [], []>} : vector<16x16xbf16>, vector<16x64xbf16>, vector<16x64xf32> -> vector<16x64xf32>
    %30 = arith.addf %22, %29 : vector<16x64xf32>
    %31 = vector.extract_strided_slice %5 {offsets = [2, 0, 0, 0], sizes = [1, 4, 4, 16], strides = [1, 1, 1, 1]} : vector<4x5x5x16xf32> to vector<1x4x4x16xf32>
    %32 = vector.shape_cast %31 : vector<1x4x4x16xf32> to vector<4x4x16xf32>
    %33 = vector.shape_cast %32 : vector<4x4x16xf32> to vector<16x16xf32>
    %34 = arith.truncf %33 : vector<16x16xf32> to vector<16x16xbf16>
    %c3 = arith.constant 3 : index
    %c0_19 = arith.constant 0 : index
    %c0_20 = arith.constant 0 : index
    %35 = vector.load %arg3[%c3, %c0_19, %c0_20] : memref<9x16x64xbf16, #tpu.memory_space<vmem>>, vector<1x16x64xbf16>
    %36 = vector.shape_cast %35 : vector<1x16x64xbf16> to vector<16x64xbf16>
    %cst_21 = arith.constant dense<0.000000e+00> : vector<16x64xf32>
    %37 = tpu.matmul %34, %36, %cst_21 {dimension_numbers = #tpu.dot_dimension_numbers<[1], [0], [0], [1], [0, 0, 1, 1], [], []>} : vector<16x16xbf16>, vector<16x64xbf16>, vector<16x64xf32> -> vector<16x64xf32>
    %38 = arith.addf %30, %37 : vector<16x64xf32>
    %39 = vector.extract_strided_slice %5 {offsets = [3, 0, 0, 0], sizes = [1, 4, 4, 16], strides = [1, 1, 1, 1]} : vector<4x5x5x16xf32> to vector<1x4x4x16xf32>
    %40 = vector.shape_cast %39 : vector<1x4x4x16xf32> to vector<4x4x16xf32>
    %41 = vector.shape_cast %40 : vector<4x4x16xf32> to vector<16x16xf32>
    %42 = arith.truncf %41 : vector<16x16xf32> to vector<16x16xbf16>
    %c4 = arith.constant 4 : index
    %c0_22 = arith.constant 0 : index
    %c0_23 = arith.constant 0 : index
    %43 = vector.load %arg3[%c4, %c0_22, %c0_23] : memref<9x16x64xbf16, #tpu.memory_space<vmem>>, vector<1x16x64xbf16>
    %44 = vector.shape_cast %43 : vector<1x16x64xbf16> to vector<16x64xbf16>
    %cst_24 = arith.constant dense<0.000000e+00> : vector<16x64xf32>
    %45 = tpu.matmul %42, %44, %cst_24 {dimension_numbers = #tpu.dot_dimension_numbers<[1], [0], [0], [1], [0, 0, 1, 1], [], []>} : vector<16x16xbf16>, vector<16x64xbf16>, vector<16x64xf32> -> vector<16x64xf32>
    %46 = arith.addf %38, %45 : vector<16x64xf32>
    %47 = vector.extract_strided_slice %5 {offsets = [2, 0, 1, 0], sizes = [1, 4, 4, 16], strides = [1, 1, 1, 1]} : vector<4x5x5x16xf32> to vector<1x4x4x16xf32>
    %48 = vector.shape_cast %47 : vector<1x4x4x16xf32> to vector<4x4x16xf32>
    %49 = vector.shape_cast %48 : vector<4x4x16xf32> to vector<16x16xf32>
    %50 = arith.truncf %49 : vector<16x16xf32> to vector<16x16xbf16>
    %c5 = arith.constant 5 : index
    %c0_25 = arith.constant 0 : index
    %c0_26 = arith.constant 0 : index
    %51 = vector.load %arg3[%c5, %c0_25, %c0_26] : memref<9x16x64xbf16, #tpu.memory_space<vmem>>, vector<1x16x64xbf16>
    %52 = vector.shape_cast %51 : vector<1x16x64xbf16> to vector<16x64xbf16>
    %cst_27 = arith.constant dense<0.000000e+00> : vector<16x64xf32>
    %53 = tpu.matmul %50, %52, %cst_27 {dimension_numbers = #tpu.dot_dimension_numbers<[1], [0], [0], [1], [0, 0, 1, 1], [], []>} : vector<16x16xbf16>, vector<16x64xbf16>, vector<16x64xf32> -> vector<16x64xf32>
    %54 = arith.addf %46, %53 : vector<16x64xf32>
    %55 = vector.extract_strided_slice %5 {offsets = [0, 1, 0, 0], sizes = [1, 4, 4, 16], strides = [1, 1, 1, 1]} : vector<4x5x5x16xf32> to vector<1x4x4x16xf32>
    %56 = vector.shape_cast %55 : vector<1x4x4x16xf32> to vector<4x4x16xf32>
    %57 = vector.shape_cast %56 : vector<4x4x16xf32> to vector<16x16xf32>
    %58 = arith.truncf %57 : vector<16x16xf32> to vector<16x16xbf16>
    %c6 = arith.constant 6 : index
    %c0_28 = arith.constant 0 : index
    %c0_29 = arith.constant 0 : index
    %59 = vector.load %arg3[%c6, %c0_28, %c0_29] : memref<9x16x64xbf16, #tpu.memory_space<vmem>>, vector<1x16x64xbf16>
    %60 = vector.shape_cast %59 : vector<1x16x64xbf16> to vector<16x64xbf16>
    %cst_30 = arith.constant dense<0.000000e+00> : vector<16x64xf32>
    %61 = tpu.matmul %58, %60, %cst_30 {dimension_numbers = #tpu.dot_dimension_numbers<[1], [0], [0], [1], [0, 0, 1, 1], [], []>} : vector<16x16xbf16>, vector<16x64xbf16>, vector<16x64xf32> -> vector<16x64xf32>
    %62 = arith.addf %54, %61 : vector<16x64xf32>
    %63 = vector.extract_strided_slice %5 {offsets = [1, 1, 0, 0], sizes = [1, 4, 4, 16], strides = [1, 1, 1, 1]} : vector<4x5x5x16xf32> to vector<1x4x4x16xf32>
    %64 = vector.shape_cast %63 : vector<1x4x4x16xf32> to vector<4x4x16xf32>
    %65 = vector.shape_cast %64 : vector<4x4x16xf32> to vector<16x16xf32>
    %66 = arith.truncf %65 : vector<16x16xf32> to vector<16x16xbf16>
    %c7 = arith.constant 7 : index
    %c0_31 = arith.constant 0 : index
    %c0_32 = arith.constant 0 : index
    %67 = vector.load %arg3[%c7, %c0_31, %c0_32] : memref<9x16x64xbf16, #tpu.memory_space<vmem>>, vector<1x16x64xbf16>
    %68 = vector.shape_cast %67 : vector<1x16x64xbf16> to vector<16x64xbf16>
    %cst_33 = arith.constant dense<0.000000e+00> : vector<16x64xf32>
    %69 = tpu.matmul %66, %68, %cst_33 {dimension_numbers = #tpu.dot_dimension_numbers<[1], [0], [0], [1], [0, 0, 1, 1], [], []>} : vector<16x16xbf16>, vector<16x64xbf16>, vector<16x64xf32> -> vector<16x64xf32>
    %70 = arith.addf %62, %69 : vector<16x64xf32>
    %71 = vector.extract_strided_slice %5 {offsets = [0, 1, 1, 0], sizes = [1, 4, 4, 16], strides = [1, 1, 1, 1]} : vector<4x5x5x16xf32> to vector<1x4x4x16xf32>
    %72 = vector.shape_cast %71 : vector<1x4x4x16xf32> to vector<4x4x16xf32>
    %73 = vector.shape_cast %72 : vector<4x4x16xf32> to vector<16x16xf32>
    %74 = arith.truncf %73 : vector<16x16xf32> to vector<16x16xbf16>
    %c8 = arith.constant 8 : index
    %c0_34 = arith.constant 0 : index
    %c0_35 = arith.constant 0 : index
    %75 = vector.load %arg3[%c8, %c0_34, %c0_35] : memref<9x16x64xbf16, #tpu.memory_space<vmem>>, vector<1x16x64xbf16>
    %76 = vector.shape_cast %75 : vector<1x16x64xbf16> to vector<16x64xbf16>
    %cst_36 = arith.constant dense<0.000000e+00> : vector<16x64xf32>
    %77 = tpu.matmul %74, %76, %cst_36 {dimension_numbers = #tpu.dot_dimension_numbers<[1], [0], [0], [1], [0, 0, 1, 1], [], []>} : vector<16x16xbf16>, vector<16x64xbf16>, vector<16x64xf32> -> vector<16x64xf32>
    %78 = arith.addf %70, %77 : vector<16x64xf32>
    %79 = vector.extract_strided_slice %1 {offsets = [3, 0, 0, 0], sizes = [1, 4, 4, 16], strides = [1, 1, 1, 1]} : vector<4x5x5x16xf32> to vector<1x4x4x16xf32>
    %80 = vector.shape_cast %79 : vector<1x4x4x16xf32> to vector<4x4x16xf32>
    %81 = vector.extract_strided_slice %1 {offsets = [2, 0, 1, 0], sizes = [1, 4, 4, 16], strides = [1, 1, 1, 1]} : vector<4x5x5x16xf32> to vector<1x4x4x16xf32>
    %82 = vector.shape_cast %81 : vector<1x4x4x16xf32> to vector<4x4x16xf32>
    %83 = arith.maximumf %80, %82 : vector<4x4x16xf32>
    %84 = vector.extract_strided_slice %1 {offsets = [1, 1, 0, 0], sizes = [1, 4, 4, 16], strides = [1, 1, 1, 1]} : vector<4x5x5x16xf32> to vector<1x4x4x16xf32>
    %85 = vector.shape_cast %84 : vector<1x4x4x16xf32> to vector<4x4x16xf32>
    %86 = vector.extract_strided_slice %1 {offsets = [0, 1, 1, 0], sizes = [1, 4, 4, 16], strides = [1, 1, 1, 1]} : vector<4x5x5x16xf32> to vector<1x4x4x16xf32>
    %87 = vector.shape_cast %86 : vector<1x4x4x16xf32> to vector<4x4x16xf32>
    %88 = arith.maximumf %85, %87 : vector<4x4x16xf32>
    %89 = arith.maximumf %83, %88 : vector<4x4x16xf32>
    %90 = vector.shape_cast %89 : vector<4x4x16xf32> to vector<16x16xf32>
    %c0_37 = arith.constant 0 : index
    %c0_38 = arith.constant 0 : index
    %91 = vector.load %arg4[%c0_37, %c0_38] : memref<16x64xf32, #tpu.memory_space<vmem>>, vector<16x64xf32>
    %cst_39 = arith.constant dense<0.000000e+00> : vector<16x64xf32>
    %92 = tpu.matmul %90, %91, %cst_39 {dimension_numbers = #tpu.dot_dimension_numbers<[1], [0], [0], [1], [0, 0, 1, 1], [], []>} : vector<16x16xf32>, vector<16x64xf32>, vector<16x64xf32> -> vector<16x64xf32>
    %93 = arith.addf %78, %92 : vector<16x64xf32>
    %c0_40 = arith.constant 0 : index
    %c0_41 = arith.constant 0 : index
    %94 = vector.load %arg5[%c0_40, %c0_41] : memref<1x64xf32, #tpu.memory_space<vmem>>, vector<1x64xf32>
    %95 = vector.broadcast %94 : vector<1x64xf32> to vector<16x64xf32>
    %96 = arith.addf %93, %95 : vector<16x64xf32>
    %cst_42 = arith.constant 0.000000e+00 : f32
    %97 = vector.broadcast %cst_42 : f32 to vector<16x64xf32>
    %98 = arith.maximumf %96, %97 : vector<16x64xf32>
    %99 = vector.shape_cast %98 : vector<16x64xf32> to vector<4x4x64xf32>
    %c0_43 = arith.constant 0 : index
    %c0_44 = arith.constant 0 : index
    %c0_45 = arith.constant 0 : index
    %c0_46 = arith.constant 0 : index
    %100 = vector.load %arg6[%c0_43, %c0_44, %c0_45, %c0_46] : memref<1x4x4x64xf32, #tpu.memory_space<vmem>>, vector<1x4x4x64xf32>
    %101 = vector.shape_cast %100 : vector<1x4x4x64xf32> to vector<4x4x64xf32>
    %102 = vector.shape_cast %99 : vector<4x4x64xf32> to vector<1x4x4x64xf32>
    tpu.vector_store %arg6[%c0_43, %c0_44, %c0_45, %c0_46], %102 {strides = array<i32>} : memref<1x4x4x64xf32, #tpu.memory_space<vmem>>, vector<1x4x4x64xf32>,
    return
  }
  func.func @transform_0(%arg0: i32) -> (i32, i32, i32, i32, i32) {
    %c0_i32 = arith.constant 0 : i32
    %c0_i32_0 = arith.constant 0 : i32
    %c0_i32_1 = arith.constant 0 : i32
    %c0_i32_2 = arith.constant 0 : i32
    %c0_i32_3 = arith.constant 0 : i32
    return %arg0, %c0_i32, %c0_i32_0, %c0_i32_1, %c0_i32_2 : i32, i32, i32, i32, i32
  }
  func.func @transform_1(%arg0: i32) -> (i32, i32, i32, i32, i32) {
    %c0_i32 = arith.constant 0 : i32
    %c0_i32_0 = arith.constant 0 : i32
    %c0_i32_1 = arith.constant 0 : i32
    %c0_i32_2 = arith.constant 0 : i32
    %c0_i32_3 = arith.constant 0 : i32
    return %arg0, %c0_i32, %c0_i32_0, %c0_i32_1, %c0_i32_2 : i32, i32, i32, i32, i32
  }
  func.func @transform_2(%arg0: i32) -> (i32, i32, i32) {
    %c0_i32 = arith.constant 0 : i32
    %c0_i32_0 = arith.constant 0 : i32
    %c0_i32_1 = arith.constant 0 : i32
    %c0_i32_2 = arith.constant 0 : i32
    return %c0_i32, %c0_i32_0, %c0_i32_1 : i32, i32, i32
  }
  func.func @transform_3(%arg0: i32) -> (i32, i32) {
    %c0_i32 = arith.constant 0 : i32
    %c0_i32_0 = arith.constant 0 : i32
    %c0_i32_1 = arith.constant 0 : i32
    return %c0_i32, %c0_i32_0 : i32, i32
  }
  func.func @transform_4(%arg0: i32) -> (i32, i32) {
    %c0_i32 = arith.constant 0 : i32
    %c0_i32_0 = arith.constant 0 : i32
    %c0_i32_1 = arith.constant 0 : i32
    return %c0_i32, %c0_i32_0 : i32, i32
  }
  func.func @transform_5(%arg0: i32) -> (i32, i32, i32, i32) {
    %c0_i32 = arith.constant 0 : i32
    %c0_i32_0 = arith.constant 0 : i32
    %c0_i32_1 = arith.constant 0 : i32
    %c0_i32_2 = arith.constant 0 : i32
    return %arg0, %c0_i32, %c0_i32_0, %c0_i32_1 : i32, i32, i32, i32
  }
}

module attributes {stable_mosaic.version = 11 : i64} {
  func.func @_sepconv_kernel(%arg0: i32, %arg1: i32, %arg2: memref<1x6x4x64xf32, #tpu.memory_space<vmem>>, %arg3: memref<1x6x4x1xf32, #tpu.memory_space<vmem>>, %arg4: memref<3x64x64xbf16, #tpu.memory_space<vmem>>, %arg5: memref<1x64xf32, #tpu.memory_space<vmem>>, %arg6: memref<1x4x4x64xf32, #tpu.memory_space<vmem>>) attributes {dimension_semantics = [#tpu.dimension_semantics<parallel>, #tpu.dimension_semantics<parallel>], iteration_bounds = array<i64: 2, 1>, scalar_prefetch = 0 : i64, scratch_operands = 0 : i64, tpu.core_type = #tpu.core_type<tc>, window_params = [{transform_indices = @transform_0, window_bounds = array<i64: 1, 6, 4, 64>}, {transform_indices = @transform_1, window_bounds = array<i64: 1, 6, 4, 1>}, {pipeline_mode = #tpu.pipeline_mode<synchronous>, transform_indices = @transform_2, window_bounds = array<i64: 3, 64, 64>}, {pipeline_mode = #tpu.pipeline_mode<synchronous>, transform_indices = @transform_3, window_bounds = array<i64: 1, 64>}, {transform_indices = @transform_4, window_bounds = array<i64: 1, 4, 4, 64>}]} {
    %c0 = arith.constant 0 : index
    %c0_0 = arith.constant 0 : index
    %c0_1 = arith.constant 0 : index
    %c0_2 = arith.constant 0 : index
    %0 = vector.load %arg2[%c0, %c0_0, %c0_1, %c0_2] : memref<1x6x4x64xf32, #tpu.memory_space<vmem>>, vector<1x6x4x64xf32>
    %1 = vector.shape_cast %0 : vector<1x6x4x64xf32> to vector<6x4x64xf32>
    %c0_3 = arith.constant 0 : index
    %c0_4 = arith.constant 0 : index
    %c0_5 = arith.constant 0 : index
    %c0_6 = arith.constant 0 : index
    %2 = vector.load %arg3[%c0_3, %c0_4, %c0_5, %c0_6] : memref<1x6x4x1xf32, #tpu.memory_space<vmem>>, vector<1x6x4x1xf32>
    %3 = vector.shape_cast %2 : vector<1x6x4x1xf32> to vector<6x4x1xf32>
    %4 = vector.broadcast %3 : vector<6x4x1xf32> to vector<6x4x64xf32>
    %5 = arith.mulf %1, %4 : vector<6x4x64xf32>
    %cst = arith.constant 0.000000e+00 : f32
    %6 = vector.broadcast %cst : f32 to vector<16x64xf32>
    %7 = vector.extract_strided_slice %5 {offsets = [0, 0, 0], sizes = [4, 4, 64], strides = [1, 1, 1]} : vector<6x4x64xf32> to vector<4x4x64xf32>
    %8 = vector.shape_cast %7 : vector<4x4x64xf32> to vector<16x64xf32>
    %9 = arith.truncf %8 : vector<16x64xf32> to vector<16x64xbf16>
    %c0_7 = arith.constant 0 : index
    %c0_8 = arith.constant 0 : index
    %c0_9 = arith.constant 0 : index
    %10 = vector.load %arg4[%c0_7, %c0_8, %c0_9] : memref<3x64x64xbf16, #tpu.memory_space<vmem>>, vector<1x64x64xbf16>
    %11 = vector.shape_cast %10 : vector<1x64x64xbf16> to vector<64x64xbf16>
    %cst_10 = arith.constant dense<0.000000e+00> : vector<16x64xf32>
    %12 = tpu.matmul %9, %11, %cst_10 {dimension_numbers = #tpu.dot_dimension_numbers<[1], [0], [0], [1], [0, 0, 1, 1], [], []>} : vector<16x64xbf16>, vector<64x64xbf16>, vector<16x64xf32> -> vector<16x64xf32>
    %13 = arith.addf %6, %12 : vector<16x64xf32>
    %14 = vector.extract_strided_slice %5 {offsets = [1, 0, 0], sizes = [4, 4, 64], strides = [1, 1, 1]} : vector<6x4x64xf32> to vector<4x4x64xf32>
    %15 = vector.shape_cast %14 : vector<4x4x64xf32> to vector<16x64xf32>
    %16 = arith.truncf %15 : vector<16x64xf32> to vector<16x64xbf16>
    %c1 = arith.constant 1 : index
    %c0_11 = arith.constant 0 : index
    %c0_12 = arith.constant 0 : index
    %17 = vector.load %arg4[%c1, %c0_11, %c0_12] : memref<3x64x64xbf16, #tpu.memory_space<vmem>>, vector<1x64x64xbf16>
    %18 = vector.shape_cast %17 : vector<1x64x64xbf16> to vector<64x64xbf16>
    %cst_13 = arith.constant dense<0.000000e+00> : vector<16x64xf32>
    %19 = tpu.matmul %16, %18, %cst_13 {dimension_numbers = #tpu.dot_dimension_numbers<[1], [0], [0], [1], [0, 0, 1, 1], [], []>} : vector<16x64xbf16>, vector<64x64xbf16>, vector<16x64xf32> -> vector<16x64xf32>
    %20 = arith.addf %13, %19 : vector<16x64xf32>
    %21 = vector.extract_strided_slice %5 {offsets = [2, 0, 0], sizes = [4, 4, 64], strides = [1, 1, 1]} : vector<6x4x64xf32> to vector<4x4x64xf32>
    %22 = vector.shape_cast %21 : vector<4x4x64xf32> to vector<16x64xf32>
    %23 = arith.truncf %22 : vector<16x64xf32> to vector<16x64xbf16>
    %c2 = arith.constant 2 : index
    %c0_14 = arith.constant 0 : index
    %c0_15 = arith.constant 0 : index
    %24 = vector.load %arg4[%c2, %c0_14, %c0_15] : memref<3x64x64xbf16, #tpu.memory_space<vmem>>, vector<1x64x64xbf16>
    %25 = vector.shape_cast %24 : vector<1x64x64xbf16> to vector<64x64xbf16>
    %cst_16 = arith.constant dense<0.000000e+00> : vector<16x64xf32>
    %26 = tpu.matmul %23, %25, %cst_16 {dimension_numbers = #tpu.dot_dimension_numbers<[1], [0], [0], [1], [0, 0, 1, 1], [], []>} : vector<16x64xbf16>, vector<64x64xbf16>, vector<16x64xf32> -> vector<16x64xf32>
    %27 = arith.addf %20, %26 : vector<16x64xf32>
    %c0_17 = arith.constant 0 : index
    %c0_18 = arith.constant 0 : index
    %28 = vector.load %arg5[%c0_17, %c0_18] : memref<1x64xf32, #tpu.memory_space<vmem>>, vector<1x64xf32>
    %29 = vector.broadcast %28 : vector<1x64xf32> to vector<16x64xf32>
    %30 = arith.addf %27, %29 : vector<16x64xf32>
    %cst_19 = arith.constant 0.000000e+00 : f32
    %31 = vector.broadcast %cst_19 : f32 to vector<16x64xf32>
    %32 = arith.maximumf %30, %31 : vector<16x64xf32>
    %33 = vector.shape_cast %32 : vector<16x64xf32> to vector<4x4x64xf32>
    %c0_20 = arith.constant 0 : index
    %c0_21 = arith.constant 0 : index
    %c0_22 = arith.constant 0 : index
    %c0_23 = arith.constant 0 : index
    %34 = vector.load %arg6[%c0_20, %c0_21, %c0_22, %c0_23] : memref<1x4x4x64xf32, #tpu.memory_space<vmem>>, vector<1x4x4x64xf32>
    %35 = vector.shape_cast %34 : vector<1x4x4x64xf32> to vector<4x4x64xf32>
    %36 = vector.shape_cast %33 : vector<4x4x64xf32> to vector<1x4x4x64xf32>
    tpu.vector_store %arg6[%c0_20, %c0_21, %c0_22, %c0_23], %36 {strides = array<i32>} : memref<1x4x4x64xf32, #tpu.memory_space<vmem>>, vector<1x4x4x64xf32>,
    return
  }
  func.func @transform_0(%arg0: i32, %arg1: i32) -> (i32, i32, i32, i32) {
    %c0_i32 = arith.constant 0 : i32
    %c0_i32_0 = arith.constant 0 : i32
    %c0_i32_1 = arith.constant 0 : i32
    return %arg0, %c0_i32, %arg1, %c0_i32_0 : i32, i32, i32, i32
  }
  func.func @transform_1(%arg0: i32, %arg1: i32) -> (i32, i32, i32, i32) {
    %c0_i32 = arith.constant 0 : i32
    %c0_i32_0 = arith.constant 0 : i32
    %c0_i32_1 = arith.constant 0 : i32
    return %arg0, %c0_i32, %arg1, %c0_i32_0 : i32, i32, i32, i32
  }
  func.func @transform_2(%arg0: i32, %arg1: i32) -> (i32, i32, i32) {
    %c0_i32 = arith.constant 0 : i32
    %c0_i32_0 = arith.constant 0 : i32
    %c0_i32_1 = arith.constant 0 : i32
    %c0_i32_2 = arith.constant 0 : i32
    return %c0_i32, %c0_i32_0, %c0_i32_1 : i32, i32, i32
  }
  func.func @transform_3(%arg0: i32, %arg1: i32) -> (i32, i32) {
    %c0_i32 = arith.constant 0 : i32
    %c0_i32_0 = arith.constant 0 : i32
    %c0_i32_1 = arith.constant 0 : i32
    return %c0_i32, %c0_i32_0 : i32, i32
  }
  func.func @transform_4(%arg0: i32, %arg1: i32) -> (i32, i32, i32, i32) {
    %c0_i32 = arith.constant 0 : i32
    %c0_i32_0 = arith.constant 0 : i32
    %c0_i32_1 = arith.constant 0 : i32
    return %arg0, %c0_i32, %arg1, %c0_i32_0 : i32, i32, i32, i32
  }
}

module attributes {stable_mosaic.version = 11 : i64} {
  func.func @_sepconv_kernel(%arg0: i32, %arg1: i32, %arg2: memref<1x4x6x64xf32, #tpu.memory_space<vmem>>, %arg3: memref<1x4x6x1xf32, #tpu.memory_space<vmem>>, %arg4: memref<3x64x64xbf16, #tpu.memory_space<vmem>>, %arg5: memref<1x64xf32, #tpu.memory_space<vmem>>, %arg6: memref<1x4x4x64xf32, #tpu.memory_space<vmem>>) attributes {dimension_semantics = [#tpu.dimension_semantics<parallel>, #tpu.dimension_semantics<parallel>], iteration_bounds = array<i64: 2, 1>, scalar_prefetch = 0 : i64, scratch_operands = 0 : i64, tpu.core_type = #tpu.core_type<tc>, window_params = [{transform_indices = @transform_0, window_bounds = array<i64: 1, 4, 6, 64>}, {transform_indices = @transform_1, window_bounds = array<i64: 1, 4, 6, 1>}, {pipeline_mode = #tpu.pipeline_mode<synchronous>, transform_indices = @transform_2, window_bounds = array<i64: 3, 64, 64>}, {pipeline_mode = #tpu.pipeline_mode<synchronous>, transform_indices = @transform_3, window_bounds = array<i64: 1, 64>}, {transform_indices = @transform_4, window_bounds = array<i64: 1, 4, 4, 64>}]} {
    %c0 = arith.constant 0 : index
    %c0_0 = arith.constant 0 : index
    %c0_1 = arith.constant 0 : index
    %c0_2 = arith.constant 0 : index
    %0 = vector.load %arg2[%c0, %c0_0, %c0_1, %c0_2] : memref<1x4x6x64xf32, #tpu.memory_space<vmem>>, vector<1x4x6x64xf32>
    %1 = vector.shape_cast %0 : vector<1x4x6x64xf32> to vector<4x6x64xf32>
    %c0_3 = arith.constant 0 : index
    %c0_4 = arith.constant 0 : index
    %c0_5 = arith.constant 0 : index
    %c0_6 = arith.constant 0 : index
    %2 = vector.load %arg3[%c0_3, %c0_4, %c0_5, %c0_6] : memref<1x4x6x1xf32, #tpu.memory_space<vmem>>, vector<1x4x6x1xf32>
    %3 = vector.shape_cast %2 : vector<1x4x6x1xf32> to vector<4x6x1xf32>
    %4 = vector.broadcast %3 : vector<4x6x1xf32> to vector<4x6x64xf32>
    %5 = arith.mulf %1, %4 : vector<4x6x64xf32>
    %cst = arith.constant 0.000000e+00 : f32
    %6 = vector.broadcast %cst : f32 to vector<16x64xf32>
    %7 = vector.extract_strided_slice %5 {offsets = [0, 0, 0], sizes = [4, 4, 64], strides = [1, 1, 1]} : vector<4x6x64xf32> to vector<4x4x64xf32>
    %8 = vector.shape_cast %7 : vector<4x4x64xf32> to vector<16x64xf32>
    %9 = arith.truncf %8 : vector<16x64xf32> to vector<16x64xbf16>
    %c0_7 = arith.constant 0 : index
    %c0_8 = arith.constant 0 : index
    %c0_9 = arith.constant 0 : index
    %10 = vector.load %arg4[%c0_7, %c0_8, %c0_9] : memref<3x64x64xbf16, #tpu.memory_space<vmem>>, vector<1x64x64xbf16>
    %11 = vector.shape_cast %10 : vector<1x64x64xbf16> to vector<64x64xbf16>
    %cst_10 = arith.constant dense<0.000000e+00> : vector<16x64xf32>
    %12 = tpu.matmul %9, %11, %cst_10 {dimension_numbers = #tpu.dot_dimension_numbers<[1], [0], [0], [1], [0, 0, 1, 1], [], []>} : vector<16x64xbf16>, vector<64x64xbf16>, vector<16x64xf32> -> vector<16x64xf32>
    %13 = arith.addf %6, %12 : vector<16x64xf32>
    %14 = vector.extract_strided_slice %5 {offsets = [0, 1, 0], sizes = [4, 4, 64], strides = [1, 1, 1]} : vector<4x6x64xf32> to vector<4x4x64xf32>
    %15 = vector.shape_cast %14 : vector<4x4x64xf32> to vector<16x64xf32>
    %16 = arith.truncf %15 : vector<16x64xf32> to vector<16x64xbf16>
    %c1 = arith.constant 1 : index
    %c0_11 = arith.constant 0 : index
    %c0_12 = arith.constant 0 : index
    %17 = vector.load %arg4[%c1, %c0_11, %c0_12] : memref<3x64x64xbf16, #tpu.memory_space<vmem>>, vector<1x64x64xbf16>
    %18 = vector.shape_cast %17 : vector<1x64x64xbf16> to vector<64x64xbf16>
    %cst_13 = arith.constant dense<0.000000e+00> : vector<16x64xf32>
    %19 = tpu.matmul %16, %18, %cst_13 {dimension_numbers = #tpu.dot_dimension_numbers<[1], [0], [0], [1], [0, 0, 1, 1], [], []>} : vector<16x64xbf16>, vector<64x64xbf16>, vector<16x64xf32> -> vector<16x64xf32>
    %20 = arith.addf %13, %19 : vector<16x64xf32>
    %21 = vector.extract_strided_slice %5 {offsets = [0, 2, 0], sizes = [4, 4, 64], strides = [1, 1, 1]} : vector<4x6x64xf32> to vector<4x4x64xf32>
    %22 = vector.shape_cast %21 : vector<4x4x64xf32> to vector<16x64xf32>
    %23 = arith.truncf %22 : vector<16x64xf32> to vector<16x64xbf16>
    %c2 = arith.constant 2 : index
    %c0_14 = arith.constant 0 : index
    %c0_15 = arith.constant 0 : index
    %24 = vector.load %arg4[%c2, %c0_14, %c0_15] : memref<3x64x64xbf16, #tpu.memory_space<vmem>>, vector<1x64x64xbf16>
    %25 = vector.shape_cast %24 : vector<1x64x64xbf16> to vector<64x64xbf16>
    %cst_16 = arith.constant dense<0.000000e+00> : vector<16x64xf32>
    %26 = tpu.matmul %23, %25, %cst_16 {dimension_numbers = #tpu.dot_dimension_numbers<[1], [0], [0], [1], [0, 0, 1, 1], [], []>} : vector<16x64xbf16>, vector<64x64xbf16>, vector<16x64xf32> -> vector<16x64xf32>
    %27 = arith.addf %20, %26 : vector<16x64xf32>
    %c0_17 = arith.constant 0 : index
    %c0_18 = arith.constant 0 : index
    %28 = vector.load %arg5[%c0_17, %c0_18] : memref<1x64xf32, #tpu.memory_space<vmem>>, vector<1x64xf32>
    %29 = vector.broadcast %28 : vector<1x64xf32> to vector<16x64xf32>
    %30 = arith.addf %27, %29 : vector<16x64xf32>
    %cst_19 = arith.constant 0.000000e+00 : f32
    %31 = vector.broadcast %cst_19 : f32 to vector<16x64xf32>
    %32 = arith.maximumf %30, %31 : vector<16x64xf32>
    %33 = vector.shape_cast %32 : vector<16x64xf32> to vector<4x4x64xf32>
    %c0_20 = arith.constant 0 : index
    %c0_21 = arith.constant 0 : index
    %c0_22 = arith.constant 0 : index
    %c0_23 = arith.constant 0 : index
    %34 = vector.load %arg6[%c0_20, %c0_21, %c0_22, %c0_23] : memref<1x4x4x64xf32, #tpu.memory_space<vmem>>, vector<1x4x4x64xf32>
    %35 = vector.shape_cast %34 : vector<1x4x4x64xf32> to vector<4x4x64xf32>
    %36 = vector.shape_cast %33 : vector<4x4x64xf32> to vector<1x4x4x64xf32>
    tpu.vector_store %arg6[%c0_20, %c0_21, %c0_22, %c0_23], %36 {strides = array<i32>} : memref<1x4x4x64xf32, #tpu.memory_space<vmem>>, vector<1x4x4x64xf32>,
    return
  }
  func.func @transform_0(%arg0: i32, %arg1: i32) -> (i32, i32, i32, i32) {
    %c0_i32 = arith.constant 0 : i32
    %c0_i32_0 = arith.constant 0 : i32
    %c0_i32_1 = arith.constant 0 : i32
    return %arg0, %arg1, %c0_i32, %c0_i32_0 : i32, i32, i32, i32
  }
  func.func @transform_1(%arg0: i32, %arg1: i32) -> (i32, i32, i32, i32) {
    %c0_i32 = arith.constant 0 : i32
    %c0_i32_0 = arith.constant 0 : i32
    %c0_i32_1 = arith.constant 0 : i32
    return %arg0, %arg1, %c0_i32, %c0_i32_0 : i32, i32, i32, i32
  }
  func.func @transform_2(%arg0: i32, %arg1: i32) -> (i32, i32, i32) {
    %c0_i32 = arith.constant 0 : i32
    %c0_i32_0 = arith.constant 0 : i32
    %c0_i32_1 = arith.constant 0 : i32
    %c0_i32_2 = arith.constant 0 : i32
    return %c0_i32, %c0_i32_0, %c0_i32_1 : i32, i32, i32
  }
  func.func @transform_3(%arg0: i32, %arg1: i32) -> (i32, i32) {
    %c0_i32 = arith.constant 0 : i32
    %c0_i32_0 = arith.constant 0 : i32
    %c0_i32_1 = arith.constant 0 : i32
    return %c0_i32, %c0_i32_0 : i32, i32
  }
  func.func @transform_4(%arg0: i32, %arg1: i32) -> (i32, i32, i32, i32) {
    %c0_i32 = arith.constant 0 : i32
    %c0_i32_0 = arith.constant 0 : i32
    %c0_i32_1 = arith.constant 0 : i32
    return %arg0, %arg1, %c0_i32, %c0_i32_0 : i32, i32, i32, i32
  }
}

module attributes {stable_mosaic.version = 11 : i64} {
  func.func @_sepconv_kernel(%arg0: i32, %arg1: i32, %arg2: memref<1x4x6x64xf32, #tpu.memory_space<vmem>>, %arg3: memref<1x4x6x1xf32, #tpu.memory_space<vmem>>, %arg4: memref<3x64x64xbf16, #tpu.memory_space<vmem>>, %arg5: memref<1x64xf32, #tpu.memory_space<vmem>>, %arg6: memref<1x4x4x64xf32, #tpu.memory_space<vmem>>, %arg7: memref<1x4x4x64xf32, #tpu.memory_space<vmem>>) attributes {dimension_semantics = [#tpu.dimension_semantics<parallel>, #tpu.dimension_semantics<parallel>], iteration_bounds = array<i64: 2, 1>, scalar_prefetch = 0 : i64, scratch_operands = 0 : i64, tpu.core_type = #tpu.core_type<tc>, window_params = [{transform_indices = @transform_0, window_bounds = array<i64: 1, 4, 6, 64>}, {transform_indices = @transform_1, window_bounds = array<i64: 1, 4, 6, 1>}, {pipeline_mode = #tpu.pipeline_mode<synchronous>, transform_indices = @transform_2, window_bounds = array<i64: 3, 64, 64>}, {pipeline_mode = #tpu.pipeline_mode<synchronous>, transform_indices = @transform_3, window_bounds = array<i64: 1, 64>}, {transform_indices = @transform_4, window_bounds = array<i64: 1, 4, 4, 64>}, {transform_indices = @transform_5, window_bounds = array<i64: 1, 4, 4, 64>}]} {
    %c0 = arith.constant 0 : index
    %c0_0 = arith.constant 0 : index
    %c0_1 = arith.constant 0 : index
    %c0_2 = arith.constant 0 : index
    %0 = vector.load %arg2[%c0, %c0_0, %c0_1, %c0_2] : memref<1x4x6x64xf32, #tpu.memory_space<vmem>>, vector<1x4x6x64xf32>
    %1 = vector.shape_cast %0 : vector<1x4x6x64xf32> to vector<4x6x64xf32>
    %c0_3 = arith.constant 0 : index
    %c0_4 = arith.constant 0 : index
    %c0_5 = arith.constant 0 : index
    %c0_6 = arith.constant 0 : index
    %2 = vector.load %arg3[%c0_3, %c0_4, %c0_5, %c0_6] : memref<1x4x6x1xf32, #tpu.memory_space<vmem>>, vector<1x4x6x1xf32>
    %3 = vector.shape_cast %2 : vector<1x4x6x1xf32> to vector<4x6x1xf32>
    %4 = vector.broadcast %3 : vector<4x6x1xf32> to vector<4x6x64xf32>
    %5 = arith.mulf %1, %4 : vector<4x6x64xf32>
    %cst = arith.constant 0.000000e+00 : f32
    %6 = vector.broadcast %cst : f32 to vector<16x64xf32>
    %7 = vector.extract_strided_slice %5 {offsets = [0, 0, 0], sizes = [4, 4, 64], strides = [1, 1, 1]} : vector<4x6x64xf32> to vector<4x4x64xf32>
    %8 = vector.shape_cast %7 : vector<4x4x64xf32> to vector<16x64xf32>
    %9 = arith.truncf %8 : vector<16x64xf32> to vector<16x64xbf16>
    %c0_7 = arith.constant 0 : index
    %c0_8 = arith.constant 0 : index
    %c0_9 = arith.constant 0 : index
    %10 = vector.load %arg4[%c0_7, %c0_8, %c0_9] : memref<3x64x64xbf16, #tpu.memory_space<vmem>>, vector<1x64x64xbf16>
    %11 = vector.shape_cast %10 : vector<1x64x64xbf16> to vector<64x64xbf16>
    %cst_10 = arith.constant dense<0.000000e+00> : vector<16x64xf32>
    %12 = tpu.matmul %9, %11, %cst_10 {dimension_numbers = #tpu.dot_dimension_numbers<[1], [0], [0], [1], [0, 0, 1, 1], [], []>} : vector<16x64xbf16>, vector<64x64xbf16>, vector<16x64xf32> -> vector<16x64xf32>
    %13 = arith.addf %6, %12 : vector<16x64xf32>
    %14 = vector.extract_strided_slice %5 {offsets = [0, 1, 0], sizes = [4, 4, 64], strides = [1, 1, 1]} : vector<4x6x64xf32> to vector<4x4x64xf32>
    %15 = vector.shape_cast %14 : vector<4x4x64xf32> to vector<16x64xf32>
    %16 = arith.truncf %15 : vector<16x64xf32> to vector<16x64xbf16>
    %c1 = arith.constant 1 : index
    %c0_11 = arith.constant 0 : index
    %c0_12 = arith.constant 0 : index
    %17 = vector.load %arg4[%c1, %c0_11, %c0_12] : memref<3x64x64xbf16, #tpu.memory_space<vmem>>, vector<1x64x64xbf16>
    %18 = vector.shape_cast %17 : vector<1x64x64xbf16> to vector<64x64xbf16>
    %cst_13 = arith.constant dense<0.000000e+00> : vector<16x64xf32>
    %19 = tpu.matmul %16, %18, %cst_13 {dimension_numbers = #tpu.dot_dimension_numbers<[1], [0], [0], [1], [0, 0, 1, 1], [], []>} : vector<16x64xbf16>, vector<64x64xbf16>, vector<16x64xf32> -> vector<16x64xf32>
    %20 = arith.addf %13, %19 : vector<16x64xf32>
    %21 = vector.extract_strided_slice %5 {offsets = [0, 2, 0], sizes = [4, 4, 64], strides = [1, 1, 1]} : vector<4x6x64xf32> to vector<4x4x64xf32>
    %22 = vector.shape_cast %21 : vector<4x4x64xf32> to vector<16x64xf32>
    %23 = arith.truncf %22 : vector<16x64xf32> to vector<16x64xbf16>
    %c2 = arith.constant 2 : index
    %c0_14 = arith.constant 0 : index
    %c0_15 = arith.constant 0 : index
    %24 = vector.load %arg4[%c2, %c0_14, %c0_15] : memref<3x64x64xbf16, #tpu.memory_space<vmem>>, vector<1x64x64xbf16>
    %25 = vector.shape_cast %24 : vector<1x64x64xbf16> to vector<64x64xbf16>
    %cst_16 = arith.constant dense<0.000000e+00> : vector<16x64xf32>
    %26 = tpu.matmul %23, %25, %cst_16 {dimension_numbers = #tpu.dot_dimension_numbers<[1], [0], [0], [1], [0, 0, 1, 1], [], []>} : vector<16x64xbf16>, vector<64x64xbf16>, vector<16x64xf32> -> vector<16x64xf32>
    %27 = arith.addf %20, %26 : vector<16x64xf32>
    %c0_17 = arith.constant 0 : index
    %c0_18 = arith.constant 0 : index
    %28 = vector.load %arg5[%c0_17, %c0_18] : memref<1x64xf32, #tpu.memory_space<vmem>>, vector<1x64xf32>
    %29 = vector.broadcast %28 : vector<1x64xf32> to vector<16x64xf32>
    %30 = arith.addf %27, %29 : vector<16x64xf32>
    %c0_19 = arith.constant 0 : index
    %c0_20 = arith.constant 0 : index
    %c0_21 = arith.constant 0 : index
    %c0_22 = arith.constant 0 : index
    %31 = vector.load %arg6[%c0_19, %c0_20, %c0_21, %c0_22] : memref<1x4x4x64xf32, #tpu.memory_space<vmem>>, vector<1x4x4x64xf32>
    %32 = vector.shape_cast %31 : vector<1x4x4x64xf32> to vector<4x4x64xf32>
    %33 = vector.shape_cast %32 : vector<4x4x64xf32> to vector<16x64xf32>
    %34 = arith.addf %30, %33 : vector<16x64xf32>
    %cst_23 = arith.constant 0.000000e+00 : f32
    %35 = vector.broadcast %cst_23 : f32 to vector<16x64xf32>
    %36 = arith.maximumf %34, %35 : vector<16x64xf32>
    %37 = vector.shape_cast %36 : vector<16x64xf32> to vector<4x4x64xf32>
    %c0_24 = arith.constant 0 : index
    %c0_25 = arith.constant 0 : index
    %c0_26 = arith.constant 0 : index
    %c0_27 = arith.constant 0 : index
    %38 = vector.load %arg7[%c0_24, %c0_25, %c0_26, %c0_27] : memref<1x4x4x64xf32, #tpu.memory_space<vmem>>, vector<1x4x4x64xf32>
    %39 = vector.shape_cast %38 : vector<1x4x4x64xf32> to vector<4x4x64xf32>
    %40 = vector.shape_cast %37 : vector<4x4x64xf32> to vector<1x4x4x64xf32>
    tpu.vector_store %arg7[%c0_24, %c0_25, %c0_26, %c0_27], %40 {strides = array<i32>} : memref<1x4x4x64xf32, #tpu.memory_space<vmem>>, vector<1x4x4x64xf32>,
    return
  }
  func.func @transform_0(%arg0: i32, %arg1: i32) -> (i32, i32, i32, i32) {
    %c0_i32 = arith.constant 0 : i32
    %c0_i32_0 = arith.constant 0 : i32
    %c0_i32_1 = arith.constant 0 : i32
    return %arg0, %arg1, %c0_i32, %c0_i32_0 : i32, i32, i32, i32
  }
  func.func @transform_1(%arg0: i32, %arg1: i32) -> (i32, i32, i32, i32) {
    %c0_i32 = arith.constant 0 : i32
    %c0_i32_0 = arith.constant 0 : i32
    %c0_i32_1 = arith.constant 0 : i32
    return %arg0, %arg1, %c0_i32, %c0_i32_0 : i32, i32, i32, i32
  }
  func.func @transform_2(%arg0: i32, %arg1: i32) -> (i32, i32, i32) {
    %c0_i32 = arith.constant 0 : i32
    %c0_i32_0 = arith.constant 0 : i32
    %c0_i32_1 = arith.constant 0 : i32
    %c0_i32_2 = arith.constant 0 : i32
    return %c0_i32, %c0_i32_0, %c0_i32_1 : i32, i32, i32
  }
  func.func @transform_3(%arg0: i32, %arg1: i32) -> (i32, i32) {
    %c0_i32 = arith.constant 0 : i32
    %c0_i32_0 = arith.constant 0 : i32
    %c0_i32_1 = arith.constant 0 : i32
    return %c0_i32, %c0_i32_0 : i32, i32
  }
  func.func @transform_4(%arg0: i32, %arg1: i32) -> (i32, i32, i32, i32) {
    %c0_i32 = arith.constant 0 : i32
    %c0_i32_0 = arith.constant 0 : i32
    %c0_i32_1 = arith.constant 0 : i32
    return %arg0, %arg1, %c0_i32, %c0_i32_0 : i32, i32, i32, i32
  }
  func.func @transform_5(%arg0: i32, %arg1: i32) -> (i32, i32, i32, i32) {
    %c0_i32 = arith.constant 0 : i32
    %c0_i32_0 = arith.constant 0 : i32
    %c0_i32_1 = arith.constant 0 : i32
    return %arg0, %arg1, %c0_i32, %c0_i32_0 : i32, i32, i32, i32
  }
}

module attributes {stable_mosaic.version = 11 : i64} {
  func.func @_sepconv_kernel(%arg0: i32, %arg1: i32, %arg2: memref<1x4x2x128xf32, #tpu.memory_space<vmem>>, %arg3: memref<1x4x2x1xf32, #tpu.memory_space<vmem>>, %arg4: memref<3x128x128xbf16, #tpu.memory_space<vmem>>, %arg5: memref<1x128xf32, #tpu.memory_space<vmem>>, %arg6: memref<1x2x2x128xf32, #tpu.memory_space<vmem>>) attributes {dimension_semantics = [#tpu.dimension_semantics<parallel>, #tpu.dimension_semantics<parallel>], iteration_bounds = array<i64: 2, 1>, scalar_prefetch = 0 : i64, scratch_operands = 0 : i64, tpu.core_type = #tpu.core_type<tc>, window_params = [{transform_indices = @transform_0, window_bounds = array<i64: 1, 4, 2, 128>}, {transform_indices = @transform_1, window_bounds = array<i64: 1, 4, 2, 1>}, {pipeline_mode = #tpu.pipeline_mode<synchronous>, transform_indices = @transform_2, window_bounds = array<i64: 3, 128, 128>}, {pipeline_mode = #tpu.pipeline_mode<synchronous>, transform_indices = @transform_3, window_bounds = array<i64: 1, 128>}, {transform_indices = @transform_4, window_bounds = array<i64: 1, 2, 2, 128>}]} {
    %c0 = arith.constant 0 : index
    %c0_0 = arith.constant 0 : index
    %c0_1 = arith.constant 0 : index
    %c0_2 = arith.constant 0 : index
    %0 = vector.load %arg2[%c0, %c0_0, %c0_1, %c0_2] : memref<1x4x2x128xf32, #tpu.memory_space<vmem>>, vector<1x4x2x128xf32>
    %1 = vector.shape_cast %0 : vector<1x4x2x128xf32> to vector<4x2x128xf32>
    %c0_3 = arith.constant 0 : index
    %c0_4 = arith.constant 0 : index
    %c0_5 = arith.constant 0 : index
    %c0_6 = arith.constant 0 : index
    %2 = vector.load %arg3[%c0_3, %c0_4, %c0_5, %c0_6] : memref<1x4x2x1xf32, #tpu.memory_space<vmem>>, vector<1x4x2x1xf32>
    %3 = vector.shape_cast %2 : vector<1x4x2x1xf32> to vector<4x2x1xf32>
    %4 = vector.broadcast %3 : vector<4x2x1xf32> to vector<4x2x128xf32>
    %5 = arith.mulf %1, %4 : vector<4x2x128xf32>
    %cst = arith.constant 0.000000e+00 : f32
    %6 = vector.broadcast %cst : f32 to vector<4x128xf32>
    %7 = vector.extract_strided_slice %5 {offsets = [0, 0, 0], sizes = [2, 2, 128], strides = [1, 1, 1]} : vector<4x2x128xf32> to vector<2x2x128xf32>
    %8 = vector.shape_cast %7 : vector<2x2x128xf32> to vector<4x128xf32>
    %9 = arith.truncf %8 : vector<4x128xf32> to vector<4x128xbf16>
    %c0_7 = arith.constant 0 : index
    %c0_8 = arith.constant 0 : index
    %c0_9 = arith.constant 0 : index
    %10 = vector.load %arg4[%c0_7, %c0_8, %c0_9] : memref<3x128x128xbf16, #tpu.memory_space<vmem>>, vector<1x128x128xbf16>
    %11 = vector.shape_cast %10 : vector<1x128x128xbf16> to vector<128x128xbf16>
    %cst_10 = arith.constant dense<0.000000e+00> : vector<4x128xf32>
    %12 = tpu.matmul %9, %11, %cst_10 {dimension_numbers = #tpu.dot_dimension_numbers<[1], [0], [0], [1], [0, 0, 1, 1], [], []>} : vector<4x128xbf16>, vector<128x128xbf16>, vector<4x128xf32> -> vector<4x128xf32>
    %13 = arith.addf %6, %12 : vector<4x128xf32>
    %14 = vector.extract_strided_slice %5 {offsets = [1, 0, 0], sizes = [2, 2, 128], strides = [1, 1, 1]} : vector<4x2x128xf32> to vector<2x2x128xf32>
    %15 = vector.shape_cast %14 : vector<2x2x128xf32> to vector<4x128xf32>
    %16 = arith.truncf %15 : vector<4x128xf32> to vector<4x128xbf16>
    %c1 = arith.constant 1 : index
    %c0_11 = arith.constant 0 : index
    %c0_12 = arith.constant 0 : index
    %17 = vector.load %arg4[%c1, %c0_11, %c0_12] : memref<3x128x128xbf16, #tpu.memory_space<vmem>>, vector<1x128x128xbf16>
    %18 = vector.shape_cast %17 : vector<1x128x128xbf16> to vector<128x128xbf16>
    %cst_13 = arith.constant dense<0.000000e+00> : vector<4x128xf32>
    %19 = tpu.matmul %16, %18, %cst_13 {dimension_numbers = #tpu.dot_dimension_numbers<[1], [0], [0], [1], [0, 0, 1, 1], [], []>} : vector<4x128xbf16>, vector<128x128xbf16>, vector<4x128xf32> -> vector<4x128xf32>
    %20 = arith.addf %13, %19 : vector<4x128xf32>
    %21 = vector.extract_strided_slice %5 {offsets = [2, 0, 0], sizes = [2, 2, 128], strides = [1, 1, 1]} : vector<4x2x128xf32> to vector<2x2x128xf32>
    %22 = vector.shape_cast %21 : vector<2x2x128xf32> to vector<4x128xf32>
    %23 = arith.truncf %22 : vector<4x128xf32> to vector<4x128xbf16>
    %c2 = arith.constant 2 : index
    %c0_14 = arith.constant 0 : index
    %c0_15 = arith.constant 0 : index
    %24 = vector.load %arg4[%c2, %c0_14, %c0_15] : memref<3x128x128xbf16, #tpu.memory_space<vmem>>, vector<1x128x128xbf16>
    %25 = vector.shape_cast %24 : vector<1x128x128xbf16> to vector<128x128xbf16>
    %cst_16 = arith.constant dense<0.000000e+00> : vector<4x128xf32>
    %26 = tpu.matmul %23, %25, %cst_16 {dimension_numbers = #tpu.dot_dimension_numbers<[1], [0], [0], [1], [0, 0, 1, 1], [], []>} : vector<4x128xbf16>, vector<128x128xbf16>, vector<4x128xf32> -> vector<4x128xf32>
    %27 = arith.addf %20, %26 : vector<4x128xf32>
    %c0_17 = arith.constant 0 : index
    %c0_18 = arith.constant 0 : index
    %28 = vector.load %arg5[%c0_17, %c0_18] : memref<1x128xf32, #tpu.memory_space<vmem>>, vector<1x128xf32>
    %29 = vector.broadcast %28 : vector<1x128xf32> to vector<4x128xf32>
    %30 = arith.addf %27, %29 : vector<4x128xf32>
    %cst_19 = arith.constant 0.000000e+00 : f32
    %31 = vector.broadcast %cst_19 : f32 to vector<4x128xf32>
    %32 = arith.maximumf %30, %31 : vector<4x128xf32>
    %33 = vector.shape_cast %32 : vector<4x128xf32> to vector<2x2x128xf32>
    %c0_20 = arith.constant 0 : index
    %c0_21 = arith.constant 0 : index
    %c0_22 = arith.constant 0 : index
    %c0_23 = arith.constant 0 : index
    %34 = vector.load %arg6[%c0_20, %c0_21, %c0_22, %c0_23] : memref<1x2x2x128xf32, #tpu.memory_space<vmem>>, vector<1x2x2x128xf32>
    %35 = vector.shape_cast %34 : vector<1x2x2x128xf32> to vector<2x2x128xf32>
    %36 = vector.shape_cast %33 : vector<2x2x128xf32> to vector<1x2x2x128xf32>
    tpu.vector_store %arg6[%c0_20, %c0_21, %c0_22, %c0_23], %36 {strides = array<i32>} : memref<1x2x2x128xf32, #tpu.memory_space<vmem>>, vector<1x2x2x128xf32>,
    return
  }
  func.func @transform_0(%arg0: i32, %arg1: i32) -> (i32, i32, i32, i32) {
    %c0_i32 = arith.constant 0 : i32
    %c0_i32_0 = arith.constant 0 : i32
    %c0_i32_1 = arith.constant 0 : i32
    return %arg0, %c0_i32, %arg1, %c0_i32_0 : i32, i32, i32, i32
  }
  func.func @transform_1(%arg0: i32, %arg1: i32) -> (i32, i32, i32, i32) {
    %c0_i32 = arith.constant 0 : i32
    %c0_i32_0 = arith.constant 0 : i32
    %c0_i32_1 = arith.constant 0 : i32
    return %arg0, %c0_i32, %arg1, %c0_i32_0 : i32, i32, i32, i32
  }
  func.func @transform_2(%arg0: i32, %arg1: i32) -> (i32, i32, i32) {
    %c0_i32 = arith.constant 0 : i32
    %c0_i32_0 = arith.constant 0 : i32
    %c0_i32_1 = arith.constant 0 : i32
    %c0_i32_2 = arith.constant 0 : i32
    return %c0_i32, %c0_i32_0, %c0_i32_1 : i32, i32, i32
  }
  func.func @transform_3(%arg0: i32, %arg1: i32) -> (i32, i32) {
    %c0_i32 = arith.constant 0 : i32
    %c0_i32_0 = arith.constant 0 : i32
    %c0_i32_1 = arith.constant 0 : i32
    return %c0_i32, %c0_i32_0 : i32, i32
  }
  func.func @transform_4(%arg0: i32, %arg1: i32) -> (i32, i32, i32, i32) {
    %c0_i32 = arith.constant 0 : i32
    %c0_i32_0 = arith.constant 0 : i32
    %c0_i32_1 = arith.constant 0 : i32
    return %arg0, %c0_i32, %arg1, %c0_i32_0 : i32, i32, i32, i32
  }
}

module attributes {stable_mosaic.version = 11 : i64} {
  func.func @_downsampler_kernel(%arg0: i32, %arg1: memref<1x4x3x3x64xf32, #tpu.memory_space<vmem>>, %arg2: memref<1x4x3x3x1xf32, #tpu.memory_space<vmem>>, %arg3: memref<9x64x128xbf16, #tpu.memory_space<vmem>>, %arg4: memref<64x128xf32, #tpu.memory_space<vmem>>, %arg5: memref<1x128xf32, #tpu.memory_space<vmem>>, %arg6: memref<1x2x2x128xf32, #tpu.memory_space<vmem>>) attributes {dimension_semantics = [#tpu.dimension_semantics<parallel>], iteration_bounds = array<i64: 2>, scalar_prefetch = 0 : i64, scratch_operands = 0 : i64, tpu.core_type = #tpu.core_type<tc>, window_params = [{transform_indices = @transform_0, window_bounds = array<i64: 1, 4, 3, 3, 64>}, {transform_indices = @transform_1, window_bounds = array<i64: 1, 4, 3, 3, 1>}, {pipeline_mode = #tpu.pipeline_mode<synchronous>, transform_indices = @transform_2, window_bounds = array<i64: 9, 64, 128>}, {pipeline_mode = #tpu.pipeline_mode<synchronous>, transform_indices = @transform_3, window_bounds = array<i64: 64, 128>}, {pipeline_mode = #tpu.pipeline_mode<synchronous>, transform_indices = @transform_4, window_bounds = array<i64: 1, 128>}, {transform_indices = @transform_5, window_bounds = array<i64: 1, 2, 2, 128>}]} {
    %c0 = arith.constant 0 : index
    %c0_0 = arith.constant 0 : index
    %c0_1 = arith.constant 0 : index
    %c0_2 = arith.constant 0 : index
    %c0_3 = arith.constant 0 : index
    %0 = vector.load %arg1[%c0, %c0_0, %c0_1, %c0_2, %c0_3] : memref<1x4x3x3x64xf32, #tpu.memory_space<vmem>>, vector<1x4x3x3x64xf32>
    %1 = vector.shape_cast %0 : vector<1x4x3x3x64xf32> to vector<4x3x3x64xf32>
    %c0_4 = arith.constant 0 : index
    %c0_5 = arith.constant 0 : index
    %c0_6 = arith.constant 0 : index
    %c0_7 = arith.constant 0 : index
    %c0_8 = arith.constant 0 : index
    %2 = vector.load %arg2[%c0_4, %c0_5, %c0_6, %c0_7, %c0_8] : memref<1x4x3x3x1xf32, #tpu.memory_space<vmem>>, vector<1x4x3x3x1xf32>
    %3 = vector.shape_cast %2 : vector<1x4x3x3x1xf32> to vector<4x3x3x1xf32>
    %4 = vector.broadcast %3 : vector<4x3x3x1xf32> to vector<4x3x3x64xf32>
    %5 = arith.mulf %1, %4 : vector<4x3x3x64xf32>
    %cst = arith.constant 0.000000e+00 : f32
    %6 = vector.broadcast %cst : f32 to vector<4x128xf32>
    %7 = vector.extract_strided_slice %5 {offsets = [0, 0, 0, 0], sizes = [1, 2, 2, 64], strides = [1, 1, 1, 1]} : vector<4x3x3x64xf32> to vector<1x2x2x64xf32>
    %8 = vector.shape_cast %7 : vector<1x2x2x64xf32> to vector<2x2x64xf32>
    %9 = vector.shape_cast %8 : vector<2x2x64xf32> to vector<4x64xf32>
    %10 = arith.truncf %9 : vector<4x64xf32> to vector<4x64xbf16>
    %c0_9 = arith.constant 0 : index
    %c0_10 = arith.constant 0 : index
    %c0_11 = arith.constant 0 : index
    %11 = vector.load %arg3[%c0_9, %c0_10, %c0_11] : memref<9x64x128xbf16, #tpu.memory_space<vmem>>, vector<1x64x128xbf16>
    %12 = vector.shape_cast %11 : vector<1x64x128xbf16> to vector<64x128xbf16>
    %cst_12 = arith.constant dense<0.000000e+00> : vector<4x128xf32>
    %13 = tpu.matmul %10, %12, %cst_12 {dimension_numbers = #tpu.dot_dimension_numbers<[1], [0], [0], [1], [0, 0, 1, 1], [], []>} : vector<4x64xbf16>, vector<64x128xbf16>, vector<4x128xf32> -> vector<4x128xf32>
    %14 = arith.addf %6, %13 : vector<4x128xf32>
    %15 = vector.extract_strided_slice %5 {offsets = [1, 0, 0, 0], sizes = [1, 2, 2, 64], strides = [1, 1, 1, 1]} : vector<4x3x3x64xf32> to vector<1x2x2x64xf32>
    %16 = vector.shape_cast %15 : vector<1x2x2x64xf32> to vector<2x2x64xf32>
    %17 = vector.shape_cast %16 : vector<2x2x64xf32> to vector<4x64xf32>
    %18 = arith.truncf %17 : vector<4x64xf32> to vector<4x64xbf16>
    %c1 = arith.constant 1 : index
    %c0_13 = arith.constant 0 : index
    %c0_14 = arith.constant 0 : index
    %19 = vector.load %arg3[%c1, %c0_13, %c0_14] : memref<9x64x128xbf16, #tpu.memory_space<vmem>>, vector<1x64x128xbf16>
    %20 = vector.shape_cast %19 : vector<1x64x128xbf16> to vector<64x128xbf16>
    %cst_15 = arith.constant dense<0.000000e+00> : vector<4x128xf32>
    %21 = tpu.matmul %18, %20, %cst_15 {dimension_numbers = #tpu.dot_dimension_numbers<[1], [0], [0], [1], [0, 0, 1, 1], [], []>} : vector<4x64xbf16>, vector<64x128xbf16>, vector<4x128xf32> -> vector<4x128xf32>
    %22 = arith.addf %14, %21 : vector<4x128xf32>
    %23 = vector.extract_strided_slice %5 {offsets = [0, 0, 1, 0], sizes = [1, 2, 2, 64], strides = [1, 1, 1, 1]} : vector<4x3x3x64xf32> to vector<1x2x2x64xf32>
    %24 = vector.shape_cast %23 : vector<1x2x2x64xf32> to vector<2x2x64xf32>
    %25 = vector.shape_cast %24 : vector<2x2x64xf32> to vector<4x64xf32>
    %26 = arith.truncf %25 : vector<4x64xf32> to vector<4x64xbf16>
    %c2 = arith.constant 2 : index
    %c0_16 = arith.constant 0 : index
    %c0_17 = arith.constant 0 : index
    %27 = vector.load %arg3[%c2, %c0_16, %c0_17] : memref<9x64x128xbf16, #tpu.memory_space<vmem>>, vector<1x64x128xbf16>
    %28 = vector.shape_cast %27 : vector<1x64x128xbf16> to vector<64x128xbf16>
    %cst_18 = arith.constant dense<0.000000e+00> : vector<4x128xf32>
    %29 = tpu.matmul %26, %28, %cst_18 {dimension_numbers = #tpu.dot_dimension_numbers<[1], [0], [0], [1], [0, 0, 1, 1], [], []>} : vector<4x64xbf16>, vector<64x128xbf16>, vector<4x128xf32> -> vector<4x128xf32>
    %30 = arith.addf %22, %29 : vector<4x128xf32>
    %31 = vector.extract_strided_slice %5 {offsets = [2, 0, 0, 0], sizes = [1, 2, 2, 64], strides = [1, 1, 1, 1]} : vector<4x3x3x64xf32> to vector<1x2x2x64xf32>
    %32 = vector.shape_cast %31 : vector<1x2x2x64xf32> to vector<2x2x64xf32>
    %33 = vector.shape_cast %32 : vector<2x2x64xf32> to vector<4x64xf32>
    %34 = arith.truncf %33 : vector<4x64xf32> to vector<4x64xbf16>
    %c3 = arith.constant 3 : index
    %c0_19 = arith.constant 0 : index
    %c0_20 = arith.constant 0 : index
    %35 = vector.load %arg3[%c3, %c0_19, %c0_20] : memref<9x64x128xbf16, #tpu.memory_space<vmem>>, vector<1x64x128xbf16>
    %36 = vector.shape_cast %35 : vector<1x64x128xbf16> to vector<64x128xbf16>
    %cst_21 = arith.constant dense<0.000000e+00> : vector<4x128xf32>
    %37 = tpu.matmul %34, %36, %cst_21 {dimension_numbers = #tpu.dot_dimension_numbers<[1], [0], [0], [1], [0, 0, 1, 1], [], []>} : vector<4x64xbf16>, vector<64x128xbf16>, vector<4x128xf32> -> vector<4x128xf32>
    %38 = arith.addf %30, %37 : vector<4x128xf32>
    %39 = vector.extract_strided_slice %5 {offsets = [3, 0, 0, 0], sizes = [1, 2, 2, 64], strides = [1, 1, 1, 1]} : vector<4x3x3x64xf32> to vector<1x2x2x64xf32>
    %40 = vector.shape_cast %39 : vector<1x2x2x64xf32> to vector<2x2x64xf32>
    %41 = vector.shape_cast %40 : vector<2x2x64xf32> to vector<4x64xf32>
    %42 = arith.truncf %41 : vector<4x64xf32> to vector<4x64xbf16>
    %c4 = arith.constant 4 : index
    %c0_22 = arith.constant 0 : index
    %c0_23 = arith.constant 0 : index
    %43 = vector.load %arg3[%c4, %c0_22, %c0_23] : memref<9x64x128xbf16, #tpu.memory_space<vmem>>, vector<1x64x128xbf16>
    %44 = vector.shape_cast %43 : vector<1x64x128xbf16> to vector<64x128xbf16>
    %cst_24 = arith.constant dense<0.000000e+00> : vector<4x128xf32>
    %45 = tpu.matmul %42, %44, %cst_24 {dimension_numbers = #tpu.dot_dimension_numbers<[1], [0], [0], [1], [0, 0, 1, 1], [], []>} : vector<4x64xbf16>, vector<64x128xbf16>, vector<4x128xf32> -> vector<4x128xf32>
    %46 = arith.addf %38, %45 : vector<4x128xf32>
    %47 = vector.extract_strided_slice %5 {offsets = [2, 0, 1, 0], sizes = [1, 2, 2, 64], strides = [1, 1, 1, 1]} : vector<4x3x3x64xf32> to vector<1x2x2x64xf32>
    %48 = vector.shape_cast %47 : vector<1x2x2x64xf32> to vector<2x2x64xf32>
    %49 = vector.shape_cast %48 : vector<2x2x64xf32> to vector<4x64xf32>
    %50 = arith.truncf %49 : vector<4x64xf32> to vector<4x64xbf16>
    %c5 = arith.constant 5 : index
    %c0_25 = arith.constant 0 : index
    %c0_26 = arith.constant 0 : index
    %51 = vector.load %arg3[%c5, %c0_25, %c0_26] : memref<9x64x128xbf16, #tpu.memory_space<vmem>>, vector<1x64x128xbf16>
    %52 = vector.shape_cast %51 : vector<1x64x128xbf16> to vector<64x128xbf16>
    %cst_27 = arith.constant dense<0.000000e+00> : vector<4x128xf32>
    %53 = tpu.matmul %50, %52, %cst_27 {dimension_numbers = #tpu.dot_dimension_numbers<[1], [0], [0], [1], [0, 0, 1, 1], [], []>} : vector<4x64xbf16>, vector<64x128xbf16>, vector<4x128xf32> -> vector<4x128xf32>
    %54 = arith.addf %46, %53 : vector<4x128xf32>
    %55 = vector.extract_strided_slice %5 {offsets = [0, 1, 0, 0], sizes = [1, 2, 2, 64], strides = [1, 1, 1, 1]} : vector<4x3x3x64xf32> to vector<1x2x2x64xf32>
    %56 = vector.shape_cast %55 : vector<1x2x2x64xf32> to vector<2x2x64xf32>
    %57 = vector.shape_cast %56 : vector<2x2x64xf32> to vector<4x64xf32>
    %58 = arith.truncf %57 : vector<4x64xf32> to vector<4x64xbf16>
    %c6 = arith.constant 6 : index
    %c0_28 = arith.constant 0 : index
    %c0_29 = arith.constant 0 : index
    %59 = vector.load %arg3[%c6, %c0_28, %c0_29] : memref<9x64x128xbf16, #tpu.memory_space<vmem>>, vector<1x64x128xbf16>
    %60 = vector.shape_cast %59 : vector<1x64x128xbf16> to vector<64x128xbf16>
    %cst_30 = arith.constant dense<0.000000e+00> : vector<4x128xf32>
    %61 = tpu.matmul %58, %60, %cst_30 {dimension_numbers = #tpu.dot_dimension_numbers<[1], [0], [0], [1], [0, 0, 1, 1], [], []>} : vector<4x64xbf16>, vector<64x128xbf16>, vector<4x128xf32> -> vector<4x128xf32>
    %62 = arith.addf %54, %61 : vector<4x128xf32>
    %63 = vector.extract_strided_slice %5 {offsets = [1, 1, 0, 0], sizes = [1, 2, 2, 64], strides = [1, 1, 1, 1]} : vector<4x3x3x64xf32> to vector<1x2x2x64xf32>
    %64 = vector.shape_cast %63 : vector<1x2x2x64xf32> to vector<2x2x64xf32>
    %65 = vector.shape_cast %64 : vector<2x2x64xf32> to vector<4x64xf32>
    %66 = arith.truncf %65 : vector<4x64xf32> to vector<4x64xbf16>
    %c7 = arith.constant 7 : index
    %c0_31 = arith.constant 0 : index
    %c0_32 = arith.constant 0 : index
    %67 = vector.load %arg3[%c7, %c0_31, %c0_32] : memref<9x64x128xbf16, #tpu.memory_space<vmem>>, vector<1x64x128xbf16>
    %68 = vector.shape_cast %67 : vector<1x64x128xbf16> to vector<64x128xbf16>
    %cst_33 = arith.constant dense<0.000000e+00> : vector<4x128xf32>
    %69 = tpu.matmul %66, %68, %cst_33 {dimension_numbers = #tpu.dot_dimension_numbers<[1], [0], [0], [1], [0, 0, 1, 1], [], []>} : vector<4x64xbf16>, vector<64x128xbf16>, vector<4x128xf32> -> vector<4x128xf32>
    %70 = arith.addf %62, %69 : vector<4x128xf32>
    %71 = vector.extract_strided_slice %5 {offsets = [0, 1, 1, 0], sizes = [1, 2, 2, 64], strides = [1, 1, 1, 1]} : vector<4x3x3x64xf32> to vector<1x2x2x64xf32>
    %72 = vector.shape_cast %71 : vector<1x2x2x64xf32> to vector<2x2x64xf32>
    %73 = vector.shape_cast %72 : vector<2x2x64xf32> to vector<4x64xf32>
    %74 = arith.truncf %73 : vector<4x64xf32> to vector<4x64xbf16>
    %c8 = arith.constant 8 : index
    %c0_34 = arith.constant 0 : index
    %c0_35 = arith.constant 0 : index
    %75 = vector.load %arg3[%c8, %c0_34, %c0_35] : memref<9x64x128xbf16, #tpu.memory_space<vmem>>, vector<1x64x128xbf16>
    %76 = vector.shape_cast %75 : vector<1x64x128xbf16> to vector<64x128xbf16>
    %cst_36 = arith.constant dense<0.000000e+00> : vector<4x128xf32>
    %77 = tpu.matmul %74, %76, %cst_36 {dimension_numbers = #tpu.dot_dimension_numbers<[1], [0], [0], [1], [0, 0, 1, 1], [], []>} : vector<4x64xbf16>, vector<64x128xbf16>, vector<4x128xf32> -> vector<4x128xf32>
    %78 = arith.addf %70, %77 : vector<4x128xf32>
    %79 = vector.extract_strided_slice %1 {offsets = [3, 0, 0, 0], sizes = [1, 2, 2, 64], strides = [1, 1, 1, 1]} : vector<4x3x3x64xf32> to vector<1x2x2x64xf32>
    %80 = vector.shape_cast %79 : vector<1x2x2x64xf32> to vector<2x2x64xf32>
    %81 = vector.extract_strided_slice %1 {offsets = [2, 0, 1, 0], sizes = [1, 2, 2, 64], strides = [1, 1, 1, 1]} : vector<4x3x3x64xf32> to vector<1x2x2x64xf32>
    %82 = vector.shape_cast %81 : vector<1x2x2x64xf32> to vector<2x2x64xf32>
    %83 = arith.maximumf %80, %82 : vector<2x2x64xf32>
    %84 = vector.extract_strided_slice %1 {offsets = [1, 1, 0, 0], sizes = [1, 2, 2, 64], strides = [1, 1, 1, 1]} : vector<4x3x3x64xf32> to vector<1x2x2x64xf32>
    %85 = vector.shape_cast %84 : vector<1x2x2x64xf32> to vector<2x2x64xf32>
    %86 = vector.extract_strided_slice %1 {offsets = [0, 1, 1, 0], sizes = [1, 2, 2, 64], strides = [1, 1, 1, 1]} : vector<4x3x3x64xf32> to vector<1x2x2x64xf32>
    %87 = vector.shape_cast %86 : vector<1x2x2x64xf32> to vector<2x2x64xf32>
    %88 = arith.maximumf %85, %87 : vector<2x2x64xf32>
    %89 = arith.maximumf %83, %88 : vector<2x2x64xf32>
    %90 = vector.shape_cast %89 : vector<2x2x64xf32> to vector<4x64xf32>
    %c0_37 = arith.constant 0 : index
    %c0_38 = arith.constant 0 : index
    %91 = vector.load %arg4[%c0_37, %c0_38] : memref<64x128xf32, #tpu.memory_space<vmem>>, vector<64x128xf32>
    %cst_39 = arith.constant dense<0.000000e+00> : vector<4x128xf32>
    %92 = tpu.matmul %90, %91, %cst_39 {dimension_numbers = #tpu.dot_dimension_numbers<[1], [0], [0], [1], [0, 0, 1, 1], [], []>} : vector<4x64xf32>, vector<64x128xf32>, vector<4x128xf32> -> vector<4x128xf32>
    %93 = arith.addf %78, %92 : vector<4x128xf32>
    %c0_40 = arith.constant 0 : index
    %c0_41 = arith.constant 0 : index
    %94 = vector.load %arg5[%c0_40, %c0_41] : memref<1x128xf32, #tpu.memory_space<vmem>>, vector<1x128xf32>
    %95 = vector.broadcast %94 : vector<1x128xf32> to vector<4x128xf32>
    %96 = arith.addf %93, %95 : vector<4x128xf32>
    %cst_42 = arith.constant 0.000000e+00 : f32
    %97 = vector.broadcast %cst_42 : f32 to vector<4x128xf32>
    %98 = arith.maximumf %96, %97 : vector<4x128xf32>
    %99 = vector.shape_cast %98 : vector<4x128xf32> to vector<2x2x128xf32>
    %c0_43 = arith.constant 0 : index
    %c0_44 = arith.constant 0 : index
    %c0_45 = arith.constant 0 : index
    %c0_46 = arith.constant 0 : index
    %100 = vector.load %arg6[%c0_43, %c0_44, %c0_45, %c0_46] : memref<1x2x2x128xf32, #tpu.memory_space<vmem>>, vector<1x2x2x128xf32>
    %101 = vector.shape_cast %100 : vector<1x2x2x128xf32> to vector<2x2x128xf32>
    %102 = vector.shape_cast %99 : vector<2x2x128xf32> to vector<1x2x2x128xf32>
    tpu.vector_store %arg6[%c0_43, %c0_44, %c0_45, %c0_46], %102 {strides = array<i32>} : memref<1x2x2x128xf32, #tpu.memory_space<vmem>>, vector<1x2x2x128xf32>,
    return
  }
  func.func @transform_0(%arg0: i32) -> (i32, i32, i32, i32, i32) {
    %c0_i32 = arith.constant 0 : i32
    %c0_i32_0 = arith.constant 0 : i32
    %c0_i32_1 = arith.constant 0 : i32
    %c0_i32_2 = arith.constant 0 : i32
    %c0_i32_3 = arith.constant 0 : i32
    return %arg0, %c0_i32, %c0_i32_0, %c0_i32_1, %c0_i32_2 : i32, i32, i32, i32, i32
  }
  func.func @transform_1(%arg0: i32) -> (i32, i32, i32, i32, i32) {
    %c0_i32 = arith.constant 0 : i32
    %c0_i32_0 = arith.constant 0 : i32
    %c0_i32_1 = arith.constant 0 : i32
    %c0_i32_2 = arith.constant 0 : i32
    %c0_i32_3 = arith.constant 0 : i32
    return %arg0, %c0_i32, %c0_i32_0, %c0_i32_1, %c0_i32_2 : i32, i32, i32, i32, i32
  }
  func.func @transform_2(%arg0: i32) -> (i32, i32, i32) {
    %c0_i32 = arith.constant 0 : i32
    %c0_i32_0 = arith.constant 0 : i32
    %c0_i32_1 = arith.constant 0 : i32
    %c0_i32_2 = arith.constant 0 : i32
    return %c0_i32, %c0_i32_0, %c0_i32_1 : i32, i32, i32
  }
  func.func @transform_3(%arg0: i32) -> (i32, i32) {
    %c0_i32 = arith.constant 0 : i32
    %c0_i32_0 = arith.constant 0 : i32
    %c0_i32_1 = arith.constant 0 : i32
    return %c0_i32, %c0_i32_0 : i32, i32
  }
  func.func @transform_4(%arg0: i32) -> (i32, i32) {
    %c0_i32 = arith.constant 0 : i32
    %c0_i32_0 = arith.constant 0 : i32
    %c0_i32_1 = arith.constant 0 : i32
    return %c0_i32, %c0_i32_0 : i32, i32
  }
  func.func @transform_5(%arg0: i32) -> (i32, i32, i32, i32) {
    %c0_i32 = arith.constant 0 : i32
    %c0_i32_0 = arith.constant 0 : i32
    %c0_i32_1 = arith.constant 0 : i32
    %c0_i32_2 = arith.constant 0 : i32
    return %arg0, %c0_i32, %c0_i32_0, %c0_i32_1 : i32, i32, i32, i32
  }
}

module attributes {stable_mosaic.version = 11 : i64} {
  func.func @_sepconv_kernel(%arg0: i32, %arg1: i32, %arg2: memref<1x2x4x128xf32, #tpu.memory_space<vmem>>, %arg3: memref<1x2x4x1xf32, #tpu.memory_space<vmem>>, %arg4: memref<3x128x128xbf16, #tpu.memory_space<vmem>>, %arg5: memref<1x128xf32, #tpu.memory_space<vmem>>, %arg6: memref<1x2x2x128xf32, #tpu.memory_space<vmem>>) attributes {dimension_semantics = [#tpu.dimension_semantics<parallel>, #tpu.dimension_semantics<parallel>], iteration_bounds = array<i64: 2, 1>, scalar_prefetch = 0 : i64, scratch_operands = 0 : i64, tpu.core_type = #tpu.core_type<tc>, window_params = [{transform_indices = @transform_0, window_bounds = array<i64: 1, 2, 4, 128>}, {transform_indices = @transform_1, window_bounds = array<i64: 1, 2, 4, 1>}, {pipeline_mode = #tpu.pipeline_mode<synchronous>, transform_indices = @transform_2, window_bounds = array<i64: 3, 128, 128>}, {pipeline_mode = #tpu.pipeline_mode<synchronous>, transform_indices = @transform_3, window_bounds = array<i64: 1, 128>}, {transform_indices = @transform_4, window_bounds = array<i64: 1, 2, 2, 128>}]} {
    %c0 = arith.constant 0 : index
    %c0_0 = arith.constant 0 : index
    %c0_1 = arith.constant 0 : index
    %c0_2 = arith.constant 0 : index
    %0 = vector.load %arg2[%c0, %c0_0, %c0_1, %c0_2] : memref<1x2x4x128xf32, #tpu.memory_space<vmem>>, vector<1x2x4x128xf32>
    %1 = vector.shape_cast %0 : vector<1x2x4x128xf32> to vector<2x4x128xf32>
    %c0_3 = arith.constant 0 : index
    %c0_4 = arith.constant 0 : index
    %c0_5 = arith.constant 0 : index
    %c0_6 = arith.constant 0 : index
    %2 = vector.load %arg3[%c0_3, %c0_4, %c0_5, %c0_6] : memref<1x2x4x1xf32, #tpu.memory_space<vmem>>, vector<1x2x4x1xf32>
    %3 = vector.shape_cast %2 : vector<1x2x4x1xf32> to vector<2x4x1xf32>
    %4 = vector.broadcast %3 : vector<2x4x1xf32> to vector<2x4x128xf32>
    %5 = arith.mulf %1, %4 : vector<2x4x128xf32>
    %cst = arith.constant 0.000000e+00 : f32
    %6 = vector.broadcast %cst : f32 to vector<4x128xf32>
    %7 = vector.extract_strided_slice %5 {offsets = [0, 0, 0], sizes = [2, 2, 128], strides = [1, 1, 1]} : vector<2x4x128xf32> to vector<2x2x128xf32>
    %8 = vector.shape_cast %7 : vector<2x2x128xf32> to vector<4x128xf32>
    %9 = arith.truncf %8 : vector<4x128xf32> to vector<4x128xbf16>
    %c0_7 = arith.constant 0 : index
    %c0_8 = arith.constant 0 : index
    %c0_9 = arith.constant 0 : index
    %10 = vector.load %arg4[%c0_7, %c0_8, %c0_9] : memref<3x128x128xbf16, #tpu.memory_space<vmem>>, vector<1x128x128xbf16>
    %11 = vector.shape_cast %10 : vector<1x128x128xbf16> to vector<128x128xbf16>
    %cst_10 = arith.constant dense<0.000000e+00> : vector<4x128xf32>
    %12 = tpu.matmul %9, %11, %cst_10 {dimension_numbers = #tpu.dot_dimension_numbers<[1], [0], [0], [1], [0, 0, 1, 1], [], []>} : vector<4x128xbf16>, vector<128x128xbf16>, vector<4x128xf32> -> vector<4x128xf32>
    %13 = arith.addf %6, %12 : vector<4x128xf32>
    %14 = vector.extract_strided_slice %5 {offsets = [0, 1, 0], sizes = [2, 2, 128], strides = [1, 1, 1]} : vector<2x4x128xf32> to vector<2x2x128xf32>
    %15 = vector.shape_cast %14 : vector<2x2x128xf32> to vector<4x128xf32>
    %16 = arith.truncf %15 : vector<4x128xf32> to vector<4x128xbf16>
    %c1 = arith.constant 1 : index
    %c0_11 = arith.constant 0 : index
    %c0_12 = arith.constant 0 : index
    %17 = vector.load %arg4[%c1, %c0_11, %c0_12] : memref<3x128x128xbf16, #tpu.memory_space<vmem>>, vector<1x128x128xbf16>
    %18 = vector.shape_cast %17 : vector<1x128x128xbf16> to vector<128x128xbf16>
    %cst_13 = arith.constant dense<0.000000e+00> : vector<4x128xf32>
    %19 = tpu.matmul %16, %18, %cst_13 {dimension_numbers = #tpu.dot_dimension_numbers<[1], [0], [0], [1], [0, 0, 1, 1], [], []>} : vector<4x128xbf16>, vector<128x128xbf16>, vector<4x128xf32> -> vector<4x128xf32>
    %20 = arith.addf %13, %19 : vector<4x128xf32>
    %21 = vector.extract_strided_slice %5 {offsets = [0, 2, 0], sizes = [2, 2, 128], strides = [1, 1, 1]} : vector<2x4x128xf32> to vector<2x2x128xf32>
    %22 = vector.shape_cast %21 : vector<2x2x128xf32> to vector<4x128xf32>
    %23 = arith.truncf %22 : vector<4x128xf32> to vector<4x128xbf16>
    %c2 = arith.constant 2 : index
    %c0_14 = arith.constant 0 : index
    %c0_15 = arith.constant 0 : index
    %24 = vector.load %arg4[%c2, %c0_14, %c0_15] : memref<3x128x128xbf16, #tpu.memory_space<vmem>>, vector<1x128x128xbf16>
    %25 = vector.shape_cast %24 : vector<1x128x128xbf16> to vector<128x128xbf16>
    %cst_16 = arith.constant dense<0.000000e+00> : vector<4x128xf32>
    %26 = tpu.matmul %23, %25, %cst_16 {dimension_numbers = #tpu.dot_dimension_numbers<[1], [0], [0], [1], [0, 0, 1, 1], [], []>} : vector<4x128xbf16>, vector<128x128xbf16>, vector<4x128xf32> -> vector<4x128xf32>
    %27 = arith.addf %20, %26 : vector<4x128xf32>
    %c0_17 = arith.constant 0 : index
    %c0_18 = arith.constant 0 : index
    %28 = vector.load %arg5[%c0_17, %c0_18] : memref<1x128xf32, #tpu.memory_space<vmem>>, vector<1x128xf32>
    %29 = vector.broadcast %28 : vector<1x128xf32> to vector<4x128xf32>
    %30 = arith.addf %27, %29 : vector<4x128xf32>
    %cst_19 = arith.constant 0.000000e+00 : f32
    %31 = vector.broadcast %cst_19 : f32 to vector<4x128xf32>
    %32 = arith.maximumf %30, %31 : vector<4x128xf32>
    %33 = vector.shape_cast %32 : vector<4x128xf32> to vector<2x2x128xf32>
    %c0_20 = arith.constant 0 : index
    %c0_21 = arith.constant 0 : index
    %c0_22 = arith.constant 0 : index
    %c0_23 = arith.constant 0 : index
    %34 = vector.load %arg6[%c0_20, %c0_21, %c0_22, %c0_23] : memref<1x2x2x128xf32, #tpu.memory_space<vmem>>, vector<1x2x2x128xf32>
    %35 = vector.shape_cast %34 : vector<1x2x2x128xf32> to vector<2x2x128xf32>
    %36 = vector.shape_cast %33 : vector<2x2x128xf32> to vector<1x2x2x128xf32>
    tpu.vector_store %arg6[%c0_20, %c0_21, %c0_22, %c0_23], %36 {strides = array<i32>} : memref<1x2x2x128xf32, #tpu.memory_space<vmem>>, vector<1x2x2x128xf32>,
    return
  }
  func.func @transform_0(%arg0: i32, %arg1: i32) -> (i32, i32, i32, i32) {
    %c0_i32 = arith.constant 0 : i32
    %c0_i32_0 = arith.constant 0 : i32
    %c0_i32_1 = arith.constant 0 : i32
    return %arg0, %arg1, %c0_i32, %c0_i32_0 : i32, i32, i32, i32
  }
  func.func @transform_1(%arg0: i32, %arg1: i32) -> (i32, i32, i32, i32) {
    %c0_i32 = arith.constant 0 : i32
    %c0_i32_0 = arith.constant 0 : i32
    %c0_i32_1 = arith.constant 0 : i32
    return %arg0, %arg1, %c0_i32, %c0_i32_0 : i32, i32, i32, i32
  }
  func.func @transform_2(%arg0: i32, %arg1: i32) -> (i32, i32, i32) {
    %c0_i32 = arith.constant 0 : i32
    %c0_i32_0 = arith.constant 0 : i32
    %c0_i32_1 = arith.constant 0 : i32
    %c0_i32_2 = arith.constant 0 : i32
    return %c0_i32, %c0_i32_0, %c0_i32_1 : i32, i32, i32
  }
  func.func @transform_3(%arg0: i32, %arg1: i32) -> (i32, i32) {
    %c0_i32 = arith.constant 0 : i32
    %c0_i32_0 = arith.constant 0 : i32
    %c0_i32_1 = arith.constant 0 : i32
    return %c0_i32, %c0_i32_0 : i32, i32
  }
  func.func @transform_4(%arg0: i32, %arg1: i32) -> (i32, i32, i32, i32) {
    %c0_i32 = arith.constant 0 : i32
    %c0_i32_0 = arith.constant 0 : i32
    %c0_i32_1 = arith.constant 0 : i32
    return %arg0, %arg1, %c0_i32, %c0_i32_0 : i32, i32, i32, i32
  }
}

module attributes {stable_mosaic.version = 11 : i64} {
  func.func @_sepconv_kernel(%arg0: i32, %arg1: i32, %arg2: memref<1x6x2x128xf32, #tpu.memory_space<vmem>>, %arg3: memref<1x6x2x1xf32, #tpu.memory_space<vmem>>, %arg4: memref<3x128x128xbf16, #tpu.memory_space<vmem>>, %arg5: memref<1x128xf32, #tpu.memory_space<vmem>>, %arg6: memref<1x2x2x128xf32, #tpu.memory_space<vmem>>) attributes {dimension_semantics = [#tpu.dimension_semantics<parallel>, #tpu.dimension_semantics<parallel>], iteration_bounds = array<i64: 2, 1>, scalar_prefetch = 0 : i64, scratch_operands = 0 : i64, tpu.core_type = #tpu.core_type<tc>, window_params = [{transform_indices = @transform_0, window_bounds = array<i64: 1, 6, 2, 128>}, {transform_indices = @transform_1, window_bounds = array<i64: 1, 6, 2, 1>}, {pipeline_mode = #tpu.pipeline_mode<synchronous>, transform_indices = @transform_2, window_bounds = array<i64: 3, 128, 128>}, {pipeline_mode = #tpu.pipeline_mode<synchronous>, transform_indices = @transform_3, window_bounds = array<i64: 1, 128>}, {transform_indices = @transform_4, window_bounds = array<i64: 1, 2, 2, 128>}]} {
    %c0 = arith.constant 0 : index
    %c0_0 = arith.constant 0 : index
    %c0_1 = arith.constant 0 : index
    %c0_2 = arith.constant 0 : index
    %0 = vector.load %arg2[%c0, %c0_0, %c0_1, %c0_2] : memref<1x6x2x128xf32, #tpu.memory_space<vmem>>, vector<1x6x2x128xf32>
    %1 = vector.shape_cast %0 : vector<1x6x2x128xf32> to vector<6x2x128xf32>
    %c0_3 = arith.constant 0 : index
    %c0_4 = arith.constant 0 : index
    %c0_5 = arith.constant 0 : index
    %c0_6 = arith.constant 0 : index
    %2 = vector.load %arg3[%c0_3, %c0_4, %c0_5, %c0_6] : memref<1x6x2x1xf32, #tpu.memory_space<vmem>>, vector<1x6x2x1xf32>
    %3 = vector.shape_cast %2 : vector<1x6x2x1xf32> to vector<6x2x1xf32>
    %4 = vector.broadcast %3 : vector<6x2x1xf32> to vector<6x2x128xf32>
    %5 = arith.mulf %1, %4 : vector<6x2x128xf32>
    %cst = arith.constant 0.000000e+00 : f32
    %6 = vector.broadcast %cst : f32 to vector<4x128xf32>
    %7 = vector.extract_strided_slice %5 {offsets = [0, 0, 0], sizes = [2, 2, 128], strides = [1, 1, 1]} : vector<6x2x128xf32> to vector<2x2x128xf32>
    %8 = vector.shape_cast %7 : vector<2x2x128xf32> to vector<4x128xf32>
    %9 = arith.truncf %8 : vector<4x128xf32> to vector<4x128xbf16>
    %c0_7 = arith.constant 0 : index
    %c0_8 = arith.constant 0 : index
    %c0_9 = arith.constant 0 : index
    %10 = vector.load %arg4[%c0_7, %c0_8, %c0_9] : memref<3x128x128xbf16, #tpu.memory_space<vmem>>, vector<1x128x128xbf16>
    %11 = vector.shape_cast %10 : vector<1x128x128xbf16> to vector<128x128xbf16>
    %cst_10 = arith.constant dense<0.000000e+00> : vector<4x128xf32>
    %12 = tpu.matmul %9, %11, %cst_10 {dimension_numbers = #tpu.dot_dimension_numbers<[1], [0], [0], [1], [0, 0, 1, 1], [], []>} : vector<4x128xbf16>, vector<128x128xbf16>, vector<4x128xf32> -> vector<4x128xf32>
    %13 = arith.addf %6, %12 : vector<4x128xf32>
    %14 = vector.extract_strided_slice %5 {offsets = [2, 0, 0], sizes = [2, 2, 128], strides = [1, 1, 1]} : vector<6x2x128xf32> to vector<2x2x128xf32>
    %15 = vector.shape_cast %14 : vector<2x2x128xf32> to vector<4x128xf32>
    %16 = arith.truncf %15 : vector<4x128xf32> to vector<4x128xbf16>
    %c1 = arith.constant 1 : index
    %c0_11 = arith.constant 0 : index
    %c0_12 = arith.constant 0 : index
    %17 = vector.load %arg4[%c1, %c0_11, %c0_12] : memref<3x128x128xbf16, #tpu.memory_space<vmem>>, vector<1x128x128xbf16>
    %18 = vector.shape_cast %17 : vector<1x128x128xbf16> to vector<128x128xbf16>
    %cst_13 = arith.constant dense<0.000000e+00> : vector<4x128xf32>
    %19 = tpu.matmul %16, %18, %cst_13 {dimension_numbers = #tpu.dot_dimension_numbers<[1], [0], [0], [1], [0, 0, 1, 1], [], []>} : vector<4x128xbf16>, vector<128x128xbf16>, vector<4x128xf32> -> vector<4x128xf32>
    %20 = arith.addf %13, %19 : vector<4x128xf32>
    %21 = vector.extract_strided_slice %5 {offsets = [4, 0, 0], sizes = [2, 2, 128], strides = [1, 1, 1]} : vector<6x2x128xf32> to vector<2x2x128xf32>
    %22 = vector.shape_cast %21 : vector<2x2x128xf32> to vector<4x128xf32>
    %23 = arith.truncf %22 : vector<4x128xf32> to vector<4x128xbf16>
    %c2 = arith.constant 2 : index
    %c0_14 = arith.constant 0 : index
    %c0_15 = arith.constant 0 : index
    %24 = vector.load %arg4[%c2, %c0_14, %c0_15] : memref<3x128x128xbf16, #tpu.memory_space<vmem>>, vector<1x128x128xbf16>
    %25 = vector.shape_cast %24 : vector<1x128x128xbf16> to vector<128x128xbf16>
    %cst_16 = arith.constant dense<0.000000e+00> : vector<4x128xf32>
    %26 = tpu.matmul %23, %25, %cst_16 {dimension_numbers = #tpu.dot_dimension_numbers<[1], [0], [0], [1], [0, 0, 1, 1], [], []>} : vector<4x128xbf16>, vector<128x128xbf16>, vector<4x128xf32> -> vector<4x128xf32>
    %27 = arith.addf %20, %26 : vector<4x128xf32>
    %c0_17 = arith.constant 0 : index
    %c0_18 = arith.constant 0 : index
    %28 = vector.load %arg5[%c0_17, %c0_18] : memref<1x128xf32, #tpu.memory_space<vmem>>, vector<1x128xf32>
    %29 = vector.broadcast %28 : vector<1x128xf32> to vector<4x128xf32>
    %30 = arith.addf %27, %29 : vector<4x128xf32>
    %cst_19 = arith.constant 0.000000e+00 : f32
    %31 = vector.broadcast %cst_19 : f32 to vector<4x128xf32>
    %32 = arith.maximumf %30, %31 : vector<4x128xf32>
    %33 = vector.shape_cast %32 : vector<4x128xf32> to vector<2x2x128xf32>
    %c0_20 = arith.constant 0 : index
    %c0_21 = arith.constant 0 : index
    %c0_22 = arith.constant 0 : index
    %c0_23 = arith.constant 0 : index
    %34 = vector.load %arg6[%c0_20, %c0_21, %c0_22, %c0_23] : memref<1x2x2x128xf32, #tpu.memory_space<vmem>>, vector<1x2x2x128xf32>
    %35 = vector.shape_cast %34 : vector<1x2x2x128xf32> to vector<2x2x128xf32>
    %36 = vector.shape_cast %33 : vector<2x2x128xf32> to vector<1x2x2x128xf32>
    tpu.vector_store %arg6[%c0_20, %c0_21, %c0_22, %c0_23], %36 {strides = array<i32>} : memref<1x2x2x128xf32, #tpu.memory_space<vmem>>, vector<1x2x2x128xf32>,
    return
  }
  func.func @transform_0(%arg0: i32, %arg1: i32) -> (i32, i32, i32, i32) {
    %c0_i32 = arith.constant 0 : i32
    %c0_i32_0 = arith.constant 0 : i32
    %c0_i32_1 = arith.constant 0 : i32
    return %arg0, %c0_i32, %arg1, %c0_i32_0 : i32, i32, i32, i32
  }
  func.func @transform_1(%arg0: i32, %arg1: i32) -> (i32, i32, i32, i32) {
    %c0_i32 = arith.constant 0 : i32
    %c0_i32_0 = arith.constant 0 : i32
    %c0_i32_1 = arith.constant 0 : i32
    return %arg0, %c0_i32, %arg1, %c0_i32_0 : i32, i32, i32, i32
  }
  func.func @transform_2(%arg0: i32, %arg1: i32) -> (i32, i32, i32) {
    %c0_i32 = arith.constant 0 : i32
    %c0_i32_0 = arith.constant 0 : i32
    %c0_i32_1 = arith.constant 0 : i32
    %c0_i32_2 = arith.constant 0 : i32
    return %c0_i32, %c0_i32_0, %c0_i32_1 : i32, i32, i32
  }
  func.func @transform_3(%arg0: i32, %arg1: i32) -> (i32, i32) {
    %c0_i32 = arith.constant 0 : i32
    %c0_i32_0 = arith.constant 0 : i32
    %c0_i32_1 = arith.constant 0 : i32
    return %c0_i32, %c0_i32_0 : i32, i32
  }
  func.func @transform_4(%arg0: i32, %arg1: i32) -> (i32, i32, i32, i32) {
    %c0_i32 = arith.constant 0 : i32
    %c0_i32_0 = arith.constant 0 : i32
    %c0_i32_1 = arith.constant 0 : i32
    return %arg0, %c0_i32, %arg1, %c0_i32_0 : i32, i32, i32, i32
  }
}

module attributes {stable_mosaic.version = 11 : i64} {
  func.func @_sepconv_kernel(%arg0: i32, %arg1: i32, %arg2: memref<1x2x6x128xf32, #tpu.memory_space<vmem>>, %arg3: memref<1x2x6x1xf32, #tpu.memory_space<vmem>>, %arg4: memref<3x128x128xbf16, #tpu.memory_space<vmem>>, %arg5: memref<1x128xf32, #tpu.memory_space<vmem>>, %arg6: memref<1x2x2x128xf32, #tpu.memory_space<vmem>>, %arg7: memref<1x2x2x128xf32, #tpu.memory_space<vmem>>) attributes {dimension_semantics = [#tpu.dimension_semantics<parallel>, #tpu.dimension_semantics<parallel>], iteration_bounds = array<i64: 2, 1>, scalar_prefetch = 0 : i64, scratch_operands = 0 : i64, tpu.core_type = #tpu.core_type<tc>, window_params = [{transform_indices = @transform_0, window_bounds = array<i64: 1, 2, 6, 128>}, {transform_indices = @transform_1, window_bounds = array<i64: 1, 2, 6, 1>}, {pipeline_mode = #tpu.pipeline_mode<synchronous>, transform_indices = @transform_2, window_bounds = array<i64: 3, 128, 128>}, {pipeline_mode = #tpu.pipeline_mode<synchronous>, transform_indices = @transform_3, window_bounds = array<i64: 1, 128>}, {transform_indices = @transform_4, window_bounds = array<i64: 1, 2, 2, 128>}, {transform_indices = @transform_5, window_bounds = array<i64: 1, 2, 2, 128>}]} {
    %c0 = arith.constant 0 : index
    %c0_0 = arith.constant 0 : index
    %c0_1 = arith.constant 0 : index
    %c0_2 = arith.constant 0 : index
    %0 = vector.load %arg2[%c0, %c0_0, %c0_1, %c0_2] : memref<1x2x6x128xf32, #tpu.memory_space<vmem>>, vector<1x2x6x128xf32>
    %1 = vector.shape_cast %0 : vector<1x2x6x128xf32> to vector<2x6x128xf32>
    %c0_3 = arith.constant 0 : index
    %c0_4 = arith.constant 0 : index
    %c0_5 = arith.constant 0 : index
    %c0_6 = arith.constant 0 : index
    %2 = vector.load %arg3[%c0_3, %c0_4, %c0_5, %c0_6] : memref<1x2x6x1xf32, #tpu.memory_space<vmem>>, vector<1x2x6x1xf32>
    %3 = vector.shape_cast %2 : vector<1x2x6x1xf32> to vector<2x6x1xf32>
    %4 = vector.broadcast %3 : vector<2x6x1xf32> to vector<2x6x128xf32>
    %5 = arith.mulf %1, %4 : vector<2x6x128xf32>
    %cst = arith.constant 0.000000e+00 : f32
    %6 = vector.broadcast %cst : f32 to vector<4x128xf32>
    %7 = vector.extract_strided_slice %5 {offsets = [0, 0, 0], sizes = [2, 2, 128], strides = [1, 1, 1]} : vector<2x6x128xf32> to vector<2x2x128xf32>
    %8 = vector.shape_cast %7 : vector<2x2x128xf32> to vector<4x128xf32>
    %9 = arith.truncf %8 : vector<4x128xf32> to vector<4x128xbf16>
    %c0_7 = arith.constant 0 : index
    %c0_8 = arith.constant 0 : index
    %c0_9 = arith.constant 0 : index
    %10 = vector.load %arg4[%c0_7, %c0_8, %c0_9] : memref<3x128x128xbf16, #tpu.memory_space<vmem>>, vector<1x128x128xbf16>
    %11 = vector.shape_cast %10 : vector<1x128x128xbf16> to vector<128x128xbf16>
    %cst_10 = arith.constant dense<0.000000e+00> : vector<4x128xf32>
    %12 = tpu.matmul %9, %11, %cst_10 {dimension_numbers = #tpu.dot_dimension_numbers<[1], [0], [0], [1], [0, 0, 1, 1], [], []>} : vector<4x128xbf16>, vector<128x128xbf16>, vector<4x128xf32> -> vector<4x128xf32>
    %13 = arith.addf %6, %12 : vector<4x128xf32>
    %14 = vector.extract_strided_slice %5 {offsets = [0, 2, 0], sizes = [2, 2, 128], strides = [1, 1, 1]} : vector<2x6x128xf32> to vector<2x2x128xf32>
    %15 = vector.shape_cast %14 : vector<2x2x128xf32> to vector<4x128xf32>
    %16 = arith.truncf %15 : vector<4x128xf32> to vector<4x128xbf16>
    %c1 = arith.constant 1 : index
    %c0_11 = arith.constant 0 : index
    %c0_12 = arith.constant 0 : index
    %17 = vector.load %arg4[%c1, %c0_11, %c0_12] : memref<3x128x128xbf16, #tpu.memory_space<vmem>>, vector<1x128x128xbf16>
    %18 = vector.shape_cast %17 : vector<1x128x128xbf16> to vector<128x128xbf16>
    %cst_13 = arith.constant dense<0.000000e+00> : vector<4x128xf32>
    %19 = tpu.matmul %16, %18, %cst_13 {dimension_numbers = #tpu.dot_dimension_numbers<[1], [0], [0], [1], [0, 0, 1, 1], [], []>} : vector<4x128xbf16>, vector<128x128xbf16>, vector<4x128xf32> -> vector<4x128xf32>
    %20 = arith.addf %13, %19 : vector<4x128xf32>
    %21 = vector.extract_strided_slice %5 {offsets = [0, 4, 0], sizes = [2, 2, 128], strides = [1, 1, 1]} : vector<2x6x128xf32> to vector<2x2x128xf32>
    %22 = vector.shape_cast %21 : vector<2x2x128xf32> to vector<4x128xf32>
    %23 = arith.truncf %22 : vector<4x128xf32> to vector<4x128xbf16>
    %c2 = arith.constant 2 : index
    %c0_14 = arith.constant 0 : index
    %c0_15 = arith.constant 0 : index
    %24 = vector.load %arg4[%c2, %c0_14, %c0_15] : memref<3x128x128xbf16, #tpu.memory_space<vmem>>, vector<1x128x128xbf16>
    %25 = vector.shape_cast %24 : vector<1x128x128xbf16> to vector<128x128xbf16>
    %cst_16 = arith.constant dense<0.000000e+00> : vector<4x128xf32>
    %26 = tpu.matmul %23, %25, %cst_16 {dimension_numbers = #tpu.dot_dimension_numbers<[1], [0], [0], [1], [0, 0, 1, 1], [], []>} : vector<4x128xbf16>, vector<128x128xbf16>, vector<4x128xf32> -> vector<4x128xf32>
    %27 = arith.addf %20, %26 : vector<4x128xf32>
    %c0_17 = arith.constant 0 : index
    %c0_18 = arith.constant 0 : index
    %28 = vector.load %arg5[%c0_17, %c0_18] : memref<1x128xf32, #tpu.memory_space<vmem>>, vector<1x128xf32>
    %29 = vector.broadcast %28 : vector<1x128xf32> to vector<4x128xf32>
    %30 = arith.addf %27, %29 : vector<4x128xf32>
    %c0_19 = arith.constant 0 : index
    %c0_20 = arith.constant 0 : index
    %c0_21 = arith.constant 0 : index
    %c0_22 = arith.constant 0 : index
    %31 = vector.load %arg6[%c0_19, %c0_20, %c0_21, %c0_22] : memref<1x2x2x128xf32, #tpu.memory_space<vmem>>, vector<1x2x2x128xf32>
    %32 = vector.shape_cast %31 : vector<1x2x2x128xf32> to vector<2x2x128xf32>
    %33 = vector.shape_cast %32 : vector<2x2x128xf32> to vector<4x128xf32>
    %34 = arith.addf %30, %33 : vector<4x128xf32>
    %cst_23 = arith.constant 0.000000e+00 : f32
    %35 = vector.broadcast %cst_23 : f32 to vector<4x128xf32>
    %36 = arith.maximumf %34, %35 : vector<4x128xf32>
    %37 = vector.shape_cast %36 : vector<4x128xf32> to vector<2x2x128xf32>
    %c0_24 = arith.constant 0 : index
    %c0_25 = arith.constant 0 : index
    %c0_26 = arith.constant 0 : index
    %c0_27 = arith.constant 0 : index
    %38 = vector.load %arg7[%c0_24, %c0_25, %c0_26, %c0_27] : memref<1x2x2x128xf32, #tpu.memory_space<vmem>>, vector<1x2x2x128xf32>
    %39 = vector.shape_cast %38 : vector<1x2x2x128xf32> to vector<2x2x128xf32>
    %40 = vector.shape_cast %37 : vector<2x2x128xf32> to vector<1x2x2x128xf32>
    tpu.vector_store %arg7[%c0_24, %c0_25, %c0_26, %c0_27], %40 {strides = array<i32>} : memref<1x2x2x128xf32, #tpu.memory_space<vmem>>, vector<1x2x2x128xf32>,
    return
  }
  func.func @transform_0(%arg0: i32, %arg1: i32) -> (i32, i32, i32, i32) {
    %c0_i32 = arith.constant 0 : i32
    %c0_i32_0 = arith.constant 0 : i32
    %c0_i32_1 = arith.constant 0 : i32
    return %arg0, %arg1, %c0_i32, %c0_i32_0 : i32, i32, i32, i32
  }
  func.func @transform_1(%arg0: i32, %arg1: i32) -> (i32, i32, i32, i32) {
    %c0_i32 = arith.constant 0 : i32
    %c0_i32_0 = arith.constant 0 : i32
    %c0_i32_1 = arith.constant 0 : i32
    return %arg0, %arg1, %c0_i32, %c0_i32_0 : i32, i32, i32, i32
  }
  func.func @transform_2(%arg0: i32, %arg1: i32) -> (i32, i32, i32) {
    %c0_i32 = arith.constant 0 : i32
    %c0_i32_0 = arith.constant 0 : i32
    %c0_i32_1 = arith.constant 0 : i32
    %c0_i32_2 = arith.constant 0 : i32
    return %c0_i32, %c0_i32_0, %c0_i32_1 : i32, i32, i32
  }
  func.func @transform_3(%arg0: i32, %arg1: i32) -> (i32, i32) {
    %c0_i32 = arith.constant 0 : i32
    %c0_i32_0 = arith.constant 0 : i32
    %c0_i32_1 = arith.constant 0 : i32
    return %c0_i32, %c0_i32_0 : i32, i32
  }
  func.func @transform_4(%arg0: i32, %arg1: i32) -> (i32, i32, i32, i32) {
    %c0_i32 = arith.constant 0 : i32
    %c0_i32_0 = arith.constant 0 : i32
    %c0_i32_1 = arith.constant 0 : i32
    return %arg0, %arg1, %c0_i32, %c0_i32_0 : i32, i32, i32, i32
  }
  func.func @transform_5(%arg0: i32, %arg1: i32) -> (i32, i32, i32, i32) {
    %c0_i32 = arith.constant 0 : i32
    %c0_i32_0 = arith.constant 0 : i32
    %c0_i32_1 = arith.constant 0 : i32
    return %arg0, %arg1, %c0_i32, %c0_i32_0 : i32, i32, i32, i32
  }
}

module attributes {stable_mosaic.version = 11 : i64} {
  func.func @_sepconv_kernel(%arg0: i32, %arg1: i32, %arg2: memref<1x10x2x128xf32, #tpu.memory_space<vmem>>, %arg3: memref<1x10x2x1xf32, #tpu.memory_space<vmem>>, %arg4: memref<3x128x128xbf16, #tpu.memory_space<vmem>>, %arg5: memref<1x128xf32, #tpu.memory_space<vmem>>, %arg6: memref<1x2x2x128xf32, #tpu.memory_space<vmem>>) attributes {dimension_semantics = [#tpu.dimension_semantics<parallel>, #tpu.dimension_semantics<parallel>], iteration_bounds = array<i64: 2, 1>, scalar_prefetch = 0 : i64, scratch_operands = 0 : i64, tpu.core_type = #tpu.core_type<tc>, window_params = [{transform_indices = @transform_0, window_bounds = array<i64: 1, 10, 2, 128>}, {transform_indices = @transform_1, window_bounds = array<i64: 1, 10, 2, 1>}, {pipeline_mode = #tpu.pipeline_mode<synchronous>, transform_indices = @transform_2, window_bounds = array<i64: 3, 128, 128>}, {pipeline_mode = #tpu.pipeline_mode<synchronous>, transform_indices = @transform_3, window_bounds = array<i64: 1, 128>}, {transform_indices = @transform_4, window_bounds = array<i64: 1, 2, 2, 128>}]} {
    %c0 = arith.constant 0 : index
    %c0_0 = arith.constant 0 : index
    %c0_1 = arith.constant 0 : index
    %c0_2 = arith.constant 0 : index
    %0 = vector.load %arg2[%c0, %c0_0, %c0_1, %c0_2] : memref<1x10x2x128xf32, #tpu.memory_space<vmem>>, vector<1x10x2x128xf32>
    %1 = vector.shape_cast %0 : vector<1x10x2x128xf32> to vector<10x2x128xf32>
    %c0_3 = arith.constant 0 : index
    %c0_4 = arith.constant 0 : index
    %c0_5 = arith.constant 0 : index
    %c0_6 = arith.constant 0 : index
    %2 = vector.load %arg3[%c0_3, %c0_4, %c0_5, %c0_6] : memref<1x10x2x1xf32, #tpu.memory_space<vmem>>, vector<1x10x2x1xf32>
    %3 = vector.shape_cast %2 : vector<1x10x2x1xf32> to vector<10x2x1xf32>
    %4 = vector.broadcast %3 : vector<10x2x1xf32> to vector<10x2x128xf32>
    %5 = arith.mulf %1, %4 : vector<10x2x128xf32>
    %cst = arith.constant 0.000000e+00 : f32
    %6 = vector.broadcast %cst : f32 to vector<4x128xf32>
    %7 = vector.extract_strided_slice %5 {offsets = [0, 0, 0], sizes = [2, 2, 128], strides = [1, 1, 1]} : vector<10x2x128xf32> to vector<2x2x128xf32>
    %8 = vector.shape_cast %7 : vector<2x2x128xf32> to vector<4x128xf32>
    %9 = arith.truncf %8 : vector<4x128xf32> to vector<4x128xbf16>
    %c0_7 = arith.constant 0 : index
    %c0_8 = arith.constant 0 : index
    %c0_9 = arith.constant 0 : index
    %10 = vector.load %arg4[%c0_7, %c0_8, %c0_9] : memref<3x128x128xbf16, #tpu.memory_space<vmem>>, vector<1x128x128xbf16>
    %11 = vector.shape_cast %10 : vector<1x128x128xbf16> to vector<128x128xbf16>
    %cst_10 = arith.constant dense<0.000000e+00> : vector<4x128xf32>
    %12 = tpu.matmul %9, %11, %cst_10 {dimension_numbers = #tpu.dot_dimension_numbers<[1], [0], [0], [1], [0, 0, 1, 1], [], []>} : vector<4x128xbf16>, vector<128x128xbf16>, vector<4x128xf32> -> vector<4x128xf32>
    %13 = arith.addf %6, %12 : vector<4x128xf32>
    %14 = vector.extract_strided_slice %5 {offsets = [4, 0, 0], sizes = [2, 2, 128], strides = [1, 1, 1]} : vector<10x2x128xf32> to vector<2x2x128xf32>
    %15 = vector.shape_cast %14 : vector<2x2x128xf32> to vector<4x128xf32>
    %16 = arith.truncf %15 : vector<4x128xf32> to vector<4x128xbf16>
    %c1 = arith.constant 1 : index
    %c0_11 = arith.constant 0 : index
    %c0_12 = arith.constant 0 : index
    %17 = vector.load %arg4[%c1, %c0_11, %c0_12] : memref<3x128x128xbf16, #tpu.memory_space<vmem>>, vector<1x128x128xbf16>
    %18 = vector.shape_cast %17 : vector<1x128x128xbf16> to vector<128x128xbf16>
    %cst_13 = arith.constant dense<0.000000e+00> : vector<4x128xf32>
    %19 = tpu.matmul %16, %18, %cst_13 {dimension_numbers = #tpu.dot_dimension_numbers<[1], [0], [0], [1], [0, 0, 1, 1], [], []>} : vector<4x128xbf16>, vector<128x128xbf16>, vector<4x128xf32> -> vector<4x128xf32>
    %20 = arith.addf %13, %19 : vector<4x128xf32>
    %21 = vector.extract_strided_slice %5 {offsets = [8, 0, 0], sizes = [2, 2, 128], strides = [1, 1, 1]} : vector<10x2x128xf32> to vector<2x2x128xf32>
    %22 = vector.shape_cast %21 : vector<2x2x128xf32> to vector<4x128xf32>
    %23 = arith.truncf %22 : vector<4x128xf32> to vector<4x128xbf16>
    %c2 = arith.constant 2 : index
    %c0_14 = arith.constant 0 : index
    %c0_15 = arith.constant 0 : index
    %24 = vector.load %arg4[%c2, %c0_14, %c0_15] : memref<3x128x128xbf16, #tpu.memory_space<vmem>>, vector<1x128x128xbf16>
    %25 = vector.shape_cast %24 : vector<1x128x128xbf16> to vector<128x128xbf16>
    %cst_16 = arith.constant dense<0.000000e+00> : vector<4x128xf32>
    %26 = tpu.matmul %23, %25, %cst_16 {dimension_numbers = #tpu.dot_dimension_numbers<[1], [0], [0], [1], [0, 0, 1, 1], [], []>} : vector<4x128xbf16>, vector<128x128xbf16>, vector<4x128xf32> -> vector<4x128xf32>
    %27 = arith.addf %20, %26 : vector<4x128xf32>
    %c0_17 = arith.constant 0 : index
    %c0_18 = arith.constant 0 : index
    %28 = vector.load %arg5[%c0_17, %c0_18] : memref<1x128xf32, #tpu.memory_space<vmem>>, vector<1x128xf32>
    %29 = vector.broadcast %28 : vector<1x128xf32> to vector<4x128xf32>
    %30 = arith.addf %27, %29 : vector<4x128xf32>
    %cst_19 = arith.constant 0.000000e+00 : f32
    %31 = vector.broadcast %cst_19 : f32 to vector<4x128xf32>
    %32 = arith.maximumf %30, %31 : vector<4x128xf32>
    %33 = vector.shape_cast %32 : vector<4x128xf32> to vector<2x2x128xf32>
    %c0_20 = arith.constant 0 : index
    %c0_21 = arith.constant 0 : index
    %c0_22 = arith.constant 0 : index
    %c0_23 = arith.constant 0 : index
    %34 = vector.load %arg6[%c0_20, %c0_21, %c0_22, %c0_23] : memref<1x2x2x128xf32, #tpu.memory_space<vmem>>, vector<1x2x2x128xf32>
    %35 = vector.shape_cast %34 : vector<1x2x2x128xf32> to vector<2x2x128xf32>
    %36 = vector.shape_cast %33 : vector<2x2x128xf32> to vector<1x2x2x128xf32>
    tpu.vector_store %arg6[%c0_20, %c0_21, %c0_22, %c0_23], %36 {strides = array<i32>} : memref<1x2x2x128xf32, #tpu.memory_space<vmem>>, vector<1x2x2x128xf32>,
    return
  }
  func.func @transform_0(%arg0: i32, %arg1: i32) -> (i32, i32, i32, i32) {
    %c0_i32 = arith.constant 0 : i32
    %c0_i32_0 = arith.constant 0 : i32
    %c0_i32_1 = arith.constant 0 : i32
    return %arg0, %c0_i32, %arg1, %c0_i32_0 : i32, i32, i32, i32
  }
  func.func @transform_1(%arg0: i32, %arg1: i32) -> (i32, i32, i32, i32) {
    %c0_i32 = arith.constant 0 : i32
    %c0_i32_0 = arith.constant 0 : i32
    %c0_i32_1 = arith.constant 0 : i32
    return %arg0, %c0_i32, %arg1, %c0_i32_0 : i32, i32, i32, i32
  }
  func.func @transform_2(%arg0: i32, %arg1: i32) -> (i32, i32, i32) {
    %c0_i32 = arith.constant 0 : i32
    %c0_i32_0 = arith.constant 0 : i32
    %c0_i32_1 = arith.constant 0 : i32
    %c0_i32_2 = arith.constant 0 : i32
    return %c0_i32, %c0_i32_0, %c0_i32_1 : i32, i32, i32
  }
  func.func @transform_3(%arg0: i32, %arg1: i32) -> (i32, i32) {
    %c0_i32 = arith.constant 0 : i32
    %c0_i32_0 = arith.constant 0 : i32
    %c0_i32_1 = arith.constant 0 : i32
    return %c0_i32, %c0_i32_0 : i32, i32
  }
  func.func @transform_4(%arg0: i32, %arg1: i32) -> (i32, i32, i32, i32) {
    %c0_i32 = arith.constant 0 : i32
    %c0_i32_0 = arith.constant 0 : i32
    %c0_i32_1 = arith.constant 0 : i32
    return %arg0, %c0_i32, %arg1, %c0_i32_0 : i32, i32, i32, i32
  }
}

module attributes {stable_mosaic.version = 11 : i64} {
  func.func @_sepconv_kernel(%arg0: i32, %arg1: i32, %arg2: memref<1x2x10x128xf32, #tpu.memory_space<vmem>>, %arg3: memref<1x2x10x1xf32, #tpu.memory_space<vmem>>, %arg4: memref<3x128x128xbf16, #tpu.memory_space<vmem>>, %arg5: memref<1x128xf32, #tpu.memory_space<vmem>>, %arg6: memref<1x2x2x128xf32, #tpu.memory_space<vmem>>, %arg7: memref<1x2x2x128xf32, #tpu.memory_space<vmem>>) attributes {dimension_semantics = [#tpu.dimension_semantics<parallel>, #tpu.dimension_semantics<parallel>], iteration_bounds = array<i64: 2, 1>, scalar_prefetch = 0 : i64, scratch_operands = 0 : i64, tpu.core_type = #tpu.core_type<tc>, window_params = [{transform_indices = @transform_0, window_bounds = array<i64: 1, 2, 10, 128>}, {transform_indices = @transform_1, window_bounds = array<i64: 1, 2, 10, 1>}, {pipeline_mode = #tpu.pipeline_mode<synchronous>, transform_indices = @transform_2, window_bounds = array<i64: 3, 128, 128>}, {pipeline_mode = #tpu.pipeline_mode<synchronous>, transform_indices = @transform_3, window_bounds = array<i64: 1, 128>}, {transform_indices = @transform_4, window_bounds = array<i64: 1, 2, 2, 128>}, {transform_indices = @transform_5, window_bounds = array<i64: 1, 2, 2, 128>}]} {
    %c0 = arith.constant 0 : index
    %c0_0 = arith.constant 0 : index
    %c0_1 = arith.constant 0 : index
    %c0_2 = arith.constant 0 : index
    %0 = vector.load %arg2[%c0, %c0_0, %c0_1, %c0_2] : memref<1x2x10x128xf32, #tpu.memory_space<vmem>>, vector<1x2x10x128xf32>
    %1 = vector.shape_cast %0 : vector<1x2x10x128xf32> to vector<2x10x128xf32>
    %c0_3 = arith.constant 0 : index
    %c0_4 = arith.constant 0 : index
    %c0_5 = arith.constant 0 : index
    %c0_6 = arith.constant 0 : index
    %2 = vector.load %arg3[%c0_3, %c0_4, %c0_5, %c0_6] : memref<1x2x10x1xf32, #tpu.memory_space<vmem>>, vector<1x2x10x1xf32>
    %3 = vector.shape_cast %2 : vector<1x2x10x1xf32> to vector<2x10x1xf32>
    %4 = vector.broadcast %3 : vector<2x10x1xf32> to vector<2x10x128xf32>
    %5 = arith.mulf %1, %4 : vector<2x10x128xf32>
    %cst = arith.constant 0.000000e+00 : f32
    %6 = vector.broadcast %cst : f32 to vector<4x128xf32>
    %7 = vector.extract_strided_slice %5 {offsets = [0, 0, 0], sizes = [2, 2, 128], strides = [1, 1, 1]} : vector<2x10x128xf32> to vector<2x2x128xf32>
    %8 = vector.shape_cast %7 : vector<2x2x128xf32> to vector<4x128xf32>
    %9 = arith.truncf %8 : vector<4x128xf32> to vector<4x128xbf16>
    %c0_7 = arith.constant 0 : index
    %c0_8 = arith.constant 0 : index
    %c0_9 = arith.constant 0 : index
    %10 = vector.load %arg4[%c0_7, %c0_8, %c0_9] : memref<3x128x128xbf16, #tpu.memory_space<vmem>>, vector<1x128x128xbf16>
    %11 = vector.shape_cast %10 : vector<1x128x128xbf16> to vector<128x128xbf16>
    %cst_10 = arith.constant dense<0.000000e+00> : vector<4x128xf32>
    %12 = tpu.matmul %9, %11, %cst_10 {dimension_numbers = #tpu.dot_dimension_numbers<[1], [0], [0], [1], [0, 0, 1, 1], [], []>} : vector<4x128xbf16>, vector<128x128xbf16>, vector<4x128xf32> -> vector<4x128xf32>
    %13 = arith.addf %6, %12 : vector<4x128xf32>
    %14 = vector.extract_strided_slice %5 {offsets = [0, 4, 0], sizes = [2, 2, 128], strides = [1, 1, 1]} : vector<2x10x128xf32> to vector<2x2x128xf32>
    %15 = vector.shape_cast %14 : vector<2x2x128xf32> to vector<4x128xf32>
    %16 = arith.truncf %15 : vector<4x128xf32> to vector<4x128xbf16>
    %c1 = arith.constant 1 : index
    %c0_11 = arith.constant 0 : index
    %c0_12 = arith.constant 0 : index
    %17 = vector.load %arg4[%c1, %c0_11, %c0_12] : memref<3x128x128xbf16, #tpu.memory_space<vmem>>, vector<1x128x128xbf16>
    %18 = vector.shape_cast %17 : vector<1x128x128xbf16> to vector<128x128xbf16>
    %cst_13 = arith.constant dense<0.000000e+00> : vector<4x128xf32>
    %19 = tpu.matmul %16, %18, %cst_13 {dimension_numbers = #tpu.dot_dimension_numbers<[1], [0], [0], [1], [0, 0, 1, 1], [], []>} : vector<4x128xbf16>, vector<128x128xbf16>, vector<4x128xf32> -> vector<4x128xf32>
    %20 = arith.addf %13, %19 : vector<4x128xf32>
    %21 = vector.extract_strided_slice %5 {offsets = [0, 8, 0], sizes = [2, 2, 128], strides = [1, 1, 1]} : vector<2x10x128xf32> to vector<2x2x128xf32>
    %22 = vector.shape_cast %21 : vector<2x2x128xf32> to vector<4x128xf32>
    %23 = arith.truncf %22 : vector<4x128xf32> to vector<4x128xbf16>
    %c2 = arith.constant 2 : index
    %c0_14 = arith.constant 0 : index
    %c0_15 = arith.constant 0 : index
    %24 = vector.load %arg4[%c2, %c0_14, %c0_15] : memref<3x128x128xbf16, #tpu.memory_space<vmem>>, vector<1x128x128xbf16>
    %25 = vector.shape_cast %24 : vector<1x128x128xbf16> to vector<128x128xbf16>
    %cst_16 = arith.constant dense<0.000000e+00> : vector<4x128xf32>
    %26 = tpu.matmul %23, %25, %cst_16 {dimension_numbers = #tpu.dot_dimension_numbers<[1], [0], [0], [1], [0, 0, 1, 1], [], []>} : vector<4x128xbf16>, vector<128x128xbf16>, vector<4x128xf32> -> vector<4x128xf32>
    %27 = arith.addf %20, %26 : vector<4x128xf32>
    %c0_17 = arith.constant 0 : index
    %c0_18 = arith.constant 0 : index
    %28 = vector.load %arg5[%c0_17, %c0_18] : memref<1x128xf32, #tpu.memory_space<vmem>>, vector<1x128xf32>
    %29 = vector.broadcast %28 : vector<1x128xf32> to vector<4x128xf32>
    %30 = arith.addf %27, %29 : vector<4x128xf32>
    %c0_19 = arith.constant 0 : index
    %c0_20 = arith.constant 0 : index
    %c0_21 = arith.constant 0 : index
    %c0_22 = arith.constant 0 : index
    %31 = vector.load %arg6[%c0_19, %c0_20, %c0_21, %c0_22] : memref<1x2x2x128xf32, #tpu.memory_space<vmem>>, vector<1x2x2x128xf32>
    %32 = vector.shape_cast %31 : vector<1x2x2x128xf32> to vector<2x2x128xf32>
    %33 = vector.shape_cast %32 : vector<2x2x128xf32> to vector<4x128xf32>
    %34 = arith.addf %30, %33 : vector<4x128xf32>
    %cst_23 = arith.constant 0.000000e+00 : f32
    %35 = vector.broadcast %cst_23 : f32 to vector<4x128xf32>
    %36 = arith.maximumf %34, %35 : vector<4x128xf32>
    %37 = vector.shape_cast %36 : vector<4x128xf32> to vector<2x2x128xf32>
    %c0_24 = arith.constant 0 : index
    %c0_25 = arith.constant 0 : index
    %c0_26 = arith.constant 0 : index
    %c0_27 = arith.constant 0 : index
    %38 = vector.load %arg7[%c0_24, %c0_25, %c0_26, %c0_27] : memref<1x2x2x128xf32, #tpu.memory_space<vmem>>, vector<1x2x2x128xf32>
    %39 = vector.shape_cast %38 : vector<1x2x2x128xf32> to vector<2x2x128xf32>
    %40 = vector.shape_cast %37 : vector<2x2x128xf32> to vector<1x2x2x128xf32>
    tpu.vector_store %arg7[%c0_24, %c0_25, %c0_26, %c0_27], %40 {strides = array<i32>} : memref<1x2x2x128xf32, #tpu.memory_space<vmem>>, vector<1x2x2x128xf32>,
    return
  }
  func.func @transform_0(%arg0: i32, %arg1: i32) -> (i32, i32, i32, i32) {
    %c0_i32 = arith.constant 0 : i32
    %c0_i32_0 = arith.constant 0 : i32
    %c0_i32_1 = arith.constant 0 : i32
    return %arg0, %arg1, %c0_i32, %c0_i32_0 : i32, i32, i32, i32
  }
  func.func @transform_1(%arg0: i32, %arg1: i32) -> (i32, i32, i32, i32) {
    %c0_i32 = arith.constant 0 : i32
    %c0_i32_0 = arith.constant 0 : i32
    %c0_i32_1 = arith.constant 0 : i32
    return %arg0, %arg1, %c0_i32, %c0_i32_0 : i32, i32, i32, i32
  }
  func.func @transform_2(%arg0: i32, %arg1: i32) -> (i32, i32, i32) {
    %c0_i32 = arith.constant 0 : i32
    %c0_i32_0 = arith.constant 0 : i32
    %c0_i32_1 = arith.constant 0 : i32
    %c0_i32_2 = arith.constant 0 : i32
    return %c0_i32, %c0_i32_0, %c0_i32_1 : i32, i32, i32
  }
  func.func @transform_3(%arg0: i32, %arg1: i32) -> (i32, i32) {
    %c0_i32 = arith.constant 0 : i32
    %c0_i32_0 = arith.constant 0 : i32
    %c0_i32_1 = arith.constant 0 : i32
    return %c0_i32, %c0_i32_0 : i32, i32
  }
  func.func @transform_4(%arg0: i32, %arg1: i32) -> (i32, i32, i32, i32) {
    %c0_i32 = arith.constant 0 : i32
    %c0_i32_0 = arith.constant 0 : i32
    %c0_i32_1 = arith.constant 0 : i32
    return %arg0, %arg1, %c0_i32, %c0_i32_0 : i32, i32, i32, i32
  }
  func.func @transform_5(%arg0: i32, %arg1: i32) -> (i32, i32, i32, i32) {
    %c0_i32 = arith.constant 0 : i32
    %c0_i32_0 = arith.constant 0 : i32
    %c0_i32_1 = arith.constant 0 : i32
    return %arg0, %arg1, %c0_i32, %c0_i32_0 : i32, i32, i32, i32
  }
}

module attributes {stable_mosaic.version = 11 : i64} {
  func.func @_sepconv_kernel(%arg0: i32, %arg1: i32, %arg2: memref<1x18x2x128xf32, #tpu.memory_space<vmem>>, %arg3: memref<1x18x2x1xf32, #tpu.memory_space<vmem>>, %arg4: memref<3x128x128xbf16, #tpu.memory_space<vmem>>, %arg5: memref<1x128xf32, #tpu.memory_space<vmem>>, %arg6: memref<1x2x2x128xf32, #tpu.memory_space<vmem>>) attributes {dimension_semantics = [#tpu.dimension_semantics<parallel>, #tpu.dimension_semantics<parallel>], iteration_bounds = array<i64: 2, 1>, scalar_prefetch = 0 : i64, scratch_operands = 0 : i64, tpu.core_type = #tpu.core_type<tc>, window_params = [{transform_indices = @transform_0, window_bounds = array<i64: 1, 18, 2, 128>}, {transform_indices = @transform_1, window_bounds = array<i64: 1, 18, 2, 1>}, {pipeline_mode = #tpu.pipeline_mode<synchronous>, transform_indices = @transform_2, window_bounds = array<i64: 3, 128, 128>}, {pipeline_mode = #tpu.pipeline_mode<synchronous>, transform_indices = @transform_3, window_bounds = array<i64: 1, 128>}, {transform_indices = @transform_4, window_bounds = array<i64: 1, 2, 2, 128>}]} {
    %c0 = arith.constant 0 : index
    %c0_0 = arith.constant 0 : index
    %c0_1 = arith.constant 0 : index
    %c0_2 = arith.constant 0 : index
    %0 = vector.load %arg2[%c0, %c0_0, %c0_1, %c0_2] : memref<1x18x2x128xf32, #tpu.memory_space<vmem>>, vector<1x18x2x128xf32>
    %1 = vector.shape_cast %0 : vector<1x18x2x128xf32> to vector<18x2x128xf32>
    %c0_3 = arith.constant 0 : index
    %c0_4 = arith.constant 0 : index
    %c0_5 = arith.constant 0 : index
    %c0_6 = arith.constant 0 : index
    %2 = vector.load %arg3[%c0_3, %c0_4, %c0_5, %c0_6] : memref<1x18x2x1xf32, #tpu.memory_space<vmem>>, vector<1x18x2x1xf32>
    %3 = vector.shape_cast %2 : vector<1x18x2x1xf32> to vector<18x2x1xf32>
    %4 = vector.broadcast %3 : vector<18x2x1xf32> to vector<18x2x128xf32>
    %5 = arith.mulf %1, %4 : vector<18x2x128xf32>
    %cst = arith.constant 0.000000e+00 : f32
    %6 = vector.broadcast %cst : f32 to vector<4x128xf32>
    %7 = vector.extract_strided_slice %5 {offsets = [0, 0, 0], sizes = [2, 2, 128], strides = [1, 1, 1]} : vector<18x2x128xf32> to vector<2x2x128xf32>
    %8 = vector.shape_cast %7 : vector<2x2x128xf32> to vector<4x128xf32>
    %9 = arith.truncf %8 : vector<4x128xf32> to vector<4x128xbf16>
    %c0_7 = arith.constant 0 : index
    %c0_8 = arith.constant 0 : index
    %c0_9 = arith.constant 0 : index
    %10 = vector.load %arg4[%c0_7, %c0_8, %c0_9] : memref<3x128x128xbf16, #tpu.memory_space<vmem>>, vector<1x128x128xbf16>
    %11 = vector.shape_cast %10 : vector<1x128x128xbf16> to vector<128x128xbf16>
    %cst_10 = arith.constant dense<0.000000e+00> : vector<4x128xf32>
    %12 = tpu.matmul %9, %11, %cst_10 {dimension_numbers = #tpu.dot_dimension_numbers<[1], [0], [0], [1], [0, 0, 1, 1], [], []>} : vector<4x128xbf16>, vector<128x128xbf16>, vector<4x128xf32> -> vector<4x128xf32>
    %13 = arith.addf %6, %12 : vector<4x128xf32>
    %14 = vector.extract_strided_slice %5 {offsets = [8, 0, 0], sizes = [2, 2, 128], strides = [1, 1, 1]} : vector<18x2x128xf32> to vector<2x2x128xf32>
    %15 = vector.shape_cast %14 : vector<2x2x128xf32> to vector<4x128xf32>
    %16 = arith.truncf %15 : vector<4x128xf32> to vector<4x128xbf16>
    %c1 = arith.constant 1 : index
    %c0_11 = arith.constant 0 : index
    %c0_12 = arith.constant 0 : index
    %17 = vector.load %arg4[%c1, %c0_11, %c0_12] : memref<3x128x128xbf16, #tpu.memory_space<vmem>>, vector<1x128x128xbf16>
    %18 = vector.shape_cast %17 : vector<1x128x128xbf16> to vector<128x128xbf16>
    %cst_13 = arith.constant dense<0.000000e+00> : vector<4x128xf32>
    %19 = tpu.matmul %16, %18, %cst_13 {dimension_numbers = #tpu.dot_dimension_numbers<[1], [0], [0], [1], [0, 0, 1, 1], [], []>} : vector<4x128xbf16>, vector<128x128xbf16>, vector<4x128xf32> -> vector<4x128xf32>
    %20 = arith.addf %13, %19 : vector<4x128xf32>
    %21 = vector.extract_strided_slice %5 {offsets = [16, 0, 0], sizes = [2, 2, 128], strides = [1, 1, 1]} : vector<18x2x128xf32> to vector<2x2x128xf32>
    %22 = vector.shape_cast %21 : vector<2x2x128xf32> to vector<4x128xf32>
    %23 = arith.truncf %22 : vector<4x128xf32> to vector<4x128xbf16>
    %c2 = arith.constant 2 : index
    %c0_14 = arith.constant 0 : index
    %c0_15 = arith.constant 0 : index
    %24 = vector.load %arg4[%c2, %c0_14, %c0_15] : memref<3x128x128xbf16, #tpu.memory_space<vmem>>, vector<1x128x128xbf16>
    %25 = vector.shape_cast %24 : vector<1x128x128xbf16> to vector<128x128xbf16>
    %cst_16 = arith.constant dense<0.000000e+00> : vector<4x128xf32>
    %26 = tpu.matmul %23, %25, %cst_16 {dimension_numbers = #tpu.dot_dimension_numbers<[1], [0], [0], [1], [0, 0, 1, 1], [], []>} : vector<4x128xbf16>, vector<128x128xbf16>, vector<4x128xf32> -> vector<4x128xf32>
    %27 = arith.addf %20, %26 : vector<4x128xf32>
    %c0_17 = arith.constant 0 : index
    %c0_18 = arith.constant 0 : index
    %28 = vector.load %arg5[%c0_17, %c0_18] : memref<1x128xf32, #tpu.memory_space<vmem>>, vector<1x128xf32>
    %29 = vector.broadcast %28 : vector<1x128xf32> to vector<4x128xf32>
    %30 = arith.addf %27, %29 : vector<4x128xf32>
    %cst_19 = arith.constant 0.000000e+00 : f32
    %31 = vector.broadcast %cst_19 : f32 to vector<4x128xf32>
    %32 = arith.maximumf %30, %31 : vector<4x128xf32>
    %33 = vector.shape_cast %32 : vector<4x128xf32> to vector<2x2x128xf32>
    %c0_20 = arith.constant 0 : index
    %c0_21 = arith.constant 0 : index
    %c0_22 = arith.constant 0 : index
    %c0_23 = arith.constant 0 : index
    %34 = vector.load %arg6[%c0_20, %c0_21, %c0_22, %c0_23] : memref<1x2x2x128xf32, #tpu.memory_space<vmem>>, vector<1x2x2x128xf32>
    %35 = vector.shape_cast %34 : vector<1x2x2x128xf32> to vector<2x2x128xf32>
    %36 = vector.shape_cast %33 : vector<2x2x128xf32> to vector<1x2x2x128xf32>
    tpu.vector_store %arg6[%c0_20, %c0_21, %c0_22, %c0_23], %36 {strides = array<i32>} : memref<1x2x2x128xf32, #tpu.memory_space<vmem>>, vector<1x2x2x128xf32>,
    return
  }
  func.func @transform_0(%arg0: i32, %arg1: i32) -> (i32, i32, i32, i32) {
    %c0_i32 = arith.constant 0 : i32
    %c0_i32_0 = arith.constant 0 : i32
    %c0_i32_1 = arith.constant 0 : i32
    return %arg0, %c0_i32, %arg1, %c0_i32_0 : i32, i32, i32, i32
  }
  func.func @transform_1(%arg0: i32, %arg1: i32) -> (i32, i32, i32, i32) {
    %c0_i32 = arith.constant 0 : i32
    %c0_i32_0 = arith.constant 0 : i32
    %c0_i32_1 = arith.constant 0 : i32
    return %arg0, %c0_i32, %arg1, %c0_i32_0 : i32, i32, i32, i32
  }
  func.func @transform_2(%arg0: i32, %arg1: i32) -> (i32, i32, i32) {
    %c0_i32 = arith.constant 0 : i32
    %c0_i32_0 = arith.constant 0 : i32
    %c0_i32_1 = arith.constant 0 : i32
    %c0_i32_2 = arith.constant 0 : i32
    return %c0_i32, %c0_i32_0, %c0_i32_1 : i32, i32, i32
  }
  func.func @transform_3(%arg0: i32, %arg1: i32) -> (i32, i32) {
    %c0_i32 = arith.constant 0 : i32
    %c0_i32_0 = arith.constant 0 : i32
    %c0_i32_1 = arith.constant 0 : i32
    return %c0_i32, %c0_i32_0 : i32, i32
  }
  func.func @transform_4(%arg0: i32, %arg1: i32) -> (i32, i32, i32, i32) {
    %c0_i32 = arith.constant 0 : i32
    %c0_i32_0 = arith.constant 0 : i32
    %c0_i32_1 = arith.constant 0 : i32
    return %arg0, %c0_i32, %arg1, %c0_i32_0 : i32, i32, i32, i32
  }
}

module attributes {stable_mosaic.version = 11 : i64} {
  func.func @_sepconv_kernel(%arg0: i32, %arg1: i32, %arg2: memref<1x2x18x128xf32, #tpu.memory_space<vmem>>, %arg3: memref<1x2x18x1xf32, #tpu.memory_space<vmem>>, %arg4: memref<3x128x128xbf16, #tpu.memory_space<vmem>>, %arg5: memref<1x128xf32, #tpu.memory_space<vmem>>, %arg6: memref<1x2x2x128xf32, #tpu.memory_space<vmem>>, %arg7: memref<1x2x2x128xf32, #tpu.memory_space<vmem>>) attributes {dimension_semantics = [#tpu.dimension_semantics<parallel>, #tpu.dimension_semantics<parallel>], iteration_bounds = array<i64: 2, 1>, scalar_prefetch = 0 : i64, scratch_operands = 0 : i64, tpu.core_type = #tpu.core_type<tc>, window_params = [{transform_indices = @transform_0, window_bounds = array<i64: 1, 2, 18, 128>}, {transform_indices = @transform_1, window_bounds = array<i64: 1, 2, 18, 1>}, {pipeline_mode = #tpu.pipeline_mode<synchronous>, transform_indices = @transform_2, window_bounds = array<i64: 3, 128, 128>}, {pipeline_mode = #tpu.pipeline_mode<synchronous>, transform_indices = @transform_3, window_bounds = array<i64: 1, 128>}, {transform_indices = @transform_4, window_bounds = array<i64: 1, 2, 2, 128>}, {transform_indices = @transform_5, window_bounds = array<i64: 1, 2, 2, 128>}]} {
    %c0 = arith.constant 0 : index
    %c0_0 = arith.constant 0 : index
    %c0_1 = arith.constant 0 : index
    %c0_2 = arith.constant 0 : index
    %0 = vector.load %arg2[%c0, %c0_0, %c0_1, %c0_2] : memref<1x2x18x128xf32, #tpu.memory_space<vmem>>, vector<1x2x18x128xf32>
    %1 = vector.shape_cast %0 : vector<1x2x18x128xf32> to vector<2x18x128xf32>
    %c0_3 = arith.constant 0 : index
    %c0_4 = arith.constant 0 : index
    %c0_5 = arith.constant 0 : index
    %c0_6 = arith.constant 0 : index
    %2 = vector.load %arg3[%c0_3, %c0_4, %c0_5, %c0_6] : memref<1x2x18x1xf32, #tpu.memory_space<vmem>>, vector<1x2x18x1xf32>
    %3 = vector.shape_cast %2 : vector<1x2x18x1xf32> to vector<2x18x1xf32>
    %4 = vector.broadcast %3 : vector<2x18x1xf32> to vector<2x18x128xf32>
    %5 = arith.mulf %1, %4 : vector<2x18x128xf32>
    %cst = arith.constant 0.000000e+00 : f32
    %6 = vector.broadcast %cst : f32 to vector<4x128xf32>
    %7 = vector.extract_strided_slice %5 {offsets = [0, 0, 0], sizes = [2, 2, 128], strides = [1, 1, 1]} : vector<2x18x128xf32> to vector<2x2x128xf32>
    %8 = vector.shape_cast %7 : vector<2x2x128xf32> to vector<4x128xf32>
    %9 = arith.truncf %8 : vector<4x128xf32> to vector<4x128xbf16>
    %c0_7 = arith.constant 0 : index
    %c0_8 = arith.constant 0 : index
    %c0_9 = arith.constant 0 : index
    %10 = vector.load %arg4[%c0_7, %c0_8, %c0_9] : memref<3x128x128xbf16, #tpu.memory_space<vmem>>, vector<1x128x128xbf16>
    %11 = vector.shape_cast %10 : vector<1x128x128xbf16> to vector<128x128xbf16>
    %cst_10 = arith.constant dense<0.000000e+00> : vector<4x128xf32>
    %12 = tpu.matmul %9, %11, %cst_10 {dimension_numbers = #tpu.dot_dimension_numbers<[1], [0], [0], [1], [0, 0, 1, 1], [], []>} : vector<4x128xbf16>, vector<128x128xbf16>, vector<4x128xf32> -> vector<4x128xf32>
    %13 = arith.addf %6, %12 : vector<4x128xf32>
    %14 = vector.extract_strided_slice %5 {offsets = [0, 8, 0], sizes = [2, 2, 128], strides = [1, 1, 1]} : vector<2x18x128xf32> to vector<2x2x128xf32>
    %15 = vector.shape_cast %14 : vector<2x2x128xf32> to vector<4x128xf32>
    %16 = arith.truncf %15 : vector<4x128xf32> to vector<4x128xbf16>
    %c1 = arith.constant 1 : index
    %c0_11 = arith.constant 0 : index
    %c0_12 = arith.constant 0 : index
    %17 = vector.load %arg4[%c1, %c0_11, %c0_12] : memref<3x128x128xbf16, #tpu.memory_space<vmem>>, vector<1x128x128xbf16>
    %18 = vector.shape_cast %17 : vector<1x128x128xbf16> to vector<128x128xbf16>
    %cst_13 = arith.constant dense<0.000000e+00> : vector<4x128xf32>
    %19 = tpu.matmul %16, %18, %cst_13 {dimension_numbers = #tpu.dot_dimension_numbers<[1], [0], [0], [1], [0, 0, 1, 1], [], []>} : vector<4x128xbf16>, vector<128x128xbf16>, vector<4x128xf32> -> vector<4x128xf32>
    %20 = arith.addf %13, %19 : vector<4x128xf32>
    %21 = vector.extract_strided_slice %5 {offsets = [0, 16, 0], sizes = [2, 2, 128], strides = [1, 1, 1]} : vector<2x18x128xf32> to vector<2x2x128xf32>
    %22 = vector.shape_cast %21 : vector<2x2x128xf32> to vector<4x128xf32>
    %23 = arith.truncf %22 : vector<4x128xf32> to vector<4x128xbf16>
    %c2 = arith.constant 2 : index
    %c0_14 = arith.constant 0 : index
    %c0_15 = arith.constant 0 : index
    %24 = vector.load %arg4[%c2, %c0_14, %c0_15] : memref<3x128x128xbf16, #tpu.memory_space<vmem>>, vector<1x128x128xbf16>
    %25 = vector.shape_cast %24 : vector<1x128x128xbf16> to vector<128x128xbf16>
    %cst_16 = arith.constant dense<0.000000e+00> : vector<4x128xf32>
    %26 = tpu.matmul %23, %25, %cst_16 {dimension_numbers = #tpu.dot_dimension_numbers<[1], [0], [0], [1], [0, 0, 1, 1], [], []>} : vector<4x128xbf16>, vector<128x128xbf16>, vector<4x128xf32> -> vector<4x128xf32>
    %27 = arith.addf %20, %26 : vector<4x128xf32>
    %c0_17 = arith.constant 0 : index
    %c0_18 = arith.constant 0 : index
    %28 = vector.load %arg5[%c0_17, %c0_18] : memref<1x128xf32, #tpu.memory_space<vmem>>, vector<1x128xf32>
    %29 = vector.broadcast %28 : vector<1x128xf32> to vector<4x128xf32>
    %30 = arith.addf %27, %29 : vector<4x128xf32>
    %c0_19 = arith.constant 0 : index
    %c0_20 = arith.constant 0 : index
    %c0_21 = arith.constant 0 : index
    %c0_22 = arith.constant 0 : index
    %31 = vector.load %arg6[%c0_19, %c0_20, %c0_21, %c0_22] : memref<1x2x2x128xf32, #tpu.memory_space<vmem>>, vector<1x2x2x128xf32>
    %32 = vector.shape_cast %31 : vector<1x2x2x128xf32> to vector<2x2x128xf32>
    %33 = vector.shape_cast %32 : vector<2x2x128xf32> to vector<4x128xf32>
    %34 = arith.addf %30, %33 : vector<4x128xf32>
    %cst_23 = arith.constant 0.000000e+00 : f32
    %35 = vector.broadcast %cst_23 : f32 to vector<4x128xf32>
    %36 = arith.maximumf %34, %35 : vector<4x128xf32>
    %37 = vector.shape_cast %36 : vector<4x128xf32> to vector<2x2x128xf32>
    %c0_24 = arith.constant 0 : index
    %c0_25 = arith.constant 0 : index
    %c0_26 = arith.constant 0 : index
    %c0_27 = arith.constant 0 : index
    %38 = vector.load %arg7[%c0_24, %c0_25, %c0_26, %c0_27] : memref<1x2x2x128xf32, #tpu.memory_space<vmem>>, vector<1x2x2x128xf32>
    %39 = vector.shape_cast %38 : vector<1x2x2x128xf32> to vector<2x2x128xf32>
    %40 = vector.shape_cast %37 : vector<2x2x128xf32> to vector<1x2x2x128xf32>
    tpu.vector_store %arg7[%c0_24, %c0_25, %c0_26, %c0_27], %40 {strides = array<i32>} : memref<1x2x2x128xf32, #tpu.memory_space<vmem>>, vector<1x2x2x128xf32>,
    return
  }
  func.func @transform_0(%arg0: i32, %arg1: i32) -> (i32, i32, i32, i32) {
    %c0_i32 = arith.constant 0 : i32
    %c0_i32_0 = arith.constant 0 : i32
    %c0_i32_1 = arith.constant 0 : i32
    return %arg0, %arg1, %c0_i32, %c0_i32_0 : i32, i32, i32, i32
  }
  func.func @transform_1(%arg0: i32, %arg1: i32) -> (i32, i32, i32, i32) {
    %c0_i32 = arith.constant 0 : i32
    %c0_i32_0 = arith.constant 0 : i32
    %c0_i32_1 = arith.constant 0 : i32
    return %arg0, %arg1, %c0_i32, %c0_i32_0 : i32, i32, i32, i32
  }
  func.func @transform_2(%arg0: i32, %arg1: i32) -> (i32, i32, i32) {
    %c0_i32 = arith.constant 0 : i32
    %c0_i32_0 = arith.constant 0 : i32
    %c0_i32_1 = arith.constant 0 : i32
    %c0_i32_2 = arith.constant 0 : i32
    return %c0_i32, %c0_i32_0, %c0_i32_1 : i32, i32, i32
  }
  func.func @transform_3(%arg0: i32, %arg1: i32) -> (i32, i32) {
    %c0_i32 = arith.constant 0 : i32
    %c0_i32_0 = arith.constant 0 : i32
    %c0_i32_1 = arith.constant 0 : i32
    return %c0_i32, %c0_i32_0 : i32, i32
  }
  func.func @transform_4(%arg0: i32, %arg1: i32) -> (i32, i32, i32, i32) {
    %c0_i32 = arith.constant 0 : i32
    %c0_i32_0 = arith.constant 0 : i32
    %c0_i32_1 = arith.constant 0 : i32
    return %arg0, %arg1, %c0_i32, %c0_i32_0 : i32, i32, i32, i32
  }
  func.func @transform_5(%arg0: i32, %arg1: i32) -> (i32, i32, i32, i32) {
    %c0_i32 = arith.constant 0 : i32
    %c0_i32_0 = arith.constant 0 : i32
    %c0_i32_1 = arith.constant 0 : i32
    return %arg0, %arg1, %c0_i32, %c0_i32_0 : i32, i32, i32, i32
  }
}

module attributes {stable_mosaic.version = 11 : i64} {
  func.func @_sepconv_kernel(%arg0: i32, %arg1: i32, %arg2: memref<1x34x2x128xf32, #tpu.memory_space<vmem>>, %arg3: memref<1x34x2x1xf32, #tpu.memory_space<vmem>>, %arg4: memref<3x128x128xbf16, #tpu.memory_space<vmem>>, %arg5: memref<1x128xf32, #tpu.memory_space<vmem>>, %arg6: memref<1x2x2x128xf32, #tpu.memory_space<vmem>>) attributes {dimension_semantics = [#tpu.dimension_semantics<parallel>, #tpu.dimension_semantics<parallel>], iteration_bounds = array<i64: 2, 1>, scalar_prefetch = 0 : i64, scratch_operands = 0 : i64, tpu.core_type = #tpu.core_type<tc>, window_params = [{transform_indices = @transform_0, window_bounds = array<i64: 1, 34, 2, 128>}, {transform_indices = @transform_1, window_bounds = array<i64: 1, 34, 2, 1>}, {pipeline_mode = #tpu.pipeline_mode<synchronous>, transform_indices = @transform_2, window_bounds = array<i64: 3, 128, 128>}, {pipeline_mode = #tpu.pipeline_mode<synchronous>, transform_indices = @transform_3, window_bounds = array<i64: 1, 128>}, {transform_indices = @transform_4, window_bounds = array<i64: 1, 2, 2, 128>}]} {
    %c0 = arith.constant 0 : index
    %c0_0 = arith.constant 0 : index
    %c0_1 = arith.constant 0 : index
    %c0_2 = arith.constant 0 : index
    %0 = vector.load %arg2[%c0, %c0_0, %c0_1, %c0_2] : memref<1x34x2x128xf32, #tpu.memory_space<vmem>>, vector<1x34x2x128xf32>
    %1 = vector.shape_cast %0 : vector<1x34x2x128xf32> to vector<34x2x128xf32>
    %c0_3 = arith.constant 0 : index
    %c0_4 = arith.constant 0 : index
    %c0_5 = arith.constant 0 : index
    %c0_6 = arith.constant 0 : index
    %2 = vector.load %arg3[%c0_3, %c0_4, %c0_5, %c0_6] : memref<1x34x2x1xf32, #tpu.memory_space<vmem>>, vector<1x34x2x1xf32>
    %3 = vector.shape_cast %2 : vector<1x34x2x1xf32> to vector<34x2x1xf32>
    %4 = vector.broadcast %3 : vector<34x2x1xf32> to vector<34x2x128xf32>
    %5 = arith.mulf %1, %4 : vector<34x2x128xf32>
    %cst = arith.constant 0.000000e+00 : f32
    %6 = vector.broadcast %cst : f32 to vector<4x128xf32>
    %7 = vector.extract_strided_slice %5 {offsets = [0, 0, 0], sizes = [2, 2, 128], strides = [1, 1, 1]} : vector<34x2x128xf32> to vector<2x2x128xf32>
    %8 = vector.shape_cast %7 : vector<2x2x128xf32> to vector<4x128xf32>
    %9 = arith.truncf %8 : vector<4x128xf32> to vector<4x128xbf16>
    %c0_7 = arith.constant 0 : index
    %c0_8 = arith.constant 0 : index
    %c0_9 = arith.constant 0 : index
    %10 = vector.load %arg4[%c0_7, %c0_8, %c0_9] : memref<3x128x128xbf16, #tpu.memory_space<vmem>>, vector<1x128x128xbf16>
    %11 = vector.shape_cast %10 : vector<1x128x128xbf16> to vector<128x128xbf16>
    %cst_10 = arith.constant dense<0.000000e+00> : vector<4x128xf32>
    %12 = tpu.matmul %9, %11, %cst_10 {dimension_numbers = #tpu.dot_dimension_numbers<[1], [0], [0], [1], [0, 0, 1, 1], [], []>} : vector<4x128xbf16>, vector<128x128xbf16>, vector<4x128xf32> -> vector<4x128xf32>
    %13 = arith.addf %6, %12 : vector<4x128xf32>
    %14 = vector.extract_strided_slice %5 {offsets = [16, 0, 0], sizes = [2, 2, 128], strides = [1, 1, 1]} : vector<34x2x128xf32> to vector<2x2x128xf32>
    %15 = vector.shape_cast %14 : vector<2x2x128xf32> to vector<4x128xf32>
    %16 = arith.truncf %15 : vector<4x128xf32> to vector<4x128xbf16>
    %c1 = arith.constant 1 : index
    %c0_11 = arith.constant 0 : index
    %c0_12 = arith.constant 0 : index
    %17 = vector.load %arg4[%c1, %c0_11, %c0_12] : memref<3x128x128xbf16, #tpu.memory_space<vmem>>, vector<1x128x128xbf16>
    %18 = vector.shape_cast %17 : vector<1x128x128xbf16> to vector<128x128xbf16>
    %cst_13 = arith.constant dense<0.000000e+00> : vector<4x128xf32>
    %19 = tpu.matmul %16, %18, %cst_13 {dimension_numbers = #tpu.dot_dimension_numbers<[1], [0], [0], [1], [0, 0, 1, 1], [], []>} : vector<4x128xbf16>, vector<128x128xbf16>, vector<4x128xf32> -> vector<4x128xf32>
    %20 = arith.addf %13, %19 : vector<4x128xf32>
    %21 = vector.extract_strided_slice %5 {offsets = [32, 0, 0], sizes = [2, 2, 128], strides = [1, 1, 1]} : vector<34x2x128xf32> to vector<2x2x128xf32>
    %22 = vector.shape_cast %21 : vector<2x2x128xf32> to vector<4x128xf32>
    %23 = arith.truncf %22 : vector<4x128xf32> to vector<4x128xbf16>
    %c2 = arith.constant 2 : index
    %c0_14 = arith.constant 0 : index
    %c0_15 = arith.constant 0 : index
    %24 = vector.load %arg4[%c2, %c0_14, %c0_15] : memref<3x128x128xbf16, #tpu.memory_space<vmem>>, vector<1x128x128xbf16>
    %25 = vector.shape_cast %24 : vector<1x128x128xbf16> to vector<128x128xbf16>
    %cst_16 = arith.constant dense<0.000000e+00> : vector<4x128xf32>
    %26 = tpu.matmul %23, %25, %cst_16 {dimension_numbers = #tpu.dot_dimension_numbers<[1], [0], [0], [1], [0, 0, 1, 1], [], []>} : vector<4x128xbf16>, vector<128x128xbf16>, vector<4x128xf32> -> vector<4x128xf32>
    %27 = arith.addf %20, %26 : vector<4x128xf32>
    %c0_17 = arith.constant 0 : index
    %c0_18 = arith.constant 0 : index
    %28 = vector.load %arg5[%c0_17, %c0_18] : memref<1x128xf32, #tpu.memory_space<vmem>>, vector<1x128xf32>
    %29 = vector.broadcast %28 : vector<1x128xf32> to vector<4x128xf32>
    %30 = arith.addf %27, %29 : vector<4x128xf32>
    %cst_19 = arith.constant 0.000000e+00 : f32
    %31 = vector.broadcast %cst_19 : f32 to vector<4x128xf32>
    %32 = arith.maximumf %30, %31 : vector<4x128xf32>
    %33 = vector.shape_cast %32 : vector<4x128xf32> to vector<2x2x128xf32>
    %c0_20 = arith.constant 0 : index
    %c0_21 = arith.constant 0 : index
    %c0_22 = arith.constant 0 : index
    %c0_23 = arith.constant 0 : index
    %34 = vector.load %arg6[%c0_20, %c0_21, %c0_22, %c0_23] : memref<1x2x2x128xf32, #tpu.memory_space<vmem>>, vector<1x2x2x128xf32>
    %35 = vector.shape_cast %34 : vector<1x2x2x128xf32> to vector<2x2x128xf32>
    %36 = vector.shape_cast %33 : vector<2x2x128xf32> to vector<1x2x2x128xf32>
    tpu.vector_store %arg6[%c0_20, %c0_21, %c0_22, %c0_23], %36 {strides = array<i32>} : memref<1x2x2x128xf32, #tpu.memory_space<vmem>>, vector<1x2x2x128xf32>,
    return
  }
  func.func @transform_0(%arg0: i32, %arg1: i32) -> (i32, i32, i32, i32) {
    %c0_i32 = arith.constant 0 : i32
    %c0_i32_0 = arith.constant 0 : i32
    %c0_i32_1 = arith.constant 0 : i32
    return %arg0, %c0_i32, %arg1, %c0_i32_0 : i32, i32, i32, i32
  }
  func.func @transform_1(%arg0: i32, %arg1: i32) -> (i32, i32, i32, i32) {
    %c0_i32 = arith.constant 0 : i32
    %c0_i32_0 = arith.constant 0 : i32
    %c0_i32_1 = arith.constant 0 : i32
    return %arg0, %c0_i32, %arg1, %c0_i32_0 : i32, i32, i32, i32
  }
  func.func @transform_2(%arg0: i32, %arg1: i32) -> (i32, i32, i32) {
    %c0_i32 = arith.constant 0 : i32
    %c0_i32_0 = arith.constant 0 : i32
    %c0_i32_1 = arith.constant 0 : i32
    %c0_i32_2 = arith.constant 0 : i32
    return %c0_i32, %c0_i32_0, %c0_i32_1 : i32, i32, i32
  }
  func.func @transform_3(%arg0: i32, %arg1: i32) -> (i32, i32) {
    %c0_i32 = arith.constant 0 : i32
    %c0_i32_0 = arith.constant 0 : i32
    %c0_i32_1 = arith.constant 0 : i32
    return %c0_i32, %c0_i32_0 : i32, i32
  }
  func.func @transform_4(%arg0: i32, %arg1: i32) -> (i32, i32, i32, i32) {
    %c0_i32 = arith.constant 0 : i32
    %c0_i32_0 = arith.constant 0 : i32
    %c0_i32_1 = arith.constant 0 : i32
    return %arg0, %c0_i32, %arg1, %c0_i32_0 : i32, i32, i32, i32
  }
}

module attributes {stable_mosaic.version = 11 : i64} {
  func.func @_sepconv_kernel(%arg0: i32, %arg1: i32, %arg2: memref<1x2x34x128xf32, #tpu.memory_space<vmem>>, %arg3: memref<1x2x34x1xf32, #tpu.memory_space<vmem>>, %arg4: memref<3x128x128xbf16, #tpu.memory_space<vmem>>, %arg5: memref<1x128xf32, #tpu.memory_space<vmem>>, %arg6: memref<1x2x2x128xf32, #tpu.memory_space<vmem>>, %arg7: memref<1x2x2x128xf32, #tpu.memory_space<vmem>>) attributes {dimension_semantics = [#tpu.dimension_semantics<parallel>, #tpu.dimension_semantics<parallel>], iteration_bounds = array<i64: 2, 1>, scalar_prefetch = 0 : i64, scratch_operands = 0 : i64, tpu.core_type = #tpu.core_type<tc>, window_params = [{transform_indices = @transform_0, window_bounds = array<i64: 1, 2, 34, 128>}, {transform_indices = @transform_1, window_bounds = array<i64: 1, 2, 34, 1>}, {pipeline_mode = #tpu.pipeline_mode<synchronous>, transform_indices = @transform_2, window_bounds = array<i64: 3, 128, 128>}, {pipeline_mode = #tpu.pipeline_mode<synchronous>, transform_indices = @transform_3, window_bounds = array<i64: 1, 128>}, {transform_indices = @transform_4, window_bounds = array<i64: 1, 2, 2, 128>}, {transform_indices = @transform_5, window_bounds = array<i64: 1, 2, 2, 128>}]} {
    %c0 = arith.constant 0 : index
    %c0_0 = arith.constant 0 : index
    %c0_1 = arith.constant 0 : index
    %c0_2 = arith.constant 0 : index
    %0 = vector.load %arg2[%c0, %c0_0, %c0_1, %c0_2] : memref<1x2x34x128xf32, #tpu.memory_space<vmem>>, vector<1x2x34x128xf32>
    %1 = vector.shape_cast %0 : vector<1x2x34x128xf32> to vector<2x34x128xf32>
    %c0_3 = arith.constant 0 : index
    %c0_4 = arith.constant 0 : index
    %c0_5 = arith.constant 0 : index
    %c0_6 = arith.constant 0 : index
    %2 = vector.load %arg3[%c0_3, %c0_4, %c0_5, %c0_6] : memref<1x2x34x1xf32, #tpu.memory_space<vmem>>, vector<1x2x34x1xf32>
    %3 = vector.shape_cast %2 : vector<1x2x34x1xf32> to vector<2x34x1xf32>
    %4 = vector.broadcast %3 : vector<2x34x1xf32> to vector<2x34x128xf32>
    %5 = arith.mulf %1, %4 : vector<2x34x128xf32>
    %cst = arith.constant 0.000000e+00 : f32
    %6 = vector.broadcast %cst : f32 to vector<4x128xf32>
    %7 = vector.extract_strided_slice %5 {offsets = [0, 0, 0], sizes = [2, 2, 128], strides = [1, 1, 1]} : vector<2x34x128xf32> to vector<2x2x128xf32>
    %8 = vector.shape_cast %7 : vector<2x2x128xf32> to vector<4x128xf32>
    %9 = arith.truncf %8 : vector<4x128xf32> to vector<4x128xbf16>
    %c0_7 = arith.constant 0 : index
    %c0_8 = arith.constant 0 : index
    %c0_9 = arith.constant 0 : index
    %10 = vector.load %arg4[%c0_7, %c0_8, %c0_9] : memref<3x128x128xbf16, #tpu.memory_space<vmem>>, vector<1x128x128xbf16>
    %11 = vector.shape_cast %10 : vector<1x128x128xbf16> to vector<128x128xbf16>
    %cst_10 = arith.constant dense<0.000000e+00> : vector<4x128xf32>
    %12 = tpu.matmul %9, %11, %cst_10 {dimension_numbers = #tpu.dot_dimension_numbers<[1], [0], [0], [1], [0, 0, 1, 1], [], []>} : vector<4x128xbf16>, vector<128x128xbf16>, vector<4x128xf32> -> vector<4x128xf32>
    %13 = arith.addf %6, %12 : vector<4x128xf32>
    %14 = vector.extract_strided_slice %5 {offsets = [0, 16, 0], sizes = [2, 2, 128], strides = [1, 1, 1]} : vector<2x34x128xf32> to vector<2x2x128xf32>
    %15 = vector.shape_cast %14 : vector<2x2x128xf32> to vector<4x128xf32>
    %16 = arith.truncf %15 : vector<4x128xf32> to vector<4x128xbf16>
    %c1 = arith.constant 1 : index
    %c0_11 = arith.constant 0 : index
    %c0_12 = arith.constant 0 : index
    %17 = vector.load %arg4[%c1, %c0_11, %c0_12] : memref<3x128x128xbf16, #tpu.memory_space<vmem>>, vector<1x128x128xbf16>
    %18 = vector.shape_cast %17 : vector<1x128x128xbf16> to vector<128x128xbf16>
    %cst_13 = arith.constant dense<0.000000e+00> : vector<4x128xf32>
    %19 = tpu.matmul %16, %18, %cst_13 {dimension_numbers = #tpu.dot_dimension_numbers<[1], [0], [0], [1], [0, 0, 1, 1], [], []>} : vector<4x128xbf16>, vector<128x128xbf16>, vector<4x128xf32> -> vector<4x128xf32>
    %20 = arith.addf %13, %19 : vector<4x128xf32>
    %21 = vector.extract_strided_slice %5 {offsets = [0, 32, 0], sizes = [2, 2, 128], strides = [1, 1, 1]} : vector<2x34x128xf32> to vector<2x2x128xf32>
    %22 = vector.shape_cast %21 : vector<2x2x128xf32> to vector<4x128xf32>
    %23 = arith.truncf %22 : vector<4x128xf32> to vector<4x128xbf16>
    %c2 = arith.constant 2 : index
    %c0_14 = arith.constant 0 : index
    %c0_15 = arith.constant 0 : index
    %24 = vector.load %arg4[%c2, %c0_14, %c0_15] : memref<3x128x128xbf16, #tpu.memory_space<vmem>>, vector<1x128x128xbf16>
    %25 = vector.shape_cast %24 : vector<1x128x128xbf16> to vector<128x128xbf16>
    %cst_16 = arith.constant dense<0.000000e+00> : vector<4x128xf32>
    %26 = tpu.matmul %23, %25, %cst_16 {dimension_numbers = #tpu.dot_dimension_numbers<[1], [0], [0], [1], [0, 0, 1, 1], [], []>} : vector<4x128xbf16>, vector<128x128xbf16>, vector<4x128xf32> -> vector<4x128xf32>
    %27 = arith.addf %20, %26 : vector<4x128xf32>
    %c0_17 = arith.constant 0 : index
    %c0_18 = arith.constant 0 : index
    %28 = vector.load %arg5[%c0_17, %c0_18] : memref<1x128xf32, #tpu.memory_space<vmem>>, vector<1x128xf32>
    %29 = vector.broadcast %28 : vector<1x128xf32> to vector<4x128xf32>
    %30 = arith.addf %27, %29 : vector<4x128xf32>
    %c0_19 = arith.constant 0 : index
    %c0_20 = arith.constant 0 : index
    %c0_21 = arith.constant 0 : index
    %c0_22 = arith.constant 0 : index
    %31 = vector.load %arg6[%c0_19, %c0_20, %c0_21, %c0_22] : memref<1x2x2x128xf32, #tpu.memory_space<vmem>>, vector<1x2x2x128xf32>
    %32 = vector.shape_cast %31 : vector<1x2x2x128xf32> to vector<2x2x128xf32>
    %33 = vector.shape_cast %32 : vector<2x2x128xf32> to vector<4x128xf32>
    %34 = arith.addf %30, %33 : vector<4x128xf32>
    %cst_23 = arith.constant 0.000000e+00 : f32
    %35 = vector.broadcast %cst_23 : f32 to vector<4x128xf32>
    %36 = arith.maximumf %34, %35 : vector<4x128xf32>
    %37 = vector.shape_cast %36 : vector<4x128xf32> to vector<2x2x128xf32>
    %c0_24 = arith.constant 0 : index
    %c0_25 = arith.constant 0 : index
    %c0_26 = arith.constant 0 : index
    %c0_27 = arith.constant 0 : index
    %38 = vector.load %arg7[%c0_24, %c0_25, %c0_26, %c0_27] : memref<1x2x2x128xf32, #tpu.memory_space<vmem>>, vector<1x2x2x128xf32>
    %39 = vector.shape_cast %38 : vector<1x2x2x128xf32> to vector<2x2x128xf32>
    %40 = vector.shape_cast %37 : vector<2x2x128xf32> to vector<1x2x2x128xf32>
    tpu.vector_store %arg7[%c0_24, %c0_25, %c0_26, %c0_27], %40 {strides = array<i32>} : memref<1x2x2x128xf32, #tpu.memory_space<vmem>>, vector<1x2x2x128xf32>,
    return
  }
  func.func @transform_0(%arg0: i32, %arg1: i32) -> (i32, i32, i32, i32) {
    %c0_i32 = arith.constant 0 : i32
    %c0_i32_0 = arith.constant 0 : i32
    %c0_i32_1 = arith.constant 0 : i32
    return %arg0, %arg1, %c0_i32, %c0_i32_0 : i32, i32, i32, i32
  }
  func.func @transform_1(%arg0: i32, %arg1: i32) -> (i32, i32, i32, i32) {
    %c0_i32 = arith.constant 0 : i32
    %c0_i32_0 = arith.constant 0 : i32
    %c0_i32_1 = arith.constant 0 : i32
    return %arg0, %arg1, %c0_i32, %c0_i32_0 : i32, i32, i32, i32
  }
  func.func @transform_2(%arg0: i32, %arg1: i32) -> (i32, i32, i32) {
    %c0_i32 = arith.constant 0 : i32
    %c0_i32_0 = arith.constant 0 : i32
    %c0_i32_1 = arith.constant 0 : i32
    %c0_i32_2 = arith.constant 0 : i32
    return %c0_i32, %c0_i32_0, %c0_i32_1 : i32, i32, i32
  }
  func.func @transform_3(%arg0: i32, %arg1: i32) -> (i32, i32) {
    %c0_i32 = arith.constant 0 : i32
    %c0_i32_0 = arith.constant 0 : i32
    %c0_i32_1 = arith.constant 0 : i32
    return %c0_i32, %c0_i32_0 : i32, i32
  }
  func.func @transform_4(%arg0: i32, %arg1: i32) -> (i32, i32, i32, i32) {
    %c0_i32 = arith.constant 0 : i32
    %c0_i32_0 = arith.constant 0 : i32
    %c0_i32_1 = arith.constant 0 : i32
    return %arg0, %arg1, %c0_i32, %c0_i32_0 : i32, i32, i32, i32
  }
  func.func @transform_5(%arg0: i32, %arg1: i32) -> (i32, i32, i32, i32) {
    %c0_i32 = arith.constant 0 : i32
    %c0_i32_0 = arith.constant 0 : i32
    %c0_i32_1 = arith.constant 0 : i32
    return %arg0, %arg1, %c0_i32, %c0_i32_0 : i32, i32, i32, i32
  }
}

module attributes {stable_mosaic.version = 11 : i64} {
  func.func @_sepconv_kernel(%arg0: i32, %arg1: i32, %arg2: memref<1x2x34x128xf32, #tpu.memory_space<vmem>>, %arg3: memref<1x2x34x1xf32, #tpu.memory_space<vmem>>, %arg4: memref<3x128x128xbf16, #tpu.memory_space<vmem>>, %arg5: memref<1x128xf32, #tpu.memory_space<vmem>>, %arg6: memref<1x2x2x128xf32, #tpu.memory_space<vmem>>, %arg7: memref<1x2x2x128xf32, #tpu.memory_space<vmem>>) attributes {dimension_semantics = [#tpu.dimension_semantics<parallel>, #tpu.dimension_semantics<parallel>], iteration_bounds = array<i64: 2, 1>, scalar_prefetch = 0 : i64, scratch_operands = 0 : i64, tpu.core_type = #tpu.core_type<tc>, window_params = [{transform_indices = @transform_0, window_bounds = array<i64: 1, 2, 34, 128>}, {transform_indices = @transform_1, window_bounds = array<i64: 1, 2, 34, 1>}, {pipeline_mode = #tpu.pipeline_mode<synchronous>, transform_indices = @transform_2, window_bounds = array<i64: 3, 128, 128>}, {pipeline_mode = #tpu.pipeline_mode<synchronous>, transform_indices = @transform_3, window_bounds = array<i64: 1, 128>}, {transform_indices = @transform_4, window_bounds = array<i64: 1, 2, 2, 128>}, {transform_indices = @transform_5, window_bounds = array<i64: 1, 2, 2, 128>}]} {
    %c0 = arith.constant 0 : index
    %c0_0 = arith.constant 0 : index
    %c0_1 = arith.constant 0 : index
    %c0_2 = arith.constant 0 : index
    %0 = vector.load %arg2[%c0, %c0_0, %c0_1, %c0_2] : memref<1x2x34x128xf32, #tpu.memory_space<vmem>>, vector<1x2x34x128xf32>
    %1 = vector.shape_cast %0 : vector<1x2x34x128xf32> to vector<2x34x128xf32>
    %c0_3 = arith.constant 0 : index
    %c0_4 = arith.constant 0 : index
    %c0_5 = arith.constant 0 : index
    %c0_6 = arith.constant 0 : index
    %2 = vector.load %arg3[%c0_3, %c0_4, %c0_5, %c0_6] : memref<1x2x34x1xf32, #tpu.memory_space<vmem>>, vector<1x2x34x1xf32>
    %3 = vector.shape_cast %2 : vector<1x2x34x1xf32> to vector<2x34x1xf32>
    %4 = vector.broadcast %3 : vector<2x34x1xf32> to vector<2x34x128xf32>
    %5 = arith.mulf %1, %4 : vector<2x34x128xf32>
    %cst = arith.constant 0.000000e+00 : f32
    %6 = vector.broadcast %cst : f32 to vector<4x128xf32>
    %7 = vector.extract_strided_slice %5 {offsets = [0, 0, 0], sizes = [2, 2, 128], strides = [1, 1, 1]} : vector<2x34x128xf32> to vector<2x2x128xf32>
    %8 = vector.shape_cast %7 : vector<2x2x128xf32> to vector<4x128xf32>
    %9 = arith.truncf %8 : vector<4x128xf32> to vector<4x128xbf16>
    %c0_7 = arith.constant 0 : index
    %c0_8 = arith.constant 0 : index
    %c0_9 = arith.constant 0 : index
    %10 = vector.load %arg4[%c0_7, %c0_8, %c0_9] : memref<3x128x128xbf16, #tpu.memory_space<vmem>>, vector<1x128x128xbf16>
    %11 = vector.shape_cast %10 : vector<1x128x128xbf16> to vector<128x128xbf16>
    %cst_10 = arith.constant dense<0.000000e+00> : vector<4x128xf32>
    %12 = tpu.matmul %9, %11, %cst_10 {dimension_numbers = #tpu.dot_dimension_numbers<[1], [0], [0], [1], [0, 0, 1, 1], [], []>} : vector<4x128xbf16>, vector<128x128xbf16>, vector<4x128xf32> -> vector<4x128xf32>
    %13 = arith.addf %6, %12 : vector<4x128xf32>
    %14 = vector.extract_strided_slice %5 {offsets = [0, 16, 0], sizes = [2, 2, 128], strides = [1, 1, 1]} : vector<2x34x128xf32> to vector<2x2x128xf32>
    %15 = vector.shape_cast %14 : vector<2x2x128xf32> to vector<4x128xf32>
    %16 = arith.truncf %15 : vector<4x128xf32> to vector<4x128xbf16>
    %c1 = arith.constant 1 : index
    %c0_11 = arith.constant 0 : index
    %c0_12 = arith.constant 0 : index
    %17 = vector.load %arg4[%c1, %c0_11, %c0_12] : memref<3x128x128xbf16, #tpu.memory_space<vmem>>, vector<1x128x128xbf16>
    %18 = vector.shape_cast %17 : vector<1x128x128xbf16> to vector<128x128xbf16>
    %cst_13 = arith.constant dense<0.000000e+00> : vector<4x128xf32>
    %19 = tpu.matmul %16, %18, %cst_13 {dimension_numbers = #tpu.dot_dimension_numbers<[1], [0], [0], [1], [0, 0, 1, 1], [], []>} : vector<4x128xbf16>, vector<128x128xbf16>, vector<4x128xf32> -> vector<4x128xf32>
    %20 = arith.addf %13, %19 : vector<4x128xf32>
    %21 = vector.extract_strided_slice %5 {offsets = [0, 32, 0], sizes = [2, 2, 128], strides = [1, 1, 1]} : vector<2x34x128xf32> to vector<2x2x128xf32>
    %22 = vector.shape_cast %21 : vector<2x2x128xf32> to vector<4x128xf32>
    %23 = arith.truncf %22 : vector<4x128xf32> to vector<4x128xbf16>
    %c2 = arith.constant 2 : index
    %c0_14 = arith.constant 0 : index
    %c0_15 = arith.constant 0 : index
    %24 = vector.load %arg4[%c2, %c0_14, %c0_15] : memref<3x128x128xbf16, #tpu.memory_space<vmem>>, vector<1x128x128xbf16>
    %25 = vector.shape_cast %24 : vector<1x128x128xbf16> to vector<128x128xbf16>
    %cst_16 = arith.constant dense<0.000000e+00> : vector<4x128xf32>
    %26 = tpu.matmul %23, %25, %cst_16 {dimension_numbers = #tpu.dot_dimension_numbers<[1], [0], [0], [1], [0, 0, 1, 1], [], []>} : vector<4x128xbf16>, vector<128x128xbf16>, vector<4x128xf32> -> vector<4x128xf32>
    %27 = arith.addf %20, %26 : vector<4x128xf32>
    %c0_17 = arith.constant 0 : index
    %c0_18 = arith.constant 0 : index
    %28 = vector.load %arg5[%c0_17, %c0_18] : memref<1x128xf32, #tpu.memory_space<vmem>>, vector<1x128xf32>
    %29 = vector.broadcast %28 : vector<1x128xf32> to vector<4x128xf32>
    %30 = arith.addf %27, %29 : vector<4x128xf32>
    %c0_19 = arith.constant 0 : index
    %c0_20 = arith.constant 0 : index
    %c0_21 = arith.constant 0 : index
    %c0_22 = arith.constant 0 : index
    %31 = vector.load %arg6[%c0_19, %c0_20, %c0_21, %c0_22] : memref<1x2x2x128xf32, #tpu.memory_space<vmem>>, vector<1x2x2x128xf32>
    %32 = vector.shape_cast %31 : vector<1x2x2x128xf32> to vector<2x2x128xf32>
    %33 = vector.shape_cast %32 : vector<2x2x128xf32> to vector<4x128xf32>
    %34 = arith.addf %30, %33 : vector<4x128xf32>
    %cst_23 = arith.constant 0.000000e+00 : f32
    %35 = vector.broadcast %cst_23 : f32 to vector<4x128xf32>
    %36 = arith.maximumf %34, %35 : vector<4x128xf32>
    %37 = vector.shape_cast %36 : vector<4x128xf32> to vector<2x2x128xf32>
    %c0_24 = arith.constant 0 : index
    %c0_25 = arith.constant 0 : index
    %c0_26 = arith.constant 0 : index
    %c0_27 = arith.constant 0 : index
    %38 = vector.load %arg7[%c0_24, %c0_25, %c0_26, %c0_27] : memref<1x2x2x128xf32, #tpu.memory_space<vmem>>, vector<1x2x2x128xf32>
    %39 = vector.shape_cast %38 : vector<1x2x2x128xf32> to vector<2x2x128xf32>
    %40 = vector.shape_cast %37 : vector<2x2x128xf32> to vector<1x2x2x128xf32>
    tpu.vector_store %arg7[%c0_24, %c0_25, %c0_26, %c0_27], %40 {strides = array<i32>} : memref<1x2x2x128xf32, #tpu.memory_space<vmem>>, vector<1x2x2x128xf32>,
    return
  }
  func.func @transform_0(%arg0: i32, %arg1: i32) -> (i32, i32, i32, i32) {
    %c0_i32 = arith.constant 0 : i32
    %c0_i32_0 = arith.constant 0 : i32
    %c0_i32_1 = arith.constant 0 : i32
    return %arg0, %arg1, %c0_i32, %c0_i32_0 : i32, i32, i32, i32
  }
  func.func @transform_1(%arg0: i32, %arg1: i32) -> (i32, i32, i32, i32) {
    %c0_i32 = arith.constant 0 : i32
    %c0_i32_0 = arith.constant 0 : i32
    %c0_i32_1 = arith.constant 0 : i32
    return %arg0, %arg1, %c0_i32, %c0_i32_0 : i32, i32, i32, i32
  }
  func.func @transform_2(%arg0: i32, %arg1: i32) -> (i32, i32, i32) {
    %c0_i32 = arith.constant 0 : i32
    %c0_i32_0 = arith.constant 0 : i32
    %c0_i32_1 = arith.constant 0 : i32
    %c0_i32_2 = arith.constant 0 : i32
    return %c0_i32, %c0_i32_0, %c0_i32_1 : i32, i32, i32
  }
  func.func @transform_3(%arg0: i32, %arg1: i32) -> (i32, i32) {
    %c0_i32 = arith.constant 0 : i32
    %c0_i32_0 = arith.constant 0 : i32
    %c0_i32_1 = arith.constant 0 : i32
    return %c0_i32, %c0_i32_0 : i32, i32
  }
  func.func @transform_4(%arg0: i32, %arg1: i32) -> (i32, i32, i32, i32) {
    %c0_i32 = arith.constant 0 : i32
    %c0_i32_0 = arith.constant 0 : i32
    %c0_i32_1 = arith.constant 0 : i32
    return %arg0, %arg1, %c0_i32, %c0_i32_0 : i32, i32, i32, i32
  }
  func.func @transform_5(%arg0: i32, %arg1: i32) -> (i32, i32, i32, i32) {
    %c0_i32 = arith.constant 0 : i32
    %c0_i32_0 = arith.constant 0 : i32
    %c0_i32_1 = arith.constant 0 : i32
    return %arg0, %arg1, %c0_i32, %c0_i32_0 : i32, i32, i32, i32
  }
}

</mosaic_0001>

<bundles_post_ra>
// kernel: _lambda_.55
= control target key start
LH: loop header
LB: loop body
LE: loop exit
PB: predicated region body
PF: predicated region fallthrough
CT: control target
= control target key end

     0   :  { %s2233_s18 = smov 0   ;;  %s2945_s0 = inlined_call_operand.vmem [shape: f32[2,4,9,9,4], index: 0, kind: input, shape index: {}]   ;;  %s2946_s1 = inlined_call_operand.vmem [shape: f32[2,4,9,9,1], index: 1, kind: input, shape index: {}]   ;;  %s2947_s2 = inlined_call_operand.vmem [shape: bf16[9,4,16], index: 2, kind: input, shape index: {}]   ;;  %s2948_s3 = inlined_call_operand.vmem [shape: f32[4,16], index: 3, kind: input, shape index: {}]   ;;  %s2949_s4 = inlined_call_operand.vmem [shape: f32[1,16], index: 4, kind: input, shape index: {}]   ;;  %s2950_s5 = inlined_call_operand.vmem [shape: f32[2,8,8,16], index: 5, kind: output, shape index: {}]  }
   0x1 LB: > { %s1949_s19 = sadd.s32 4294967295, %s2200_s18   ;;  %p1953_p0 = scmp.ge.s32.totalorder %s2200_s18, 1  ;;  %s2200_s18 = sphi %s2233_s18, %s15_s18  }
   0x2   : > { %p197_p1 = scmp.lt.s32.totalorder %s2200_s18, 3 }
   0x4   : > { %p198_p2 = pnand %p1953_p0, %p197_p1 }
   0x6   : > { %201 = sbr.rel (%p198_p2) target bundleno = 479 (0x1df), region = 40 }
   0xb   : > { %p230_p3 = scmp.lt.s32.totalorder %s1949_s19, 1  ;;  %v2202_v0 = vmov 0   ;;  %vm678_vm0 = vcmask 1041408   ;;  %v1958_v13 = vld [vmem:[%s2947_s2 + $0x2] sm:$0x3]  ;;  %vm665_vm1 = vcmask 31744  }
   0xc   : > { %2193 = vset.pattern.permute.xlu1 %v2202_v0  ;;  %2192 = vset.pattern.permute.xlu0 %v2202_v0  ;;  %v680_v14 = vsel %vm678_vm0, %v1958_v13, 0  ;;  %v658_v15 = vld [vmem:[%s2947_s2] sm:$0x3]  ;;  %v2284_v25 = vld [vmem:[%s2947_s2 + $0x4] sm:$0x3]  ;;  %vm843_vm2 = vcmask 1046528  }
   0xd   : > { %s3025_s19 = smov (!%p230_p3, %s1949_s19), 1  ;;  %2173 = vmatprep.subr.msk.bf16.mxu0 %vm678_vm0, %v1958_v13  ;;  %v760_v16 = vsel %vm678_vm0, %v658_v15, 0  ;;  %2174 = vmatprep.subr.msk.bf16.mxu1 %vm678_vm0, %v658_v15  ;;  %v2293_v28 = vld [vmem:[%s2947_s2 + $0x6] sm:$0x3]  ;;  %v895_v13 = vsel %vm678_vm0, %v2284_v25, 0  ;;  %vm1733_vm3 = vcmask 1043456  }
   0xe   : > { %s2182_s20 = smul.u32 576, %s3025_s19  ;;  %2070 = vmatpush3.bf16.msra.mxu0 %v680_v14  ;;  %2080 = vmatpush3.bf16.msra.mxu1 %v760_v16  ;;  %v2372_v16 = vld [vmem:[%s2947_s2 + $0x8] sm:$0x3]  ;;  %s2014_s26 = sshll.u32 %s3025_s19, 6  ;;  %vm1873_vm4 = vcmask 130048  }
   0xf   : > { %2175 = vmatprep.subr.msk.bf16.mxu0 %vm678_vm0, %v2284_v25  ;;  %2176 = vmatprep.subr.msk.bf16.mxu1 %vm678_vm0, %v2293_v28  ;;  %s2920_s28 = scalar_lea.vmem %s2950_s5, %s2014_s26 }
  0x10   : > { %s2249_s23 = scalar_lea.vmem %s2946_s1, %s2182_s20  ;;  %s2331_s9 = scalar_lea.vmem %s2945_s0, %s2182_s20 }
  0x11   : > { %v317_v1 = vld [vmem:[%s2249_s23 + $0xb0] sm:$0xff]  ;;  %v318_v3 = vld [vmem:[%s2249_s23 + $0xc0] sm:$0xff]  ;;  %v300_v21 = vld [vmem:[%s2249_s23 + $0x18] sm:$0x1] }
  0x12   : > { %v315_v2 = vld [vmem:[%s2249_s23 + $0x90] sm:$0xff]  ;;  %450 = vperm.xlu1 %2193, %v317_v1   ;;  %v316_v4 = vld [vmem:[%s2249_s23 + $0xa0] sm:$0xff]  ;;  %v298_v22 = vld [vmem:[%s2249_s23 + $0x8] sm:$0x1] }
  0x13   : > { %440 = vperm.xlu0 %2192, %v315_v2   ;;  %v299_v5 = vld [vmem:[%s2249_s23 + $0x10] sm:$0xff]  ;;  %v297_v6 = vld [vmem:[%s2249_s23] sm:$0xff]  ;;  %v304_v23 = vld [vmem:[%s2249_s23 + $0x38] sm:$0x1] }
  0x14   : > { %v303_v7 = vld [vmem:[%s2249_s23 + $0x30] sm:$0xff]  ;;  %v301_v8 = vld [vmem:[%s2249_s23 + $0x20] sm:$0xff]  ;;  %v302_v24 = vld [vmem:[%s2249_s23 + $0x28] sm:$0x1] }
  0x15   : > { %v320_v9 = vld [vmem:[%s2249_s23 + $0xe0] sm:$0xff]  ;;  %v319_v10 = vld [vmem:[%s2249_s23 + $0xd0] sm:$0xff]  ;;  %v308_v31 = vld [vmem:[%s2249_s23 + $0x58] sm:$0x1] }
  0x16   : > { %455 = vperm.xlu1 %2193, %v318_v3   ;;  %v322_v11 = vld [vmem:[%s2249_s23 + $0x100] sm:$0xff]  ;;  %v321_v12 = vld [vmem:[%s2249_s23 + $0xf0] sm:$0xff]  ;;  %v306_v32 = vld [vmem:[%s2249_s23 + $0x48] sm:$0x1] }
  0x17   : > { %445 = vperm.xlu0 %2192, %v316_v4   ;;  %v307_v17 = vld [vmem:[%s2249_s23 + $0x50] sm:$0xff]  ;;  %v305_v18 = vld [vmem:[%s2249_s23 + $0x40] sm:$0xff]  ;;  %v312_v33 = vld [vmem:[%s2249_s23 + $0x78] sm:$0x1] }
  0x18   : > { %v311_v19 = vld [vmem:[%s2249_s23 + $0x70] sm:$0xff]  ;;  %v309_v20 = vld [vmem:[%s2249_s23 + $0x60] sm:$0xff]  ;;  %v310_v34 = vld [vmem:[%s2249_s23 + $0x68] sm:$0x1] }
  0x19   : > { %v326_v26 = vld [vmem:[%s2249_s23 + $0x130] sm:$0xff]  ;;  %v324_v27 = vld [vmem:[%s2249_s23 + $0x120] sm:$0xff]  ;;  %v327_v39 = vld [vmem:[%s2249_s23 + $0x138] sm:$0x1] }
  0x1a   : > { %360 = vperm.xlu1 %2193, %v299_v5   ;;  %v330_v29 = vld [vmem:[%s2249_s23 + $0x150] sm:$0xff]  ;;  %v328_v30 = vld [vmem:[%s2249_s23 + $0x140] sm:$0xff]  ;;  %v325_v40 = vld [vmem:[%s2249_s23 + $0x128] sm:$0x1] }
  0x1b   : > { %350 = vperm.xlu0 %2192, %v297_v6   ;;  %v334_v35 = vld [vmem:[%s2249_s23 + $0x170] sm:$0xff]  ;;  %v332_v36 = vld [vmem:[%s2249_s23 + $0x160] sm:$0xff]  ;;  %v331_v41 = vld [vmem:[%s2249_s23 + $0x158] sm:$0x1] }
  0x1c   : > { %v338_v37 = vld [vmem:[%s2249_s23 + $0x190] sm:$0xff]  ;;  %v336_v38 = vld [vmem:[%s2249_s23 + $0x180] sm:$0xff]  ;;  %v329_v42 = vld [vmem:[%s2249_s23 + $0x148] sm:$0x1] }
  0x1d   : > { %v341_v43 = vld [vmem:[%s2249_s23 + $0x1c0] sm:$0xff]  ;;  %v340_v44 = vld [vmem:[%s2249_s23 + $0x1b0] sm:$0xff]  ;;  %v335_v47 = vld [vmem:[%s2249_s23 + $0x178] sm:$0x1] }
  0x1e   : > { %380 = vperm.xlu1 %2193, %v303_v7   ;;  %v343_v45 = vld [vmem:[%s2249_s23 + $0x1e0] sm:$0xff]  ;;  %v342_v46 = vld [vmem:[%s2249_s23 + $0x1d0] sm:$0xff]  ;;  %v333_v48 = vld [vmem:[%s2249_s23 + $0x168] sm:$0x1] }
  0x1f   : > { %370 = vperm.xlu0 %2192, %v301_v8   ;;  %v339_v49 = vld [vmem:[%s2249_s23 + $0x198] sm:$0x1]  ;;  %v337_v50 = vld [vmem:[%s2249_s23 + $0x188] sm:$0x1]  ;;  %v345_v51 = vld [vmem:[%s2249_s23 + $0x200] sm:$0xff] }
  0x20   : > { %v344_v52 = vld [vmem:[%s2249_s23 + $0x1f0] sm:$0xff]  ;;  %v347_v53 = vld [vmem:[%s2249_s23 + $0x220] sm:$0xff]  ;;  %v314_v57 = vld [vmem:[%s2249_s23 + $0x88] sm:$0x1] }
  0x21   : > { %v346_v54 = vld [vmem:[%s2249_s23 + $0x210] sm:$0xff]  ;;  %v313_v56 = vld [vmem:[%s2249_s23 + $0x80] sm:$0xff] }
  0x22   : > { %465 = vperm.xlu1 %2193, %v320_v9   ;;  %v323_v55 = vld [vmem:[%s2249_s23 + $0x110] sm:$0xff]  ;;  %v2338_v62 = vld [vmem:[%s2331_s9 + $0xc0] sm:$0xff] }
  0x23   : > { %460 = vperm.xlu0 %2192, %v319_v10   ;;  %v2334_v60 = vld [vmem:[%s2331_s9 + $0xb0] sm:$0xff]  ;;  %v2341_v63 = vld [vmem:[%s2331_s9 + $0xa0] sm:$0xff] }
  0x24   : > { %v264_v61 = vld [vmem:[%s2331_s9 + $0x90] sm:$0xff]  ;;  %v246_v7 = vld [vmem:[%s2331_s9] sm:$0xff] }
  0x25   : > { %v2353_v6 = vld [vmem:[%s2331_s9 + $0x10] sm:$0xff] }
  0x26   : > { %475 = vperm.xlu1 %2193, %v322_v11   ;;  %v2396_v25 = vld [vmem:[%s2331_s9 + $0xd0] sm:$0xff] }
  0x27   : > { %470 = vperm.xlu0 %2192, %v321_v12   ;;  %2971 = vst [vmem:[#allocation3_spill] sm:$0xff] %v2396_v25 }
  0x2a   : > { %400 = vperm.xlu1 %2193, %v307_v17   ;;  %v2376_v17 = vld [vmem:[%s2331_s9 + $0x30] sm:$0xff] }
  0x2b   : > { %390 = vperm.xlu0 %2192, %v305_v18   ;;  %v2379_v18 = vld [vmem:[%s2331_s9 + $0x20] sm:$0xff] }
  0x2e   : > { %420 = vperm.xlu1 %2193, %v311_v19  }
  0x2f   : > { %410 = vperm.xlu0 %2192, %v309_v20  }
  0x32   : > { %365 = vperm.xlu1 %2193, %v300_v21  }
  0x33   : > { %355 = vperm.xlu0 %2192, %v298_v22  }
  0x36   : > { %385 = vperm.xlu1 %2193, %v304_v23  }
  0x37   : > { %375 = vperm.xlu0 %2192, %v302_v24   ;;  %v2393_v24 = vld [vmem:[%s2331_s9 + $0xe0] sm:$0xff] }
  0x38   : > { %2970 = vst [vmem:[#allocation2_spill] sm:$0xff] %v2393_v24 }
  0x3a   : > { %495 = vperm.xlu1 %2193, %v326_v26  }
  0x3b   : > { %485 = vperm.xlu0 %2192, %v324_v27  }
  0x3e   : > { %515 = vperm.xlu1 %2193, %v330_v29   ;;  %v989_v29 = vsel %vm678_vm0, %v2293_v28, 0  ;;  %v2420_v28 = vld [vmem:[%s2331_s9 + $0xf0] sm:$0xff] }
  0x3f   : > { %505 = vperm.xlu0 %2192, %v328_v30   ;;  %2973 = vst [vmem:[#allocation5_spill] sm:$0xff] %v2420_v28 }
  0x42   : > { %405 = vperm.xlu1 %2193, %v308_v31  }
  0x43   : > { %395 = vperm.xlu0 %2192, %v306_v32   ;;  %v2407_v32 = vld [vmem:[%s2947_s2 + $0xa] sm:$0x3] }
  0x46   : > { %425 = vperm.xlu1 %2193, %v312_v33  }
  0x47   : > { %415 = vperm.xlu0 %2192, %v310_v34  }
  0x4a   : > { %535 = vperm.xlu1 %2193, %v334_v35   ;;  %v2417_v35 = vld [vmem:[%s2331_s9 + $0x100] sm:$0xff] }
  0x4b   : > { %525 = vperm.xlu0 %2192, %v332_v36   ;;  %2972 = vst [vmem:[#allocation4_spill] sm:$0xff] %v2417_v35 }
  0x4e   : > { %555 = vperm.xlu1 %2193, %v338_v37   ;;  %v2588_v37 = vld [vmem:[%s2331_s9 + $0x160] sm:$0xff] }
  0x4f   : > { %545 = vperm.xlu0 %2192, %v336_v38  }
  0x52   : > { %500 = vperm.xlu1 %2193, %v327_v39  }
  0x53   : > { %490 = vperm.xlu0 %2192, %v325_v40  }
  0x56   : > { %520 = vperm.xlu1 %2193, %v331_v41  }
  0x57   : > { %510 = vperm.xlu0 %2192, %v329_v42   ;;  %v2436_v42 = vld [vmem:[%s2331_s9 + $0x50] sm:$0xff] }
  0x5a   : > { %570 = vperm.xlu1 %2193, %v341_v43   ;;  %v2439_v43 = vld [vmem:[%s2331_s9 + $0x40] sm:$0xff] }
  0x5b   : > { %565 = vperm.xlu0 %2192, %v340_v44  }
  0x5e   : > { %580 = vperm.xlu1 %2193, %v343_v45  }
  0x5f   : > { %575 = vperm.xlu0 %2192, %v342_v46  }
  0x62   : > { %540 = vperm.xlu1 %2193, %v335_v47  }
  0x63   : > { %530 = vperm.xlu0 %2192, %v333_v48  }
  0x66   : > { %560 = vperm.xlu1 %2193, %v339_v49  }
  0x67   : > { %550 = vperm.xlu0 %2192, %v337_v50   ;;  %v2453_v50 = vld [vmem:[%s2331_s9 + $0x70] sm:$0xff] }
  0x6a   : > { %590 = vperm.xlu1 %2193, %v345_v51   ;;  %v2456_v51 = vld [vmem:[%s2331_s9 + $0x60] sm:$0xff] }
  0x6b   : > { %585 = vperm.xlu0 %2192, %v344_v52  }
  0x6e   : > { %600 = vperm.xlu1 %2193, %v347_v53  }
  0x6f   : > { %595 = vperm.xlu0 %2192, %v346_v54  }
  0x72   : > { %480 = vperm.xlu1 %2193, %v323_v55  }
  0x73   : > { %430 = vperm.xlu0 %2192, %v313_v56  }
  0x77   : > { %435 = vperm.xlu0 %2192, %v314_v57  }
  0x8d   : > { %v451_v58 = vpop.permute.xlu1 %450 }
  0x8e   : > { %v441_v59 = vpop.permute.xlu0 %440  ;;  %v2344_v2 = vmul.f32 %v451_v58, %v2334_v60  ;;  %v2470_v58 = vld [vmem:[%s2331_s9 + $0x18] sm:$0x1] }
  0x8f   : > { %v621_v3 = vmul.f32 %v441_v59, %v264_v61  ;;  %v247_v59 = vld [vmem:[%s2331_s9 + $0x8] sm:$0x1] }
  0x91   : > { %v456_v0 = vpop.permute.xlu1 %455 }
  0x92   : > { %v446_v1 = vpop.permute.xlu0 %445  ;;  %v2347_v4 = vmul.f32 %v456_v0, %v2338_v62 }
  0x93   : > { %v2350_v5 = vmul.f32 %v446_v1, %v2341_v63 }
  0x94   : > { %v660_v8 = vpack.c.bf16 %v2347_v4, %v2344_v2 }
  0x95   : > { %v659_v10 = vpack.c.bf16 %v2350_v5, %v621_v3  ;;  %v361_v11 = vpop.permute.xlu1 %360 }
  0x96   : > { %v351_v12 = vpop.permute.xlu0 %350  ;;  %v2364_v14 = vmul.f32 %v361_v11, %v2353_v6  ;;  %v2483_v11 = vld [vmem:[%s2331_s9 + $0x28] sm:$0x1] }
  0x97   : > { %v2366_v15 = vmul.f32 %v351_v12, %v246_v7  ;;  %2071 = vmatprep.mubr.msk.bf16.mxu0 %vm665_vm1, %v659_v10  ;;  %v2480_v10 = vld [vmem:[%s2331_s9 + $0x38] sm:$0x1] }
  0x98   : > { %2072 = vmatmul.mubr.msk.bf16.vlgmr.msra.gmra.mxu0 %vm665_vm1, %v660_v8  ;;  %v847_v12 = vrot.slane %v2364_v14, 1 }
  0x99   : > { %v654_v19 = vpack.c.bf16 %v2364_v14, %v2366_v15  ;;  %2090 = vmatpush3.bf16.msra.mxu0 %v895_v13  ;;  %v381_v20 = vpop.permute.xlu1 %380  ;;  %v844_v13 = vrot.slane %v2366_v15, 1  ;;  %v2498_v15 = vld [vmem:[%s2331_s9 + $0x120] sm:$0xff] }
  0x9a   : > { %v371_v21 = vpop.permute.xlu0 %370  ;;  %2177 = vmatprep.subr.msk.bf16.mxu0 %vm678_vm0, %v2372_v16  ;;  %v2386_v22 = vmul.f32 %v381_v20, %v2376_v17 }
  0x9b   : > { %v2389_v23 = vmul.f32 %v371_v21, %v2379_v18  ;;  %2081 = vmatprep.mubr.msk.bf16.mxu1 %vm665_vm1, %v654_v19 }
  0x9d   : > { %v655_v26 = vpack.c.bf16 %v2386_v22, %v2389_v23  ;;  %v466_v30 = vpop.permute.xlu1 %465 }
  0x9e   : > { %v461_v31 = vpop.permute.xlu0 %460  ;;  %v2410_v33 = vmul.f32 %v466_v30, %v2393_v24  ;;  %v2647_v24 = vld [vmem:[%s2331_s9 + $0x1c0] sm:$0xff] }
  0x9f   : > { %v2413_v34 = vmul.f32 %v461_v31, %v2396_v25  ;;  %2082 = vmatmul.mubr.msk.bf16.vlgmr.msra.gmra.mxu1 %vm665_vm1, %v655_v26  ;;  %2985 = vst [vmem:[#allocation17_spill] sm:$0xff] %v2647_v24 }
  0xa0   : > { %2100 = vmatpush3.bf16.msra.mxu1 %v989_v29 }
  0xa1   : > { %v661_v36 = vpack.c.bf16 %v2410_v33, %v2413_v34  ;;  %2178 = vmatprep.subr.msk.bf16.mxu1 %vm678_vm0, %v2407_v32  ;;  %v476_v38 = vpop.permute.xlu1 %475 }
  0xa2   : > { %v471_v39 = vpop.permute.xlu0 %470  ;;  %v2429_v40 = vmul.f32 %v476_v38, %v2417_v35 }
  0xa3   : > { %v2432_v41 = vmul.f32 %v471_v39, %v2420_v28  ;;  %2075 = vmatprep.mubr.msk.bf16.mxu0 %vm665_vm1, %v661_v36  ;;  %v2495_v39 = vld [vmem:[%s2331_s9 + $0x130] sm:$0xff] }
  0xa5   : > { %v662_v44 = vpack.c.bf16 %v2429_v40, %v2432_v41  ;;  %v401_v46 = vpop.permute.xlu1 %400 }
  0xa6   : > { %v391_v47 = vpop.permute.xlu0 %390  ;;  %v2446_v48 = vmul.f32 %v401_v46, %v2436_v42  ;;  %v850_v46 = vrot.slane %v2389_v23, 1 }
  0xa7   : > { %v2449_v49 = vmul.f32 %v391_v47, %v2439_v43  ;;  %2076 = vmatmul.mubr.msk.bf16.gmra.mxu0 %vm665_vm1, %v662_v44  ;;  %v853_v44 = vrot.slane %v2386_v22, 1 }
  0xa9   : > { %v656_v52 = vpack.c.bf16 %v2446_v48, %v2449_v49  ;;  %v421_v54 = vpop.permute.xlu1 %420 }
  0xaa   : > { %v411_v55 = vpop.permute.xlu0 %410  ;;  %v2463_v56 = vmul.f32 %v421_v54, %v2453_v50 }
  0xab   : > { %v2466_v57 = vmul.f32 %v411_v55, %v2456_v51  ;;  %2085 = vmatprep.mubr.msk.bf16.mxu1 %vm665_vm1, %v656_v52 }
  0xac   : > { %2974 = vst [vmem:[#allocation6_spill] sm:$0xff] %v2463_v56 }
  0xad   : > { %v657_v61 = vpack.c.bf16 %v2463_v56, %v2466_v57  ;;  %v366_v1 = vpop.permute.xlu1 %365 }
  0xae   : > { %v356_v3 = vpop.permute.xlu0 %355  ;;  %v606_v7 = vmul.f32 %v366_v1, %v2470_v58 }
  0xaf   : > { %v604_v8 = vmul.f32 %v356_v3, %v247_v59  ;;  %2086 = vmatmul.mubr.msk.bf16.gmra.mxu1 %vm665_vm1, %v657_v61 }
  0xb0   : > { %v848_v19 = vrot.slane %v606_v7, 1 }
  0xb1   : > { %v845_v20 = vrot.slane %v604_v8, 1  ;;  %v386_v21 = vpop.permute.xlu1 %385 }
  0xb2   : > { %v376_v26 = vpop.permute.xlu0 %375  ;;  %v2488_v29 = vsel %vm843_vm2, %v847_v12, %v848_v19  ;;  %v610_v31 = vmul.f32 %v386_v21, %v2480_v10  ;;  %v2520_v12 = vld [vmem:[%s2331_s9 + $0x150] sm:$0xff]  ;;  %v1083_v19 = vsel %vm678_vm0, %v2372_v16, 0  ;;  %v2532_v21 = vld [vmem:[%s2947_s2 + $0xc] sm:$0x3]  ;;  %v2543_v16 = vld [vmem:[%s2331_s9 + $0x58] sm:$0x1] }
  0xb3   : > { %2975 = vst [vmem:[#allocation7_spill] sm:$0xff] %v2488_v29  ;;  %v846_v30 = vsel %vm843_vm2, %v844_v13, %v845_v20  ;;  %v608_v36 = vmul.f32 %v376_v26, %v2483_v11  ;;  %v2523_v13 = vld [vmem:[%s2331_s9 + $0x140] sm:$0xff] }
  0xb4   : > { %v876_v38 = vpack.c.bf16 %v2488_v29, %v846_v30  ;;  %v854_v47 = vrot.slane %v610_v31, 1 }
  0xb5   : > { %v851_v52 = vrot.slane %v608_v36, 1  ;;  %v496_v54 = vpop.permute.xlu1 %495 }
  0xb6   : > { %v486_v55 = vpop.permute.xlu0 %485  ;;  %2091 = vmatprep.mubr.msk.bf16.mxu0 %vm665_vm1, %v876_v38  ;;  %v2504_v59 = vsel %vm843_vm2, %v853_v44, %v854_v47  ;;  %v2510_v1 = vmul.f32 %v496_v54, %v2495_v39  ;;  %v2546_v38 = vld [vmem:[%s2331_s9 + $0x48] sm:$0x1]  ;;  %v2557_v54 = vld [vmem:[%s2947_s2 + $0xe] sm:$0x3] }
  0xb7   : > { %2976 = vst [vmem:[#allocation8_spill] sm:$0xff] %v2504_v59  ;;  %v2507_v61 = vsel %vm843_vm2, %v850_v46, %v851_v52  ;;  %v2513_v3 = vmul.f32 %v486_v55, %v2498_v15  ;;  %v1225_v46 = vsel %vm678_vm0, %v2407_v32, 0  ;;  %v859_v32 = vrot.slane %v2446_v48, 1 }
  0xb8   : > { %2977 = vst [vmem:[#allocation9_spill] sm:$0xff] %v2507_v61  ;;  %v877_v7 = vpack.c.bf16 %v2504_v59, %v2507_v61 }
  0xb9   : > { %v970_v20 = vpack.c.bf16 %v2510_v1, %v2513_v3  ;;  %v516_v26 = vpop.permute.xlu1 %515  ;;  %v1174_v28 = vrot.slane %v2513_v3, 1 }
  0xba   : > { %v506_v30 = vpop.permute.xlu0 %505  ;;  %2092 = vmatmul.mubr.msk.bf16.vlgmr.msra.gmra.mxu0 %vm665_vm1, %v877_v7  ;;  %v2536_v31 = vmul.f32 %v516_v26, %v2520_v12  ;;  %v856_v26 = vrot.slane %v2449_v49, 1 }
  0xbb   : > { %v2539_v36 = vmul.f32 %v506_v30, %v2523_v13  ;;  %2101 = vmatprep.mubr.msk.bf16.mxu1 %vm665_vm1, %v970_v20  ;;  %2110 = vmatpush3.bf16.msra.mxu0 %v1083_v19  ;;  %v2563_v19 = vld [vmem:[%s2331_s9 + $0x78] sm:$0x1]  ;;  %v2566_v20 = vld [vmem:[%s2331_s9 + $0x68] sm:$0x1] }
  0xbc   : > { %2179 = vmatprep.subr.msk.bf16.mxu0 %vm678_vm0, %v2532_v21 }
  0xbd   : > { %v971_v44 = vpack.c.bf16 %v2536_v31, %v2539_v36  ;;  %v406_v47 = vpop.permute.xlu1 %405  ;;  %v1180_v3 = vrot.slane %v2539_v36, 1  ;;  %v2663_v36 = vld [vmem:[%s2331_s9 + $0x1d0] sm:$0xff] }
  0xbe   : > { %v396_v52 = vpop.permute.xlu0 %395  ;;  %v614_v55 = vmul.f32 %v406_v47, %v2543_v16  ;;  %2987 = vst [vmem:[#allocation19_spill] sm:$0xff] %v2663_v36 }
  0xbf   : > { %v612_v7 = vmul.f32 %v396_v52, %v2546_v38  ;;  %2102 = vmatmul.mubr.msk.bf16.vlgmr.msra.gmra.mxu1 %vm665_vm1, %v971_v44 }
  0xc0   : > { %2120 = vmatpush3.bf16.msra.mxu1 %v1225_v46  ;;  %v860_v30 = vrot.slane %v614_v55, 1 }
  0xc1   : > { %v857_v8 = vrot.slane %v612_v7, 1  ;;  %2180 = vmatprep.subr.msk.bf16.mxu1 %vm678_vm0, %v2557_v54  ;;  %v426_v47 = vpop.permute.xlu1 %425  ;;  %v2585_v7 = vld [vmem:[%s2331_s9 + $0x170] sm:$0xff] }
  0xc2   : > { %v416_v52 = vpop.permute.xlu0 %415  ;;  %v2573_v44 = vsel %vm843_vm2, %v859_v32, %v860_v30  ;;  %v618_v53 = vmul.f32 %v426_v47, %v2563_v19  ;;  %2980 = vst [vmem:[#allocation12_spill] sm:$0xff] %v2585_v7  ;;  %v865_v32 = vrot.slane %v2463_v56, 1 }
  0xc3   : > { %2978 = vst [vmem:[#allocation10_spill] sm:$0xff] %v2573_v44  ;;  %v2576_v0 = vsel %vm843_vm2, %v856_v26, %v857_v8  ;;  %v616_v46 = vmul.f32 %v416_v52, %v2566_v20  ;;  %v862_v8 = vrot.slane %v2466_v57, 1 }
  0xc4   : > { %2979 = vst [vmem:[#allocation11_spill] sm:$0xff] %v2576_v0  ;;  %v878_v45 = vpack.c.bf16 %v2573_v44, %v2576_v0  ;;  %v866_v26 = vrot.slane %v618_v53, 1  ;;  %v2611_v0 = vld [vmem:[%s2331_s9 + $0x180] sm:$0xff] }
  0xc5   : > { %v863_v30 = vrot.slane %v616_v46, 1  ;;  %v536_v47 = vpop.permute.xlu1 %535  ;;  %v2608_v46 = vld [vmem:[%s2331_s9 + $0x190] sm:$0xff]  ;;  %2984 = vst [vmem:[#allocation16_spill] sm:$0xff] %v2611_v0 }
  0xc6   : > { %v526_v52 = vpop.permute.xlu0 %525  ;;  %2095 = vmatprep.mubr.msk.bf16.mxu0 %vm665_vm1, %v878_v45  ;;  %v2594_v27 = vsel %vm843_vm2, %v865_v32, %v866_v26  ;;  %v2600_v9 = vmul.f32 %v536_v47, %v2585_v7  ;;  %2983 = vst [vmem:[#allocation15_spill] sm:$0xff] %v2608_v46  ;;  %v2624_v47 = vld [vmem:[%s2331_s9 + $0x138] sm:$0x1] }
  0xc7   : > { %2981 = vst [vmem:[#allocation13_spill] sm:$0xff] %v2594_v27  ;;  %v2597_v55 = vsel %vm843_vm2, %v862_v8, %v863_v30  ;;  %v2603_v59 = vmul.f32 %v526_v52, %v2588_v37  ;;  %v2627_v52 = vld [vmem:[%s2331_s9 + $0x128] sm:$0x1] }
  0xc8   : > { %2982 = vst [vmem:[#allocation14_spill] sm:$0xff] %v2597_v55  ;;  %v879_v53 = vpack.c.bf16 %v2594_v27, %v2597_v55 }
  0xc9   : > { %v972_v45 = vpack.c.bf16 %v2600_v9, %v2603_v59  ;;  %v556_v32 = vpop.permute.xlu1 %555 }
  0xca   : > { %v546_v8 = vpop.permute.xlu0 %545  ;;  %2096 = vmatmul.mubr.msk.bf16.gmra.mxu0 %vm665_vm1, %v879_v53  ;;  %v2617_v26 = vmul.f32 %v556_v32, %v2608_v46  ;;  %v2635_v32 = vld [vmem:[%s2331_s9 + $0x158] sm:$0x1] }
  0xcb   : > { %v2620_v30 = vmul.f32 %v546_v8, %v2611_v0  ;;  %2105 = vmatprep.mubr.msk.bf16.mxu1 %vm665_vm1, %v972_v45  ;;  %v2638_v45 = vld [vmem:[%s2331_s9 + $0x148] sm:$0x1]  ;;  %v1177_v8 = vrot.slane %v2510_v1, 1  ;;  %v2650_v1 = vld [vmem:[%s2331_s9 + $0x1b0] sm:$0xff] }
  0xcd   : > { %v973_v27 = vpack.c.bf16 %v2617_v26, %v2620_v30  ;;  %v501_v55 = vpop.permute.xlu1 %500 }
  0xce   : > { %v491_v44 = vpop.permute.xlu0 %490  ;;  %v633_v35 = vmul.f32 %v501_v55, %v2624_v47 }
  0xcf   : > { %v631_v53 = vmul.f32 %v491_v44, %v2627_v52  ;;  %2106 = vmatmul.mubr.msk.bf16.gmra.mxu1 %vm665_vm1, %v973_v27 }
  0xd0   : > { %v1178_v29 = vrot.slane %v633_v35, 1  ;;  %v1183_v35 = vrot.slane %v2536_v31, 1  ;;  %v2660_v31 = vld [vmem:[%s2331_s9 + $0x1e0] sm:$0xff] }
  0xd1   : > { %v1175_v61 = vrot.slane %v631_v53, 1  ;;  %v521_v56 = vpop.permute.xlu1 %520  ;;  %2986 = vst [vmem:[#allocation18_spill] sm:$0xff] %v2660_v31 }
  0xd2   : > { %v511_v46 = vpop.permute.xlu0 %510  ;;  %v1179_v55 = vsel %vm843_vm2, %v1177_v8, %v1178_v29  ;;  %v637_v44 = vmul.f32 %v521_v56, %v2635_v32 }
  0xd3   : > { %v1176_v0 = vsel %vm843_vm2, %v1174_v28, %v1175_v61  ;;  %v635_v27 = vmul.f32 %v511_v46, %v2638_v45 }
  0xd4   : > { %v1206_v25 = vpack.c.bf16 %v1179_v55, %v1176_v0  ;;  %v1184_v53 = vrot.slane %v637_v44, 1  ;;  %v1413_v55 = vsel %vm678_vm0, %v2557_v54, 0  ;;  %v2677_v54 = vld [vmem:[%s2331_s9 + $0x178] sm:$0x1] }
  0xd5   : > { %v1181_v7 = vrot.slane %v635_v27, 1  ;;  %v571_v29 = vpop.permute.xlu1 %570  ;;  %2988 = vst [vmem:[#allocation20_spill] sm:$0xff] %v2677_v54 }
  0xd6   : > { %v566_v8 = vpop.permute.xlu0 %565  ;;  %2121 = vmatprep.mubr.msk.bf16.mxu1 %vm665_vm1, %v1206_v25  ;;  %v1185_v28 = vsel %vm843_vm2, %v1183_v35, %v1184_v53  ;;  %v647_v0 = vmul.f32 %v571_v29, %v2647_v24  ;;  %v2670_v25 = vld [vmem:[%s2948_s3] sm:$0xf]  ;;  %v2680_v53 = vld [vmem:[%s2331_s9 + $0x168] sm:$0x1] }
  0xd7   : > { %v1182_v56 = vsel %vm843_vm2, %v1180_v3, %v1181_v7  ;;  %v646_v61 = vmul.f32 %v566_v8, %v2650_v1  ;;  %v1319_v8 = vsel %vm678_vm0, %v2532_v21, 0  ;;  %v1189_v21 = vrot.slane %v2600_v9, 1  ;;  %v2709_v9 = vld [vmem:[%s2331_s9 + $0x200] sm:$0xff] }
  0xd8   : > { %v1207_v46 = vpack.c.bf16 %v1185_v28, %v1182_v56 }
  0xd9   : > { %v1064_v44 = vpack.c.bf16 %v647_v0, %v646_v61  ;;  %v581_v7 = vpop.permute.xlu1 %580  ;;  %v2689_v0 = vld [vmem:[%s2947_s2 + $0x10] sm:$0x3] }
  0xda   : > { %v576_v27 = vpop.permute.xlu0 %575  ;;  %2122 = vmatmul.mubr.msk.bf16.vlgmr.msra.gmra.mxu1 %vm665_vm1, %v1207_v46  ;;  %v649_v35 = vmul.f32 %v581_v7, %v2660_v31  ;;  %v1186_v7 = vrot.slane %v2603_v59, 1  ;;  %v2712_v59 = vld [vmem:[%s2331_s9 + $0x1f0] sm:$0xff] }
  0xdb   : > { %v648_v3 = vmul.f32 %v576_v27, %v2663_v36  ;;  %2111 = vmatprep.mubr.msk.bf16.mxu0 %vm665_vm1, %v1064_v44  ;;  %2140 = vmatpush3.bf16.msra.mxu1 %v1413_v55  ;;  %v2695_v55 = vld [vmem:[%s2331_s9 + $0x198] sm:$0x1]  ;;  %v2698_v44 = vld [vmem:[%s2331_s9 + $0x188] sm:$0x1] }
  0xdc   : > { %2159 = vmatprep.subr.msk.mxu1 %vm1733_vm3, %v2670_v25 }
  0xdd   : > { %v1065_v29 = vpack.c.bf16 %v649_v35, %v648_v3  ;;  %v541_v28 = vpop.permute.xlu1 %540 }
  0xde   : > { %v531_v56 = vpop.permute.xlu0 %530  ;;  %v641_v61 = vmul.f32 %v541_v28, %v2677_v54 }
  0xdf   : > { %v639_v46 = vmul.f32 %v531_v56, %v2680_v53  ;;  %2112 = vmatmul.mubr.msk.bf16.vlgmr.msra.gmra.mxu0 %vm665_vm1, %v1065_v29 }
  0xe0   : > { %2130 = vmatpush3.bf16.msra.mxu0 %v1319_v8  ;;  %v1190_v27 = vrot.slane %v641_v61, 1  ;;  %v1195_v61 = vrot.slane %v2617_v26, 1  ;;  %v2725_v26 = vld [vmem:[%s2331_s9 + $0x210] sm:$0xff] }
  0xe1   : > { %v1187_v35 = vrot.slane %v639_v46, 1  ;;  %2181 = vmatprep.subr.msk.bf16.mxu0 %vm678_vm0, %v2689_v0  ;;  %v561_v3 = vpop.permute.xlu1 %560  ;;  %v1192_v46 = vrot.slane %v2620_v30, 1 }
  0xe2   : > { %v551_v28 = vpop.permute.xlu0 %550  ;;  %v1191_v29 = vsel %vm843_vm2, %v1189_v21, %v1190_v27  ;;  %v645_v31 = vmul.f32 %v561_v3, %v2695_v55 }
  0xe3   : > { %v1188_v56 = vsel %vm843_vm2, %v1186_v7, %v1187_v35  ;;  %v643_v54 = vmul.f32 %v551_v28, %v2698_v44 }
  0xe4   : > { %v1208_v8 = vpack.c.bf16 %v1191_v29, %v1188_v56  ;;  %v1196_v36 = vrot.slane %v645_v31, 1  ;;  %v2722_v56 = vld [vmem:[%s2331_s9 + $0x220] sm:$0xff] }
  0xe5   : > { %v1193_v24 = vrot.slane %v643_v54, 1  ;;  %v591_v21 = vpop.permute.xlu1 %590 }
  0xe6   : > { %v586_v27 = vpop.permute.xlu0 %585  ;;  %2125 = vmatprep.mubr.msk.bf16.mxu1 %vm665_vm1, %v1208_v8  ;;  %v1197_v7 = vsel %vm843_vm2, %v1195_v61, %v1196_v36  ;;  %v651_v3 = vmul.f32 %v591_v21, %v2709_v9  ;;  %v1660_v8 = vrot.slane %v2353_v6, 1  ;;  %v1661_v36 = vrot.slane %v2470_v58, 1 }
  0xe7   : > { %v1194_v35 = vsel %vm843_vm2, %v1192_v46, %v1193_v24  ;;  %v650_v28 = vmul.f32 %v586_v27, %v2712_v59  ;;  %v2989_v46 = vpack.c.bf16 %v2344_v2, %v2350_v5  ;;  %v1604_v21 = vrot.slane %v2498_v15, 1 }
  0xe8   : > { %v1209_v29 = vpack.c.bf16 %v1197_v7, %v1194_v35  ;;  %v1605_v27 = vrot.slane %v2627_v52, 1  ;;  %v1666_v6 = vrot.slane %v2376_v17, 1  ;;  %v1663_v58 = vrot.slane %v2379_v18, 1  ;;  %v2751_v52 = vld [vmem:[%s2331_s9 + $0x110] sm:$0xff] }
  0xe9   : > { %v1066_v30 = vpack.c.bf16 %v651_v3, %v650_v28  ;;  %v601_v31 = vpop.permute.xlu1 %600  ;;  %v1667_v35 = vrot.slane %v2480_v10, 1  ;;  %v1664_v3 = vrot.slane %v2483_v11, 1  ;;  %v1662_v28 = vsel %vm843_vm2, %v1660_v8, %v1661_v36 }
  0xea   : > { %v596_v54 = vpop.permute.xlu0 %595  ;;  %2126 = vmatmul.mubr.msk.bf16.gmra.mxu1 %vm665_vm1, %v1209_v29  ;;  %v653_v24 = vmul.f32 %v601_v31, %v2722_v56  ;;  %v1606_v2 = vsel %vm843_vm2, %v1604_v21, %v1605_v27  ;;  %v2990_v5 = vpack.c.bf16 %v2389_v23, %v2364_v14  ;;  %v1692_v17 = vmax.f32 %v2341_v63, %v1662_v28 }
  0xeb   : > { %v652_v61 = vmul.f32 %v596_v54, %v2725_v26  ;;  %2115 = vmatprep.mubr.msk.bf16.mxu0 %vm665_vm1, %v1066_v30  ;;  %2141 = vmatprep.mubr.msk.bf16.mxu1 %vm665_vm1, %v2989_v46  ;;  %v1668_v18 = vsel %vm843_vm2, %v1666_v6, %v1667_v35  ;;  %v1665_v10 = vsel %vm843_vm2, %v1663_v58, %v1664_v3  ;;  %v1607_v11 = vrot.slane %v2495_v39, 1  ;;  %v262_v54 = vld [vmem:[%s2331_s9 + $0x80] sm:$0xff]  ;;  %v3001_v58 = vld [vmem:[#allocation16_spill] sm:$0xff] }
  0xec   : > { %v2991_v29 = vpack.c.bf16 %v2413_v34, %v2347_v4  ;;  %v1610_v14 = vrot.slane %v2523_v13, 1  ;;  %v1608_v23 = vrot.slane %v2624_v47, 1  ;;  %v1611_v30 = vrot.slane %v2638_v45, 1 }
  0xed   : > { %v1067_v7 = vpack.c.bf16 %v653_v24, %v652_v61  ;;  %v481_v15 = vpop.permute.xlu1 %480  ;;  %v1636_v63 = vmax.f32 %v2650_v1, %v1606_v2  ;;  %v2992_v31 = vpack.c.bf16 %v2432_v41, %v2410_v33  ;;  %v1672_v4 = vrot.slane %v2436_v42, 1  ;;  %v2995_v61 = vld [vmem:[#allocation12_spill] sm:$0xff] }
  0xee   : > { %v1673_v34 = vrot.slane %v2543_v16, 1  ;;  %v629_v39 = vmul.f32 %v481_v15, %v2751_v52  ;;  %v1669_v13 = vrot.slane %v2439_v43, 1  ;;  %v1678_v47 = vrot.slane %v2453_v50, 1  ;;  %v431_v16 = vpop.permute.xlu0 %430  ;;  %v3002_v15 = vld [vmem:[#allocation15_spill] sm:$0xff] }
  0xef   : > { %2116 = vmatmul.mubr.msk.bf16.gmra.mxu0 %vm665_vm1, %v1067_v7  ;;  %v1670_v45 = vrot.slane %v2546_v38, 1  ;;  %v1513_v33 = vsel %vm678_vm0, %v2689_v0, 0  ;;  %v1675_v41 = vrot.slane %v2456_v51, 1  ;;  %v1694_v1 = vmax.f32 %v2338_v62, %v1668_v18  ;;  %v3003_v18 = vld [vmem:[#allocation6_spill] sm:$0xff] }
  0xf0   : > { %2131 = vmatprep.mubr.msk.bf16.mxu0 %vm665_vm1, %v2990_v5  ;;  %v1613_v42 = vrot.slane %v2520_v12, 1  ;;  %v1614_v8 = vrot.slane %v2635_v32, 1  ;;  %v1609_v43 = vsel %vm843_vm2, %v1607_v11, %v1608_v23  ;;  %v1700_v50 = vmax.f32 %v1636_v63, %v1692_v17  ;;  %v263_v63 = vld [vmem:[%s2331_s9 + $0x88] sm:$0x1] }
  0xf1   : > { %v1612_v38 = vsel %vm843_vm2, %v1610_v14, %v1611_v30  ;;  %v2993_v0 = vpack.c.bf16 %v2449_v49, %v2386_v22  ;;  %v1674_v62 = vsel %vm843_vm2, %v1672_v4, %v1673_v34  ;;  %v1617_v51 = vrot.slane %v2680_v53, 1  ;;  %v2997_v53 = vld [vmem:[#allocation19_spill] sm:$0xff] }
  0xf2   : > { %2142 = vmatmul.mubr.msk.bf16.vlgmr.msra.gmra.mxu1 %vm665_vm1, %v2991_v29  ;;  %v1397_v12 = vpack.c.bf16 %v629_v39, %v2429_v40  ;;  %v2994_v32 = vpack.c.bf16 %v2466_v57, %v2446_v48  ;;  %v1671_v36 = vsel %vm843_vm2, %v1669_v13, %v1670_v45  ;;  %v1679_v22 = vrot.slane %v2563_v19, 1  ;;  %v2998_v40 = vld [vmem:[#allocation20_spill] sm:$0xff]  ;;  %v2999_v48 = vld [vmem:[#allocation2_spill] sm:$0xff]  ;;  %v3000_v19 = vld [vmem:[#allocation3_spill] sm:$0xff]  ;;  %v436_v34 = vpop.permute.xlu0 %435 }
  0xf3   : > { %2145 = vmatprep.mubr.msk.bf16.mxu1 %vm665_vm1, %v2992_v31  ;;  %2160 = vmatpush3.msk.msra.mxu1 %vm1733_vm3, %v2670_v25  ;;  %v1693_v25 = vmax.f32 %v2334_v60, %v1665_v10  ;;  %v1616_v60 = vrot.slane %v2588_v37, 1  ;;  %v1676_v49 = vrot.slane %v2566_v20, 1  ;;  %v619_v24 = vmul.f32 %v431_v16, %v262_v54  ;;  %v2996_v37 = vld [vmem:[#allocation17_spill] sm:$0xff]  ;;  %v3004_v29 = vld [vmem:[#allocation18_spill] sm:$0xff]  ;;  %v3006_v45 = vld [vmem:[#allocation7_spill] sm:$0xff] }
  0xf4   : > { %v1619_v46 = vrot.slane %v2995_v61, 1  ;;  %v1637_v21 = vmax.f32 %v2996_v37, %v1609_v43  ;;  %v1638_v27 = vmax.f32 %v2997_v53, %v1612_v38  ;;  %v1620_v7 = vrot.slane %v2998_v40, 1 }
  0xf5   : > { %v1696_v57 = vmax.f32 %v2999_v48, %v1674_v62  ;;  %v1615_v6 = vsel %vm843_vm2, %v1613_v42, %v1614_v8  ;;  %v1695_v20 = vmax.f32 %v3000_v19, %v1671_v36  ;;  %v1622_v35 = vrot.slane %v3001_v58, 1  ;;  %v3009_v42 = vld [vmem:[#allocation4_spill] sm:$0xff]  ;;  %v3011_v62 = vld [vmem:[#allocation14_spill] sm:$0xff]  ;;  %v3012_v36 = vld [vmem:[#allocation11_spill] sm:$0xff] }
  0xf6   : > { %v1623_v3 = vrot.slane %v2698_v44, 1  ;;  %v1618_v28 = vsel %vm843_vm2, %v1616_v60, %v1617_v51  ;;  %v1680_v2 = vsel %vm843_vm2, %v1678_v47, %v1679_v22  ;;  %v1677_v5 = vsel %vm843_vm2, %v1675_v41, %v1676_v49  ;;  %v3005_v47 = vld [vmem:[#allocation9_spill] sm:$0xff]  ;;  %v3013_v22 = vld [vmem:[#allocation8_spill] sm:$0xff] }
  0xf7   : > { %2132 = vmatmul.mubr.msk.bf16.vlgmr.msra.gmra.mxu0 %vm665_vm1, %v2993_v0  ;;  %v1625_v17 = vrot.slane %v3002_v15, 1  ;;  %v1303_v10 = vpack.c.bf16 %v619_v24, %v3003_v18  ;;  %v1701_v11 = vmax.f32 %v1637_v21, %v1693_v25  ;;  %v1639_v14 = vmax.f32 %v3004_v29, %v1615_v6  ;;  %v3008_v41 = vld [vmem:[#allocation5_spill] sm:$0xff]  ;;  %v3010_v0 = vld [vmem:[#allocation10_spill] sm:$0xff] }
  0xf8   : > { %2150 = vmatpush3.bf16.msra.mxu0 %v1513_v33  ;;  %2135 = vmatprep.mubr.msk.bf16.mxu0 %vm665_vm1, %v2994_v32  ;;  %v1702_v23 = vmax.f32 %v1638_v27, %v1694_v1  ;;  %v1621_v30 = vsel %vm843_vm2, %v1619_v46, %v1620_v7  ;;  %v1626_v31 = vrot.slane %v2695_v55, 1  ;;  %v1640_v44 = vmax.f32 %v2712_v59, %v1618_v28 }
  0xf9   : > { %v1681_v4 = vrot.slane %v262_v54, 1  ;;  %v1682_v39 = vrot.slane %v263_v63, 1  ;;  %v1624_v13 = vsel %vm843_vm2, %v1622_v35, %v1623_v3  ;;  %v3007_v33 = vpack.c.bf16 %v3005_v47, %v3006_v45 }
  0xfa   : > { %2146 = vmatmul.mubr.msk.bf16.gmra.mxu1 %vm665_vm1, %v1397_v12  ;;  %v1697_v1 = vmax.f32 %v3008_v41, %v1677_v5  ;;  %v1641_v25 = vmax.f32 %v2709_v9, %v1621_v30  ;;  %v1698_v55 = vmax.f32 %v3009_v42, %v1680_v2  ;;  %v1703_v16 = vmax.f32 %v1639_v14, %v1695_v20 }
  0xfb   : > { %2161 = vmatprep.mubr.msk.f32.mxu1 %vm665_vm1, %v1700_v50  ;;  %v620_v59 = vmul.f32 %v436_v34, %v263_v63  ;;  %v1704_v54 = vmax.f32 %v1640_v44, %v1696_v57  ;;  %v1627_v8 = vsel %vm843_vm2, %v1625_v17, %v1626_v31  ;;  %v1642_v43 = vmax.f32 %v2725_v26, %v1624_v13 }
  0xfc   : > { %v1683_v50 = vsel %vm843_vm2, %v1681_v4, %v1682_v39  ;;  %v1705_v38 = vmax.f32 %v1641_v25, %v1697_v1  ;;  %v1496_v60 = vpack.c.bf16 %v3011_v62, %v3010_v0  ;;  %v1643_v9 = vmax.f32 %v2722_v56, %v1627_v8 }
  0xfd   : > { %v1491_v51 = vrot.slane %v620_v59, 1  ;;  %v1699_v12 = vmax.f32 %v2751_v52, %v1683_v50  ;;  %v1706_v32 = vmax.f32 %v1642_v43, %v1698_v55  ;;  %v3014_v49 = vpack.c.bf16 %v3012_v36, %v3013_v22  ;;  %v3015_v52 = vld [vmem:[#allocation13_spill] sm:$0xff] }
  0xfe   : > { %v1490_v26 = vrot.slane %v619_v24, 1 }
  0xff   : > { %2136 = vmatmul.mubr.msk.bf16.gmra.mxu0 %vm665_vm1, %v1303_v10  ;;  %v1707_v56 = vmax.f32 %v1643_v9, %v1699_v12 }
 0x100   : > { %2151 = vmatprep.mubr.msk.bf16.mxu0 %vm665_vm1, %v3007_v33  ;;  %v1492_v61 = vsel %vm843_vm2, %v1490_v26, %v1491_v51 }
 0x101   : > { %v1497_v46 = vpack.c.bf16 %v1492_v61, %v3015_v52 }
 0x102   : > { %2162 = vmatmul.mubr.msk.f32.vlgmr.msra.gmra.mxu1 %vm665_vm1, %v1701_v11 }
 0x103   : > { %2164 = vmatprep.mubr.msk.f32.mxu1 %vm665_vm1, %v1702_v23 }
 0x106   : > { %2165 = vmatmul.mubr.msk.f32.gmra.mxu1 %vm665_vm1, %v1703_v16 }
 0x107   : > { %2152 = vmatmul.mubr.msk.bf16.vlgmr.msra.gmra.mxu0 %vm665_vm1, %v3014_v49  ;;  %2167 = vmatprep.mubr.msk.f32.mxu1 %vm665_vm1, %v1704_v54 }
 0x108   : > { %2155 = vmatprep.mubr.msk.bf16.mxu0 %vm665_vm1, %v1496_v60 }
 0x10a   : > { %2168 = vmatmul.mubr.msk.f32.gmra.mxu1 %vm665_vm1, %v1705_v38 }
 0x10b   : > { %2170 = vmatprep.mubr.msk.f32.mxu1 %vm665_vm1, %v1706_v32 }
 0x10e   : > { %2171 = vmatmul.mubr.msk.f32.gmra.mxu1 %vm665_vm1, %v1707_v56 }
 0x10f   : > { %2156 = vmatmul.mubr.msk.bf16.gmra.mxu0 %vm665_vm1, %v1497_v46 }
 0x158   : > { %v2073_v21 = vpop.f32.mrf.mxu0 }
 0x15a   : > { %v716_v27 = vpop.f32.mrf.mxu0 }
 0x15c   : > { %v2074_v40 = vpop.f32.mrf.mxu0 }
 0x15e   : > { %v719_v57 = vpop.f32.mrf.mxu0 }
 0x15f   : > { %v2083_v37 = vpop.f32.mrf.mxu1 }
 0x160   : > { %v805_v62 = vadd.f32 %v2083_v37, %v2073_v21 }
 0x161   : > { %v796_v53 = vpop.f32.mrf.mxu1 }
 0x162   : > { %v797_v51 = vadd.f32 %v796_v53, %v716_v27 }
 0x163   : > { %v2084_v24 = vpop.f32.mrf.mxu1 }
 0x164   : > { %v808_v22 = vadd.f32 %v2084_v24, %v2074_v40 }
 0x165   : > { %v799_v7 = vpop.f32.mrf.mxu1 }
 0x166   : > { %v800_v52 = vadd.f32 %v799_v7, %v719_v57 }
 0x167   : > { %v2077_v6 = vpop.f32.mrf.mxu0 }
 0x169   : > { %v732_v20 = vpop.f32.mrf.mxu0 }
 0x16b   : > { %v2858_v35 = vpop.f32.mrf.mxu0 }
 0x16d   : > { %v2862_v2 = vpop.f32.mrf.mxu0 }
 0x16f   : > { %v2087_v48 = vpop.f32.mrf.mxu1 }
 0x170   : > { %v821_v37 = vadd.f32 %v2087_v48, %v2077_v6 }
 0x171   : > { %v2854_v19 = vpop.f32.mrf.mxu1 }
 0x172   : > { %v813_v24 = vadd.f32 %v2854_v19, %v732_v20 }
 0x173   : > { %v2856_v58 = vpop.f32.mrf.mxu1 }
 0x174   : > { %v824_v57 = vadd.f32 %v2856_v58, %v2858_v35 }
 0x175   : > { %v2860_v3 = vpop.f32.mrf.mxu1 }
 0x176   : > { %v816_v19 = vadd.f32 %v2860_v3, %v2862_v2 }
 0x17a   : > { %v2093_v5 = vpop.f32.mrf.mxu0 }
 0x17b   : > { %v964_v12 = vadd.f32 %v2093_v5, %v805_v62 }
 0x17c   : > { %v931_v17 = vpop.f32.mrf.mxu0 }
 0x17d   : > { %v962_v49 = vadd.f32 %v931_v17, %v797_v51 }
 0x17e   : > { %v2094_v10 = vpop.f32.mrf.mxu0 }
 0x17f   : > { %v2103_v28 = vpop.f32.mrf.mxu1  ;;  %v965_v46 = vadd.f32 %v2094_v10, %v808_v22 }
 0x180   : > { %v934_v14 = vpop.f32.mrf.mxu0  ;;  %v1058_v26 = vadd.f32 %v2103_v28, %v964_v12 }
 0x181   : > { %v1025_v15 = vpop.f32.mrf.mxu1 }
 0x183   : > { %v2104_v18 = vpop.f32.mrf.mxu1 }
 0x184   : > { %v1059_v53 = vadd.f32 %v2104_v18, %v965_v46 }
 0x185   : > { %v1028_v11 = vpop.f32.mrf.mxu1 }
 0x18a   : > { %v2097_v30 = vpop.f32.mrf.mxu0 }
 0x18b   : > { %v968_v40 = vadd.f32 %v2097_v30, %v821_v37 }
 0x18c   : > { %v947_v31 = vpop.f32.mrf.mxu0 }
 0x18e   : > { %v2098_v4 = vpop.f32.mrf.mxu0 }
 0x18f   : > { %v2107_v29 = vpop.f32.mrf.mxu1  ;;  %v969_v20 = vadd.f32 %v2098_v4, %v824_v57 }
 0x190   : > { %v2870_v39 = vpop.f32.mrf.mxu0  ;;  %v1062_v48 = vadd.f32 %v2107_v29, %v968_v40 }
 0x191   : > { %v2864_v23 = vpop.f32.mrf.mxu1  ;;  %v967_v58 = vadd.f32 %v2870_v39, %v816_v19 }
 0x193   : > { %v2866_v63 = vpop.f32.mrf.mxu1 }
 0x194   : > { %v1063_v35 = vadd.f32 %v2866_v63, %v969_v20 }
 0x195   : > { %v2868_v44 = vpop.f32.mrf.mxu1 }
 0x196   : > { %v1061_v2 = vadd.f32 %v2868_v44, %v967_v58 }
 0x19a   : > { %v2123_v34 = vpop.f32.mrf.mxu1 }
 0x19c   : > { %v1261_v13 = vpop.f32.mrf.mxu1 }
 0x19e   : > { %v2124_v45 = vpop.f32.mrf.mxu1 }
 0x19f   : > { %v2113_v47 = vpop.f32.mrf.mxu0 }
 0x1a0   : > { %v2872_v41 = vpop.f32.mrf.mxu1 }
 0x1a1   : > { %v1119_v33 = vpop.f32.mrf.mxu0 }
 0x1a3   : > { %v2114_v1 = vpop.f32.mrf.mxu0 }
 0x1a4   : > { %v1153_v62 = vadd.f32 %v2114_v1, %v1059_v53 }
 0x1a5   : > { %v1122_v55 = vpop.f32.mrf.mxu0 }
 0x1a6   : > { %v1295_v1 = vadd.f32 %v2124_v45, %v1153_v62 }
 0x1aa   : > { %v2874_v25 = vpop.f32.mrf.mxu1 }
 0x1ac   : > { %v2876_v42 = vpop.f32.mrf.mxu1 }
 0x1ad   : > { %3016 = vst [vmem:[#allocation12_spill] sm:$0xff] %v2876_v42 }
 0x1ae   : > { %v2878_v16 = vpop.f32.mrf.mxu1 }
 0x1af   : > { %3017 = vst [vmem:[#allocation17_spill] sm:$0xff] %v2878_v16  ;;  %v2117_v59 = vpop.f32.mrf.mxu0  ;;  %v1152_v16 = vadd.f32 %v2113_v47, %v1058_v26 }
 0x1b0   : > { %v2880_v54 = vpop.f32.mrf.mxu1  ;;  %v1156_v30 = vadd.f32 %v2117_v59, %v1062_v48 }
 0x1b1   : > { %3018 = vst [vmem:[#allocation19_spill] sm:$0xff] %v2880_v54  ;;  %v1135_v8 = vpop.f32.mrf.mxu0  ;;  %v1056_v54 = vadd.f32 %v1025_v15, %v962_v49  ;;  %v1294_v51 = vadd.f32 %v2123_v34, %v1152_v16  ;;  %v966_v15 = vadd.f32 %v947_v31, %v813_v24 }
 0x1b2   : > { %v2143_v43 = vpop.f32.mrf.mxu1  ;;  %v1298_v4 = vadd.f32 %v2874_v25, %v1156_v30 }
 0x1b3   : > { %v2118_v50 = vpop.f32.mrf.mxu0  ;;  %v1150_v27 = vadd.f32 %v1119_v33, %v1056_v54 }
 0x1b4   : > { %v1449_v38 = vpop.f32.mrf.mxu1  ;;  %v3020_v12 = vld [vmem:[#allocation12_spill] sm:$0xff] }
 0x1b5   : > { %v2882_v0 = vpop.f32.mrf.mxu0 }
 0x1b6   : > { %v2884_v60 = vpop.f32.mrf.mxu1  ;;  %v1155_v63 = vadd.f32 %v2882_v0, %v1061_v2 }
 0x1b7   : > { %3019 = vst [vmem:[#allocation20_spill] sm:$0xff] %v2884_v60  ;;  %v2133_v9 = vpop.f32.mrf.mxu0  ;;  %v963_v60 = vadd.f32 %v934_v14, %v800_v52  ;;  %v1292_v14 = vadd.f32 %v1261_v13, %v1150_v27 }
 0x1b8   : > { %v2886_v32 = vpop.f32.mrf.mxu1  ;;  %v1388_v18 = vadd.f32 %v2133_v9, %v1294_v51  ;;  %v3023_v24 = vld [vmem:[#allocation19_spill] sm:$0xff] }
 0x1b9   : > { %v1355_v36 = vpop.f32.mrf.mxu0  ;;  %v1057_v17 = vadd.f32 %v1028_v11, %v963_v60  ;;  %v1060_v11 = vadd.f32 %v2864_v23, %v966_v15  ;;  %v1157_v23 = vadd.f32 %v2118_v50, %v1063_v35  ;;  %v1297_v40 = vadd.f32 %v3023_v24, %v1155_v63 }
 0x1ba   : > { %v2888_v61 = vpop.f32.mrf.mxu1  ;;  %v1386_v33 = vadd.f32 %v1355_v36, %v1292_v14  ;;  %v1482_v54 = vadd.f32 %v2143_v43, %v1388_v18 }
 0x1bb   : > { %v2134_v56 = vpop.f32.mrf.mxu0  ;;  %v1151_v10 = vadd.f32 %v1122_v55, %v1057_v17  ;;  %v1154_v29 = vadd.f32 %v1135_v8, %v1060_v11 }
 0x1bc   : > { %v2890_v42 = vpop.f32.mrf.mxu1  ;;  %v1389_v55 = vadd.f32 %v2134_v56, %v1295_v1  ;;  %v1480_v9 = vadd.f32 %v1449_v38, %v1386_v33  ;;  %v3022_v56 = vld [vmem:[#allocation17_spill] sm:$0xff] }
 0x1bd   : > { %v1358_v21 = vpop.f32.mrf.mxu0  ;;  %v1293_v13 = vadd.f32 %v2872_v41, %v1151_v10  ;;  %v1296_v36 = vadd.f32 %v3020_v12, %v1154_v29  ;;  %v2011_v41 = vld [vmem:[%s2949_s4] ss:$0 sm:$0xff]  ;;  %v1299_v38 = vadd.f32 %v3022_v56, %v1157_v23 }
 0x1be   : > { %v2892_v5 = vpop.f32.mrf.mxu1  ;;  %v3021_v50 = vld [vmem:[#allocation20_spill] sm:$0xff] }
 0x1bf   : > { %v2137_v28 = vpop.f32.mrf.mxu0  ;;  %v1387_v45 = vadd.f32 %v1358_v21, %v1293_v13  ;;  %v1483_v25 = vadd.f32 %v3021_v50, %v1389_v55 }
 0x1c0   : > { %v2895_v7 = vpop.f32.mrf.mxu1  ;;  %v1392_v8 = vadd.f32 %v2137_v28, %v1298_v4 }
 0x1c1   : > { %v1371_v6 = vpop.f32.mrf.mxu0  ;;  %v1481_v21 = vadd.f32 %v2886_v32, %v1387_v45 }
 0x1c2   : > { %v2163_v47 = vpop.f32.mrf.mxu1  ;;  %v1390_v26 = vadd.f32 %v1371_v6, %v1296_v36  ;;  %v1486_v17 = vadd.f32 %v2888_v61, %v1392_v8 }
 0x1c3   : > { %v2138_v34 = vpop.f32.mrf.mxu0 }
 0x1c4   : > { %v1803_v16 = vpop.f32.mrf.mxu1  ;;  %v1393_v27 = vadd.f32 %v2138_v34, %v1299_v38  ;;  %v1484_v10 = vadd.f32 %v2890_v42, %v1390_v26 }
 0x1c5   : > { %v1374_v31 = vpop.f32.mrf.mxu0 }
 0x1c6   : > { %v2166_v3 = vpop.f32.mrf.mxu1  ;;  %v1391_v48 = vadd.f32 %v1374_v31, %v1297_v40  ;;  %v1487_v30 = vadd.f32 %v2892_v5, %v1393_v27 }
 0x1c7   : > { %v2153_v59 = vpop.f32.mrf.mxu0 }
 0x1c8   : > { %v1582_v60 = vadd.f32 %v2153_v59, %v1482_v54  ;;  %v1813_v39 = vpop.f32.mrf.mxu1  ;;  %v1485_v58 = vadd.f32 %v2895_v7, %v1391_v48 }
 0x1c9   : > { %v1549_v22 = vpop.f32.mrf.mxu0 }
 0x1ca   : > { %v1580_v44 = vadd.f32 %v1549_v22, %v1480_v9  ;;  %v1844_v43 = vadd.f32 %v1813_v39, %v1582_v60  ;;  %v2169_v49 = vpop.f32.mrf.mxu1 }
 0x1cb   : > { %v2154_v52 = vpop.f32.mrf.mxu0 }
 0x1cc   : > { %v1842_v46 = vadd.f32 %v1803_v16, %v1580_v44  ;;  %v1859_v0 = vadd.f32 %v2011_v41, %v1844_v43  ;;  %v1583_v37 = vadd.f32 %v2154_v52, %v1483_v25  ;;  %v1823_v53 = vpop.f32.mrf.mxu1 }
 0x1cd   : > { %v1552_v28 = vpop.f32.mrf.mxu0 }
 0x1ce   : > { %v1857_v62 = vadd.f32 %v2011_v41, %v1842_v46  ;;  %v1867_v51 = vmax.f32 %v1859_v0, 0.0  ;;  %v1845_v57 = vadd.f32 %v2166_v3, %v1583_v37  ;;  %v1581_v15 = vadd.f32 %v1552_v28, %v1481_v21  ;;  %v2172_v32 = vpop.f32.mrf.mxu1 }
 0x1cf   : > { %v2157_v6 = vpop.f32.mrf.mxu0 }
 0x1d0   : > { %v1865_v18 = vmax.f32 %v1857_v62, 0.0  ;;  %1876 = vst.msk [vmem:[%s2920_s28 + $0x10] sm:$0xff] %vm1873_vm4, %v1867_v51  ;;  %v1860_v14 = vadd.f32 %v2011_v41, %v1845_v57  ;;  %v1843_v19 = vadd.f32 %v2163_v47, %v1581_v15  ;;  %v1586_v20 = vadd.f32 %v2157_v6, %v1486_v17  ;;  %v1833_v11 = vpop.f32.mrf.mxu1 }
 0x1d1   : > { %v1565_v61 = vpop.f32.mrf.mxu0 }
 0x1d2   : > { %1874 = vst.msk [vmem:[%s2920_s28] sm:$0xff] %vm1873_vm4, %v1865_v18  ;;  %v1868_v34 = vmax.f32 %v1860_v14, 0.0  ;;  %v1858_v33 = vadd.f32 %v2011_v41, %v1843_v19  ;;  %v1584_v1 = vadd.f32 %v1565_v61, %v1484_v10  ;;  %v1848_v16 = vadd.f32 %v1833_v11, %v1586_v20 }
 0x1d3   : > { %v2158_v42 = vpop.f32.mrf.mxu0 }
 0x1d4   : > { %1877 = vst.msk [vmem:[%s2920_s28 + $0x18] sm:$0xff] %vm1873_vm4, %v1868_v34  ;;  %v1866_v47 = vmax.f32 %v1858_v33, 0.0  ;;  %v1846_v35 = vadd.f32 %v1823_v53, %v1584_v1  ;;  %v1863_v29 = vadd.f32 %v2011_v41, %v1848_v16  ;;  %v1587_v31 = vadd.f32 %v2158_v42, %v1487_v30 }
 0x1d5   : > { %v1568_v5 = vpop.f32.mrf.mxu0 }
 0x1d6   : > { %1875 = vst.msk [vmem:[%s2920_s28 + $0x8] sm:$0xff] %vm1873_vm4, %v1866_v47  ;;  %v1861_v55 = vadd.f32 %v2011_v41, %v1846_v35  ;;  %v1871_v13 = vmax.f32 %v1863_v29, 0.0  ;;  %v1849_v54 = vadd.f32 %v2172_v32, %v1587_v31  ;;  %v1585_v3 = vadd.f32 %v1568_v5, %v1485_v58 }
 0x1d8   : > { %v1869_v2 = vmax.f32 %v1861_v55, 0.0  ;;  %1880 = vst.msk [vmem:[%s2920_s28 + $0x30] sm:$0xff] %vm1873_vm4, %v1871_v13  ;;  %v1864_v7 = vadd.f32 %v2011_v41, %v1849_v54  ;;  %v1847_v23 = vadd.f32 %v2169_v49, %v1585_v3 }
 0x1da   : > { %1878 = vst.msk [vmem:[%s2920_s28 + $0x20] sm:$0xff] %vm1873_vm4, %v1869_v2  ;;  %v1872_v4 = vmax.f32 %v1864_v7, 0.0  ;;  %v1862_v59 = vadd.f32 %v2011_v41, %v1847_v23 }
 0x1dc   : > { %1881 = vst.msk [vmem:[%s2920_s28 + $0x38] sm:$0xff] %vm1873_vm4, %v1872_v4  ;;  %v1870_v45 = vmax.f32 %v1862_v59, 0.0 }
 0x1de   : > { %1879 = vst.msk [vmem:[%s2920_s28 + $0x28] sm:$0xff] %vm1873_vm4, %v1870_v45 }
 0x1df PF: > { %s15_s18 = sadd.s32 1, %s2200_s18  }
 0x1e0   : > { %p12_p4 = scmp.ge.s32.totalorder %s15_s18, 4  }
 0x1e2   :  { %14 = sbr.rel (!%p12_p4) target bundleno = 1 (0x1), region = 81 }

// kernel: _lambda_.56
= control target key start
LH: loop header
LB: loop body
LE: loop exit
PB: predicated region body
PF: predicated region fallthrough
CT: control target
= control target key end

     0   :  { %s1411_s18 = smov 0   ;;  %s1668_s0 = inlined_call_operand.vmem [shape: f32[2,4,5,5,16], index: 0, kind: input, shape index: {}]   ;;  %s1669_s1 = inlined_call_operand.vmem [shape: f32[2,4,5,5,1], index: 1, kind: input, shape index: {}]   ;;  %s1670_s2 = inlined_call_operand.vmem [shape: bf16[9,16,64], index: 2, kind: input, shape index: {}]   ;;  %s1671_s3 = inlined_call_operand.vmem [shape: f32[16,64], index: 3, kind: input, shape index: {}]   ;;  %s1672_s4 = inlined_call_operand.vmem [shape: f32[1,64], index: 4, kind: input, shape index: {}]   ;;  %s1673_s5 = inlined_call_operand.vmem [shape: f32[2,4,4,64], index: 5, kind: output, shape index: {}]  }
   0x1 LB: > { %s1206_s19 = sadd.s32 4294967295, %s1376_s18   ;;  %p1210_p0 = scmp.ge.s32.totalorder %s1376_s18, 1  ;;  %s1376_s18 = sphi %s1411_s18, %s15_s18  }
   0x2   : > { %p197_p1 = scmp.lt.s32.totalorder %s1376_s18, 3 }
   0x4   : > { %p198_p2 = pnand %p1210_p0, %p197_p1 }
   0x5   : > { %p230_p3 = scmp.lt.s32.totalorder (!%p198_p2), %s1206_s19, 1 }
   0x6   : > { %201 = sbr.rel (%p198_p2) target bundleno = 398 (0x18e), region = 40 }
   0xb   : > { %v1378_v0 = vmov 0   ;;  %s1677_s19 = smov (!%p230_p3, %s1206_s19), 1  ;;  %v1361_v7 = vld [vmem:[%s1670_s2 + $0x8] sm:$0xff]   ;;  %v1379_v8 = vmov 0.0   ;;  %vm1380_vm0 = vmmov 0   ;;  %v1362_v11 = vld [vmem:[%s1670_s2] sm:$0xff]  }
   0xc   : > { %1360 = vset.pattern.permute.xlu1 %v1378_v0  ;;  %1359 = vset.pattern.permute.xlu0 %v1378_v0  ;;  %s1347_s20 = smul.u32 160, %s1677_s19  ;;  %vm419_vm1 = vcmask 130048   ;;  %v1363_v40 = vld [vmem:[%s1670_s2 + $0x10] sm:$0xff]   ;;  %vm518_vm2 = vcmask 1042432   ;;  %vm519_vm3 = vcmask 1046532   ;;  %s1263_s28 = sshll.u32 %s1677_s19, 4 }
   0xd   : > { %1286 = vmatprep.subr.bf16.mxu0 %v1379_v8  ;;  %1292 = vmatprep.subr.bf16.mxu1 %v1379_v8  ;;  %vm1527_vm4 = vmor %vm518_vm2, %vm519_vm3  ;;  %s244_s6 = scalar_lea.vmem %s1673_s5, %s1263_s28  ;;  %vm1134_vm5 = vcmask 519168  }
   0xe   : > { %s1427_s23 = scalar_lea.vmem %s1669_s1, %s1347_s20  ;;  %1287 = vmatpush3.bf16.msra.mxu0 %v1361_v7  ;;  %1288 = vmatprep.mubr.msk.bf16.mxu0 %vm1380_vm0, %v1379_v8  ;;  %s1466_s30 = scalar_lea.vmem %s1668_s0, %s1347_s20 }
   0xf   : > { %v271_v1 = vld [vmem:[%s1427_s23 + $0x38] sm:$0x1f]  ;;  %v269_v2 = vld [vmem:[%s1427_s23 + $0x28] sm:$0x1f]  ;;  %v272_v3 = vld [vmem:[%s1427_s23 + $0x40] sm:$0x1f]  ;;  %1294 = vmatprep.mubr.msk.bf16.mxu1 %vm1380_vm0, %v1379_v8  ;;  %1298 = vmatprep.subr.bf16.mxu0 %v1379_v8 }
  0x10   : > { %319 = vperm.xlu1 %1360, %v271_v1   ;;  %309 = vperm.xlu0 %1359, %v269_v2   ;;  %v270_v4 = vld [vmem:[%s1427_s23 + $0x30] sm:$0x1f]  ;;  %v265_v5 = vld [vmem:[%s1427_s23 + $0x8] sm:$0x1f]  ;;  %v264_v6 = vld [vmem:[%s1427_s23] sm:$0x1f] }
  0x11   : > { %v267_v9 = vld [vmem:[%s1427_s23 + $0x18] sm:$0x1f]  ;;  %v266_v10 = vld [vmem:[%s1427_s23 + $0x10] sm:$0x1f]  ;;  %1293 = vmatpush3.bf16.msra.mxu1 %v1362_v11  ;;  %v277_v14 = vld [vmem:[%s1427_s23 + $0x68] sm:$0x1f] }
  0x12   : > { %v275_v12 = vld [vmem:[%s1427_s23 + $0x58] sm:$0x1f]  ;;  %v274_v13 = vld [vmem:[%s1427_s23 + $0x50] sm:$0x1f]  ;;  %1304 = vmatprep.subr.bf16.mxu1 %v1379_v8  ;;  %v276_v15 = vld [vmem:[%s1427_s23 + $0x60] sm:$0x1f] }
  0x13   : > { %v279_v16 = vld [vmem:[%s1427_s23 + $0x80] sm:$0x1f]  ;;  %v278_v17 = vld [vmem:[%s1427_s23 + $0x78] sm:$0x1f]  ;;  %v281_v18 = vld [vmem:[%s1427_s23 + $0x90] sm:$0x1f] }
  0x14   : > { %324 = vperm.xlu1 %1360, %v272_v3   ;;  %314 = vperm.xlu0 %1359, %v270_v4   ;;  %v280_v19 = vld [vmem:[%s1427_s23 + $0x88] sm:$0x1f]  ;;  %v268_v21 = vld [vmem:[%s1427_s23 + $0x20] sm:$0x1f]  ;;  %v1469_v24 = vld [vmem:[%s1466_s30 + $0x38] sm:$0x1f] }
  0x15   : > { %v273_v20 = vld [vmem:[%s1427_s23 + $0x48] sm:$0x1f]  ;;  %v1473_v26 = vld [vmem:[%s1466_s30 + $0x40] sm:$0x1f]  ;;  %v1476_v27 = vld [vmem:[%s1466_s30 + $0x30] sm:$0x1f] }
  0x16   : > { %v251_v25 = vld [vmem:[%s1466_s30 + $0x28] sm:$0x1f]  ;;  %v246_v35 = vld [vmem:[%s1466_s30] sm:$0x1f]  ;;  %v1501_v44 = vld [vmem:[%s1466_s30 + $0x18] sm:$0x1f] }
  0x17   : > { %v1488_v34 = vld [vmem:[%s1466_s30 + $0x8] sm:$0x1f]  ;;  %v1504_v45 = vld [vmem:[%s1466_s30 + $0x10] sm:$0x1f]  ;;  %v1519_v52 = vld [vmem:[%s1466_s30 + $0x58] sm:$0x1f] }
  0x18   : > { %289 = vperm.xlu1 %1360, %v265_v5   ;;  %284 = vperm.xlu0 %1359, %v264_v6   ;;  %v1522_v53 = vld [vmem:[%s1466_s30 + $0x50] sm:$0x1f]  ;;  %v1364_v5 = vld [vmem:[%s1670_s2 + $0x18] sm:$0xff]   ;;  %v1547_v11 = vld [vmem:[%s1466_s30 + $0x60] sm:$0x1f] }
  0x1c   : > { %299 = vperm.xlu1 %1360, %v267_v9   ;;  %294 = vperm.xlu0 %1359, %v266_v10   ;;  %v1544_v10 = vld [vmem:[%s1466_s30 + $0x68] sm:$0x1f] }
  0x20   : > { %339 = vperm.xlu1 %1360, %v275_v12   ;;  %334 = vperm.xlu0 %1359, %v274_v13  }
  0x24   : > { %349 = vperm.xlu1 %1360, %v277_v14   ;;  %344 = vperm.xlu0 %1359, %v276_v15  }
  0x28   : > { %359 = vperm.xlu1 %1360, %v279_v16   ;;  %354 = vperm.xlu0 %1359, %v278_v17  }
  0x2c   : > { %369 = vperm.xlu1 %1360, %v281_v18   ;;  %364 = vperm.xlu0 %1359, %v280_v19  }
  0x30   : > { %329 = vperm.xlu1 %1360, %v273_v20   ;;  %304 = vperm.xlu0 %1359, %v268_v21  }
  0x8b   : > { %v320_v22 = vpop.permute.xlu1 %319  ;;  %v310_v23 = vpop.permute.xlu0 %309 }
  0x8c   : > { %v1479_v30 = vmul.f32 %v320_v22, %v1469_v24  ;;  %v377_v31 = vmul.f32 %v310_v23, %v251_v25 }
  0x8f   : > { %v325_v28 = vpop.permute.xlu1 %324  ;;  %v315_v29 = vpop.permute.xlu0 %314 }
  0x90   : > { %v1482_v32 = vmul.f32 %v325_v28, %v1473_v26  ;;  %v1485_v33 = vmul.f32 %v315_v29, %v1476_v27 }
  0x92   : > { %v406_v36 = vcombine.low %v1479_v30, %v1482_v32  ;;  %v405_v37 = vcombine.low %v377_v31, %v1485_v33  ;;  %v1365_v31 = vld [vmem:[%s1670_s2 + $0x20] sm:$0xff]  }
  0x93   : > { %v290_v38 = vpop.permute.xlu1 %289  ;;  %v285_v39 = vpop.permute.xlu0 %284 }
  0x94   : > { %v409_v41 = vpack.c.bf16 %v406_v36, %v405_v37  ;;  %v1498_v42 = vmul.f32 %v290_v38, %v1488_v34  ;;  %v372_v43 = vmul.f32 %v285_v39, %v246_v35  ;;  %v261_v38 = vld [vmem:[%s1466_s30 + $0x80] sm:$0x1f] }
  0x96   : > { %v515_v46 = vcombine.high %v1498_v42, %v1498_v42  ;;  %v514_v47 = vcombine.high %v372_v43, %v372_v43  ;;  %1289 = vmatmul.mubr.msk.bf16.vlgmr.msra.gmra.mxu0 %vm419_vm1, %v409_v41  ;;  %v1222_v54 = vrot.slane %v1498_v42, 9  ;;  %v394_v59 = vcombine.low %v372_v43, %v1498_v42 }
  0x97   : > { %v300_v48 = vpop.permute.xlu1 %299  ;;  %v295_v49 = vpop.permute.xlu0 %294  ;;  %1299 = vmatpush3.bf16.msra.mxu0 %v1363_v40  ;;  %1300 = vmatprep.mubr.msk.bf16.mxu0 %vm1380_vm0, %v1379_v8  ;;  %v1221_v60 = vrot.slane %v372_v43, 9  ;;  %v260_v40 = vld [vmem:[%s1466_s30 + $0x78] sm:$0x1f] }
  0x98   : > { %v1512_v50 = vmul.f32 %v300_v48, %v1501_v44  ;;  %v1515_v51 = vmul.f32 %v295_v49, %v1504_v45  ;;  %1310 = vmatprep.subr.bf16.mxu0 %v1379_v8  ;;  %v527_v55 = vrot.slane %v515_v46, 5  ;;  %v523_v56 = vrot.slane %v514_v47, 5  ;;  %v1578_v49 = vld [vmem:[%s1466_s30 + $0x90] sm:$0x1f] }
  0x9a   : > { %v517_v57 = vcombine.high %v1512_v50, %v1512_v50  ;;  %v395_v61 = vcombine.low %v1515_v51, %v1512_v50  ;;  %v516_v62 = vcombine.high %v1515_v51, %v1515_v51  ;;  %v1224_v1 = vrot.slane %v1512_v50, 9 }
  0x9b   : > { %v340_v63 = vpop.permute.xlu1 %339  ;;  %v335_v0 = vpop.permute.xlu0 %334  ;;  %v1223_v6 = vrot.slane %v1515_v51, 9  ;;  %v524_v12 = vsel %vm1527_vm4, %v1221_v60, %v523_v56  ;;  %v1553_v13 = vsel %vm1527_vm4, %v1222_v54, %v527_v55  ;;  %v1366_v54 = vld [vmem:[%s1670_s2 + $0x28] sm:$0xff]  }
  0x9c   : > { %v535_v2 = vrot.slane %v517_v57, 5  ;;  %v383_v3 = vmul.f32 %v340_v63, %v1519_v52  ;;  %v382_v4 = vmul.f32 %v335_v0, %v1522_v53  ;;  %v531_v7 = vrot.slane %v516_v62, 5 }
  0x9d   : > { %v398_v9 = vpack.c.bf16 %v395_v61, %v394_v59  ;;  %v537_v23 = vcombine.low %v524_v12, %v1553_v13  ;;  %v1585_v59 = vld [vmem:[%s1466_s30 + $0x88] sm:$0x1f]  ;;  %v1012_v0 = vrot.slane %v1488_v34, 1  ;;  %v996_v12 = vrot.slane %v1522_v53, 1 }
  0x9e   : > { %v1557_v14 = vsel %vm1527_vm4, %v1224_v1, %v535_v2  ;;  %v1561_v15 = vsel %vm1527_vm4, %v1223_v6, %v531_v7  ;;  %v726_v16 = vcombine.high %v383_v3, %v383_v3  ;;  %v725_v17 = vcombine.high %v382_v4, %v382_v4 }
  0x9f   : > { %1295 = vmatmul.mubr.msk.bf16.vlgmr.msra.gmra.mxu1 %vm419_vm1, %v398_v9  ;;  %v350_v18 = vpop.permute.xlu1 %349  ;;  %v345_v19 = vpop.permute.xlu0 %344  ;;  %v538_v22 = vcombine.low %v1561_v15, %v1557_v14  ;;  %v601_v25 = vcombine.low %v382_v4, %v383_v3  ;;  %v1238_v55 = vrot.slane %v383_v3, 9  ;;  %v1237_v60 = vrot.slane %v382_v4, 9 }
  0xa0   : > { %v385_v20 = vmul.f32 %v350_v18, %v1544_v10  ;;  %v384_v21 = vmul.f32 %v345_v19, %v1547_v11  ;;  %1305 = vmatpush3.bf16.msra.mxu1 %v1364_v5  ;;  %1306 = vmatprep.mubr.msk.bf16.mxu1 %vm1380_vm0, %v1379_v8  ;;  %v735_v35 = vrot.slane %v726_v16, 5  ;;  %v731_v43 = vrot.slane %v725_v17, 5  ;;  %v250_v17 = vld [vmem:[%s1466_s30 + $0x20] sm:$0x1f]  ;;  %v255_v19 = vld [vmem:[%s1466_s30 + $0x48] sm:$0x1f] }
  0xa1   : > { %1316 = vmatprep.subr.bf16.mxu1 %v1379_v8  ;;  %v541_v41 = vpack.c.bf16 %v538_v22, %v537_v23  ;;  %v1013_v5 = vrot.slane %v1504_v45, 1  ;;  %v997_v9 = vrot.slane %v1519_v52, 1  ;;  %v1367_v23 = vld [vmem:[%s1670_s2 + $0x30] sm:$0xff]   ;;  %v932_v58 = vcombine.low %v1553_v13, %v1561_v15 }
  0xa2   : > { %v728_v28 = vcombine.high %v385_v20, %v385_v20  ;;  %v602_v29 = vcombine.low %v384_v21, %v385_v20  ;;  %v727_v36 = vcombine.high %v384_v21, %v384_v21  ;;  %v1240_v46 = vrot.slane %v385_v20, 9 }
  0xa3   : > { %v360_v37 = vpop.permute.xlu1 %359  ;;  %v355_v39 = vpop.permute.xlu0 %354  ;;  %v1239_v56 = vrot.slane %v384_v21, 9  ;;  %1301 = vmatmul.mubr.msk.bf16.vlgmr.msra.gmra.mxu0 %vm419_vm1, %v541_v41  ;;  %v736_v1 = vsel %vm1527_vm4, %v1238_v55, %v735_v35  ;;  %v732_v6 = vsel %vm1527_vm4, %v1237_v60, %v731_v43  ;;  %v1021_v52 = vmax.f32 %v1469_v24, %v1013_v5 }
  0xa4   : > { %v743_v47 = vrot.slane %v728_v28, 5  ;;  %v605_v48 = vpack.c.bf16 %v602_v29, %v601_v25  ;;  %v739_v57 = vrot.slane %v727_v36, 5  ;;  %v387_v62 = vmul.f32 %v360_v37, %v261_v38  ;;  %1311 = vmatpush3.bf16.msra.mxu0 %v1365_v31  ;;  %1312 = vmatprep.mubr.msk.bf16.mxu0 %vm1380_vm0, %v1379_v8  ;;  %v1368_v29 = vld [vmem:[%s1670_s2 + $0x38] sm:$0xff]  }
  0xa5   : > { %v386_v63 = vmul.f32 %v355_v39, %v260_v40  ;;  %1322 = vmatprep.subr.bf16.mxu0 %v1379_v8  ;;  %v745_v20 = vcombine.low %v732_v6, %v736_v1  ;;  %v1020_v25 = vmax.f32 %v1476_v27, %v1012_v0  ;;  %v1005_v31 = vmax.f32 %v261_v38, %v997_v9  ;;  %v1029_v38 = vld [vmem:[%s1671_s3 + $0x8] sm:$0xff] }
  0xa6   : > { %v744_v61 = vsel %vm1527_vm4, %v1240_v46, %v743_v47  ;;  %v740_v2 = vsel %vm1527_vm4, %v1239_v56, %v739_v57  ;;  %v1004_v35 = vmax.f32 %v260_v40, %v996_v12  ;;  %v1014_v39 = vrot.slane %v1501_v44, 1  ;;  %v1369_v57 = vld [vmem:[%s1670_s2 + $0x40] sm:$0xff]  }
  0xa7   : > { %1307 = vmatmul.mubr.msk.bf16.vlgmr.msra.gmra.mxu1 %vm419_vm1, %v605_v48  ;;  %v370_v3 = vpop.permute.xlu1 %369  ;;  %v365_v4 = vpop.permute.xlu0 %364  ;;  %v746_v16 = vcombine.low %v740_v2, %v744_v61  ;;  %v665_v45 = vcombine.low %v386_v63, %v387_v62  ;;  %v999_v41 = vrot.slane %v1544_v10, 1  ;;  %v998_v27 = vrot.slane %v1547_v11, 1 }
  0xa8   : > { %v389_v34 = vmul.f32 %v370_v3, %v1578_v49  ;;  %v388_v7 = vmul.f32 %v365_v4, %v1585_v59  ;;  %1317 = vmatpush3.bf16.msra.mxu1 %v1366_v54  ;;  %1318 = vmatprep.mubr.msk.bf16.mxu1 %vm1380_vm0, %v1379_v8  ;;  %v1015_v24 = vrot.slane %v250_v17, 1  ;;  %v1025_v44 = vmax.f32 %v1005_v31, %v1021_v52 }
  0xa9   : > { %1328 = vmatprep.subr.bf16.mxu1 %v1379_v8  ;;  %v749_v37 = vpack.c.bf16 %v746_v16, %v745_v20  ;;  %v1024_v10 = vmax.f32 %v1004_v35, %v1020_v25  ;;  %v1022_v11 = vmax.f32 %v1473_v26, %v1014_v39  ;;  %v806_v48 = vcombine.low %v1498_v42, %v1515_v51 }
  0xaa   : > { %v666_v18 = vcombine.low %v388_v7, %v389_v34  ;;  %v867_v54 = vcombine.low %v1485_v33, %v1479_v30  ;;  %v1006_v55 = vmax.f32 %v1585_v59, %v998_v27  ;;  %v1023_v56 = vmax.f32 %v255_v19, %v1015_v24  ;;  %v1028_v30 = vld [vmem:[%s1671_s3] sm:$0xff] }
  0xab   : > { %v330_v21 = vpop.permute.xlu1 %329  ;;  %v305_v22 = vpop.permute.xlu0 %304  ;;  %v1034_v61 = vcombine.low %v1024_v10, %v1025_v44 }
  0xac   : > { %v669_v28 = vpack.c.bf16 %v666_v18, %v665_v45  ;;  %v376_v53 = vmul.f32 %v305_v22, %v250_v17  ;;  %v381_v36 = vmul.f32 %v330_v21, %v255_v19  ;;  %v1026_v33 = vmax.f32 %v1006_v55, %v1022_v11 }
  0xae   : > { %v927_v43 = vcombine.high %v376_v53, %v376_v53  ;;  %1313 = vmatmul.mubr.msk.bf16.vlgmr.msra.gmra.mxu0 %vm419_vm1, %v669_v28  ;;  %v807_v40 = vcombine.low %v1512_v50, %v376_v53  ;;  %v868_v46 = vcombine.low %v1482_v32, %v381_v36  ;;  %v1007_v50 = vmax.f32 %v1578_v49, %v999_v41 }
  0xaf   : > { %1319 = vmatmul.mubr.msk.bf16.vlgmr.msra.gmra.mxu1 %vm419_vm1, %v749_v37  ;;  %1323 = vmatpush3.bf16.msra.mxu0 %v1367_v23  ;;  %v1253_v32 = vrot.slane %v376_v53, 9 }
  0xb0   : > { %1329 = vmatpush3.bf16.msra.mxu1 %v1368_v29  ;;  %1324 = vmatprep.mubr.msk.bf16.mxu0 %vm1380_vm0, %v1379_v8  ;;  %v930_v47 = vrot.slane %v927_v43, 5  ;;  %v810_v60 = vpack.c.bf16 %v807_v40, %v806_v48  ;;  %v871_v26 = vpack.c.bf16 %v868_v46, %v867_v54  ;;  %v1027_v51 = vmax.f32 %v1007_v50, %v1023_v56  ;;  %v1260_v56 = vld [vmem:[%s1672_s4] ss:$0 sm:$0xff] }
  0xb1   : > { %1330 = vmatprep.mubr.msk.bf16.mxu1 %vm1380_vm0, %v1379_v8  ;;  %1334 = vmatprep.subr.bf16.mxu0 %v1379_v8 }
  0xb2   : > { %1340 = vmatprep.subr.mxu1 %v1029_v38  ;;  %v931_v42 = vsel %vm1527_vm4, %v1253_v32, %v930_v47  ;;  %v1035_v59 = vcombine.low %v1026_v33, %v1027_v51 }
  0xb3   : > { %v933_v49 = vcombine.low %v1557_v14, %v931_v42 }
  0xb5   : > { %v936_v62 = vpack.c.bf16 %v933_v49, %v932_v58 }
  0xb6   : > { %1325 = vmatmul.mubr.msk.bf16.vlgmr.msra.gmra.mxu0 %vm419_vm1, %v810_v60 }
  0xb7   : > { %1331 = vmatmul.mubr.msk.bf16.vlgmr.msra.gmra.mxu1 %vm419_vm1, %v871_v26  ;;  %1335 = vmatpush3.bf16.msra.mxu0 %v1369_v57 }
  0xb8   : > { %1341 = vmatpush3.msra.mxu1 %v1029_v38  ;;  %1336 = vmatprep.mubr.msk.bf16.mxu0 %vm1380_vm0, %v1379_v8 }
  0xb9   : > { %1342 = vmatprep.subr.mxu1 %v1028_v30  ;;  %1344 = vmatprep.mubr.msk.f32.mxu1 %vm419_vm1, %v1034_v61 }
  0xba   : > { %1343 = vmatpush3.msra.mxu1 %v1028_v30 }
  0xbe   : > { %1337 = vmatmul.mubr.msk.bf16.vlgmr.msra.gmra.mxu0 %vm419_vm1, %v936_v62 }
  0xbf   : > { %1345 = vmatmul.mubr.msk.f32.vlgmr.msra.gmra.mxu1 %vm419_vm1, %v1035_v59 }
 0x156   : > { %v457_v63 = vpop.f32.mrf.mxu0 }
 0x158   : > { %v1290_v0 = vpop.f32.mrf.mxu0 }
 0x15a   : > { %v460_v14 = vpop.f32.mrf.mxu0 }
 0x15c   : > { %v1291_v1 = vpop.f32.mrf.mxu0 }
 0x15f   : > { %v507_v2 = vpop.f32.mrf.mxu1 }
 0x160   : > { %v508_v13 = vadd.f32 %v507_v2, %v457_v63 }
 0x161   : > { %v1296_v3 = vpop.f32.mrf.mxu1 }
 0x163   : > { %v510_v8 = vpop.f32.mrf.mxu1  ;;  %v588_v4 = vpop.f32.mrf.mxu0 }
 0x164   : > { %v595_v16 = vadd.f32 %v588_v4, %v508_v13  ;;  %v511_v18 = vadd.f32 %v510_v8, %v460_v14 }
 0x165   : > { %v1297_v5 = vpop.f32.mrf.mxu1  ;;  %v1302_v6 = vpop.f32.mrf.mxu0 }
 0x167   : > { %v652_v34 = vpop.f32.mrf.mxu1  ;;  %v591_v7 = vpop.f32.mrf.mxu0 }
 0x168   : > { %v659_v21 = vadd.f32 %v652_v34, %v595_v16  ;;  %v596_v22 = vadd.f32 %v591_v7, %v511_v18 }
 0x169   : > { %v1308_v9 = vpop.f32.mrf.mxu1  ;;  %v1303_v15 = vpop.f32.mrf.mxu0 }
 0x16b   : > { %v655_v12 = vpop.f32.mrf.mxu1 }
 0x16c   : > { %v660_v29 = vadd.f32 %v655_v12, %v596_v22 }
 0x16d   : > { %v1309_v17 = vpop.f32.mrf.mxu1 }
 0x16e   : > { %v716_v45 = vpop.f32.mrf.mxu0 }
 0x16f   : > { %v796_v19 = vpop.f32.mrf.mxu1  ;;  %v723_v52 = vadd.f32 %v716_v45, %v659_v21 }
 0x170   : > { %v1314_v20 = vpop.f32.mrf.mxu0 }
 0x171   : > { %v1320_v23 = vpop.f32.mrf.mxu1  ;;  %v803_v36 = vadd.f32 %v796_v19, %v723_v52 }
 0x172   : > { %v719_v25 = vpop.f32.mrf.mxu0 }
 0x173   : > { %v799_v28 = vpop.f32.mrf.mxu1  ;;  %v724_v37 = vadd.f32 %v719_v25, %v660_v29 }
 0x174   : > { %v1315_v53 = vpop.f32.mrf.mxu0 }
 0x175   : > { %v1321_v31 = vpop.f32.mrf.mxu1  ;;  %v804_v38 = vadd.f32 %v799_v28, %v724_v37 }
 0x176   : > { %v857_v35 = vpop.f32.mrf.mxu0 }
 0x177   : > { %v918_v39 = vpop.f32.mrf.mxu1  ;;  %v864_v43 = vadd.f32 %v857_v35, %v803_v36 }
 0x178   : > { %v1326_v41 = vpop.f32.mrf.mxu0 }
 0x179   : > { %v1332_v27 = vpop.f32.mrf.mxu1  ;;  %v925_v10 = vadd.f32 %v918_v39, %v864_v43 }
 0x17a   : > { %v860_v24 = vpop.f32.mrf.mxu0 }
 0x17b   : > { %v921_v40 = vpop.f32.mrf.mxu1  ;;  %v865_v46 = vadd.f32 %v860_v24, %v804_v38 }
 0x17c   : > { %v1327_v44 = vpop.f32.mrf.mxu0 }
 0x17d   : > { %v1333_v47 = vpop.f32.mrf.mxu1  ;;  %v926_v55 = vadd.f32 %v921_v40, %v865_v46 }
 0x17e   : > { %v983_v11 = vpop.f32.mrf.mxu0 }
 0x17f   : > { %v990_v48 = vadd.f32 %v983_v11, %v925_v10  ;;  %v1346_v50 = vpop.f32.mrf.mxu1 }
 0x180   : > { %v1338_v54 = vpop.f32.mrf.mxu0 }
 0x181   : > { %v1106_v32 = vpop.f32.mrf.mxu1 }
 0x182   : > { %v1115_v57 = vadd.f32 %v1106_v32, %v990_v48  ;;  %v986_v60 = vpop.f32.mrf.mxu0 }
 0x183   : > { %v991_v61 = vadd.f32 %v986_v60, %v926_v55 }
 0x184   : > { %v1124_v26 = vadd.f32 %v1260_v56, %v1115_v57  ;;  %v1339_v42 = vpop.f32.mrf.mxu0 }
 0x185   : > { %v1116_v30 = vadd.f32 %v1346_v50, %v991_v61 }
 0x186   : > { %v1126_v33 = vmax.f32 %v1124_v26, 0.0 }
 0x187   : > { %v1125_v51 = vadd.f32 %v1260_v56, %v1116_v30 }
 0x188   : > { %v1130_v49 = vcombine.high %v1126_v33, %v1126_v33  ;;  %1135 = vst.msk [vmem:[%s244_s6] sm:$0xf] %vm1134_vm5, %v1126_v33 }
 0x189   : > { %v1127_v58 = vmax.f32 %v1125_v51, 0.0 }
 0x18a   : > { %1136 = vst.msk [vmem:[%s244_s6 + $0x4] sm:$0xf] %vm1134_vm5, %v1130_v49 }
 0x18b   : > { %v1131_v59 = vcombine.high %v1127_v58, %v1127_v58  ;;  %1137 = vst.msk [vmem:[%s244_s6 + $0x8] sm:$0xf] %vm1134_vm5, %v1127_v58 }
 0x18d   : > { %1138 = vst.msk [vmem:[%s244_s6 + $0xc] sm:$0xf] %vm1134_vm5, %v1131_v59 }
 0x18e PF: > { %s15_s18 = sadd.s32 1, %s1376_s18  }
 0x18f   : > { %p12_p4 = scmp.ge.s32.totalorder %s15_s18, 4  }
 0x191   :  { %14 = sbr.rel (!%p12_p4) target bundleno = 1 (0x1), region = 81 }

// kernel: _lambda_.57
= control target key start
LH: loop header
LB: loop body
LE: loop exit
PB: predicated region body
PF: predicated region fallthrough
CT: control target
= control target key end

     0   :  { %s873_s15 = smov 0   ;;  %s875_s16 = smov 0   ;;  %s977_s0 = inlined_call_operand.vmem [shape: f32[2,6,4,64], index: 0, kind: input, shape index: {}]   ;;  %s978_s1 = inlined_call_operand.vmem [shape: f32[2,6,4,1], index: 1, kind: input, shape index: {}]   ;;  %s979_s2 = inlined_call_operand.vmem [shape: bf16[3,64,64], index: 2, kind: input, shape index: {}]   ;;  %s980_s3 = inlined_call_operand.vmem [shape: f32[1,64], index: 3, kind: input, shape index: {}]   ;;  %s981_s4 = inlined_call_operand.vmem [shape: f32[2,4,4,64], index: 4, kind: output, shape index: {}]  }
   0x1   :  { %s877_s17 = smov 0  }
   0x2 LB: > { %s26_s18 = sadd.s32 1, %s839_s16  ;;  %p688_p0 = scmp.ge.s32.totalorder %s843_s17, 1  ;;  %s843_s17 = sphi %s877_s17, %s14_s17   ;;  %s839_s16 = sphi %s875_s16, %s983_s16   ;;  %s835_s15 = sphi %s873_s15, %s982_s15  }
   0x3   : > { %p28_p1 = scmp.ge.s32.totalorder %s26_s18, 2  ;;  %p196_p2 = scmp.lt.s32.totalorder %s843_s17, 3 }
   0x5   : > { %s985_s18 = smov (%p28_p1, %s26_s18), 0  ;;  %p197_p3 = pnand %p688_p0, %p196_p2 }
   0x6   : > { %p236_p4 = scmp.lt.s32.totalorder (!%p197_p3), %s835_s15, 1 }
   0x7   : > { %200 = sbr.rel (%p197_p3) target bundleno = 373 (0x175), region = 36 }
   0xc   : > { %v809_v0 = vld [vmem:[%s979_s2 + $0x38] sm:$0xff]   ;;  %v845_v1 = vmov 0   ;;  %s987_s15 = smov (!%p236_p4, %s835_s15), 1  ;;  %v846_v2 = vmov 0.0   ;;  %v810_v3 = vld [vmem:[%s979_s2 + $0x30] sm:$0xff]   ;;  %v812_v8 = vld [vmem:[%s979_s2 + $0x28] sm:$0xff]  }
   0xd   : > { %808 = vset.pattern.permute.xlu1 %v845_v1  ;;  %807 = vset.pattern.permute.xlu0 %v845_v1  ;;  %v811_v4 = vld [vmem:[%s979_s2 + $0x18] sm:$0xff]   ;;  %s779_s25 = smul.u32 24, %s987_s15  ;;  %v813_v5 = vld [vmem:[%s979_s2 + $0x10] sm:$0xff]   ;;  %v815_v11 = vld [vmem:[%s979_s2 + $0x8] sm:$0xff]   ;;  %vm847_vm0 = vmmov 0   ;;  %vm365_vm1 = vcmask 523264  }
   0xe   : > { %743 = vmatprep.subr.bf16.mxu0 %v846_v2  ;;  %755 = vmatprep.subr.bf16.mxu1 %v846_v2  ;;  %v814_v13 = vld [vmem:[%s979_s2 + $0x20] sm:$0xff]   ;;  %v816_v32 = vld [vmem:[%s979_s2 + $0x58] sm:$0xff]   ;;  %v818_v37 = vld [vmem:[%s979_s2 + $0x50] sm:$0xff]   ;;  %vm578_vm2 = vcmask 519168  }
   0xf   : > { %744 = vmatpush3.bf16.msra.mxu0 %v809_v0  ;;  %756 = vmatpush3.bf16.msra.mxu1 %v811_v4  ;;  %s251_s30 = scalar_lea.vmem %s978_s1, %s779_s25  ;;  %v817_v15 = vld [vmem:[%s979_s2] sm:$0xff]   ;;  %s243_s19 = scalar_lea.vmem %s977_s0, %s779_s25  ;;  %v819_v41 = vld [vmem:[%s979_s2 + $0x48] sm:$0xff]  }
  0x10   : > { %745 = vmatprep.subr.bf16.mxu0 %v846_v2  ;;  %757 = vmatprep.subr.bf16.mxu1 %v846_v2  ;;  %v270_v6 = vld [vmem:[%s251_s30 + $0xc] sm:$0xf]  ;;  %v268_v7 = vld [vmem:[%s251_s30 + $0x4] sm:$0xf]  ;;  %v271_v9 = vld [vmem:[%s251_s30 + $0x10] sm:$0xf] }
  0x11   : > { %290 = vperm.xlu1 %808, %v270_v6   ;;  %280 = vperm.xlu0 %807, %v268_v7   ;;  %v269_v10 = vld [vmem:[%s251_s30 + $0x8] sm:$0xf]  ;;  %v272_v12 = vld [vmem:[%s251_s30 + $0x14] sm:$0xf]  ;;  %v267_v14 = vld [vmem:[%s251_s30] sm:$0xf] }
  0x12   : > { %751 = vmatprep.mubr.msk.bf16.mxu0 %vm847_vm0, %v846_v2  ;;  %763 = vmatprep.mubr.msk.bf16.mxu1 %vm847_vm0, %v846_v2  ;;  %v264_v18 = vld [vmem:[%s243_s19 + $0xc] sm:$0xf]  ;;  %v262_v19 = vld [vmem:[%s243_s19 + $0x4] sm:$0xf]  ;;  %v265_v20 = vld [vmem:[%s243_s19 + $0x10] sm:$0xf] }
  0x13   : > { %746 = vmatpush3.bf16.msra.mxu0 %v810_v3  ;;  %758 = vmatpush3.bf16.msra.mxu1 %v813_v5  ;;  %v263_v21 = vld [vmem:[%s243_s19 + $0x8] sm:$0xf]  ;;  %v261_v28 = vld [vmem:[%s243_s19] sm:$0xf]  ;;  %v266_v40 = vld [vmem:[%s243_s19 + $0x14] sm:$0xf] }
  0x14   : > { %747 = vmatprep.subr.bf16.mxu0 %v846_v2  ;;  %759 = vmatprep.subr.bf16.mxu1 %v846_v2  ;;  %v820_v43 = vld [vmem:[%s979_s2 + $0x40] sm:$0xff]   ;;  %s727_s30 = sshll.u32 %s987_s15, 4 }
  0x15   : > { %295 = vperm.xlu1 %808, %v271_v9   ;;  %285 = vperm.xlu0 %807, %v269_v10   ;;  %v724_v56 = vld [vmem:[%s980_s3] ss:$0 sm:$0xff]  ;;  %s259_s7 = scalar_lea.vmem %s981_s4, %s727_s30 }
  0x17   : > { %748 = vmatpush3.bf16.msra.mxu0 %v812_v8  ;;  %760 = vmatpush3.bf16.msra.mxu1 %v815_v11 }
  0x18   : > { %749 = vmatprep.subr.bf16.mxu0 %v846_v2  ;;  %761 = vmatprep.subr.bf16.mxu1 %v846_v2 }
  0x19   : > { %300 = vperm.xlu1 %808, %v272_v12   ;;  %275 = vperm.xlu0 %807, %v267_v14  }
  0x1b   : > { %750 = vmatpush3.bf16.msra.mxu0 %v814_v13  ;;  %762 = vmatpush3.bf16.msra.mxu1 %v817_v15 }
  0x1c   : > { %767 = vmatprep.subr.bf16.mxu0 %v846_v2 }
  0x8c   : > { %v291_v16 = vpop.permute.xlu1 %290  ;;  %v281_v17 = vpop.permute.xlu0 %280 }
  0x8d   : > { %v306_v24 = vmul.f32 %v291_v16, %v264_v18  ;;  %v304_v25 = vmul.f32 %v281_v17, %v262_v19 }
  0x90   : > { %v296_v22 = vpop.permute.xlu1 %295  ;;  %v286_v23 = vpop.permute.xlu0 %285 }
  0x91   : > { %v307_v26 = vmul.f32 %v296_v22, %v265_v20  ;;  %v305_v27 = vmul.f32 %v286_v23, %v263_v21 }
  0x93   : > { %v328_v29 = vcombine.low %v306_v24, %v307_v26  ;;  %v327_v30 = vcombine.low %v304_v25, %v305_v27  ;;  %v314_v35 = vcombine.low %v305_v27, %v306_v24 }
  0x94   : > { %v276_v31 = vpop.permute.xlu0 %275  ;;  %v301_v39 = vpop.permute.xlu1 %300 }
  0x95   : > { %v331_v33 = vpack.c.bf16 %v328_v29, %v327_v30  ;;  %v303_v34 = vmul.f32 %v276_v31, %v261_v28  ;;  %v308_v42 = vmul.f32 %v301_v39, %v266_v40 }
  0x97   : > { %v313_v36 = vcombine.low %v303_v34, %v304_v25  ;;  %752 = vmatmul.mubr.msk.bf16.vlgmr.msra.gmra.mxu0 %vm365_vm1, %v331_v33  ;;  %v479_v44 = vcombine.low %v307_v26, %v308_v42 }
  0x98   : > { %768 = vmatpush3.bf16.msra.mxu0 %v816_v32  ;;  %775 = vmatprep.mubr.msk.bf16.mxu0 %vm847_vm0, %v846_v2 }
  0x99   : > { %v317_v38 = vpack.c.bf16 %v314_v35, %v313_v36  ;;  %769 = vmatprep.subr.bf16.mxu0 %v846_v2  ;;  %v481_v45 = vpack.c.bf16 %v479_v44, %v314_v35 }
  0x9b   : > { %764 = vmatmul.mubr.msk.bf16.vlgmr.msra.gmra.mxu1 %vm365_vm1, %v317_v38 }
  0x9c   : > { %770 = vmatpush3.bf16.msra.mxu0 %v818_v37 }
  0x9d   : > { %771 = vmatprep.subr.bf16.mxu0 %v846_v2 }
  0xa0   : > { %772 = vmatpush3.bf16.msra.mxu0 %v819_v41 }
  0xa1   : > { %773 = vmatprep.subr.bf16.mxu0 %v846_v2 }
  0xa4   : > { %774 = vmatpush3.bf16.msra.mxu0 %v820_v43 }
  0xa7   : > { %776 = vmatmul.mubr.msk.bf16.vlgmr.msra.gmra.mxu0 %vm365_vm1, %v481_v45 }
 0x157   : > { %v403_v46 = vpop.f32.mrf.mxu0 }
 0x159   : > { %v753_v47 = vpop.f32.mrf.mxu0 }
 0x15b   : > { %v406_v48 = vpop.f32.mrf.mxu0  ;;  %v471_v49 = vpop.f32.mrf.mxu1 }
 0x15c   : > { %v472_v54 = vadd.f32 %v471_v49, %v403_v46 }
 0x15d   : > { %v754_v50 = vpop.f32.mrf.mxu0  ;;  %v765_v51 = vpop.f32.mrf.mxu1 }
 0x15f   : > { %v474_v52 = vpop.f32.mrf.mxu1 }
 0x160   : > { %v475_v59 = vadd.f32 %v474_v52, %v406_v48 }
 0x161   : > { %v766_v53 = vpop.f32.mrf.mxu1 }
 0x167   : > { %v552_v55 = vpop.f32.mrf.mxu0 }
 0x168   : > { %v559_v57 = vadd.f32 %v552_v55, %v472_v54 }
 0x169   : > { %v777_v58 = vpop.f32.mrf.mxu0 }
 0x16a   : > { %v568_v60 = vadd.f32 %v724_v56, %v559_v57 }
 0x16b   : > { %v555_v61 = vpop.f32.mrf.mxu0 }
 0x16c   : > { %v570_v62 = vmax.f32 %v568_v60, 0.0  ;;  %v560_v63 = vadd.f32 %v555_v61, %v475_v59 }
 0x16d   : > { %v778_v0 = vpop.f32.mrf.mxu0 }
 0x16e   : > { %v574_v1 = vcombine.high %v570_v62, %v570_v62  ;;  %579 = vst.msk [vmem:[%s259_s7] sm:$0xf] %vm578_vm2, %v570_v62  ;;  %v569_v2 = vadd.f32 %v724_v56, %v560_v63 }
 0x170   : > { %580 = vst.msk [vmem:[%s259_s7 + $0x4] sm:$0xf] %vm578_vm2, %v574_v1  ;;  %v571_v3 = vmax.f32 %v569_v2, 0.0 }
 0x172   : > { %v575_v4 = vcombine.high %v571_v3, %v571_v3  ;;  %581 = vst.msk [vmem:[%s259_s7 + $0x8] sm:$0xf] %vm578_vm2, %v571_v3 }
 0x174   : > { %582 = vst.msk [vmem:[%s259_s7 + $0xc] sm:$0xf] %vm578_vm2, %v575_v4 }
 0x175 PF: > { %s14_s17 = sadd.s32 1, %s843_s17   ;;  %s982_s15 = smov %s839_s16 }
 0x176   : > { %p11_p5 = scmp.ge.s32.totalorder %s14_s17, 4   ;;  %s983_s16 = smov %s985_s18 }
 0x178   :  { %13 = sbr.rel (!%p11_p5) target bundleno = 2 (0x2), region = 71 }

// kernel: _lambda_.58
= control target key start
LH: loop header
LB: loop body
LE: loop exit
PB: predicated region body
PF: predicated region fallthrough
CT: control target
= control target key end

     0   :  { %s927_s15 = smov 0   ;;  %s929_s16 = smov 0   ;;  %s1031_s0 = inlined_call_operand.vmem [shape: f32[2,4,6,64], index: 0, kind: input, shape index: {}]   ;;  %s1032_s1 = inlined_call_operand.vmem [shape: f32[2,4,6,1], index: 1, kind: input, shape index: {}]   ;;  %s1033_s2 = inlined_call_operand.vmem [shape: bf16[3,64,64], index: 2, kind: input, shape index: {}]   ;;  %s1034_s3 = inlined_call_operand.vmem [shape: f32[1,64], index: 3, kind: input, shape index: {}]   ;;  %s1035_s4 = inlined_call_operand.vmem [shape: f32[2,4,4,64], index: 4, kind: output, shape index: {}]  }
   0x1   :  { %s931_s17 = smov 0  }
   0x2 LB: > { %s26_s18 = sadd.s32 1, %s893_s16  ;;  %p731_p0 = scmp.ge.s32.totalorder %s897_s17, 1  ;;  %s897_s17 = sphi %s931_s17, %s14_s17   ;;  %s893_s16 = sphi %s929_s16, %s1037_s16   ;;  %s889_s15 = sphi %s927_s15, %s1036_s15  }
   0x3   : > { %p28_p1 = scmp.ge.s32.totalorder %s26_s18, 2  ;;  %p200_p2 = scmp.lt.s32.totalorder %s897_s17, 3 }
   0x5   : > { %s1039_s18 = smov (%p28_p1, %s26_s18), 0  ;;  %p201_p3 = pnand %p731_p0, %p200_p2 }
   0x6   : > { %p244_p4 = scmp.lt.s32.totalorder (!%p201_p3), %s889_s15, 1 }
   0x7   : > { %204 = sbr.rel (%p201_p3) target bundleno = 378 (0x17a), region = 36 }
   0xc   : > { %v863_v0 = vld [vmem:[%s1033_s2 + $0x18] sm:$0xff]   ;;  %v899_v1 = vmov 0   ;;  %s1041_s15 = smov (!%p244_p4, %s889_s15), 1  ;;  %v900_v2 = vmov 0.0   ;;  %v865_v4 = vld [vmem:[%s1033_s2 + $0x10] sm:$0xff]   ;;  %v867_v8 = vld [vmem:[%s1033_s2 + $0x8] sm:$0xff]  }
   0xd   : > { %862 = vset.pattern.permute.xlu1 %v899_v1  ;;  %861 = vset.pattern.permute.xlu0 %v899_v1  ;;  %v864_v3 = vld [vmem:[%s1033_s2 + $0x38] sm:$0xff]   ;;  %s780_s23 = sshll.u32 %s1041_s15, 5  ;;  %v866_v5 = vld [vmem:[%s1033_s2 + $0x30] sm:$0xff]   ;;  %v868_v11 = vld [vmem:[%s1033_s2 + $0x28] sm:$0xff]   ;;  %vm901_vm0 = vmmov 0   ;;  %vm327_vm1 = vcmask 1042432  }
   0xe   : > { %810 = vmatprep.subr.bf16.mxu1 %v900_v2  ;;  %798 = vmatprep.subr.bf16.mxu0 %v900_v2  ;;  %s261_s28 = scalar_lea.vmem %s1032_s1, %s780_s23  ;;  %v869_v12 = vld [vmem:[%s1033_s2] sm:$0xff]   ;;  %s251_s19 = scalar_lea.vmem %s1031_s0, %s780_s23  ;;  %vm328_vm2 = vcmask 1046532   ;;  %vm384_vm4 = vcmask 523264   ;;  %v871_v47 = vld [vmem:[%s1033_s2 + $0x58] sm:$0xff]   ;;  %v872_v49 = vld [vmem:[%s1033_s2 + $0x50] sm:$0xff]   ;;  %vm497_vm5 = vcmask 1041408  }
   0xf   : > { %811 = vmatpush3.bf16.msra.mxu1 %v863_v0  ;;  %799 = vmatpush3.bf16.msra.mxu0 %v864_v3  ;;  %v280_v6 = vld [vmem:[%s261_s28 + $0x10] sm:$0x3f]  ;;  %v278_v7 = vld [vmem:[%s261_s28] sm:$0x3f]  ;;  %v281_v9 = vld [vmem:[%s261_s28 + $0x18] sm:$0x3f] }
  0x10   : > { %812 = vmatprep.subr.bf16.mxu1 %v900_v2  ;;  %800 = vmatprep.subr.bf16.mxu0 %v900_v2  ;;  %v279_v10 = vld [vmem:[%s261_s28 + $0x8] sm:$0x3f]  ;;  %v870_v13 = vld [vmem:[%s1033_s2 + $0x20] sm:$0xff]   ;;  %v276_v14 = vld [vmem:[%s251_s19 + $0x10] sm:$0x3f]  ;;  %vm498_vm6 = vcmask 1045508  }
  0x11   : > { %294 = vperm.xlu1 %862, %v280_v6   ;;  %284 = vperm.xlu0 %861, %v278_v7   ;;  %v274_v15 = vld [vmem:[%s251_s19] sm:$0x3f]  ;;  %v277_v20 = vld [vmem:[%s251_s19 + $0x18] sm:$0x3f]  ;;  %v275_v21 = vld [vmem:[%s251_s19 + $0x8] sm:$0x3f] }
  0x12   : > { %818 = vmatprep.mubr.msk.bf16.mxu1 %vm901_vm0, %v900_v2  ;;  %806 = vmatprep.mubr.msk.bf16.mxu0 %vm901_vm0, %v900_v2  ;;  %vm329_vm3 = vmor %vm327_vm1, %vm328_vm2  ;;  %v873_v56 = vld [vmem:[%s1033_s2 + $0x48] sm:$0xff]   ;;  %v874_v63 = vld [vmem:[%s1033_s2 + $0x40] sm:$0xff]   ;;  %s782_s30 = sshll.u32 %s1041_s15, 4  ;;  %vm617_vm8 = vcmask 519168  }
  0x13   : > { %813 = vmatpush3.bf16.msra.mxu1 %v865_v4  ;;  %801 = vmatpush3.bf16.msra.mxu0 %v866_v5  ;;  %vm499_vm7 = vmor %vm497_vm5, %vm498_vm6  ;;  %s271_s7 = scalar_lea.vmem %s1035_s4, %s782_s30 }
  0x14   : > { %814 = vmatprep.subr.bf16.mxu1 %v900_v2  ;;  %802 = vmatprep.subr.bf16.mxu0 %v900_v2 }
  0x15   : > { %299 = vperm.xlu1 %862, %v281_v9   ;;  %289 = vperm.xlu0 %861, %v279_v10  }
  0x17   : > { %815 = vmatpush3.bf16.msra.mxu1 %v867_v8  ;;  %803 = vmatpush3.bf16.msra.mxu0 %v868_v11 }
  0x18   : > { %816 = vmatprep.subr.bf16.mxu1 %v900_v2  ;;  %804 = vmatprep.subr.bf16.mxu0 %v900_v2 }
  0x1b   : > { %817 = vmatpush3.bf16.msra.mxu1 %v869_v12  ;;  %805 = vmatpush3.bf16.msra.mxu0 %v870_v13 }
  0x1c   : > { %822 = vmatprep.subr.bf16.mxu0 %v900_v2 }
  0x8c   : > { %v295_v16 = vpop.permute.xlu1 %294  ;;  %v285_v17 = vpop.permute.xlu0 %284 }
  0x8d   : > { %v304_v18 = vmul.f32 %v295_v16, %v276_v14  ;;  %v302_v19 = vmul.f32 %v285_v17, %v274_v15 }
  0x8f   : > { %v325_v22 = vcombine.high %v304_v18, %v304_v18  ;;  %v323_v25 = vcombine.high %v302_v19, %v302_v19  ;;  %v740_v34 = vrot.slane %v304_v18, 9  ;;  %v738_v37 = vrot.slane %v302_v19, 9 }
  0x90   : > { %v300_v23 = vpop.permute.xlu1 %299  ;;  %v290_v24 = vpop.permute.xlu0 %289  ;;  %v762_v57 = vrot.slane %v304_v18, 10  ;;  %v760_v58 = vrot.slane %v302_v19, 10 }
  0x91   : > { %v305_v26 = vmul.f32 %v300_v23, %v277_v20  ;;  %v303_v27 = vmul.f32 %v290_v24, %v275_v21  ;;  %v340_v28 = vrot.slane %v325_v22, 5  ;;  %v332_v31 = vrot.slane %v323_v25, 5 }
  0x92   : > { %v510_v52 = vrot.slane %v325_v22, 6  ;;  %v502_v53 = vrot.slane %v323_v25, 6 }
  0x93   : > { %v311_v29 = vcombine.low %v304_v18, %v305_v26  ;;  %v326_v30 = vcombine.high %v305_v26, %v305_v26  ;;  %v310_v32 = vcombine.low %v302_v19, %v303_v27  ;;  %v324_v33 = vcombine.high %v303_v27, %v303_v27 }
  0x94   : > { %v741_v35 = vrot.slane %v305_v26, 9  ;;  %v739_v38 = vrot.slane %v303_v27, 9  ;;  %v341_v41 = vsel %vm329_vm3, %v740_v34, %v340_v28  ;;  %v333_v43 = vsel %vm329_vm3, %v738_v37, %v332_v31 }
  0x95   : > { %v344_v36 = vrot.slane %v326_v30, 5  ;;  %v336_v39 = vrot.slane %v324_v33, 5  ;;  %v314_v40 = vpack.c.bf16 %v311_v29, %v310_v32  ;;  %v514_v50 = vrot.slane %v326_v30, 6 }
  0x96   : > { %v506_v51 = vrot.slane %v324_v33, 6  ;;  %v763_v54 = vrot.slane %v305_v26, 10  ;;  %v761_v55 = vrot.slane %v303_v27, 10  ;;  %v511_v61 = vsel %vm499_vm7, %v762_v57, %v510_v52 }
  0x97   : > { %v345_v42 = vsel %vm329_vm3, %v741_v35, %v344_v36  ;;  %819 = vmatmul.mubr.msk.bf16.vlgmr.msra.gmra.mxu1 %vm384_vm4, %v314_v40  ;;  %v337_v44 = vsel %vm329_vm3, %v739_v38, %v336_v39  ;;  %v503_v62 = vsel %vm499_vm7, %v760_v58, %v502_v53 }
  0x98   : > { %v347_v45 = vcombine.low %v341_v41, %v345_v42  ;;  %v346_v46 = vcombine.low %v333_v43, %v337_v44  ;;  %v515_v59 = vsel %vm499_vm7, %v763_v54, %v514_v50  ;;  %v507_v60 = vsel %vm499_vm7, %v761_v55, %v506_v51 }
  0x99   : > { %v516_v0 = vcombine.low %v503_v62, %v507_v60  ;;  %v517_v1 = vcombine.low %v511_v61, %v515_v59 }
  0x9a   : > { %v350_v48 = vpack.c.bf16 %v347_v45, %v346_v46 }
  0x9b   : > { %v520_v3 = vpack.c.bf16 %v517_v1, %v516_v0 }
  0x9c   : > { %807 = vmatmul.mubr.msk.bf16.vlgmr.msra.gmra.mxu0 %vm384_vm4, %v350_v48 }
  0x9d   : > { %823 = vmatpush3.bf16.msra.mxu0 %v871_v47  ;;  %830 = vmatprep.mubr.msk.bf16.mxu0 %vm901_vm0, %v900_v2 }
  0x9e   : > { %824 = vmatprep.subr.bf16.mxu0 %v900_v2 }
  0xa1   : > { %825 = vmatpush3.bf16.msra.mxu0 %v872_v49 }
  0xa2   : > { %826 = vmatprep.subr.bf16.mxu0 %v900_v2 }
  0xa5   : > { %827 = vmatpush3.bf16.msra.mxu0 %v873_v56 }
  0xa6   : > { %828 = vmatprep.subr.bf16.mxu0 %v900_v2  ;;  %v777_v2 = vld [vmem:[%s1034_s3] ss:$0 sm:$0xff] }
  0xa9   : > { %829 = vmatpush3.bf16.msra.mxu0 %v874_v63 }
  0xac   : > { %831 = vmatmul.mubr.msk.bf16.vlgmr.msra.gmra.mxu0 %vm384_vm4, %v520_v3 }
 0x157   : > { %v490_v4 = vpop.f32.mrf.mxu1 }
 0x159   : > { %v820_v5 = vpop.f32.mrf.mxu1 }
 0x15b   : > { %v493_v6 = vpop.f32.mrf.mxu1 }
 0x15c   : > { %v422_v7 = vpop.f32.mrf.mxu0 }
 0x15d   : > { %v821_v8 = vpop.f32.mrf.mxu1  ;;  %v491_v12 = vadd.f32 %v490_v4, %v422_v7 }
 0x15e   : > { %v808_v9 = vpop.f32.mrf.mxu0 }
 0x160   : > { %v425_v10 = vpop.f32.mrf.mxu0 }
 0x161   : > { %v494_v16 = vadd.f32 %v493_v6, %v425_v10 }
 0x162   : > { %v809_v11 = vpop.f32.mrf.mxu0 }
 0x16c   : > { %v591_v13 = vpop.f32.mrf.mxu0 }
 0x16d   : > { %v598_v14 = vadd.f32 %v591_v13, %v491_v12 }
 0x16e   : > { %v832_v15 = vpop.f32.mrf.mxu0 }
 0x16f   : > { %v607_v17 = vadd.f32 %v777_v2, %v598_v14 }
 0x170   : > { %v594_v18 = vpop.f32.mrf.mxu0 }
 0x171   : > { %v609_v19 = vmax.f32 %v607_v17, 0.0  ;;  %v599_v20 = vadd.f32 %v594_v18, %v494_v16 }
 0x172   : > { %v833_v21 = vpop.f32.mrf.mxu0 }
 0x173   : > { %v613_v22 = vcombine.high %v609_v19, %v609_v19  ;;  %618 = vst.msk [vmem:[%s271_s7] sm:$0xf] %vm617_vm8, %v609_v19  ;;  %v608_v23 = vadd.f32 %v777_v2, %v599_v20 }
 0x175   : > { %619 = vst.msk [vmem:[%s271_s7 + $0x4] sm:$0xf] %vm617_vm8, %v613_v22  ;;  %v610_v24 = vmax.f32 %v608_v23, 0.0 }
 0x177   : > { %v614_v25 = vcombine.high %v610_v24, %v610_v24  ;;  %620 = vst.msk [vmem:[%s271_s7 + $0x8] sm:$0xf] %vm617_vm8, %v610_v24 }
 0x179   : > { %621 = vst.msk [vmem:[%s271_s7 + $0xc] sm:$0xf] %vm617_vm8, %v614_v25 }
 0x17a PF: > { %s14_s17 = sadd.s32 1, %s897_s17   ;;  %s1036_s15 = smov %s893_s16 }
 0x17b   : > { %p11_p5 = scmp.ge.s32.totalorder %s14_s17, 4   ;;  %s1037_s16 = smov %s1039_s18 }
 0x17d   :  { %13 = sbr.rel (!%p11_p5) target bundleno = 2 (0x2), region = 71 }

// kernel: _lambda_.60
= control target key start
LH: loop header
LB: loop body
LE: loop exit
PB: predicated region body
PF: predicated region fallthrough
CT: control target
= control target key end

     0   :  { %s1032_s18 = smov 0   ;;  %s1034_s19 = smov 0   ;;  %s1147_s0 = inlined_call_operand.vmem [shape: f32[2,4,6,64], index: 0, kind: input, shape index: {}]   ;;  %s1148_s1 = inlined_call_operand.vmem [shape: f32[2,4,6,1], index: 1, kind: input, shape index: {}]   ;;  %s1149_s2 = inlined_call_operand.vmem [shape: bf16[3,64,64], index: 2, kind: input, shape index: {}]   ;;  %s1150_s3 = inlined_call_operand.vmem [shape: f32[1,64], index: 3, kind: input, shape index: {}]   ;;  %s1151_s4 = inlined_call_operand.vmem [shape: f32[2,4,4,64], index: 4, kind: input, shape index: {}]   ;;  %s1152_s5 = inlined_call_operand.vmem [shape: f32[2,4,4,64], index: 5, kind: output, shape index: {}]  }
   0x1   :  { %s1036_s20 = smov 0  }
   0x2 LB: > { %s27_s21 = sadd.s32 1, %s993_s19  ;;  %p826_p0 = scmp.ge.s32.totalorder %s997_s20, 1  ;;  %s997_s20 = sphi %s1036_s20, %s15_s20   ;;  %s993_s19 = sphi %s1034_s19, %s1154_s19   ;;  %s989_s18 = sphi %s1032_s18, %s1153_s18  }
   0x3   : > { %p29_p1 = scmp.ge.s32.totalorder %s27_s21, 2  ;;  %p242_p2 = scmp.lt.s32.totalorder %s997_s20, 3 }
   0x5   : > { %s1156_s21 = smov (%p29_p1, %s27_s21), 0  ;;  %p243_p3 = pnand %p826_p0, %p242_p2 }
   0x6   : > { %p297_p4 = scmp.lt.s32.totalorder (!%p243_p3), %s989_s18, 1 }
   0x7   : > { %246 = sbr.rel (%p243_p3) target bundleno = 380 (0x17c), region = 40 }
   0xc   : > { %v961_v0 = vld [vmem:[%s1149_s2 + $0x18] sm:$0xff]   ;;  %v999_v1 = vmov 0   ;;  %s1158_s18 = smov (!%p297_p4, %s989_s18), 1  ;;  %v1000_v2 = vmov 0.0   ;;  %v963_v4 = vld [vmem:[%s1149_s2 + $0x10] sm:$0xff]   ;;  %v965_v8 = vld [vmem:[%s1149_s2 + $0x8] sm:$0xff]  }
   0xd   : > { %960 = vset.pattern.permute.xlu1 %v999_v1  ;;  %959 = vset.pattern.permute.xlu0 %v999_v1  ;;  %v962_v3 = vld [vmem:[%s1149_s2 + $0x38] sm:$0xff]   ;;  %s877_s26 = sshll.u32 %s1158_s18, 5  ;;  %v964_v5 = vld [vmem:[%s1149_s2 + $0x30] sm:$0xff]   ;;  %v966_v11 = vld [vmem:[%s1149_s2 + $0x28] sm:$0xff]   ;;  %s879_s13 = sshll.u32 %s1158_s18, 4  ;;  %vm1001_vm0 = vmmov 0  }
   0xe   : > { %908 = vmatprep.subr.bf16.mxu1 %v1000_v2  ;;  %896 = vmatprep.subr.bf16.mxu0 %v1000_v2  ;;  %s314_s6 = scalar_lea.vmem %s1148_s1, %s877_s26  ;;  %v967_v12 = vld [vmem:[%s1149_s2] sm:$0xff]   ;;  %s1093_s22 = scalar_lea.vmem %s1151_s4, %s879_s13  ;;  %vm390_vm1 = vcmask 1042432   ;;  %vm391_vm2 = vcmask 1046532   ;;  %vm447_vm4 = vcmask 523264   ;;  %v969_v47 = vld [vmem:[%s1149_s2 + $0x58] sm:$0xff]   ;;  %v970_v49 = vld [vmem:[%s1149_s2 + $0x50] sm:$0xff]  }
   0xf   : > { %909 = vmatpush3.bf16.msra.mxu1 %v961_v0  ;;  %897 = vmatpush3.bf16.msra.mxu0 %v962_v3  ;;  %v343_v6 = vld [vmem:[%s314_s6 + $0x10] sm:$0x3f]  ;;  %v341_v7 = vld [vmem:[%s314_s6] sm:$0x3f]  ;;  %v344_v9 = vld [vmem:[%s314_s6 + $0x18] sm:$0x3f]  ;;  %s304_s28 = scalar_lea.vmem %s1147_s0, %s877_s26  ;;  %s334_s16 = scalar_lea.vmem %s1152_s5, %s879_s13 }
  0x10   : > { %910 = vmatprep.subr.bf16.mxu1 %v1000_v2  ;;  %898 = vmatprep.subr.bf16.mxu0 %v1000_v2  ;;  %v342_v10 = vld [vmem:[%s314_s6 + $0x8] sm:$0x3f]  ;;  %v968_v13 = vld [vmem:[%s1149_s2 + $0x20] sm:$0xff]   ;;  %v339_v14 = vld [vmem:[%s304_s28 + $0x10] sm:$0x3f]  ;;  %vm560_vm5 = vcmask 1041408  }
  0x11   : > { %357 = vperm.xlu1 %960, %v343_v6   ;;  %347 = vperm.xlu0 %959, %v341_v7   ;;  %v337_v15 = vld [vmem:[%s304_s28] sm:$0x3f]  ;;  %v340_v20 = vld [vmem:[%s304_s28 + $0x18] sm:$0x3f]  ;;  %v338_v21 = vld [vmem:[%s304_s28 + $0x8] sm:$0x3f] }
  0x12   : > { %916 = vmatprep.mubr.msk.bf16.mxu1 %vm1001_vm0, %v1000_v2  ;;  %904 = vmatprep.mubr.msk.bf16.mxu0 %vm1001_vm0, %v1000_v2  ;;  %vm392_vm3 = vmor %vm390_vm1, %vm391_vm2  ;;  %vm561_vm6 = vcmask 1045508   ;;  %v971_v56 = vld [vmem:[%s1149_s2 + $0x48] sm:$0xff]   ;;  %v972_v63 = vld [vmem:[%s1149_s2 + $0x40] sm:$0xff]   ;;  %vm694_vm8 = vcmask 519168  }
  0x13   : > { %911 = vmatpush3.bf16.msra.mxu1 %v963_v4  ;;  %899 = vmatpush3.bf16.msra.mxu0 %v964_v5  ;;  %vm562_vm7 = vmor %vm560_vm5, %vm561_vm6 }
  0x14   : > { %912 = vmatprep.subr.bf16.mxu1 %v1000_v2  ;;  %900 = vmatprep.subr.bf16.mxu0 %v1000_v2 }
  0x15   : > { %362 = vperm.xlu1 %960, %v344_v9   ;;  %352 = vperm.xlu0 %959, %v342_v10  }
  0x17   : > { %913 = vmatpush3.bf16.msra.mxu1 %v965_v8  ;;  %901 = vmatpush3.bf16.msra.mxu0 %v966_v11 }
  0x18   : > { %914 = vmatprep.subr.bf16.mxu1 %v1000_v2  ;;  %902 = vmatprep.subr.bf16.mxu0 %v1000_v2 }
  0x1b   : > { %915 = vmatpush3.bf16.msra.mxu1 %v967_v12  ;;  %903 = vmatpush3.bf16.msra.mxu0 %v968_v13 }
  0x1c   : > { %920 = vmatprep.subr.bf16.mxu0 %v1000_v2 }
  0x8c   : > { %v358_v16 = vpop.permute.xlu1 %357  ;;  %v348_v17 = vpop.permute.xlu0 %347 }
  0x8d   : > { %v367_v18 = vmul.f32 %v358_v16, %v339_v14  ;;  %v365_v19 = vmul.f32 %v348_v17, %v337_v15  ;;  %v973_v15 = vld [vmem:[%s1093_s22] sm:$0xff]  }
  0x8f   : > { %v388_v22 = vcombine.high %v367_v18, %v367_v18  ;;  %v386_v25 = vcombine.high %v365_v19, %v365_v19  ;;  %v837_v34 = vrot.slane %v367_v18, 9  ;;  %v835_v37 = vrot.slane %v365_v19, 9 }
  0x90   : > { %v363_v23 = vpop.permute.xlu1 %362  ;;  %v353_v24 = vpop.permute.xlu0 %352  ;;  %v859_v57 = vrot.slane %v367_v18, 10  ;;  %v857_v58 = vrot.slane %v365_v19, 10 }
  0x91   : > { %v368_v26 = vmul.f32 %v363_v23, %v340_v20  ;;  %v366_v27 = vmul.f32 %v353_v24, %v338_v21  ;;  %v403_v28 = vrot.slane %v388_v22, 5  ;;  %v395_v31 = vrot.slane %v386_v25, 5 }
  0x92   : > { %v573_v52 = vrot.slane %v388_v22, 6  ;;  %v565_v53 = vrot.slane %v386_v25, 6  ;;  %v974_v22 = vld [vmem:[%s1093_s22 + $0x8] sm:$0xff]  }
  0x93   : > { %v374_v29 = vcombine.low %v367_v18, %v368_v26  ;;  %v389_v30 = vcombine.high %v368_v26, %v368_v26  ;;  %v373_v32 = vcombine.low %v365_v19, %v366_v27  ;;  %v387_v33 = vcombine.high %v366_v27, %v366_v27 }
  0x94   : > { %v838_v35 = vrot.slane %v368_v26, 9  ;;  %v836_v38 = vrot.slane %v366_v27, 9  ;;  %v404_v41 = vsel %vm392_vm3, %v837_v34, %v403_v28  ;;  %v396_v43 = vsel %vm392_vm3, %v835_v37, %v395_v31 }
  0x95   : > { %v407_v36 = vrot.slane %v389_v30, 5  ;;  %v399_v39 = vrot.slane %v387_v33, 5  ;;  %v377_v40 = vpack.c.bf16 %v374_v29, %v373_v32  ;;  %v577_v50 = vrot.slane %v389_v30, 6 }
  0x96   : > { %v569_v51 = vrot.slane %v387_v33, 6  ;;  %v860_v54 = vrot.slane %v368_v26, 10  ;;  %v858_v55 = vrot.slane %v366_v27, 10  ;;  %v574_v61 = vsel %vm562_vm7, %v859_v57, %v573_v52 }
  0x97   : > { %v408_v42 = vsel %vm392_vm3, %v838_v35, %v407_v36  ;;  %917 = vmatmul.mubr.msk.bf16.vlgmr.msra.gmra.mxu1 %vm447_vm4, %v377_v40  ;;  %v400_v44 = vsel %vm392_vm3, %v836_v38, %v399_v39  ;;  %v566_v62 = vsel %vm562_vm7, %v857_v58, %v565_v53 }
  0x98   : > { %v410_v45 = vcombine.low %v404_v41, %v408_v42  ;;  %v409_v46 = vcombine.low %v396_v43, %v400_v44  ;;  %v578_v59 = vsel %vm562_vm7, %v860_v54, %v577_v50  ;;  %v570_v60 = vsel %vm562_vm7, %v858_v55, %v569_v51 }
  0x99   : > { %v579_v0 = vcombine.low %v566_v62, %v570_v60  ;;  %v580_v1 = vcombine.low %v574_v61, %v578_v59 }
  0x9a   : > { %v413_v48 = vpack.c.bf16 %v410_v45, %v409_v46 }
  0x9b   : > { %v583_v3 = vpack.c.bf16 %v580_v1, %v579_v0 }
  0x9c   : > { %905 = vmatmul.mubr.msk.bf16.vlgmr.msra.gmra.mxu0 %vm447_vm4, %v413_v48 }
  0x9d   : > { %921 = vmatpush3.bf16.msra.mxu0 %v969_v47  ;;  %928 = vmatprep.mubr.msk.bf16.mxu0 %vm1001_vm0, %v1000_v2 }
  0x9e   : > { %922 = vmatprep.subr.bf16.mxu0 %v1000_v2 }
  0xa1   : > { %923 = vmatpush3.bf16.msra.mxu0 %v970_v49 }
  0xa2   : > { %924 = vmatprep.subr.bf16.mxu0 %v1000_v2 }
  0xa5   : > { %925 = vmatpush3.bf16.msra.mxu0 %v971_v56 }
  0xa6   : > { %926 = vmatprep.subr.bf16.mxu0 %v1000_v2  ;;  %v874_v2 = vld [vmem:[%s1150_s3] ss:$0 sm:$0xff] }
  0xa9   : > { %927 = vmatpush3.bf16.msra.mxu0 %v972_v63 }
  0xac   : > { %929 = vmatmul.mubr.msk.bf16.vlgmr.msra.gmra.mxu0 %vm447_vm4, %v583_v3 }
 0x157   : > { %v553_v4 = vpop.f32.mrf.mxu1 }
 0x159   : > { %v918_v5 = vpop.f32.mrf.mxu1 }
 0x15b   : > { %v556_v6 = vpop.f32.mrf.mxu1 }
 0x15c   : > { %v485_v7 = vpop.f32.mrf.mxu0 }
 0x15d   : > { %v919_v8 = vpop.f32.mrf.mxu1  ;;  %v554_v12 = vadd.f32 %v553_v4, %v485_v7 }
 0x15e   : > { %v906_v9 = vpop.f32.mrf.mxu0 }
 0x160   : > { %v488_v10 = vpop.f32.mrf.mxu0 }
 0x161   : > { %v557_v17 = vadd.f32 %v556_v6, %v488_v10 }
 0x162   : > { %v907_v11 = vpop.f32.mrf.mxu0 }
 0x16c   : > { %v654_v13 = vpop.f32.mrf.mxu0 }
 0x16d   : > { %v661_v14 = vadd.f32 %v654_v13, %v554_v12 }
 0x16e   : > { %v930_v16 = vpop.f32.mrf.mxu0 }
 0x16f   : > { %v670_v18 = vadd.f32 %v874_v2, %v661_v14 }
 0x170   : > { %v657_v19 = vpop.f32.mrf.mxu0 }
 0x171   : > { %v684_v20 = vadd.f32 %v973_v15, %v670_v18  ;;  %v662_v21 = vadd.f32 %v657_v19, %v557_v17 }
 0x172   : > { %v931_v23 = vpop.f32.mrf.mxu0 }
 0x173   : > { %v686_v24 = vmax.f32 %v684_v20, 0.0  ;;  %v671_v25 = vadd.f32 %v874_v2, %v662_v21 }
 0x175   : > { %v690_v26 = vcombine.high %v686_v24, %v686_v24  ;;  %695 = vst.msk [vmem:[%s334_s16] sm:$0xf] %vm694_vm8, %v686_v24  ;;  %v685_v27 = vadd.f32 %v974_v22, %v671_v25 }
 0x177   : > { %696 = vst.msk [vmem:[%s334_s16 + $0x4] sm:$0xf] %vm694_vm8, %v690_v26  ;;  %v687_v28 = vmax.f32 %v685_v27, 0.0 }
 0x179   : > { %v691_v29 = vcombine.high %v687_v28, %v687_v28  ;;  %697 = vst.msk [vmem:[%s334_s16 + $0x8] sm:$0xf] %vm694_vm8, %v687_v28 }
 0x17b   : > { %698 = vst.msk [vmem:[%s334_s16 + $0xc] sm:$0xf] %vm694_vm8, %v691_v29 }
 0x17c PF: > { %s15_s20 = sadd.s32 1, %s997_s20   ;;  %s1153_s18 = smov %s993_s19 }
 0x17d   : > { %p12_p5 = scmp.ge.s32.totalorder %s15_s20, 4   ;;  %s1154_s19 = smov %s1156_s21 }
 0x17f   :  { %14 = sbr.rel (!%p12_p5) target bundleno = 2 (0x2), region = 78 }

// kernel: _lambda_.78
= control target key start
LH: loop header
LB: loop body
LE: loop exit
PB: predicated region body
PF: predicated region fallthrough
CT: control target
= control target key end

     0   :  { %s1033_s15 = smov 0   ;;  %s1035_s16 = smov 0   ;;  %s1188_s0 = inlined_call_operand.vmem [shape: f32[2,4,2,128], index: 0, kind: input, shape index: {}]   ;;  %s1189_s1 = inlined_call_operand.vmem [shape: f32[2,4,2,1], index: 1, kind: input, shape index: {}]   ;;  %s1190_s2 = inlined_call_operand.vmem [shape: bf16[3,128,128], index: 2, kind: input, shape index: {}]   ;;  %s1191_s3 = inlined_call_operand.vmem [shape: f32[1,128], index: 3, kind: input, shape index: {}]   ;;  %s1192_s4 = inlined_call_operand.vmem [shape: f32[2,2,2,128], index: 4, kind: output, shape index: {}]  }
   0x1   :  { %s1037_s17 = smov 0  }
   0x2 LB: > { %s26_s18 = sadd.s32 1, %s998_s16  ;;  %p769_p0 = scmp.ge.s32.totalorder %s1002_s17, 1  ;;  %s1002_s17 = sphi %s1037_s17, %s14_s17   ;;  %s998_s16 = sphi %s1035_s16, %s1194_s16   ;;  %s994_s15 = sphi %s1033_s15, %s1193_s15  }
   0x3   : > { %p28_p1 = scmp.ge.s32.totalorder %s26_s18, 2  ;;  %p196_p2 = scmp.lt.s32.totalorder %s1002_s17, 3 }
   0x5   : > { %s1196_s18 = smov (%p28_p1, %s26_s18), 0  ;;  %p197_p3 = pnand %p769_p0, %p196_p2 }
   0x6   : > { %p236_p4 = scmp.lt.s32.totalorder (!%p197_p3), %s994_s15, 1 }
   0x7   : > { %200 = sbr.rel (%p197_p3) target bundleno = 389 (0x185), region = 36 }
   0xc   : > { %v956_v0 = vld [vmem:[%s1190_s2 + $0x38] sm:$0xff]   ;;  %v1004_v1 = vmov 0   ;;  %s1198_s15 = smov (!%p236_p4, %s994_s15), 1  ;;  %v1005_v2 = vmov 0.0   ;;  %v958_v4 = vld [vmem:[%s1190_s2 + $0x30] sm:$0xff]   ;;  %v960_v8 = vld [vmem:[%s1190_s2 + $0x28] sm:$0xff]   ;;  %v299_v24 = vlaneseq }
   0xd   : > { %955 = vset.pattern.permute.xlu1 %v1004_v1  ;;  %954 = vset.pattern.permute.xlu0 %v1004_v1  ;;  %v957_v3 = vld [vmem:[%s1190_s2 + $0x78] sm:$0xff]   ;;  %s836_s25 = sshll.u32 %s1198_s15, 3  ;;  %v959_v5 = vld [vmem:[%s1190_s2 + $0x70] sm:$0xff]   ;;  %v961_v11 = vld [vmem:[%s1190_s2 + $0x68] sm:$0xff]   ;;  %vm1006_vm0 = vmmov 0   ;;  %s838_s7 = sshll.u32 %s1198_s15, 2 }
   0xe   : > { %886 = vmatprep.subr.bf16.mxu1 %v1005_v2  ;;  %866 = vmatprep.subr.bf16.mxu0 %v1005_v2  ;;  %s251_s30 = scalar_lea.vmem %s1189_s1, %s836_s25  ;;  %v962_v12 = vld [vmem:[%s1190_s2 + $0x20] sm:$0xff]   ;;  %v964_v14 = vld [vmem:[%s1190_s2 + $0x18] sm:$0xff]   ;;  %v966_v16 = vld [vmem:[%s1190_s2 + $0x10] sm:$0xff]   ;;  %v1007_v22 = vmov 1983009808   ;;  %s1133_s10 = scalar_lea.vmem %s1188_s0, %s836_s25  ;;  %v300_v26 = vshrl.u32 %v299_v24, 7 }
   0xf   : > { %887 = vmatpush3.bf16.msra.mxu1 %v956_v0  ;;  %867 = vmatpush3.bf16.msra.mxu0 %v957_v3  ;;  %v266_v6 = vld [vmem:[%s251_s30 + $0x2] sm:$0x3]  ;;  %v265_v7 = vld [vmem:[%s251_s30] sm:$0x3]  ;;  %v267_v9 = vld [vmem:[%s251_s30 + $0x4] sm:$0x3]  ;;  %v297_v23 = vunpack.c.l.s4 %v1007_v22 }
  0x10   : > { %888 = vmatprep.subr.bf16.mxu1 %v1005_v2  ;;  %868 = vmatprep.subr.bf16.mxu0 %v1005_v2  ;;  %v268_v10 = vld [vmem:[%s251_s30 + $0x6] sm:$0x3]  ;;  %v965_v15 = vld [vmem:[%s1190_s2 + $0x58] sm:$0xff]   ;;  %v967_v17 = vld [vmem:[%s1190_s2 + $0x50] sm:$0xff]  }
  0x11   : > { %276 = vperm.xlu0 %954, %v266_v6   ;;  %271 = vperm.xlu1 %955, %v265_v7   ;;  %v963_v13 = vld [vmem:[%s1190_s2 + $0x60] sm:$0xff]   ;;  %v968_v18 = vld [vmem:[%s1190_s2 + $0x8] sm:$0xff]   ;;  %v298_v25 = vunpack.c.0.s8 %v297_v23  ;;  %v972_v42 = vld [vmem:[%s1190_s2 + $0xb8] sm:$0xff]  }
  0x12   : > { %902 = vmatprep.mubr.msk.bf16.mxu1 %vm1006_vm0, %v1005_v2  ;;  %882 = vmatprep.mubr.msk.bf16.mxu0 %vm1006_vm0, %v1005_v2  ;;  %v969_v19 = vld [vmem:[%s1190_s2 + $0x48] sm:$0xff]   ;;  %v970_v20 = vld [vmem:[%s1190_s2] sm:$0xff]   ;;  %v973_v44 = vld [vmem:[%s1190_s2 + $0xb0] sm:$0xff]  }
  0x13   : > { %889 = vmatpush3.bf16.msra.mxu1 %v958_v4  ;;  %869 = vmatpush3.bf16.msra.mxu0 %v959_v5  ;;  %v971_v21 = vld [vmem:[%s1190_s2 + $0x40] sm:$0xff]   ;;  %v301_v33 = vsub.s32 %v298_v25, %v300_v26  ;;  %v974_v45 = vld [vmem:[%s1190_s2 + $0xa8] sm:$0xff]   ;;  %v976_v47 = vld [vmem:[%s1190_s2 + $0x98] sm:$0xff]  }
  0x14   : > { %890 = vmatprep.subr.bf16.mxu1 %v1005_v2  ;;  %870 = vmatprep.subr.bf16.mxu0 %v1005_v2  ;;  %v262_v27 = vld [vmem:[%s1133_s10 + $0x2] sm:$0x3]  ;;  %v261_v28 = vld [vmem:[%s1133_s10] sm:$0x3]  ;;  %v263_v34 = vld [vmem:[%s1133_s10 + $0x4] sm:$0x3] }
  0x15   : > { %281 = vperm.xlu0 %954, %v267_v9   ;;  %286 = vperm.xlu1 %955, %v268_v10   ;;  %v975_v46 = vld [vmem:[%s1190_s2 + $0xa0] sm:$0xff]   ;;  %v977_v50 = vld [vmem:[%s1190_s2 + $0x90] sm:$0xff]   ;;  %v978_v52 = vld [vmem:[%s1190_s2 + $0x88] sm:$0xff]  }
  0x16   : > { %v264_v49 = vld [vmem:[%s1133_s10 + $0x6] sm:$0x3]  ;;  %v832_v4 = vld [vmem:[%s1191_s3] ss:$0 sm:$0xff]  ;;  %s259_s10 = scalar_lea.vmem %s1192_s4, %s838_s7 }
  0x17   : > { %891 = vmatpush3.bf16.msra.mxu1 %v960_v8  ;;  %871 = vmatpush3.bf16.msra.mxu0 %v961_v11  ;;  %v979_v54 = vld [vmem:[%s1190_s2 + $0x80] sm:$0xff]  }
  0x18   : > { %892 = vmatprep.subr.bf16.mxu1 %v1005_v2  ;;  %872 = vmatprep.subr.bf16.mxu0 %v1005_v2 }
  0x1b   : > { %893 = vmatpush3.bf16.msra.mxu1 %v962_v12  ;;  %873 = vmatpush3.bf16.msra.mxu0 %v963_v13 }
  0x1c   : > { %894 = vmatprep.subr.bf16.mxu1 %v1005_v2  ;;  %874 = vmatprep.subr.bf16.mxu0 %v1005_v2 }
  0x1f   : > { %895 = vmatpush3.bf16.msra.mxu1 %v964_v14  ;;  %875 = vmatpush3.bf16.msra.mxu0 %v965_v15 }
  0x20   : > { %896 = vmatprep.subr.bf16.mxu1 %v1005_v2  ;;  %876 = vmatprep.subr.bf16.mxu0 %v1005_v2 }
  0x23   : > { %897 = vmatpush3.bf16.msra.mxu1 %v966_v16  ;;  %877 = vmatpush3.bf16.msra.mxu0 %v967_v17 }
  0x24   : > { %898 = vmatprep.subr.bf16.mxu1 %v1005_v2  ;;  %878 = vmatprep.subr.bf16.mxu0 %v1005_v2 }
  0x27   : > { %899 = vmatpush3.bf16.msra.mxu1 %v968_v18  ;;  %879 = vmatpush3.bf16.msra.mxu0 %v969_v19 }
  0x28   : > { %900 = vmatprep.subr.bf16.mxu1 %v1005_v2  ;;  %880 = vmatprep.subr.bf16.mxu0 %v1005_v2 }
  0x2b   : > { %901 = vmatpush3.bf16.msra.mxu1 %v970_v20  ;;  %881 = vmatpush3.bf16.msra.mxu0 %v971_v21 }
  0x2c   : > { %906 = vmatprep.subr.bf16.mxu0 %v1005_v2 }
  0x8c   : > { %v277_v29 = vpop.permute.xlu0 %276  ;;  %v272_v30 = vpop.permute.xlu1 %271 }
  0x8d   : > { %v290_v31 = vmul.f32 %v277_v29, %v262_v27  ;;  %v289_v32 = vmul.f32 %v272_v30, %v261_v28 }
  0x8f   : > { %v295_v35 = vcombine.low %v289_v32, %v290_v31 }
  0x90   : > { %v282_v36 = vpop.permute.xlu0 %281  ;;  %v287_v48 = vpop.permute.xlu1 %286 }
  0x91   : > { %v291_v37 = vmul.f32 %v282_v36, %v263_v34  ;;  %v302_v38 = vrot.slane %v295_v35, %v301_v33  ;;  %v292_v51 = vmul.f32 %v287_v48, %v264_v49 }
  0x93   : > { %v322_v39 = vcombine.low %v290_v31, %v291_v37  ;;  %v304_v40 = vpack.c.bf16 %v302_v38, %v302_v38  ;;  %v526_v53 = vcombine.low %v291_v37, %v292_v51 }
  0x95   : > { %903 = vmatmul.mubr.bf16.vlgmr.msra.gmra.mxu1 %v304_v40  ;;  %v329_v41 = vrot.slane %v322_v39, %v301_v33  ;;  %v533_v55 = vrot.slane %v526_v53, %v301_v33 }
  0x97   : > { %v331_v43 = vpack.c.bf16 %v329_v41, %v329_v41  ;;  %v535_v56 = vpack.c.bf16 %v533_v55, %v533_v55 }
  0x99   : > { %883 = vmatmul.mubr.bf16.vlgmr.msra.gmra.mxu0 %v331_v43 }
  0x9a   : > { %907 = vmatpush3.bf16.msra.mxu0 %v972_v42  ;;  %922 = vmatprep.mubr.msk.bf16.mxu0 %vm1006_vm0, %v1005_v2 }
  0x9b   : > { %908 = vmatprep.subr.bf16.mxu0 %v1005_v2 }
  0x9e   : > { %909 = vmatpush3.bf16.msra.mxu0 %v973_v44 }
  0x9f   : > { %910 = vmatprep.subr.bf16.mxu0 %v1005_v2 }
  0xa2   : > { %911 = vmatpush3.bf16.msra.mxu0 %v974_v45 }
  0xa3   : > { %912 = vmatprep.subr.bf16.mxu0 %v1005_v2 }
  0xa6   : > { %913 = vmatpush3.bf16.msra.mxu0 %v975_v46 }
  0xa7   : > { %914 = vmatprep.subr.bf16.mxu0 %v1005_v2 }
  0xaa   : > { %915 = vmatpush3.bf16.msra.mxu0 %v976_v47 }
  0xab   : > { %916 = vmatprep.subr.bf16.mxu0 %v1005_v2 }
  0xae   : > { %917 = vmatpush3.bf16.msra.mxu0 %v977_v50 }
  0xaf   : > { %918 = vmatprep.subr.bf16.mxu0 %v1005_v2 }
  0xb2   : > { %919 = vmatpush3.bf16.msra.mxu0 %v978_v52 }
  0xb3   : > { %920 = vmatprep.subr.bf16.mxu0 %v1005_v2 }
  0xb6   : > { %921 = vmatpush3.bf16.msra.mxu0 %v979_v54 }
  0xb9   : > { %923 = vmatmul.mubr.bf16.vlgmr.msra.gmra.mxu0 %v535_v56 }
 0x155   : > { %v519_v57 = vpop.f32.mrf.mxu1 }
 0x157   : > { %v904_v58 = vpop.f32.mrf.mxu1 }
 0x159   : > { %v431_v59 = vpop.f32.mrf.mxu0  ;;  %v522_v60 = vpop.f32.mrf.mxu1 }
 0x15a   : > { %v520_v1 = vadd.f32 %v519_v57, %v431_v59 }
 0x15b   : > { %v884_v61 = vpop.f32.mrf.mxu0  ;;  %v905_v62 = vpop.f32.mrf.mxu1 }
 0x15d   : > { %v434_v63 = vpop.f32.mrf.mxu0 }
 0x15f   : > { %v885_v0 = vpop.f32.mrf.mxu0 }
 0x179   : > { %v635_v3 = vpop.f32.mrf.mxu0 }
 0x17a   : > { %v641_v5 = vadd.f32 %v635_v3, %v520_v1 }
 0x17b   : > { %v924_v2 = vpop.f32.mrf.mxu0 }
 0x17c   : > { %v649_v6 = vadd.f32 %v832_v4, %v641_v5 }
 0x17d   : > { %v638_v7 = vpop.f32.mrf.mxu0 }
 0x17e   : > { %v650_v8 = vmax.f32 %v649_v6, 0.0 }
 0x17f   : > { %v925_v9 = vpop.f32.mrf.mxu0 }
 0x180   : > { %v658_v10 = vrot.slane %v650_v8, %v301_v33  ;;  %833 = vst.sshfl [vmem:[%s259_s10] sm:$0x3 pattern:$0x76325410] %v650_v8 }
 0x182   : > { %v659_v11 = vcombine.high %v658_v10, %v658_v10 }
 0x184   : > { %663 = vst [vmem:[%s259_s10 + $0x2] sm:$0x3] %v659_v11 }
 0x185 PF: > { %s14_s17 = sadd.s32 1, %s1002_s17   ;;  %s1193_s15 = smov %s998_s16 }
 0x186   : > { %p11_p5 = scmp.ge.s32.totalorder %s14_s17, 4   ;;  %s1194_s16 = smov %s1196_s18 }
 0x188   :  { %13 = sbr.rel (!%p11_p5) target bundleno = 2 (0x2), region = 71 }

// kernel: _lambda_.79
= control target key start
LH: loop header
LB: loop body
LE: loop exit
PB: predicated region body
PF: predicated region fallthrough
CT: control target
= control target key end

     0   :  { %s1065_s15 = smov 0   ;;  %s1067_s16 = smov 0   ;;  %s1222_s0 = inlined_call_operand.vmem [shape: f32[2,2,4,128], index: 0, kind: input, shape index: {}]   ;;  %s1223_s1 = inlined_call_operand.vmem [shape: f32[2,2,4,1], index: 1, kind: input, shape index: {}]   ;;  %s1224_s2 = inlined_call_operand.vmem [shape: bf16[3,128,128], index: 2, kind: input, shape index: {}]   ;;  %s1225_s3 = inlined_call_operand.vmem [shape: f32[1,128], index: 3, kind: input, shape index: {}]   ;;  %s1226_s4 = inlined_call_operand.vmem [shape: f32[2,2,2,128], index: 4, kind: output, shape index: {}]  }
   0x1   :  { %s1069_s17 = smov 0  }
   0x2 LB: > { %s26_s18 = sadd.s32 1, %s1030_s16  ;;  %p799_p0 = scmp.ge.s32.totalorder %s1034_s17, 1  ;;  %s1034_s17 = sphi %s1069_s17, %s14_s17   ;;  %s1030_s16 = sphi %s1067_s16, %s1228_s16   ;;  %s1026_s15 = sphi %s1065_s15, %s1227_s15  }
   0x3   : > { %p28_p1 = scmp.ge.s32.totalorder %s26_s18, 2  ;;  %p200_p2 = scmp.lt.s32.totalorder %s1034_s17, 3 }
   0x5   : > { %s1230_s18 = smov (%p28_p1, %s26_s18), 0  ;;  %p201_p3 = pnand %p799_p0, %p200_p2 }
   0x6   : > { %p244_p4 = scmp.lt.s32.totalorder (!%p201_p3), %s1026_s15, 1 }
   0x7   : > { %204 = sbr.rel (%p201_p3) target bundleno = 395 (0x18b), region = 36 }
   0xc   : > { %v988_v0 = vld [vmem:[%s1224_s2 + $0x38] sm:$0xff]   ;;  %v1036_v1 = vmov 0   ;;  %v1037_v2 = vmov 0.0   ;;  %s1232_s15 = smov (!%p244_p4, %s1026_s15), 1  ;;  %v989_v3 = vld [vmem:[%s1224_s2 + $0x30] sm:$0xff]   ;;  %v991_v7 = vld [vmem:[%s1224_s2 + $0x28] sm:$0xff]   ;;  %v296_v22 = vlaneseq }
   0xd   : > { %987 = vset.pattern.permute.xlu0 %v1036_v1  ;;  %919 = vmatprep.subr.bf16.mxu1 %v1037_v2  ;;  %v990_v4 = vld [vmem:[%s1224_s2 + $0x78] sm:$0xff]   ;;  %s869_s25 = sshll.u32 %s1232_s15, 3  ;;  %v992_v5 = vld [vmem:[%s1224_s2 + $0x70] sm:$0xff]   ;;  %v994_v9 = vld [vmem:[%s1224_s2 + $0x68] sm:$0xff]   ;;  %vm1038_vm0 = vmmov 0   ;;  %vm334_vm1 = vcmask 1040384  }
   0xe   : > { %920 = vmatpush3.bf16.msra.mxu1 %v988_v0  ;;  %899 = vmatprep.subr.bf16.mxu0 %v1037_v2  ;;  %s261_s28 = scalar_lea.vmem %s1223_s1, %s869_s25  ;;  %v993_v10 = vld [vmem:[%s1224_s2 + $0x20] sm:$0xff]   ;;  %v995_v12 = vld [vmem:[%s1224_s2 + $0x18] sm:$0xff]   ;;  %v997_v14 = vld [vmem:[%s1224_s2 + $0x10] sm:$0xff]   ;;  %v1039_v20 = vmov 1983009808   ;;  %v297_v24 = vshrl.u32 %v296_v22, 7  ;;  %s251_s10 = scalar_lea.vmem %s1222_s0, %s869_s25 }
   0xf   : > { %921 = vmatprep.subr.bf16.mxu1 %v1037_v2  ;;  %900 = vmatpush3.bf16.msra.mxu0 %v990_v4  ;;  %v276_v6 = vld [vmem:[%s261_s28] sm:$0xf]  ;;  %v277_v8 = vld [vmem:[%s261_s28 + $0x4] sm:$0xf]  ;;  %v998_v13 = vld [vmem:[%s1224_s2 + $0x58] sm:$0xff]   ;;  %v294_v21 = vunpack.c.l.s4 %v1039_v20  ;;  %vm335_vm2 = vcmask 1042434  }
  0x10   : > { %901 = vmatprep.subr.bf16.mxu0 %v1037_v2  ;;  %280 = vperm.xlu0 %987, %v276_v6   ;;  %v996_v11 = vld [vmem:[%s1224_s2 + $0x60] sm:$0xff]   ;;  %v999_v15 = vld [vmem:[%s1224_s2 + $0x8] sm:$0xff]   ;;  %v1000_v16 = vld [vmem:[%s1224_s2 + $0x50] sm:$0xff]   ;;  %vm337_vm4 = vcmask 1044484   ;;  %vm339_vm6 = vcmask 1046534   ;;  %s871_s7 = sshll.u32 %s1232_s15, 2 }
  0x11   : > { %935 = vmatprep.mubr.msk.bf16.mxu1 %vm1038_vm0, %v1037_v2  ;;  %915 = vmatprep.mubr.msk.bf16.mxu0 %vm1038_vm0, %v1037_v2  ;;  %v1002_v17 = vld [vmem:[%s1224_s2 + $0x48] sm:$0xff]   ;;  %v1001_v18 = vld [vmem:[%s1224_s2] sm:$0xff]   ;;  %v295_v23 = vunpack.c.0.s8 %v294_v21  ;;  %vm336_vm3 = vmor %vm334_vm1, %vm335_vm2 }
  0x12   : > { %922 = vmatpush3.bf16.msra.mxu1 %v989_v3  ;;  %v1003_v19 = vld [vmem:[%s1224_s2 + $0x40] sm:$0xff]   ;;  %vm338_vm5 = vmor %vm336_vm3, %vm337_vm4  ;;  %v1004_v47 = vld [vmem:[%s1224_s2 + $0xb8] sm:$0xff]  }
  0x13   : > { %923 = vmatprep.subr.bf16.mxu1 %v1037_v2  ;;  %902 = vmatpush3.bf16.msra.mxu0 %v992_v5  ;;  %v274_v25 = vld [vmem:[%s251_s10] sm:$0xf]  ;;  %v1165_v26 = vsub.s32 %v295_v23, %v297_v24  ;;  %v275_v29 = vld [vmem:[%s251_s10 + $0x4] sm:$0xf]  ;;  %vm340_vm7 = vmor %vm338_vm5, %vm339_vm6  ;;  %s271_s10 = scalar_lea.vmem %s1226_s4, %s871_s7 }
  0x14   : > { %903 = vmatprep.subr.bf16.mxu0 %v1037_v2  ;;  %285 = vperm.xlu0 %987, %v277_v8   ;;  %v1005_v49 = vld [vmem:[%s1224_s2 + $0xb0] sm:$0xff]   ;;  %v1006_v50 = vld [vmem:[%s1224_s2 + $0xa8] sm:$0xff]   ;;  %v1007_v51 = vld [vmem:[%s1224_s2 + $0xa0] sm:$0xff]  }
  0x15   : > { %v1008_v52 = vld [vmem:[%s1224_s2 + $0x98] sm:$0xff]   ;;  %v1009_v53 = vld [vmem:[%s1224_s2 + $0x90] sm:$0xff]   ;;  %v1010_v54 = vld [vmem:[%s1224_s2 + $0x88] sm:$0xff]  }
  0x16   : > { %924 = vmatpush3.bf16.msra.mxu1 %v991_v7  ;;  %v1011_v56 = vld [vmem:[%s1224_s2 + $0x80] sm:$0xff]  }
  0x17   : > { %925 = vmatprep.subr.bf16.mxu1 %v1037_v2  ;;  %904 = vmatpush3.bf16.msra.mxu0 %v994_v9 }
  0x18   : > { %905 = vmatprep.subr.bf16.mxu0 %v1037_v2 }
  0x1a   : > { %926 = vmatpush3.bf16.msra.mxu1 %v993_v10 }
  0x1b   : > { %927 = vmatprep.subr.bf16.mxu1 %v1037_v2  ;;  %906 = vmatpush3.bf16.msra.mxu0 %v996_v11 }
  0x1c   : > { %907 = vmatprep.subr.bf16.mxu0 %v1037_v2 }
  0x1e   : > { %928 = vmatpush3.bf16.msra.mxu1 %v995_v12 }
  0x1f   : > { %929 = vmatprep.subr.bf16.mxu1 %v1037_v2  ;;  %908 = vmatpush3.bf16.msra.mxu0 %v998_v13 }
  0x20   : > { %909 = vmatprep.subr.bf16.mxu0 %v1037_v2 }
  0x22   : > { %930 = vmatpush3.bf16.msra.mxu1 %v997_v14 }
  0x23   : > { %931 = vmatprep.subr.bf16.mxu1 %v1037_v2  ;;  %910 = vmatpush3.bf16.msra.mxu0 %v1000_v16 }
  0x24   : > { %911 = vmatprep.subr.bf16.mxu0 %v1037_v2 }
  0x26   : > { %932 = vmatpush3.bf16.msra.mxu1 %v999_v15 }
  0x27   : > { %933 = vmatprep.subr.bf16.mxu1 %v1037_v2  ;;  %912 = vmatpush3.bf16.msra.mxu0 %v1002_v17 }
  0x28   : > { %913 = vmatprep.subr.bf16.mxu0 %v1037_v2 }
  0x2a   : > { %934 = vmatpush3.bf16.msra.mxu1 %v1001_v18 }
  0x2b   : > { %914 = vmatpush3.bf16.msra.mxu0 %v1003_v19 }
  0x2c   : > { %939 = vmatprep.subr.bf16.mxu0 %v1037_v2 }
  0x8b   : > { %v281_v27 = vpop.permute.xlu0 %280 }
  0x8c   : > { %v288_v28 = vmul.f32 %v281_v27, %v274_v25 }
  0x8e   : > { %v324_v30 = vrot.slane %v288_v28, %v1165_v26 }
  0x8f   : > { %v286_v31 = vpop.permute.xlu0 %285 }
  0x90   : > { %v325_v32 = vcombine.high %v324_v30, %v324_v30  ;;  %v289_v33 = vmul.f32 %v286_v31, %v275_v29  ;;  %v806_v39 = vrot.slane %v324_v30, 9 }
  0x92   : > { %v292_v34 = vcombine.low %v288_v28, %v289_v33  ;;  %v332_v35 = vrot.slane %v289_v33, %v1165_v26  ;;  %v343_v36 = vrot.slane %v325_v32, 7 }
  0x94   : > { %v333_v37 = vcombine.high %v332_v35, %v332_v35  ;;  %v299_v38 = vrot.slane %v292_v34, %v1165_v26  ;;  %v807_v40 = vrot.slane %v332_v35, 9  ;;  %v344_v43 = vsel %vm340_vm7, %v806_v39, %v343_v36 }
  0x95   : > { %v840_v55 = vcombine.high %v324_v30, %v332_v35 }
  0x96   : > { %v347_v41 = vrot.slane %v333_v37, 7  ;;  %v301_v42 = vpack.c.bf16 %v299_v38, %v299_v38 }
  0x97   : > { %v559_v57 = vrot.slane %v840_v55, %v1165_v26 }
  0x98   : > { %936 = vmatmul.mubr.bf16.vlgmr.msra.gmra.mxu1 %v301_v42  ;;  %v348_v44 = vsel %vm340_vm7, %v807_v40, %v347_v41 }
  0x99   : > { %v349_v45 = vcombine.low %v344_v43, %v348_v44  ;;  %v561_v58 = vpack.c.bf16 %v559_v57, %v559_v57 }
  0x9b   : > { %v356_v46 = vrot.slane %v349_v45, %v1165_v26 }
  0x9d   : > { %v358_v48 = vpack.c.bf16 %v356_v46, %v356_v46 }
  0x9f   : > { %916 = vmatmul.mubr.bf16.vlgmr.msra.gmra.mxu0 %v358_v48 }
  0xa0   : > { %940 = vmatpush3.bf16.msra.mxu0 %v1004_v47  ;;  %955 = vmatprep.mubr.msk.bf16.mxu0 %vm1038_vm0, %v1037_v2 }
  0xa1   : > { %941 = vmatprep.subr.bf16.mxu0 %v1037_v2 }
  0xa4   : > { %942 = vmatpush3.bf16.msra.mxu0 %v1005_v49 }
  0xa5   : > { %943 = vmatprep.subr.bf16.mxu0 %v1037_v2 }
  0xa8   : > { %944 = vmatpush3.bf16.msra.mxu0 %v1006_v50 }
  0xa9   : > { %945 = vmatprep.subr.bf16.mxu0 %v1037_v2 }
  0xac   : > { %946 = vmatpush3.bf16.msra.mxu0 %v1007_v51 }
  0xad   : > { %947 = vmatprep.subr.bf16.mxu0 %v1037_v2 }
  0xb0   : > { %948 = vmatpush3.bf16.msra.mxu0 %v1008_v52 }
  0xb1   : > { %949 = vmatprep.subr.bf16.mxu0 %v1037_v2 }
  0xb4   : > { %950 = vmatpush3.bf16.msra.mxu0 %v1009_v53 }
  0xb5   : > { %951 = vmatprep.subr.bf16.mxu0 %v1037_v2 }
  0xb8   : > { %952 = vmatpush3.bf16.msra.mxu0 %v1010_v54 }
  0xb9   : > { %953 = vmatprep.subr.bf16.mxu0 %v1037_v2  ;;  %v865_v2 = vld [vmem:[%s1225_s3] ss:$0 sm:$0xff] }
  0xbc   : > { %954 = vmatpush3.bf16.msra.mxu0 %v1011_v56 }
  0xbf   : > { %956 = vmatmul.mubr.bf16.vlgmr.msra.gmra.mxu0 %v561_v58 }
 0x158   : > { %v546_v59 = vpop.f32.mrf.mxu1 }
 0x15a   : > { %v937_v60 = vpop.f32.mrf.mxu1 }
 0x15c   : > { %v549_v61 = vpop.f32.mrf.mxu1 }
 0x15e   : > { %v938_v62 = vpop.f32.mrf.mxu1 }
 0x15f   : > { %v458_v63 = vpop.f32.mrf.mxu0 }
 0x160   : > { %v547_v4 = vadd.f32 %v546_v59, %v458_v63 }
 0x161   : > { %v917_v0 = vpop.f32.mrf.mxu0 }
 0x163   : > { %v461_v1 = vpop.f32.mrf.mxu0 }
 0x165   : > { %v918_v3 = vpop.f32.mrf.mxu0 }
 0x17f   : > { %v661_v5 = vpop.f32.mrf.mxu0 }
 0x180   : > { %v667_v6 = vadd.f32 %v661_v5, %v547_v4 }
 0x181   : > { %v957_v7 = vpop.f32.mrf.mxu0 }
 0x182   : > { %v675_v8 = vadd.f32 %v865_v2, %v667_v6 }
 0x183   : > { %v664_v9 = vpop.f32.mrf.mxu0 }
 0x184   : > { %v676_v10 = vmax.f32 %v675_v8, 0.0 }
 0x185   : > { %v958_v11 = vpop.f32.mrf.mxu0 }
 0x186   : > { %v684_v12 = vrot.slane %v676_v10, %v1165_v26  ;;  %866 = vst.sshfl [vmem:[%s271_s10] sm:$0x3 pattern:$0x76325410] %v676_v10 }
 0x188   : > { %v685_v13 = vcombine.high %v684_v12, %v684_v12 }
 0x18a   : > { %689 = vst [vmem:[%s271_s10 + $0x2] sm:$0x3] %v685_v13 }
 0x18b PF: > { %s14_s17 = sadd.s32 1, %s1034_s17   ;;  %s1227_s15 = smov %s1030_s16 }
 0x18c   : > { %p11_p5 = scmp.ge.s32.totalorder %s14_s17, 4   ;;  %s1228_s16 = smov %s1230_s18 }
 0x18e   :  { %13 = sbr.rel (!%p11_p5) target bundleno = 2 (0x2), region = 71 }

// kernel: _lambda_.80
= control target key start
LH: loop header
LB: loop body
LE: loop exit
PB: predicated region body
PF: predicated region fallthrough
CT: control target
= control target key end

     0   :  { %s1048_s15 = smov 0   ;;  %s1050_s16 = smov 0   ;;  %s1205_s0 = inlined_call_operand.vmem [shape: f32[2,6,2,128], index: 0, kind: input, shape index: {}]   ;;  %s1206_s1 = inlined_call_operand.vmem [shape: f32[2,6,2,1], index: 1, kind: input, shape index: {}]   ;;  %s1207_s2 = inlined_call_operand.vmem [shape: bf16[3,128,128], index: 2, kind: input, shape index: {}]   ;;  %s1208_s3 = inlined_call_operand.vmem [shape: f32[1,128], index: 3, kind: input, shape index: {}]   ;;  %s1209_s4 = inlined_call_operand.vmem [shape: f32[2,2,2,128], index: 4, kind: output, shape index: {}]  }
   0x1   :  { %s1052_s17 = smov 0  }
   0x2 LB: > { %s26_s18 = sadd.s32 1, %s1013_s16  ;;  %p787_p0 = scmp.ge.s32.totalorder %s1017_s17, 1  ;;  %s1017_s17 = sphi %s1052_s17, %s14_s17   ;;  %s1013_s16 = sphi %s1050_s16, %s1211_s16   ;;  %s1009_s15 = sphi %s1048_s15, %s1210_s15  }
   0x3   : > { %p28_p1 = scmp.ge.s32.totalorder %s26_s18, 2  ;;  %p196_p2 = scmp.lt.s32.totalorder %s1017_s17, 3 }
   0x5   : > { %s1213_s18 = smov (%p28_p1, %s26_s18), 0  ;;  %p197_p3 = pnand %p787_p0, %p196_p2 }
   0x6   : > { %p236_p4 = scmp.lt.s32.totalorder (!%p197_p3), %s1009_s15, 1 }
   0x7   : > { %200 = sbr.rel (%p197_p3) target bundleno = 389 (0x185), region = 36 }
   0xc   : > { %v971_v0 = vld [vmem:[%s1207_s2 + $0x78] sm:$0xff]   ;;  %v1019_v1 = vmov 0   ;;  %s1215_s15 = smov (!%p236_p4, %s1009_s15), 1  ;;  %v1020_v2 = vmov 0.0   ;;  %v973_v4 = vld [vmem:[%s1207_s2 + $0x70] sm:$0xff]   ;;  %v975_v8 = vld [vmem:[%s1207_s2 + $0x68] sm:$0xff]   ;;  %v315_v26 = vlaneseq }
   0xd   : > { %970 = vset.pattern.permute.xlu1 %v1019_v1  ;;  %969 = vset.pattern.permute.xlu0 %v1019_v1  ;;  %v972_v3 = vld [vmem:[%s1207_s2 + $0x38] sm:$0xff]   ;;  %s940_s25 = smul.u32 12, %s1215_s15  ;;  %v974_v5 = vld [vmem:[%s1207_s2 + $0x30] sm:$0xff]   ;;  %v976_v10 = vld [vmem:[%s1207_s2 + $0x28] sm:$0xff]   ;;  %vm1021_vm0 = vmmov 0   ;;  %s852_s7 = sshll.u32 %s1215_s15, 2 }
   0xe   : > { %880 = vmatprep.subr.bf16.mxu0 %v1020_v2  ;;  %900 = vmatprep.subr.bf16.mxu1 %v1020_v2  ;;  %v977_v12 = vld [vmem:[%s1207_s2 + $0x60] sm:$0xff]   ;;  %v979_v16 = vld [vmem:[%s1207_s2 + $0x58] sm:$0xff]   ;;  %v981_v18 = vld [vmem:[%s1207_s2 + $0x50] sm:$0xff]   ;;  %v1022_v24 = vmov 1983009808   ;;  %v316_v31 = vshrl.u32 %v315_v26, 7 }
   0xf   : > { %881 = vmatpush3.bf16.msra.mxu0 %v971_v0  ;;  %901 = vmatpush3.bf16.msra.mxu1 %v972_v3  ;;  %s251_s30 = scalar_lea.vmem %s1206_s1, %s940_s25  ;;  %v978_v15 = vld [vmem:[%s1207_s2 + $0x20] sm:$0xff]   ;;  %v980_v17 = vld [vmem:[%s1207_s2 + $0x18] sm:$0xff]   ;;  %v982_v19 = vld [vmem:[%s1207_s2 + $0x10] sm:$0xff]   ;;  %v313_v25 = vunpack.c.l.s4 %v1022_v24  ;;  %s1148_s10 = scalar_lea.vmem %s1205_s0, %s940_s25 }
  0x10   : > { %882 = vmatprep.subr.bf16.mxu0 %v1020_v2  ;;  %902 = vmatprep.subr.bf16.mxu1 %v1020_v2  ;;  %v269_v6 = vld [vmem:[%s251_s30 + $0x4] sm:$0x3]  ;;  %v267_v7 = vld [vmem:[%s251_s30] sm:$0x3]  ;;  %v270_v9 = vld [vmem:[%s251_s30 + $0x6] sm:$0x3] }
  0x11   : > { %285 = vperm.xlu0 %969, %v269_v6   ;;  %275 = vperm.xlu1 %970, %v267_v7   ;;  %v268_v11 = vld [vmem:[%s251_s30 + $0x2] sm:$0x3]  ;;  %v271_v13 = vld [vmem:[%s251_s30 + $0x8] sm:$0x3]  ;;  %v272_v14 = vld [vmem:[%s251_s30 + $0xa] sm:$0x3]  ;;  %v314_v30 = vunpack.c.0.s8 %v313_v25 }
  0x12   : > { %896 = vmatprep.mubr.msk.bf16.mxu0 %vm1021_vm0, %v1020_v2  ;;  %916 = vmatprep.mubr.msk.bf16.mxu1 %vm1021_vm0, %v1020_v2  ;;  %v983_v20 = vld [vmem:[%s1207_s2 + $0x48] sm:$0xff]   ;;  %v985_v22 = vld [vmem:[%s1207_s2 + $0x40] sm:$0xff]   ;;  %v987_v46 = vld [vmem:[%s1207_s2 + $0xb8] sm:$0xff]  }
  0x13   : > { %883 = vmatpush3.bf16.msra.mxu0 %v973_v4  ;;  %903 = vmatpush3.bf16.msra.mxu1 %v974_v5  ;;  %v984_v21 = vld [vmem:[%s1207_s2 + $0x8] sm:$0xff]   ;;  %v986_v23 = vld [vmem:[%s1207_s2] sm:$0xff]   ;;  %v317_v41 = vsub.s32 %v314_v30, %v316_v31  ;;  %v988_v49 = vld [vmem:[%s1207_s2 + $0xb0] sm:$0xff]  }
  0x14   : > { %884 = vmatprep.subr.bf16.mxu0 %v1020_v2  ;;  %904 = vmatprep.subr.bf16.mxu1 %v1020_v2  ;;  %v261_v29 = vld [vmem:[%s1148_s10] sm:$0x3]  ;;  %v263_v32 = vld [vmem:[%s1148_s10 + $0x4] sm:$0x3]  ;;  %v264_v33 = vld [vmem:[%s1148_s10 + $0x6] sm:$0x3] }
  0x15   : > { %290 = vperm.xlu0 %969, %v270_v9   ;;  %280 = vperm.xlu1 %970, %v268_v11   ;;  %v262_v34 = vld [vmem:[%s1148_s10 + $0x2] sm:$0x3]  ;;  %v989_v50 = vld [vmem:[%s1207_s2 + $0xa8] sm:$0xff]   ;;  %v991_v52 = vld [vmem:[%s1207_s2 + $0x98] sm:$0xff]  }
  0x16   : > { %v990_v51 = vld [vmem:[%s1207_s2 + $0xa0] sm:$0xff]   ;;  %v265_v54 = vld [vmem:[%s1148_s10 + $0x8] sm:$0x3]  ;;  %v266_v56 = vld [vmem:[%s1148_s10 + $0xa] sm:$0x3]  ;;  %s259_s10 = scalar_lea.vmem %s1209_s4, %s852_s7 }
  0x17   : > { %885 = vmatpush3.bf16.msra.mxu0 %v975_v8  ;;  %905 = vmatpush3.bf16.msra.mxu1 %v976_v10  ;;  %v992_v57 = vld [vmem:[%s1207_s2 + $0x90] sm:$0xff]   ;;  %v993_v60 = vld [vmem:[%s1207_s2 + $0x88] sm:$0xff]   ;;  %v994_v62 = vld [vmem:[%s1207_s2 + $0x80] sm:$0xff]  }
  0x18   : > { %886 = vmatprep.subr.bf16.mxu0 %v1020_v2  ;;  %906 = vmatprep.subr.bf16.mxu1 %v1020_v2 }
  0x19   : > { %295 = vperm.xlu0 %969, %v271_v13   ;;  %300 = vperm.xlu1 %970, %v272_v14  }
  0x1b   : > { %887 = vmatpush3.bf16.msra.mxu0 %v977_v12  ;;  %907 = vmatpush3.bf16.msra.mxu1 %v978_v15  ;;  %v848_v12 = vld [vmem:[%s1208_s3] ss:$0 sm:$0xff] }
  0x1c   : > { %888 = vmatprep.subr.bf16.mxu0 %v1020_v2  ;;  %908 = vmatprep.subr.bf16.mxu1 %v1020_v2 }
  0x1f   : > { %889 = vmatpush3.bf16.msra.mxu0 %v979_v16  ;;  %909 = vmatpush3.bf16.msra.mxu1 %v980_v17 }
  0x20   : > { %890 = vmatprep.subr.bf16.mxu0 %v1020_v2  ;;  %910 = vmatprep.subr.bf16.mxu1 %v1020_v2 }
  0x23   : > { %891 = vmatpush3.bf16.msra.mxu0 %v981_v18  ;;  %911 = vmatpush3.bf16.msra.mxu1 %v982_v19 }
  0x24   : > { %892 = vmatprep.subr.bf16.mxu0 %v1020_v2  ;;  %912 = vmatprep.subr.bf16.mxu1 %v1020_v2 }
  0x27   : > { %893 = vmatpush3.bf16.msra.mxu0 %v983_v20  ;;  %913 = vmatpush3.bf16.msra.mxu1 %v984_v21 }
  0x28   : > { %894 = vmatprep.subr.bf16.mxu0 %v1020_v2  ;;  %914 = vmatprep.subr.bf16.mxu1 %v1020_v2 }
  0x2b   : > { %895 = vmatpush3.bf16.msra.mxu0 %v985_v22  ;;  %915 = vmatpush3.bf16.msra.mxu1 %v986_v23 }
  0x2c   : > { %920 = vmatprep.subr.bf16.mxu0 %v1020_v2 }
  0x8c   : > { %v286_v27 = vpop.permute.xlu0 %285  ;;  %v276_v28 = vpop.permute.xlu1 %275 }
  0x8d   : > { %v303_v35 = vmul.f32 %v276_v28, %v261_v29  ;;  %v305_v38 = vmul.f32 %v286_v27, %v263_v32 }
  0x90   : > { %v291_v36 = vpop.permute.xlu0 %290  ;;  %v281_v37 = vpop.permute.xlu1 %280 }
  0x91   : > { %v306_v39 = vmul.f32 %v291_v36, %v264_v33  ;;  %v304_v40 = vmul.f32 %v281_v37, %v262_v34 }
  0x93   : > { %v339_v42 = vcombine.low %v305_v38, %v306_v39  ;;  %v311_v43 = vcombine.low %v303_v35, %v304_v40 }
  0x94   : > { %v296_v53 = vpop.permute.xlu0 %295  ;;  %v301_v55 = vpop.permute.xlu1 %300 }
  0x95   : > { %v346_v44 = vrot.slane %v339_v42, %v317_v41  ;;  %v318_v45 = vrot.slane %v311_v43, %v317_v41  ;;  %v307_v58 = vmul.f32 %v296_v53, %v265_v54  ;;  %v308_v59 = vmul.f32 %v301_v55, %v266_v56 }
  0x97   : > { %v348_v47 = vpack.c.bf16 %v346_v44, %v346_v44  ;;  %v320_v48 = vpack.c.bf16 %v318_v45, %v318_v45  ;;  %v544_v61 = vcombine.low %v307_v58, %v308_v59 }
  0x99   : > { %897 = vmatmul.mubr.bf16.vlgmr.msra.gmra.mxu0 %v348_v47  ;;  %917 = vmatmul.mubr.bf16.vlgmr.msra.gmra.mxu1 %v320_v48  ;;  %v551_v63 = vrot.slane %v544_v61, %v317_v41 }
  0x9a   : > { %921 = vmatpush3.bf16.msra.mxu0 %v987_v46  ;;  %936 = vmatprep.mubr.msk.bf16.mxu0 %vm1021_vm0, %v1020_v2 }
  0x9b   : > { %922 = vmatprep.subr.bf16.mxu0 %v1020_v2  ;;  %v553_v0 = vpack.c.bf16 %v551_v63, %v551_v63 }
  0x9e   : > { %923 = vmatpush3.bf16.msra.mxu0 %v988_v49 }
  0x9f   : > { %924 = vmatprep.subr.bf16.mxu0 %v1020_v2 }
  0xa2   : > { %925 = vmatpush3.bf16.msra.mxu0 %v989_v50 }
  0xa3   : > { %926 = vmatprep.subr.bf16.mxu0 %v1020_v2 }
  0xa6   : > { %927 = vmatpush3.bf16.msra.mxu0 %v990_v51 }
  0xa7   : > { %928 = vmatprep.subr.bf16.mxu0 %v1020_v2 }
  0xaa   : > { %929 = vmatpush3.bf16.msra.mxu0 %v991_v52 }
  0xab   : > { %930 = vmatprep.subr.bf16.mxu0 %v1020_v2 }
  0xae   : > { %931 = vmatpush3.bf16.msra.mxu0 %v992_v57 }
  0xaf   : > { %932 = vmatprep.subr.bf16.mxu0 %v1020_v2 }
  0xb2   : > { %933 = vmatpush3.bf16.msra.mxu0 %v993_v60 }
  0xb3   : > { %934 = vmatprep.subr.bf16.mxu0 %v1020_v2 }
  0xb6   : > { %935 = vmatpush3.bf16.msra.mxu0 %v994_v62 }
  0xb9   : > { %937 = vmatmul.mubr.bf16.vlgmr.msra.gmra.mxu0 %v553_v0 }
 0x159   : > { %v448_v1 = vpop.f32.mrf.mxu0  ;;  %v536_v3 = vpop.f32.mrf.mxu1 }
 0x15a   : > { %v537_v10 = vadd.f32 %v536_v3, %v448_v1 }
 0x15b   : > { %v898_v4 = vpop.f32.mrf.mxu0  ;;  %v918_v5 = vpop.f32.mrf.mxu1 }
 0x15d   : > { %v451_v6 = vpop.f32.mrf.mxu0  ;;  %v539_v7 = vpop.f32.mrf.mxu1 }
 0x15f   : > { %v899_v8 = vpop.f32.mrf.mxu0  ;;  %v919_v9 = vpop.f32.mrf.mxu1 }
 0x179   : > { %v653_v11 = vpop.f32.mrf.mxu0 }
 0x17a   : > { %v659_v13 = vadd.f32 %v653_v11, %v537_v10 }
 0x17b   : > { %v938_v2 = vpop.f32.mrf.mxu0 }
 0x17c   : > { %v667_v14 = vadd.f32 %v848_v12, %v659_v13 }
 0x17d   : > { %v656_v15 = vpop.f32.mrf.mxu0 }
 0x17e   : > { %v668_v16 = vmax.f32 %v667_v14, 0.0 }
 0x17f   : > { %v939_v17 = vpop.f32.mrf.mxu0 }
 0x180   : > { %v676_v18 = vrot.slane %v668_v16, %v317_v41  ;;  %849 = vst.sshfl [vmem:[%s259_s10] sm:$0x3 pattern:$0x76325410] %v668_v16 }
 0x182   : > { %v677_v19 = vcombine.high %v676_v18, %v676_v18 }
 0x184   : > { %681 = vst [vmem:[%s259_s10 + $0x2] sm:$0x3] %v677_v19 }
 0x185 PF: > { %s14_s17 = sadd.s32 1, %s1017_s17   ;;  %s1210_s15 = smov %s1013_s16 }
 0x186   : > { %p11_p5 = scmp.ge.s32.totalorder %s14_s17, 4   ;;  %s1211_s16 = smov %s1213_s18 }
 0x188   :  { %13 = sbr.rel (!%p11_p5) target bundleno = 2 (0x2), region = 71 }

// kernel: _lambda_.77
= control target key start
LH: loop header
LB: loop body
LE: loop exit
PB: predicated region body
PF: predicated region fallthrough
CT: control target
= control target key end

     0   :  { %s1785_s18 = smov 0   ;;  %s2114_s0 = inlined_call_operand.vmem [shape: f32[2,4,3,3,64], index: 0, kind: input, shape index: {}]   ;;  %s2115_s1 = inlined_call_operand.vmem [shape: f32[2,4,3,3,1], index: 1, kind: input, shape index: {}]   ;;  %s2116_s2 = inlined_call_operand.vmem [shape: bf16[9,64,128], index: 2, kind: input, shape index: {}]   ;;  %s2117_s3 = inlined_call_operand.vmem [shape: f32[64,128], index: 3, kind: input, shape index: {}]   ;;  %s2118_s4 = inlined_call_operand.vmem [shape: f32[1,128], index: 4, kind: input, shape index: {}]   ;;  %s2119_s5 = inlined_call_operand.vmem [shape: f32[2,2,2,128], index: 5, kind: output, shape index: {}]  }
   0x1 LB: > { %s1382_s19 = sadd.s32 4294967295, %s1749_s18   ;;  %p1386_p0 = scmp.ge.s32.totalorder %s1749_s18, 1  ;;  %s1749_s18 = sphi %s1785_s18, %s15_s18  }
   0x2   : > { %p197_p1 = scmp.lt.s32.totalorder %s1749_s18, 3 }
   0x4   : > { %p198_p2 = pnand %p1386_p0, %p197_p1 }
   0x5   : > { %p230_p3 = scmp.lt.s32.totalorder (!%p198_p2), %s1382_s19, 1 }
   0x6   : > { %201 = sbr.rel (%p198_p2) target bundleno = 422 (0x1a6), region = 40 }
   0xb   : > { %v1707_v0 = vld [vmem:[%s2116_s2 + $0x38] sm:$0xff]   ;;  %v1751_v1 = vmov 0   ;;  %s2123_s19 = smov (!%p230_p3, %s1382_s19), 1  ;;  %v1752_v2 = vmov 0.0   ;;  %v1709_v4 = vld [vmem:[%s2116_s2 + $0x30] sm:$0xff]   ;;  %v1711_v12 = vld [vmem:[%s2116_s2 + $0x28] sm:$0xff]   ;;  %v332_v41 = vlaneseq }
   0xc   : > { %1706 = vset.pattern.permute.xlu1 %v1751_v1  ;;  %1705 = vset.pattern.permute.xlu0 %v1751_v1  ;;  %v1708_v3 = vld [vmem:[%s2116_s2 + $0x18] sm:$0xff]   ;;  %s1692_s26 = smul.u32 48, %s2123_s19  ;;  %v1710_v5 = vld [vmem:[%s2116_s2 + $0x10] sm:$0xff]   ;;  %v1712_v13 = vld [vmem:[%s2116_s2 + $0x8] sm:$0xff]   ;;  %vm1753_vm0 = vmmov 0   ;;  %vm518_vm1 = vcmask 1040384  }
   0xd   : > { %1565 = vmatprep.subr.bf16.mxu0 %v1752_v2  ;;  %1577 = vmatprep.subr.bf16.mxu1 %v1752_v2  ;;  %v1713_v17 = vld [vmem:[%s2116_s2 + $0x20] sm:$0xff]   ;;  %v1754_v39 = vmov 1983009808   ;;  %v333_v43 = vshrl.u32 %v332_v41, 7  ;;  %vm519_vm2 = vcmask 1042434   ;;  %vm521_vm4 = vcmask 1044484  }
   0xe   : > { %1566 = vmatpush3.bf16.msra.mxu0 %v1707_v0  ;;  %1578 = vmatpush3.bf16.msra.mxu1 %v1708_v3  ;;  %s1815_s6 = scalar_lea.vmem %s2115_s1, %s1692_s26  ;;  %s1828_s9 = scalar_lea.vmem %s2114_s0, %s1692_s26  ;;  %v1714_v18 = vld [vmem:[%s2116_s2] sm:$0xff]   ;;  %v330_v40 = vunpack.c.l.s4 %v1754_v39  ;;  %vm520_vm3 = vmor %vm518_vm1, %vm519_vm2  ;;  %vm391_vm5 = vcmask 523264   ;;  %v1715_v63 = vld [vmem:[%s2116_s2 + $0x58] sm:$0xff]   ;;  %vm523_vm7 = vcmask 1046534  }
   0xf   : > { %1567 = vmatprep.subr.bf16.mxu0 %v1752_v2  ;;  %1579 = vmatprep.subr.bf16.mxu1 %v1752_v2  ;;  %v259_v6 = vld [vmem:[%s1815_s6 + $0xc] sm:$0x7]  ;;  %v256_v7 = vld [vmem:[%s1815_s6] sm:$0x7]  ;;  %v260_v8 = vld [vmem:[%s1815_s6 + $0x10] sm:$0x7] }
  0x10   : > { %283 = vperm.xlu0 %1705, %v259_v6   ;;  %268 = vperm.xlu1 %1706, %v256_v7   ;;  %v257_v9 = vld [vmem:[%s1815_s6 + $0x4] sm:$0x7]  ;;  %v262_v10 = vld [vmem:[%s1815_s6 + $0x18] sm:$0x7]  ;;  %v263_v11 = vld [vmem:[%s1815_s6 + $0x1c] sm:$0x7]  ;;  %v331_v42 = vunpack.c.0.s8 %v330_v40 }
  0x11   : > { %v250_v14 = vld [vmem:[%s1828_s9 + $0x10] sm:$0x7]  ;;  %v247_v15 = vld [vmem:[%s1828_s9 + $0x4] sm:$0x7]  ;;  %v265_v21 = vld [vmem:[%s1815_s6 + $0x28] sm:$0x7]  ;;  %1573 = vmatprep.mubr.msk.bf16.mxu0 %vm1753_vm0, %v1752_v2  ;;  %1585 = vmatprep.mubr.msk.bf16.mxu1 %vm1753_vm0, %v1752_v2 }
  0x12   : > { %1568 = vmatpush3.bf16.msra.mxu0 %v1709_v4  ;;  %1580 = vmatpush3.bf16.msra.mxu1 %v1710_v5  ;;  %v1194_v16 = vrot.slane %v247_v15, 1  ;;  %v264_v20 = vld [vmem:[%s1815_s6 + $0x24] sm:$0x7]  ;;  %v258_v22 = vld [vmem:[%s1815_s6 + $0x8] sm:$0x7]  ;;  %v1884_v48 = vsub.s32 %v331_v42, %v333_v43  ;;  %v1716_v0 = vld [vmem:[%s2116_s2 + $0x78] sm:$0xff]  }
  0x13   : > { %1569 = vmatprep.subr.bf16.mxu0 %v1752_v2  ;;  %1581 = vmatprep.subr.bf16.mxu1 %v1752_v2  ;;  %v261_v23 = vld [vmem:[%s1815_s6 + $0x14] sm:$0x7]  ;;  %v1857_v24 = vld [vmem:[%s1828_s9 + $0x18] sm:$0x7]  ;;  %v1861_v26 = vld [vmem:[%s1828_s9 + $0x1c] sm:$0x7] }
  0x14   : > { %288 = vperm.xlu0 %1705, %v260_v8   ;;  %273 = vperm.xlu1 %1706, %v257_v9   ;;  %v1198_v19 = vmax.f32 %v250_v14, %v1194_v16  ;;  %v1186_v25 = vrot.slane %v1857_v24, 1  ;;  %v1864_v27 = vld [vmem:[%s1828_s9 + $0x24] sm:$0x7]  ;;  %v1187_v28 = vrot.slane %v1861_v26, 1  ;;  %v1869_v31 = vld [vmem:[%s1828_s9 + $0x28] sm:$0x7]  ;;  %vm522_vm6 = vmor %vm520_vm3, %vm521_vm4 }
  0x15   : > { %v1872_v32 = vld [vmem:[%s1828_s9 + $0x8] sm:$0x7]  ;;  %v1877_v35 = vld [vmem:[%s1828_s9 + $0x14] sm:$0x7]  ;;  %v246_v44 = vld [vmem:[%s1828_s9] sm:$0x7] }
  0x16   : > { %1570 = vmatpush3.bf16.msra.mxu0 %v1711_v12  ;;  %1582 = vmatpush3.bf16.msra.mxu1 %v1712_v13  ;;  %v1190_v29 = vmax.f32 %v1864_v27, %v1186_v25  ;;  %v1191_v33 = vmax.f32 %v1869_v31, %v1187_v28  ;;  %v1195_v34 = vrot.slane %v1872_v32, 1  ;;  %v249_v47 = vld [vmem:[%s1828_s9 + $0xc] sm:$0x7]  ;;  %vm1911_vm8 = vmor %vm522_vm6, %vm523_vm7  ;;  %s1510_s25 = sshll.u32 %s2123_s19, 2 }
  0x17   : > { %1571 = vmatprep.subr.bf16.mxu0 %v1752_v2  ;;  %1583 = vmatprep.subr.bf16.mxu1 %v1752_v2  ;;  %v1741_v12 = vld [vmem:[%s2116_s2 + $0x108] sm:$0xff]   ;;  %s244_s28 = scalar_lea.vmem %s2119_s5, %s1510_s25 }
  0x18   : > { %298 = vperm.xlu0 %1705, %v262_v10   ;;  %303 = vperm.xlu1 %1706, %v263_v11   ;;  %v1200_v30 = vmax.f32 %v1190_v29, %v1198_v19  ;;  %v1199_v36 = vmax.f32 %v1877_v35, %v1195_v34  ;;  %v1717_v10 = vld [vmem:[%s2116_s2 + $0x50] sm:$0xff]  }
  0x19   : > { %v1718_v11 = vld [vmem:[%s2116_s2 + $0x70] sm:$0xff]  }
  0x1a   : > { %1572 = vmatpush3.bf16.msra.mxu0 %v1713_v17  ;;  %1584 = vmatpush3.bf16.msra.mxu1 %v1714_v18  ;;  %v1201_v37 = vmax.f32 %v1191_v33, %v1199_v36  ;;  %v1719_v17 = vld [vmem:[%s2116_s2 + $0x48] sm:$0xff]   ;;  %v1724_v33 = vld [vmem:[%s2116_s2 + $0xb8] sm:$0xff]  }
  0x1b   : > { %1589 = vmatprep.subr.bf16.mxu0 %v1752_v2  ;;  %1601 = vmatprep.subr.bf16.mxu1 %v1752_v2  ;;  %v1720_v18 = vld [vmem:[%s2116_s2 + $0x68] sm:$0xff]  }
  0x1c   : > { %308 = vperm.xlu0 %1705, %v264_v20   ;;  %313 = vperm.xlu1 %1706, %v265_v21   ;;  %v1880_v38 = vcombine.low %v1200_v30, %v1201_v37  ;;  %v1723_v30 = vld [vmem:[%s2116_s2 + $0x98] sm:$0xff]  }
  0x20   : > { %278 = vperm.xlu0 %1705, %v258_v22   ;;  %293 = vperm.xlu1 %1706, %v261_v23   ;;  %v1721_v23 = vld [vmem:[%s2116_s2 + $0x40] sm:$0xff]  }
  0x8b   : > { %v284_v45 = vpop.permute.xlu0 %283  ;;  %v269_v46 = vpop.permute.xlu1 %268 }
  0x8c   : > { %v316_v49 = vmul.f32 %v269_v46, %v246_v44  ;;  %v319_v52 = vmul.f32 %v284_v45, %v249_v47  ;;  %v1725_v44 = vld [vmem:[%s2116_s2 + $0x90] sm:$0xff]  }
  0x8d   : > { %v1726_v45 = vld [vmem:[%s2116_s2 + $0xb0] sm:$0xff]  }
  0x8e   : > { %v508_v55 = vrot.slane %v316_v49, %v1884_v48 }
  0x8f   : > { %v289_v50 = vpop.permute.xlu0 %288  ;;  %v274_v51 = vpop.permute.xlu1 %273 }
  0x90   : > { %v1886_v53 = vmul.f32 %v289_v50, %v250_v14  ;;  %v1888_v54 = vmul.f32 %v274_v51, %v247_v15  ;;  %v509_v62 = vcombine.high %v508_v55, %v508_v55  ;;  %v1409_v7 = vrot.slane %v508_v55, 9  ;;  %v1729_v55 = vld [vmem:[%s2116_s2 + $0x80] sm:$0xff]  }
  0x92   : > { %v348_v56 = vcombine.low %v319_v52, %v1886_v53  ;;  %v328_v57 = vcombine.low %v316_v49, %v1888_v54  ;;  %v516_v58 = vrot.slane %v1888_v54, %v1884_v48  ;;  %v527_v8 = vrot.slane %v509_v62, 7 }
  0x93   : > { %v299_v5 = vpop.permute.xlu0 %298  ;;  %v304_v6 = vpop.permute.xlu1 %303 }
  0x94   : > { %v355_v59 = vrot.slane %v348_v56, %v1884_v48  ;;  %v335_v60 = vrot.slane %v328_v57, %v1884_v48  ;;  %v517_v61 = vcombine.high %v516_v58, %v516_v58  ;;  %v1410_v9 = vrot.slane %v516_v58, 9  ;;  %v1730_v56 = vld [vmem:[%s2116_s2 + $0xa0] sm:$0xff]  }
  0x95   : > { %v322_v13 = vmul.f32 %v299_v5, %v1857_v24  ;;  %v323_v14 = vmul.f32 %v304_v6, %v1861_v26  ;;  %v528_v16 = vsel %vm1911_vm8, %v1409_v7, %v527_v8  ;;  %v1722_v24 = vld [vmem:[%s2116_s2 + $0x60] sm:$0xff]   ;;  %v1735_v6 = vld [vmem:[%s2116_s2 + $0xc8] sm:$0xff]  }
  0x96   : > { %v357_v1 = vpack.c.bf16 %v355_v59, %v355_v59  ;;  %v337_v3 = vpack.c.bf16 %v335_v60, %v335_v60  ;;  %v531_v4 = vrot.slane %v517_v61, 7  ;;  %v1731_v59 = vld [vmem:[%s2116_s2 + $0xd8] sm:$0xff]  }
  0x97   : > { %v622_v19 = vcombine.low %v322_v13, %v323_v14  ;;  %v804_v21 = vrot.slane %v322_v13, %v1884_v48  ;;  %v812_v22 = vrot.slane %v323_v14, %v1884_v48  ;;  %v309_v40 = vpop.permute.xlu0 %308  ;;  %v314_v41 = vpop.permute.xlu1 %313  ;;  %v1732_v60 = vld [vmem:[%s2116_s2 + $0xf8] sm:$0xff]  }
  0x98   : > { %1574 = vmatmul.mubr.msk.bf16.vlgmr.msra.gmra.mxu0 %vm391_vm5, %v357_v1  ;;  %1586 = vmatmul.mubr.msk.bf16.vlgmr.msra.gmra.mxu1 %vm391_vm5, %v337_v3  ;;  %v1921_v15 = vsel %vm1911_vm8, %v1410_v9, %v531_v4  ;;  %v324_v46 = vmul.f32 %v309_v40, %v1864_v27  ;;  %v325_v47 = vmul.f32 %v314_v41, %v1869_v31  ;;  %v1727_v27 = vld [vmem:[%s2116_s2 + $0x88] sm:$0xff]   ;;  %v1733_v1 = vld [vmem:[%s2116_s2 + $0xd0] sm:$0xff]   ;;  %v1737_v9 = vld [vmem:[%s2116_s2 + $0xc0] sm:$0xff]  }
  0x99   : > { %1590 = vmatpush3.bf16.msra.mxu0 %v1715_v63  ;;  %1602 = vmatpush3.bf16.msra.mxu1 %v1716_v0  ;;  %v533_v20 = vcombine.low %v528_v16, %v1921_v15  ;;  %v629_v25 = vrot.slane %v622_v19, %v1884_v48  ;;  %v805_v28 = vcombine.high %v804_v21, %v804_v21  ;;  %v1450_v42 = vrot.slane %v804_v21, 9  ;;  %v1728_v31 = vld [vmem:[%s2116_s2 + $0xa8] sm:$0xff]   ;;  %v1734_v3 = vld [vmem:[%s2116_s2 + $0xf0] sm:$0xff]   ;;  %v1739_v13 = vld [vmem:[%s2116_s2 + $0x118] sm:$0xff]  }
  0x9a   : > { %1591 = vmatprep.subr.bf16.mxu0 %v1752_v2  ;;  %1603 = vmatprep.subr.bf16.mxu1 %v1752_v2  ;;  %v813_v29 = vcombine.high %v812_v22, %v812_v22  ;;  %v1451_v43 = vrot.slane %v812_v22, 9  ;;  %v711_v52 = vcombine.low %v324_v46, %v325_v47  ;;  %v1208_v19 = vld [vmem:[%s2117_s3 + $0x30] sm:$0xff]  ;;  %v1207_v22 = vld [vmem:[%s2117_s3 + $0x28] sm:$0xff] }
  0x9b   : > { %1597 = vmatprep.mubr.msk.bf16.mxu0 %vm1753_vm0, %v1752_v2  ;;  %1609 = vmatprep.mubr.msk.bf16.mxu1 %vm1753_vm0, %v1752_v2  ;;  %v540_v26 = vrot.slane %v533_v20, %v1884_v48  ;;  %v631_v34 = vpack.c.bf16 %v629_v25, %v629_v25  ;;  %v816_v37 = vrot.slane %v805_v28, 7  ;;  %v279_v63 = vpop.permute.xlu0 %278  ;;  %v294_v0 = vpop.permute.xlu1 %293  ;;  %v1740_v21 = vld [vmem:[%s2116_s2 + $0x110] sm:$0xff]  }
  0x9c   : > { %v820_v39 = vrot.slane %v813_v29, 7  ;;  %v718_v58 = vrot.slane %v711_v52, %v1884_v48  ;;  %v318_v4 = vmul.f32 %v279_v63, %v1872_v32  ;;  %v321_v5 = vmul.f32 %v294_v0, %v1877_v35  ;;  %v1736_v32 = vld [vmem:[%s2116_s2 + $0xe8] sm:$0xff]   ;;  %v1204_v28 = vld [vmem:[%s2117_s3 + $0x10] sm:$0xff] }
  0x9d   : > { %1592 = vmatpush3.bf16.msra.mxu0 %v1717_v10  ;;  %1604 = vmatpush3.bf16.msra.mxu1 %v1718_v11  ;;  %v542_v36 = vpack.c.bf16 %v540_v26, %v540_v26  ;;  %v817_v49 = vsel %vm1911_vm8, %v1450_v42, %v816_v37  ;;  %v1738_v10 = vld [vmem:[%s2116_s2 + $0xe0] sm:$0xff]   ;;  %v1205_v26 = vld [vmem:[%s2117_s3 + $0x18] sm:$0xff] }
  0x9e   : > { %1593 = vmatprep.subr.bf16.mxu0 %v1752_v2  ;;  %1605 = vmatprep.subr.bf16.mxu1 %v1752_v2  ;;  %v821_v50 = vsel %vm1911_vm8, %v1451_v43, %v820_v39  ;;  %v720_v61 = vpack.c.bf16 %v718_v58, %v718_v58  ;;  %v910_v35 = vcombine.low %v1888_v54, %v318_v4 }
  0x9f   : > { %v822_v51 = vcombine.low %v817_v49, %v821_v50  ;;  %v998_v7 = vcombine.low %v1886_v53, %v321_v5  ;;  %v1091_v8 = vrot.slane %v318_v4, %v1884_v48 }
  0xa0   : > { %v917_v54 = vrot.slane %v910_v35, %v1884_v48 }
  0xa1   : > { %1594 = vmatpush3.bf16.msra.mxu0 %v1719_v17  ;;  %1606 = vmatpush3.bf16.msra.mxu1 %v1720_v18  ;;  %v829_v57 = vrot.slane %v822_v51, %v1884_v48  ;;  %v1005_v53 = vrot.slane %v998_v7, %v1884_v48  ;;  %v1092_v11 = vcombine.high %v1091_v8, %v1091_v8  ;;  %v1209_v17 = vld [vmem:[%s2117_s3 + $0x38] sm:$0xff]  ;;  %v1491_v20 = vrot.slane %v1091_v8, 9 }
  0xa2   : > { %1595 = vmatprep.subr.bf16.mxu0 %v1752_v2  ;;  %1607 = vmatprep.subr.bf16.mxu1 %v1752_v2  ;;  %v919_v14 = vpack.c.bf16 %v917_v54, %v917_v54 }
  0xa3   : > { %v831_v62 = vpack.c.bf16 %v829_v57, %v829_v57  ;;  %v1007_v16 = vpack.c.bf16 %v1005_v53, %v1005_v53  ;;  %v1095_v18 = vrot.slane %v1092_v11, 7 }
  0xa5   : > { %1596 = vmatpush3.bf16.msra.mxu0 %v1721_v23  ;;  %1608 = vmatpush3.bf16.msra.mxu1 %v1722_v24  ;;  %v1096_v23 = vsel %vm1911_vm8, %v1491_v20, %v1095_v18  ;;  %v1206_v24 = vld [vmem:[%s2117_s3 + $0x20] sm:$0xff] }
  0xa6   : > { %1613 = vmatprep.subr.bf16.mxu0 %v1752_v2  ;;  %1625 = vmatprep.subr.bf16.mxu1 %v1752_v2  ;;  %v1097_v25 = vcombine.low %v1921_v15, %v1096_v23  ;;  %v1742_v15 = vld [vmem:[%s2116_s2 + $0x100] sm:$0xff]  }
  0xa8   : > { %1598 = vmatmul.mubr.msk.bf16.vlgmr.msra.gmra.mxu0 %vm391_vm5, %v542_v36  ;;  %1610 = vmatmul.mubr.msk.bf16.vlgmr.msra.gmra.mxu1 %vm391_vm5, %v631_v34  ;;  %v1104_v29 = vrot.slane %v1097_v25, %v1884_v48  ;;  %v1202_v34 = vld [vmem:[%s2117_s3] sm:$0xff] }
  0xa9   : > { %1614 = vmatpush3.bf16.msra.mxu0 %v1723_v30  ;;  %1626 = vmatpush3.bf16.msra.mxu1 %v1724_v33  ;;  %v1203_v30 = vld [vmem:[%s2117_s3 + $0x8] sm:$0xff]  ;;  %v1219_v33 = vrot.slane %v1880_v38, %v1884_v48 }
  0xaa   : > { %1615 = vmatprep.subr.bf16.mxu0 %v1752_v2  ;;  %1627 = vmatprep.subr.bf16.mxu1 %v1752_v2  ;;  %v1106_v36 = vpack.c.bf16 %v1104_v29, %v1104_v29 }
  0xab   : > { %1621 = vmatprep.mubr.msk.bf16.mxu0 %vm1753_vm0, %v1752_v2  ;;  %1633 = vmatprep.mubr.msk.bf16.mxu1 %vm1753_vm0, %v1752_v2 }
  0xad   : > { %1616 = vmatpush3.bf16.msra.mxu0 %v1725_v44  ;;  %1628 = vmatpush3.bf16.msra.mxu1 %v1726_v45 }
  0xae   : > { %1617 = vmatprep.subr.bf16.mxu0 %v1752_v2  ;;  %1629 = vmatprep.subr.bf16.mxu1 %v1752_v2 }
  0xb1   : > { %1618 = vmatpush3.bf16.msra.mxu0 %v1727_v27  ;;  %1630 = vmatpush3.bf16.msra.mxu1 %v1728_v31 }
  0xb2   : > { %1619 = vmatprep.subr.bf16.mxu0 %v1752_v2  ;;  %1631 = vmatprep.subr.bf16.mxu1 %v1752_v2 }
  0xb5   : > { %1620 = vmatpush3.bf16.msra.mxu0 %v1729_v55  ;;  %1632 = vmatpush3.bf16.msra.mxu1 %v1730_v56 }
  0xb6   : > { %1637 = vmatprep.subr.bf16.mxu0 %v1752_v2  ;;  %1649 = vmatprep.subr.bf16.mxu1 %v1752_v2 }
  0xb8   : > { %1622 = vmatmul.mubr.msk.bf16.vlgmr.msra.gmra.mxu0 %vm391_vm5, %v720_v61  ;;  %1634 = vmatmul.mubr.msk.bf16.vlgmr.msra.gmra.mxu1 %vm391_vm5, %v831_v62 }
  0xb9   : > { %1638 = vmatpush3.bf16.msra.mxu0 %v1731_v59  ;;  %1650 = vmatpush3.bf16.msra.mxu1 %v1732_v60 }
  0xba   : > { %1639 = vmatprep.subr.bf16.mxu0 %v1752_v2  ;;  %1651 = vmatprep.subr.bf16.mxu1 %v1752_v2 }
  0xbb   : > { %1645 = vmatprep.mubr.msk.bf16.mxu0 %vm1753_vm0, %v1752_v2  ;;  %1657 = vmatprep.mubr.msk.bf16.mxu1 %vm1753_vm0, %v1752_v2 }
  0xbd   : > { %1640 = vmatpush3.bf16.msra.mxu0 %v1733_v1  ;;  %1652 = vmatpush3.bf16.msra.mxu1 %v1734_v3 }
  0xbe   : > { %1641 = vmatprep.subr.bf16.mxu0 %v1752_v2  ;;  %1653 = vmatprep.subr.bf16.mxu1 %v1752_v2 }
  0xc1   : > { %1642 = vmatpush3.bf16.msra.mxu0 %v1735_v6  ;;  %1654 = vmatpush3.bf16.msra.mxu1 %v1736_v32 }
  0xc2   : > { %1643 = vmatprep.subr.bf16.mxu0 %v1752_v2  ;;  %1655 = vmatprep.subr.bf16.mxu1 %v1752_v2 }
  0xc5   : > { %1644 = vmatpush3.bf16.msra.mxu0 %v1737_v9  ;;  %1656 = vmatpush3.bf16.msra.mxu1 %v1738_v10 }
  0xc6   : > { %1661 = vmatprep.subr.bf16.mxu0 %v1752_v2  ;;  %1673 = vmatprep.subr.mxu1 %v1752_v2 }
  0xc8   : > { %1646 = vmatmul.mubr.msk.bf16.vlgmr.msra.gmra.mxu0 %vm391_vm5, %v919_v14  ;;  %1658 = vmatmul.mubr.msk.bf16.vlgmr.msra.gmra.mxu1 %vm391_vm5, %v1007_v16 }
  0xc9   : > { %1662 = vmatpush3.bf16.msra.mxu0 %v1739_v13  ;;  %1674 = vmatpush3.msra.mxu1 %v1209_v17  ;;  %v1506_v13 = vld [vmem:[%s2118_s4] ss:$0 sm:$0xff] }
  0xca   : > { %1675 = vmatprep.subr.mxu1 %v1752_v2  ;;  %1663 = vmatprep.subr.bf16.mxu0 %v1752_v2 }
  0xcb   : > { %1676 = vmatpush3.msra.mxu1 %v1208_v19  ;;  %1669 = vmatprep.mubr.msk.bf16.mxu0 %vm1753_vm0, %v1752_v2 }
  0xcc   : > { %1677 = vmatprep.subr.mxu1 %v1752_v2  ;;  %1689 = vmatprep.mubr.msk.f32.mxu1 %vm1753_vm0, %v1752_v2 }
  0xcd   : > { %1664 = vmatpush3.bf16.msra.mxu0 %v1740_v21  ;;  %1678 = vmatpush3.msra.mxu1 %v1207_v22 }
  0xce   : > { %1679 = vmatprep.subr.mxu1 %v1752_v2  ;;  %1665 = vmatprep.subr.bf16.mxu0 %v1752_v2 }
  0xcf   : > { %1680 = vmatpush3.msra.mxu1 %v1206_v24 }
  0xd0   : > { %1681 = vmatprep.subr.mxu1 %v1752_v2 }
  0xd1   : > { %1666 = vmatpush3.bf16.msra.mxu0 %v1741_v12  ;;  %1682 = vmatpush3.msra.mxu1 %v1205_v26 }
  0xd2   : > { %1683 = vmatprep.subr.mxu1 %v1752_v2  ;;  %1667 = vmatprep.subr.bf16.mxu0 %v1752_v2 }
  0xd3   : > { %1684 = vmatpush3.msra.mxu1 %v1204_v28 }
  0xd4   : > { %1685 = vmatprep.subr.mxu1 %v1752_v2 }
  0xd5   : > { %1668 = vmatpush3.bf16.msra.mxu0 %v1742_v15  ;;  %1686 = vmatpush3.msra.mxu1 %v1203_v30 }
  0xd6   : > { %1687 = vmatprep.subr.mxu1 %v1752_v2 }
  0xd7   : > { %1688 = vmatpush3.msra.mxu1 %v1202_v34 }
  0xd8   : > { %1670 = vmatmul.mubr.msk.bf16.vlgmr.msra.gmra.mxu0 %vm391_vm5, %v1106_v36  ;;  %1690 = vmatmul.mubr.msk.f32.vlgmr.msra.gmra.mxu1 %vm391_vm5, %v1219_v33 }
 0x158   : > { %v429_v37 = vpop.f32.mrf.mxu0  ;;  %v496_v39 = vpop.f32.mrf.mxu1 }
 0x159   : > { %v497_v61 = vadd.f32 %v496_v39, %v429_v37 }
 0x15a   : > { %v1575_v40 = vpop.f32.mrf.mxu0  ;;  %v1587_v38 = vpop.f32.mrf.mxu1 }
 0x15c   : > { %v432_v41 = vpop.f32.mrf.mxu0  ;;  %v499_v42 = vpop.f32.mrf.mxu1 }
 0x15e   : > { %v1576_v43 = vpop.f32.mrf.mxu0  ;;  %v1588_v44 = vpop.f32.mrf.mxu1 }
 0x168   : > { %v613_v45 = vpop.f32.mrf.mxu0  ;;  %v702_v46 = vpop.f32.mrf.mxu1 }
 0x169   : > { %v619_v62 = vadd.f32 %v613_v45, %v497_v61 }
 0x16a   : > { %v1599_v47 = vpop.f32.mrf.mxu0  ;;  %v1611_v49 = vpop.f32.mrf.mxu1 }
 0x16b   : > { %v708_v4 = vadd.f32 %v702_v46, %v619_v62 }
 0x16c   : > { %v616_v50 = vpop.f32.mrf.mxu0  ;;  %v705_v2 = vpop.f32.mrf.mxu1 }
 0x16e   : > { %v1600_v27 = vpop.f32.mrf.mxu0  ;;  %v1612_v31 = vpop.f32.mrf.mxu1 }
 0x178   : > { %v791_v51 = vpop.f32.mrf.mxu0  ;;  %v902_v52 = vpop.f32.mrf.mxu1 }
 0x179   : > { %v797_v32 = vadd.f32 %v791_v51, %v708_v4 }
 0x17a   : > { %v1623_v55 = vpop.f32.mrf.mxu0  ;;  %v1635_v56 = vpop.f32.mrf.mxu1 }
 0x17b   : > { %v908_v8 = vadd.f32 %v902_v52, %v797_v32 }
 0x17c   : > { %v794_v57 = vpop.f32.mrf.mxu0  ;;  %v905_v58 = vpop.f32.mrf.mxu1 }
 0x17e   : > { %v1624_v59 = vpop.f32.mrf.mxu0  ;;  %v1636_v60 = vpop.f32.mrf.mxu1 }
 0x188   : > { %v990_v63 = vpop.f32.mrf.mxu0  ;;  %v1078_v0 = vpop.f32.mrf.mxu1 }
 0x189   : > { %v996_v9 = vadd.f32 %v990_v63, %v908_v8 }
 0x18a   : > { %v1647_v1 = vpop.f32.mrf.mxu0  ;;  %v1659_v3 = vpop.f32.mrf.mxu1 }
 0x18b   : > { %v1084_v10 = vadd.f32 %v1078_v0, %v996_v9 }
 0x18c   : > { %v993_v5 = vpop.f32.mrf.mxu0  ;;  %v1081_v6 = vpop.f32.mrf.mxu1 }
 0x18e   : > { %v1648_v35 = vpop.f32.mrf.mxu0  ;;  %v1660_v7 = vpop.f32.mrf.mxu1 }
 0x198   : > { %v1177_v54 = vpop.f32.mrf.mxu0  ;;  %v1288_v53 = vpop.f32.mrf.mxu1 }
 0x199   : > { %v1183_v11 = vadd.f32 %v1177_v54, %v1084_v10 }
 0x19a   : > { %v1671_v14 = vpop.f32.mrf.mxu0  ;;  %v1691_v16 = vpop.f32.mrf.mxu1 }
 0x19b   : > { %v1292_v17 = vadd.f32 %v1288_v53, %v1183_v11 }
 0x19c   : > { %v1180_v18 = vpop.f32.mrf.mxu0 }
 0x19d   : > { %v1300_v19 = vadd.f32 %v1506_v13, %v1292_v17 }
 0x19e   : > { %v1672_v20 = vpop.f32.mrf.mxu0 }
 0x19f   : > { %v1301_v21 = vmax.f32 %v1300_v19, 0.0 }
 0x1a1   : > { %v1309_v22 = vrot.slane %v1301_v21, %v1884_v48  ;;  %1507 = vst.sshfl [vmem:[%s244_s28] sm:$0x3 pattern:$0x76325410] %v1301_v21 }
 0x1a3   : > { %v1310_v23 = vcombine.high %v1309_v22, %v1309_v22 }
 0x1a5   : > { %1314 = vst [vmem:[%s244_s28 + $0x2] sm:$0x3] %v1310_v23 }
 0x1a6 PF: > { %s15_s18 = sadd.s32 1, %s1749_s18  }
 0x1a7   : > { %p12_p4 = scmp.ge.s32.totalorder %s15_s18, 4  }
 0x1a9   :  { %14 = sbr.rel (!%p12_p4) target bundleno = 1 (0x1), region = 81 }

// kernel: _lambda_.81
= control target key start
LH: loop header
LB: loop body
LE: loop exit
PB: predicated region body
PF: predicated region fallthrough
CT: control target
= control target key end

     0   :  { %s1167_s18 = smov 0   ;;  %s1169_s19 = smov 0   ;;  %s1330_s0 = inlined_call_operand.vmem [shape: f32[2,2,6,128], index: 0, kind: input, shape index: {}]   ;;  %s1331_s1 = inlined_call_operand.vmem [shape: f32[2,2,6,1], index: 1, kind: input, shape index: {}]   ;;  %s1332_s2 = inlined_call_operand.vmem [shape: bf16[3,128,128], index: 2, kind: input, shape index: {}]   ;;  %s1333_s3 = inlined_call_operand.vmem [shape: f32[1,128], index: 3, kind: input, shape index: {}]   ;;  %s1334_s4 = inlined_call_operand.vmem [shape: f32[2,2,2,128], index: 4, kind: input, shape index: {}]   ;;  %s1335_s5 = inlined_call_operand.vmem [shape: f32[2,2,2,128], index: 5, kind: output, shape index: {}]  }
   0x1   :  { %s1171_s20 = smov 0  }
   0x2 LB: > { %s27_s21 = sadd.s32 1, %s1127_s19  ;;  %p895_p0 = scmp.ge.s32.totalorder %s1131_s20, 1  ;;  %s1131_s20 = sphi %s1171_s20, %s15_s20   ;;  %s1127_s19 = sphi %s1169_s19, %s1337_s19   ;;  %s1123_s18 = sphi %s1167_s18, %s1336_s18  }
   0x3   : > { %p29_p1 = scmp.ge.s32.totalorder %s27_s21, 2  ;;  %p242_p2 = scmp.lt.s32.totalorder %s1131_s20, 3 }
   0x5   : > { %s1339_s21 = smov (%p29_p1, %s27_s21), 0  ;;  %p243_p3 = pnand %p895_p0, %p242_p2 }
   0x6   : > { %p297_p4 = scmp.lt.s32.totalorder (!%p243_p3), %s1123_s18, 1 }
   0x7   : > { %246 = sbr.rel (%p243_p3) target bundleno = 392 (0x188), region = 40 }
   0xc   : > { %v1085_v0 = vld [vmem:[%s1332_s2 + $0x38] sm:$0xff]   ;;  %v1133_v1 = vmov 0   ;;  %v1134_v2 = vmov 0.0   ;;  %s1341_s18 = smov (!%p297_p4, %s1123_s18), 1  ;;  %v1087_v4 = vld [vmem:[%s1332_s2 + $0x30] sm:$0xff]   ;;  %v1089_v7 = vld [vmem:[%s1332_s2 + $0x28] sm:$0xff]   ;;  %v359_v22 = vlaneseq }
   0xd   : > { %1084 = vset.pattern.permute.xlu0 %v1133_v1  ;;  %1016 = vmatprep.subr.bf16.mxu1 %v1134_v2  ;;  %v1086_v3 = vld [vmem:[%s1332_s2 + $0x78] sm:$0xff]   ;;  %s965_s28 = sshll.u32 %s1341_s18, 4  ;;  %v1088_v5 = vld [vmem:[%s1332_s2 + $0x70] sm:$0xff]   ;;  %v1090_v9 = vld [vmem:[%s1332_s2 + $0x68] sm:$0xff]   ;;  %vm1135_vm0 = vmmov 0   ;;  %s967_s11 = sshll.u32 %s1341_s18, 2 }
   0xe   : > { %996 = vmatprep.subr.bf16.mxu0 %v1134_v2  ;;  %1017 = vmatpush3.bf16.msra.mxu1 %v1085_v0  ;;  %s314_s8 = scalar_lea.vmem %s1331_s1, %s965_s28  ;;  %v1091_v10 = vld [vmem:[%s1332_s2 + $0x20] sm:$0xff]   ;;  %v1093_v12 = vld [vmem:[%s1332_s2 + $0x18] sm:$0xff]   ;;  %v1095_v14 = vld [vmem:[%s1332_s2 + $0x10] sm:$0xff]   ;;  %v1136_v20 = vmov 1983009808   ;;  %s304_s15 = scalar_lea.vmem %s1330_s0, %s965_s28  ;;  %v360_v24 = vshrl.u32 %v359_v22, 7 }
   0xf   : > { %1018 = vmatprep.subr.bf16.mxu1 %v1134_v2  ;;  %997 = vmatpush3.bf16.msra.mxu0 %v1086_v3  ;;  %v339_v6 = vld [vmem:[%s314_s8] sm:$0x3f]  ;;  %v340_v8 = vld [vmem:[%s314_s8 + $0x8] sm:$0x3f]  ;;  %v1094_v13 = vld [vmem:[%s1332_s2 + $0x58] sm:$0xff]   ;;  %v357_v21 = vunpack.c.l.s4 %v1136_v20  ;;  %s324_s14 = scalar_lea.vmem %s1334_s4, %s967_s11  ;;  %s334_s17 = scalar_lea.vmem %s1335_s5, %s967_s11 }
  0x10   : > { %998 = vmatprep.subr.bf16.mxu0 %v1134_v2  ;;  %343 = vperm.xlu0 %1084, %v339_v6   ;;  %v1092_v11 = vld [vmem:[%s1332_s2 + $0x60] sm:$0xff]   ;;  %v1096_v15 = vld [vmem:[%s1332_s2 + $0x50] sm:$0xff]   ;;  %v1097_v16 = vld [vmem:[%s1332_s2 + $0x8] sm:$0xff]  }
  0x11   : > { %1032 = vmatprep.mubr.msk.bf16.mxu1 %vm1135_vm0, %v1134_v2  ;;  %1012 = vmatprep.mubr.msk.bf16.mxu0 %vm1135_vm0, %v1134_v2  ;;  %v1098_v17 = vld [vmem:[%s1332_s2 + $0x48] sm:$0xff]   ;;  %v1099_v18 = vld [vmem:[%s1332_s2] sm:$0xff]   ;;  %v358_v23 = vunpack.c.0.s8 %v357_v21  ;;  %v1101_v39 = vld [vmem:[%s1332_s2 + $0xb8] sm:$0xff]  }
  0x12   : > { %1019 = vmatpush3.bf16.msra.mxu1 %v1087_v4  ;;  %v1100_v19 = vld [vmem:[%s1332_s2 + $0x40] sm:$0xff]   ;;  %v338_v27 = vld [vmem:[%s304_s15 + $0x8] sm:$0x3f]  ;;  %v1102_v41 = vld [vmem:[%s1332_s2 + $0xb0] sm:$0xff]  }
  0x13   : > { %1020 = vmatprep.subr.bf16.mxu1 %v1134_v2  ;;  %999 = vmatpush3.bf16.msra.mxu0 %v1088_v5  ;;  %v337_v26 = vld [vmem:[%s304_s15] sm:$0x3f]  ;;  %v1267_v28 = vsub.s32 %v358_v23, %v360_v24  ;;  %v1103_v42 = vld [vmem:[%s1332_s2 + $0xa8] sm:$0xff]   ;;  %v1105_v44 = vld [vmem:[%s1332_s2 + $0x98] sm:$0xff]  }
  0x14   : > { %1000 = vmatprep.subr.bf16.mxu0 %v1134_v2  ;;  %348 = vperm.xlu0 %1084, %v340_v8   ;;  %v1104_v43 = vld [vmem:[%s1332_s2 + $0xa0] sm:$0xff]   ;;  %v1106_v47 = vld [vmem:[%s1332_s2 + $0x90] sm:$0xff]   ;;  %v1107_v50 = vld [vmem:[%s1332_s2 + $0x88] sm:$0xff]  }
  0x15   : > { %v1108_v52 = vld [vmem:[%s1332_s2 + $0x80] sm:$0xff]  }
  0x16   : > { %1021 = vmatpush3.bf16.msra.mxu1 %v1089_v7  ;;  %v740_v63 = vld [vmem:[%s324_s14] sm:$0x3]  ;;  %v741_v0 = vld [vmem:[%s324_s14 + $0x2] sm:$0x3] }
  0x17   : > { %1022 = vmatprep.subr.bf16.mxu1 %v1134_v2  ;;  %1001 = vmatpush3.bf16.msra.mxu0 %v1090_v9  ;;  %v744_v1 = vcombine.low %v740_v63, %v741_v0  ;;  %v961_v4 = vld [vmem:[%s1333_s3] ss:$0 sm:$0xff] }
  0x18   : > { %1002 = vmatprep.subr.bf16.mxu0 %v1134_v2 }
  0x19   : > { %v751_v6 = vrot.slane %v744_v1, %v1267_v28 }
  0x1a   : > { %1023 = vmatpush3.bf16.msra.mxu1 %v1091_v10 }
  0x1b   : > { %1024 = vmatprep.subr.bf16.mxu1 %v1134_v2  ;;  %1003 = vmatpush3.bf16.msra.mxu0 %v1092_v11 }
  0x1c   : > { %1004 = vmatprep.subr.bf16.mxu0 %v1134_v2 }
  0x1e   : > { %1025 = vmatpush3.bf16.msra.mxu1 %v1093_v12 }
  0x1f   : > { %1026 = vmatprep.subr.bf16.mxu1 %v1134_v2  ;;  %1005 = vmatpush3.bf16.msra.mxu0 %v1094_v13 }
  0x20   : > { %1006 = vmatprep.subr.bf16.mxu0 %v1134_v2 }
  0x22   : > { %1027 = vmatpush3.bf16.msra.mxu1 %v1095_v14 }
  0x23   : > { %1028 = vmatprep.subr.bf16.mxu1 %v1134_v2  ;;  %1007 = vmatpush3.bf16.msra.mxu0 %v1096_v15 }
  0x24   : > { %1008 = vmatprep.subr.bf16.mxu0 %v1134_v2 }
  0x26   : > { %1029 = vmatpush3.bf16.msra.mxu1 %v1097_v16 }
  0x27   : > { %1030 = vmatprep.subr.bf16.mxu1 %v1134_v2  ;;  %1009 = vmatpush3.bf16.msra.mxu0 %v1098_v17 }
  0x28   : > { %1010 = vmatprep.subr.bf16.mxu0 %v1134_v2 }
  0x2a   : > { %1031 = vmatpush3.bf16.msra.mxu1 %v1099_v18 }
  0x2b   : > { %1011 = vmatpush3.bf16.msra.mxu0 %v1100_v19 }
  0x2c   : > { %1036 = vmatprep.subr.bf16.mxu0 %v1134_v2 }
  0x8b   : > { %v344_v25 = vpop.permute.xlu0 %343 }
  0x8c   : > { %v351_v29 = vmul.f32 %v344_v25, %v337_v26 }
  0x8e   : > { %v387_v32 = vrot.slane %v351_v29, %v1267_v28  ;;  %v600_v46 = vcombine.high %v351_v29, %v351_v29 }
  0x8f   : > { %v349_v30 = vpop.permute.xlu0 %348 }
  0x90   : > { %v352_v31 = vmul.f32 %v349_v30, %v338_v27  ;;  %v607_v49 = vrot.slane %v600_v46, %v1267_v28 }
  0x92   : > { %v355_v33 = vcombine.low %v351_v29, %v352_v31  ;;  %v395_v34 = vrot.slane %v352_v31, %v1267_v28  ;;  %v608_v45 = vcombine.high %v352_v31, %v352_v31 }
  0x94   : > { %v362_v35 = vrot.slane %v355_v33, %v1267_v28  ;;  %v904_v36 = vcombine.high %v387_v32, %v395_v34  ;;  %v615_v48 = vrot.slane %v608_v45, %v1267_v28 }
  0x96   : > { %v364_v37 = vpack.c.bf16 %v362_v35, %v362_v35  ;;  %v404_v38 = vrot.slane %v904_v36, %v1267_v28  ;;  %v616_v51 = vcombine.low %v607_v49, %v615_v48 }
  0x98   : > { %1033 = vmatmul.mubr.bf16.vlgmr.msra.gmra.mxu1 %v364_v37  ;;  %v406_v40 = vpack.c.bf16 %v404_v38, %v404_v38  ;;  %v623_v53 = vrot.slane %v616_v51, %v1267_v28 }
  0x9a   : > { %1013 = vmatmul.mubr.bf16.vlgmr.msra.gmra.mxu0 %v406_v40  ;;  %v625_v54 = vpack.c.bf16 %v623_v53, %v623_v53 }
  0x9b   : > { %1037 = vmatpush3.bf16.msra.mxu0 %v1101_v39  ;;  %1052 = vmatprep.mubr.msk.bf16.mxu0 %vm1135_vm0, %v1134_v2 }
  0x9c   : > { %1038 = vmatprep.subr.bf16.mxu0 %v1134_v2 }
  0x9f   : > { %1039 = vmatpush3.bf16.msra.mxu0 %v1102_v41 }
  0xa0   : > { %1040 = vmatprep.subr.bf16.mxu0 %v1134_v2 }
  0xa3   : > { %1041 = vmatpush3.bf16.msra.mxu0 %v1103_v42 }
  0xa4   : > { %1042 = vmatprep.subr.bf16.mxu0 %v1134_v2 }
  0xa7   : > { %1043 = vmatpush3.bf16.msra.mxu0 %v1104_v43 }
  0xa8   : > { %1044 = vmatprep.subr.bf16.mxu0 %v1134_v2 }
  0xab   : > { %1045 = vmatpush3.bf16.msra.mxu0 %v1105_v44 }
  0xac   : > { %1046 = vmatprep.subr.bf16.mxu0 %v1134_v2 }
  0xaf   : > { %1047 = vmatpush3.bf16.msra.mxu0 %v1106_v47 }
  0xb0   : > { %1048 = vmatprep.subr.bf16.mxu0 %v1134_v2 }
  0xb3   : > { %1049 = vmatpush3.bf16.msra.mxu0 %v1107_v50 }
  0xb4   : > { %1050 = vmatprep.subr.bf16.mxu0 %v1134_v2 }
  0xb7   : > { %1051 = vmatpush3.bf16.msra.mxu0 %v1108_v52 }
  0xba   : > { %1053 = vmatmul.mubr.bf16.vlgmr.msra.gmra.mxu0 %v625_v54 }
 0x158   : > { %v594_v55 = vpop.f32.mrf.mxu1 }
 0x15a   : > { %v506_v56 = vpop.f32.mrf.mxu0  ;;  %v1034_v57 = vpop.f32.mrf.mxu1 }
 0x15b   : > { %v595_v2 = vadd.f32 %v594_v55, %v506_v56 }
 0x15c   : > { %v1014_v58 = vpop.f32.mrf.mxu0  ;;  %v597_v59 = vpop.f32.mrf.mxu1 }
 0x15e   : > { %v509_v60 = vpop.f32.mrf.mxu0  ;;  %v1035_v61 = vpop.f32.mrf.mxu1 }
 0x160   : > { %v1015_v62 = vpop.f32.mrf.mxu0 }
 0x17a   : > { %v725_v3 = vpop.f32.mrf.mxu0 }
 0x17b   : > { %v731_v5 = vadd.f32 %v725_v3, %v595_v2 }
 0x17c   : > { %v1054_v7 = vpop.f32.mrf.mxu0 }
 0x17d   : > { %v739_v8 = vadd.f32 %v961_v4, %v731_v5 }
 0x17e   : > { %v728_v9 = vpop.f32.mrf.mxu0 }
 0x17f   : > { %v753_v10 = vadd.f32 %v751_v6, %v739_v8 }
 0x180   : > { %v1055_v11 = vpop.f32.mrf.mxu0 }
 0x181   : > { %v754_v12 = vmax.f32 %v753_v10, 0.0 }
 0x183   : > { %v762_v13 = vrot.slane %v754_v12, %v1267_v28  ;;  %962 = vst.sshfl [vmem:[%s334_s17] sm:$0x3 pattern:$0x76325410] %v754_v12 }
 0x185   : > { %v763_v14 = vcombine.high %v762_v13, %v762_v13 }
 0x187   : > { %767 = vst [vmem:[%s334_s17 + $0x2] sm:$0x3] %v763_v14 }
 0x188 PF: > { %s15_s20 = sadd.s32 1, %s1131_s20   ;;  %s1336_s18 = smov %s1127_s19 }
 0x189   : > { %p12_p5 = scmp.ge.s32.totalorder %s15_s20, 4   ;;  %s1337_s19 = smov %s1339_s21 }
 0x18b   :  { %14 = sbr.rel (!%p12_p5) target bundleno = 2 (0x2), region = 78 }

// kernel: _lambda_.84
= control target key start
LH: loop header
LB: loop body
LE: loop exit
PB: predicated region body
PF: predicated region fallthrough
CT: control target
= control target key end

     0   :  { %s1048_s15 = smov 0   ;;  %s1050_s16 = smov 0   ;;  %s1205_s0 = inlined_call_operand.vmem [shape: f32[2,10,2,128], index: 0, kind: input, shape index: {}]   ;;  %s1206_s1 = inlined_call_operand.vmem [shape: f32[2,10,2,1], index: 1, kind: input, shape index: {}]   ;;  %s1207_s2 = inlined_call_operand.vmem [shape: bf16[3,128,128], index: 2, kind: input, shape index: {}]   ;;  %s1208_s3 = inlined_call_operand.vmem [shape: f32[1,128], index: 3, kind: input, shape index: {}]   ;;  %s1209_s4 = inlined_call_operand.vmem [shape: f32[2,2,2,128], index: 4, kind: output, shape index: {}]  }
   0x1   :  { %s1052_s17 = smov 0  }
   0x2 LB: > { %s26_s18 = sadd.s32 1, %s1013_s16  ;;  %p787_p0 = scmp.ge.s32.totalorder %s1017_s17, 1  ;;  %s1017_s17 = sphi %s1052_s17, %s14_s17   ;;  %s1013_s16 = sphi %s1050_s16, %s1211_s16   ;;  %s1009_s15 = sphi %s1048_s15, %s1210_s15  }
   0x3   : > { %p28_p1 = scmp.ge.s32.totalorder %s26_s18, 2  ;;  %p196_p2 = scmp.lt.s32.totalorder %s1017_s17, 3 }
   0x5   : > { %s1213_s18 = smov (%p28_p1, %s26_s18), 0  ;;  %p197_p3 = pnand %p787_p0, %p196_p2 }
   0x6   : > { %p236_p4 = scmp.lt.s32.totalorder (!%p197_p3), %s1009_s15, 1 }
   0x7   : > { %200 = sbr.rel (%p197_p3) target bundleno = 389 (0x185), region = 36 }
   0xc   : > { %v971_v0 = vld [vmem:[%s1207_s2 + $0x78] sm:$0xff]   ;;  %v1019_v1 = vmov 0   ;;  %s1215_s15 = smov (!%p236_p4, %s1009_s15), 1  ;;  %v1020_v2 = vmov 0.0   ;;  %v973_v4 = vld [vmem:[%s1207_s2 + $0x70] sm:$0xff]   ;;  %v975_v8 = vld [vmem:[%s1207_s2 + $0x68] sm:$0xff]   ;;  %v315_v26 = vlaneseq }
   0xd   : > { %970 = vset.pattern.permute.xlu1 %v1019_v1  ;;  %969 = vset.pattern.permute.xlu0 %v1019_v1  ;;  %v972_v3 = vld [vmem:[%s1207_s2 + $0x38] sm:$0xff]   ;;  %s940_s25 = smul.u32 20, %s1215_s15  ;;  %v974_v5 = vld [vmem:[%s1207_s2 + $0x30] sm:$0xff]   ;;  %v976_v10 = vld [vmem:[%s1207_s2 + $0x28] sm:$0xff]   ;;  %vm1021_vm0 = vmmov 0   ;;  %s852_s7 = sshll.u32 %s1215_s15, 2 }
   0xe   : > { %880 = vmatprep.subr.bf16.mxu0 %v1020_v2  ;;  %900 = vmatprep.subr.bf16.mxu1 %v1020_v2  ;;  %v977_v12 = vld [vmem:[%s1207_s2 + $0x60] sm:$0xff]   ;;  %v979_v16 = vld [vmem:[%s1207_s2 + $0x58] sm:$0xff]   ;;  %v981_v18 = vld [vmem:[%s1207_s2 + $0x50] sm:$0xff]   ;;  %v1022_v24 = vmov 1983009808   ;;  %v316_v31 = vshrl.u32 %v315_v26, 7 }
   0xf   : > { %881 = vmatpush3.bf16.msra.mxu0 %v971_v0  ;;  %901 = vmatpush3.bf16.msra.mxu1 %v972_v3  ;;  %s251_s30 = scalar_lea.vmem %s1206_s1, %s940_s25  ;;  %v978_v15 = vld [vmem:[%s1207_s2 + $0x20] sm:$0xff]   ;;  %v980_v17 = vld [vmem:[%s1207_s2 + $0x18] sm:$0xff]   ;;  %v982_v19 = vld [vmem:[%s1207_s2 + $0x10] sm:$0xff]   ;;  %v313_v25 = vunpack.c.l.s4 %v1022_v24  ;;  %s1148_s10 = scalar_lea.vmem %s1205_s0, %s940_s25 }
  0x10   : > { %882 = vmatprep.subr.bf16.mxu0 %v1020_v2  ;;  %902 = vmatprep.subr.bf16.mxu1 %v1020_v2  ;;  %v269_v6 = vld [vmem:[%s251_s30 + $0x8] sm:$0x3]  ;;  %v267_v7 = vld [vmem:[%s251_s30] sm:$0x3]  ;;  %v270_v9 = vld [vmem:[%s251_s30 + $0xa] sm:$0x3] }
  0x11   : > { %285 = vperm.xlu0 %969, %v269_v6   ;;  %275 = vperm.xlu1 %970, %v267_v7   ;;  %v268_v11 = vld [vmem:[%s251_s30 + $0x2] sm:$0x3]  ;;  %v271_v13 = vld [vmem:[%s251_s30 + $0x10] sm:$0x3]  ;;  %v272_v14 = vld [vmem:[%s251_s30 + $0x12] sm:$0x3]  ;;  %v314_v30 = vunpack.c.0.s8 %v313_v25 }
  0x12   : > { %896 = vmatprep.mubr.msk.bf16.mxu0 %vm1021_vm0, %v1020_v2  ;;  %916 = vmatprep.mubr.msk.bf16.mxu1 %vm1021_vm0, %v1020_v2  ;;  %v983_v20 = vld [vmem:[%s1207_s2 + $0x48] sm:$0xff]   ;;  %v985_v22 = vld [vmem:[%s1207_s2 + $0x40] sm:$0xff]   ;;  %v987_v46 = vld [vmem:[%s1207_s2 + $0xb8] sm:$0xff]  }
  0x13   : > { %883 = vmatpush3.bf16.msra.mxu0 %v973_v4  ;;  %903 = vmatpush3.bf16.msra.mxu1 %v974_v5  ;;  %v984_v21 = vld [vmem:[%s1207_s2 + $0x8] sm:$0xff]   ;;  %v986_v23 = vld [vmem:[%s1207_s2] sm:$0xff]   ;;  %v317_v41 = vsub.s32 %v314_v30, %v316_v31  ;;  %v988_v49 = vld [vmem:[%s1207_s2 + $0xb0] sm:$0xff]  }
  0x14   : > { %884 = vmatprep.subr.bf16.mxu0 %v1020_v2  ;;  %904 = vmatprep.subr.bf16.mxu1 %v1020_v2  ;;  %v261_v29 = vld [vmem:[%s1148_s10] sm:$0x3]  ;;  %v263_v32 = vld [vmem:[%s1148_s10 + $0x8] sm:$0x3]  ;;  %v264_v33 = vld [vmem:[%s1148_s10 + $0xa] sm:$0x3] }
  0x15   : > { %290 = vperm.xlu0 %969, %v270_v9   ;;  %280 = vperm.xlu1 %970, %v268_v11   ;;  %v262_v34 = vld [vmem:[%s1148_s10 + $0x2] sm:$0x3]  ;;  %v989_v50 = vld [vmem:[%s1207_s2 + $0xa8] sm:$0xff]   ;;  %v991_v52 = vld [vmem:[%s1207_s2 + $0x98] sm:$0xff]  }
  0x16   : > { %v990_v51 = vld [vmem:[%s1207_s2 + $0xa0] sm:$0xff]   ;;  %v265_v54 = vld [vmem:[%s1148_s10 + $0x10] sm:$0x3]  ;;  %v266_v56 = vld [vmem:[%s1148_s10 + $0x12] sm:$0x3]  ;;  %s259_s10 = scalar_lea.vmem %s1209_s4, %s852_s7 }
  0x17   : > { %885 = vmatpush3.bf16.msra.mxu0 %v975_v8  ;;  %905 = vmatpush3.bf16.msra.mxu1 %v976_v10  ;;  %v992_v57 = vld [vmem:[%s1207_s2 + $0x90] sm:$0xff]   ;;  %v993_v60 = vld [vmem:[%s1207_s2 + $0x88] sm:$0xff]   ;;  %v994_v62 = vld [vmem:[%s1207_s2 + $0x80] sm:$0xff]  }
  0x18   : > { %886 = vmatprep.subr.bf16.mxu0 %v1020_v2  ;;  %906 = vmatprep.subr.bf16.mxu1 %v1020_v2 }
  0x19   : > { %295 = vperm.xlu0 %969, %v271_v13   ;;  %300 = vperm.xlu1 %970, %v272_v14  }
  0x1b   : > { %887 = vmatpush3.bf16.msra.mxu0 %v977_v12  ;;  %907 = vmatpush3.bf16.msra.mxu1 %v978_v15  ;;  %v848_v12 = vld [vmem:[%s1208_s3] ss:$0 sm:$0xff] }
  0x1c   : > { %888 = vmatprep.subr.bf16.mxu0 %v1020_v2  ;;  %908 = vmatprep.subr.bf16.mxu1 %v1020_v2 }
  0x1f   : > { %889 = vmatpush3.bf16.msra.mxu0 %v979_v16  ;;  %909 = vmatpush3.bf16.msra.mxu1 %v980_v17 }
  0x20   : > { %890 = vmatprep.subr.bf16.mxu0 %v1020_v2  ;;  %910 = vmatprep.subr.bf16.mxu1 %v1020_v2 }
  0x23   : > { %891 = vmatpush3.bf16.msra.mxu0 %v981_v18  ;;  %911 = vmatpush3.bf16.msra.mxu1 %v982_v19 }
  0x24   : > { %892 = vmatprep.subr.bf16.mxu0 %v1020_v2  ;;  %912 = vmatprep.subr.bf16.mxu1 %v1020_v2 }
  0x27   : > { %893 = vmatpush3.bf16.msra.mxu0 %v983_v20  ;;  %913 = vmatpush3.bf16.msra.mxu1 %v984_v21 }
  0x28   : > { %894 = vmatprep.subr.bf16.mxu0 %v1020_v2  ;;  %914 = vmatprep.subr.bf16.mxu1 %v1020_v2 }
  0x2b   : > { %895 = vmatpush3.bf16.msra.mxu0 %v985_v22  ;;  %915 = vmatpush3.bf16.msra.mxu1 %v986_v23 }
  0x2c   : > { %920 = vmatprep.subr.bf16.mxu0 %v1020_v2 }
  0x8c   : > { %v286_v27 = vpop.permute.xlu0 %285  ;;  %v276_v28 = vpop.permute.xlu1 %275 }
  0x8d   : > { %v303_v35 = vmul.f32 %v276_v28, %v261_v29  ;;  %v305_v38 = vmul.f32 %v286_v27, %v263_v32 }
  0x90   : > { %v291_v36 = vpop.permute.xlu0 %290  ;;  %v281_v37 = vpop.permute.xlu1 %280 }
  0x91   : > { %v306_v39 = vmul.f32 %v291_v36, %v264_v33  ;;  %v304_v40 = vmul.f32 %v281_v37, %v262_v34 }
  0x93   : > { %v339_v42 = vcombine.low %v305_v38, %v306_v39  ;;  %v311_v43 = vcombine.low %v303_v35, %v304_v40 }
  0x94   : > { %v296_v53 = vpop.permute.xlu0 %295  ;;  %v301_v55 = vpop.permute.xlu1 %300 }
  0x95   : > { %v346_v44 = vrot.slane %v339_v42, %v317_v41  ;;  %v318_v45 = vrot.slane %v311_v43, %v317_v41  ;;  %v307_v58 = vmul.f32 %v296_v53, %v265_v54  ;;  %v308_v59 = vmul.f32 %v301_v55, %v266_v56 }
  0x97   : > { %v348_v47 = vpack.c.bf16 %v346_v44, %v346_v44  ;;  %v320_v48 = vpack.c.bf16 %v318_v45, %v318_v45  ;;  %v544_v61 = vcombine.low %v307_v58, %v308_v59 }
  0x99   : > { %897 = vmatmul.mubr.bf16.vlgmr.msra.gmra.mxu0 %v348_v47  ;;  %917 = vmatmul.mubr.bf16.vlgmr.msra.gmra.mxu1 %v320_v48  ;;  %v551_v63 = vrot.slane %v544_v61, %v317_v41 }
  0x9a   : > { %921 = vmatpush3.bf16.msra.mxu0 %v987_v46  ;;  %936 = vmatprep.mubr.msk.bf16.mxu0 %vm1021_vm0, %v1020_v2 }
  0x9b   : > { %922 = vmatprep.subr.bf16.mxu0 %v1020_v2  ;;  %v553_v0 = vpack.c.bf16 %v551_v63, %v551_v63 }
  0x9e   : > { %923 = vmatpush3.bf16.msra.mxu0 %v988_v49 }
  0x9f   : > { %924 = vmatprep.subr.bf16.mxu0 %v1020_v2 }
  0xa2   : > { %925 = vmatpush3.bf16.msra.mxu0 %v989_v50 }
  0xa3   : > { %926 = vmatprep.subr.bf16.mxu0 %v1020_v2 }
  0xa6   : > { %927 = vmatpush3.bf16.msra.mxu0 %v990_v51 }
  0xa7   : > { %928 = vmatprep.subr.bf16.mxu0 %v1020_v2 }
  0xaa   : > { %929 = vmatpush3.bf16.msra.mxu0 %v991_v52 }
  0xab   : > { %930 = vmatprep.subr.bf16.mxu0 %v1020_v2 }
  0xae   : > { %931 = vmatpush3.bf16.msra.mxu0 %v992_v57 }
  0xaf   : > { %932 = vmatprep.subr.bf16.mxu0 %v1020_v2 }
  0xb2   : > { %933 = vmatpush3.bf16.msra.mxu0 %v993_v60 }
  0xb3   : > { %934 = vmatprep.subr.bf16.mxu0 %v1020_v2 }
  0xb6   : > { %935 = vmatpush3.bf16.msra.mxu0 %v994_v62 }
  0xb9   : > { %937 = vmatmul.mubr.bf16.vlgmr.msra.gmra.mxu0 %v553_v0 }
 0x159   : > { %v448_v1 = vpop.f32.mrf.mxu0  ;;  %v536_v3 = vpop.f32.mrf.mxu1 }
 0x15a   : > { %v537_v10 = vadd.f32 %v536_v3, %v448_v1 }
 0x15b   : > { %v898_v4 = vpop.f32.mrf.mxu0  ;;  %v918_v5 = vpop.f32.mrf.mxu1 }
 0x15d   : > { %v451_v6 = vpop.f32.mrf.mxu0  ;;  %v539_v7 = vpop.f32.mrf.mxu1 }
 0x15f   : > { %v899_v8 = vpop.f32.mrf.mxu0  ;;  %v919_v9 = vpop.f32.mrf.mxu1 }
 0x179   : > { %v653_v11 = vpop.f32.mrf.mxu0 }
 0x17a   : > { %v659_v13 = vadd.f32 %v653_v11, %v537_v10 }
 0x17b   : > { %v938_v2 = vpop.f32.mrf.mxu0 }
 0x17c   : > { %v667_v14 = vadd.f32 %v848_v12, %v659_v13 }
 0x17d   : > { %v656_v15 = vpop.f32.mrf.mxu0 }
 0x17e   : > { %v668_v16 = vmax.f32 %v667_v14, 0.0 }
 0x17f   : > { %v939_v17 = vpop.f32.mrf.mxu0 }
 0x180   : > { %v676_v18 = vrot.slane %v668_v16, %v317_v41  ;;  %849 = vst.sshfl [vmem:[%s259_s10] sm:$0x3 pattern:$0x76325410] %v668_v16 }
 0x182   : > { %v677_v19 = vcombine.high %v676_v18, %v676_v18 }
 0x184   : > { %681 = vst [vmem:[%s259_s10 + $0x2] sm:$0x3] %v677_v19 }
 0x185 PF: > { %s14_s17 = sadd.s32 1, %s1017_s17   ;;  %s1210_s15 = smov %s1013_s16 }
 0x186   : > { %p11_p5 = scmp.ge.s32.totalorder %s14_s17, 4   ;;  %s1211_s16 = smov %s1213_s18 }
 0x188   :  { %13 = sbr.rel (!%p11_p5) target bundleno = 2 (0x2), region = 71 }

// kernel: _lambda_.85
= control target key start
LH: loop header
LB: loop body
LE: loop exit
PB: predicated region body
PF: predicated region fallthrough
CT: control target
= control target key end

     0   :  { %s1181_s18 = smov 0   ;;  %s1183_s19 = smov 0   ;;  %s1348_s0 = inlined_call_operand.vmem [shape: f32[2,2,10,128], index: 0, kind: input, shape index: {}]   ;;  %s1349_s1 = inlined_call_operand.vmem [shape: f32[2,2,10,1], index: 1, kind: input, shape index: {}]   ;;  %s1350_s2 = inlined_call_operand.vmem [shape: bf16[3,128,128], index: 2, kind: input, shape index: {}]   ;;  %s1351_s3 = inlined_call_operand.vmem [shape: f32[1,128], index: 3, kind: input, shape index: {}]   ;;  %s1352_s4 = inlined_call_operand.vmem [shape: f32[2,2,2,128], index: 4, kind: input, shape index: {}]   ;;  %s1353_s5 = inlined_call_operand.vmem [shape: f32[2,2,2,128], index: 5, kind: output, shape index: {}]  }
   0x1   :  { %s1185_s20 = smov 0  }
   0x2 LB: > { %s27_s21 = sadd.s32 1, %s1141_s19  ;;  %p909_p0 = scmp.ge.s32.totalorder %s1145_s20, 1  ;;  %s1145_s20 = sphi %s1185_s20, %s15_s20   ;;  %s1141_s19 = sphi %s1183_s19, %s1355_s19   ;;  %s1137_s18 = sphi %s1181_s18, %s1354_s18  }
   0x3   : > { %p29_p1 = scmp.ge.s32.totalorder %s27_s21, 2  ;;  %p244_p2 = scmp.lt.s32.totalorder %s1145_s20, 3 }
   0x5   : > { %s1357_s21 = smov (%p29_p1, %s27_s21), 0  ;;  %p245_p3 = pnand %p909_p0, %p244_p2 }
   0x6   : > { %p301_p4 = scmp.lt.s32.totalorder (!%p245_p3), %s1137_s18, 1 }
   0x7   : > { %248 = sbr.rel (%p245_p3) target bundleno = 395 (0x18b), region = 40 }
   0xc   : > { %v1099_v0 = vld [vmem:[%s1350_s2 + $0x38] sm:$0xff]   ;;  %v1147_v1 = vmov 0   ;;  %s1359_s18 = smov (!%p301_p4, %s1137_s18), 1  ;;  %v1148_v2 = vmov 0.0   ;;  %v1101_v4 = vld [vmem:[%s1350_s2 + $0x30] sm:$0xff]   ;;  %v1103_v8 = vld [vmem:[%s1350_s2 + $0x28] sm:$0xff]   ;;  %v381_v24 = vlaneseq }
   0xd   : > { %1097 = vset.pattern.permute.xlu0 %v1147_v1  ;;  %1098 = vset.pattern.permute.xlu1 %v1147_v1  ;;  %v1100_v3 = vld [vmem:[%s1350_s2 + $0x78] sm:$0xff]   ;;  %s978_s28 = sshll.u32 %s1359_s18, 5  ;;  %v1102_v5 = vld [vmem:[%s1350_s2 + $0x70] sm:$0xff]   ;;  %v1104_v11 = vld [vmem:[%s1350_s2 + $0x68] sm:$0xff]   ;;  %vm1149_vm0 = vmmov 0   ;;  %s980_s11 = sshll.u32 %s1359_s18, 2 }
   0xe   : > { %1029 = vmatprep.subr.bf16.mxu1 %v1148_v2  ;;  %1009 = vmatprep.subr.bf16.mxu0 %v1148_v2  ;;  %s320_s8 = scalar_lea.vmem %s1349_s1, %s978_s28  ;;  %v1105_v12 = vld [vmem:[%s1350_s2 + $0x20] sm:$0xff]   ;;  %v1107_v14 = vld [vmem:[%s1350_s2 + $0x18] sm:$0xff]   ;;  %v1109_v16 = vld [vmem:[%s1350_s2 + $0x10] sm:$0xff]   ;;  %s1281_s15 = scalar_lea.vmem %s1348_s0, %s978_s28  ;;  %v1150_v22 = vmov 1983009808   ;;  %v382_v28 = vshrl.u32 %v381_v24, 7 }
   0xf   : > { %1030 = vmatpush3.bf16.msra.mxu1 %v1099_v0  ;;  %1010 = vmatpush3.bf16.msra.mxu0 %v1100_v3  ;;  %v347_v6 = vld [vmem:[%s320_s8] sm:$0xff]  ;;  %v348_v7 = vld [vmem:[%s320_s8 + $0x8] sm:$0x3]  ;;  %v349_v9 = vld [vmem:[%s320_s8 + $0x10] sm:$0xff]  ;;  %v379_v23 = vunpack.c.l.s4 %v1150_v22  ;;  %s330_s14 = scalar_lea.vmem %s1352_s4, %s980_s11  ;;  %s340_s17 = scalar_lea.vmem %s1353_s5, %s980_s11 }
  0x10   : > { %1031 = vmatprep.subr.bf16.mxu1 %v1148_v2  ;;  %1011 = vmatprep.subr.bf16.mxu0 %v1148_v2  ;;  %v350_v10 = vld [vmem:[%s320_s8 + $0x18] sm:$0x3]  ;;  %v1106_v13 = vld [vmem:[%s1350_s2 + $0x60] sm:$0xff]   ;;  %v1110_v17 = vld [vmem:[%s1350_s2 + $0x50] sm:$0xff]  }
  0x11   : > { %353 = vperm.xlu0 %1097, %v347_v6   ;;  %358 = vperm.xlu1 %1098, %v348_v7   ;;  %v1108_v15 = vld [vmem:[%s1350_s2 + $0x58] sm:$0xff]   ;;  %v1111_v18 = vld [vmem:[%s1350_s2 + $0x8] sm:$0xff]   ;;  %v1113_v20 = vld [vmem:[%s1350_s2] sm:$0xff]   ;;  %v380_v27 = vunpack.c.0.s8 %v379_v23 }
  0x12   : > { %1045 = vmatprep.mubr.msk.bf16.mxu1 %vm1149_vm0, %v1148_v2  ;;  %1025 = vmatprep.mubr.msk.bf16.mxu0 %vm1149_vm0, %v1148_v2  ;;  %v1112_v19 = vld [vmem:[%s1350_s2 + $0x48] sm:$0xff]   ;;  %v1114_v21 = vld [vmem:[%s1350_s2 + $0x40] sm:$0xff]   ;;  %v345_v30 = vld [vmem:[%s1281_s15 + $0x10] sm:$0xff] }
  0x13   : > { %1032 = vmatpush3.bf16.msra.mxu1 %v1101_v4  ;;  %1012 = vmatpush3.bf16.msra.mxu0 %v1102_v5  ;;  %v343_v25 = vld [vmem:[%s1281_s15] sm:$0xff]  ;;  %v1285_v32 = vsub.s32 %v380_v27, %v382_v28  ;;  %v1115_v43 = vld [vmem:[%s1350_s2 + $0xb8] sm:$0xff]   ;;  %v1116_v45 = vld [vmem:[%s1350_s2 + $0xb0] sm:$0xff]  }
  0x14   : > { %1033 = vmatprep.subr.bf16.mxu1 %v1148_v2  ;;  %1013 = vmatprep.subr.bf16.mxu0 %v1148_v2  ;;  %v1117_v46 = vld [vmem:[%s1350_s2 + $0xa8] sm:$0xff]   ;;  %v1118_v47 = vld [vmem:[%s1350_s2 + $0xa0] sm:$0xff]   ;;  %v1119_v49 = vld [vmem:[%s1350_s2 + $0x98] sm:$0xff]  }
  0x15   : > { %363 = vperm.xlu0 %1097, %v349_v9   ;;  %368 = vperm.xlu1 %1098, %v350_v10   ;;  %v344_v50 = vld [vmem:[%s1281_s15 + $0x8] sm:$0x3]  ;;  %v346_v52 = vld [vmem:[%s1281_s15 + $0x18] sm:$0x3]  ;;  %v1120_v53 = vld [vmem:[%s1350_s2 + $0x90] sm:$0xff]  }
  0x16   : > { %v1121_v56 = vld [vmem:[%s1350_s2 + $0x88] sm:$0xff]   ;;  %v1122_v58 = vld [vmem:[%s1350_s2 + $0x80] sm:$0xff]  }
  0x17   : > { %1034 = vmatpush3.bf16.msra.mxu1 %v1103_v8  ;;  %1014 = vmatpush3.bf16.msra.mxu0 %v1104_v11  ;;  %v748_v6 = vld [vmem:[%s330_s14] sm:$0x3]  ;;  %v749_v7 = vld [vmem:[%s330_s14 + $0x2] sm:$0x3] }
  0x18   : > { %1035 = vmatprep.subr.bf16.mxu1 %v1148_v2  ;;  %1015 = vmatprep.subr.bf16.mxu0 %v1148_v2  ;;  %v752_v8 = vcombine.low %v748_v6, %v749_v7  ;;  %v974_v10 = vld [vmem:[%s1351_s3] ss:$0 sm:$0xff] }
  0x1b   : > { %1036 = vmatpush3.bf16.msra.mxu1 %v1105_v12  ;;  %1016 = vmatpush3.bf16.msra.mxu0 %v1106_v13  ;;  %v759_v12 = vrot.slane %v752_v8, %v1285_v32 }
  0x1c   : > { %1037 = vmatprep.subr.bf16.mxu1 %v1148_v2  ;;  %1017 = vmatprep.subr.bf16.mxu0 %v1148_v2 }
  0x1f   : > { %1038 = vmatpush3.bf16.msra.mxu1 %v1107_v14  ;;  %1018 = vmatpush3.bf16.msra.mxu0 %v1108_v15 }
  0x20   : > { %1039 = vmatprep.subr.bf16.mxu1 %v1148_v2  ;;  %1019 = vmatprep.subr.bf16.mxu0 %v1148_v2 }
  0x23   : > { %1040 = vmatpush3.bf16.msra.mxu1 %v1109_v16  ;;  %1020 = vmatpush3.bf16.msra.mxu0 %v1110_v17 }
  0x24   : > { %1041 = vmatprep.subr.bf16.mxu1 %v1148_v2  ;;  %1021 = vmatprep.subr.bf16.mxu0 %v1148_v2 }
  0x27   : > { %1042 = vmatpush3.bf16.msra.mxu1 %v1111_v18  ;;  %1022 = vmatpush3.bf16.msra.mxu0 %v1112_v19 }
  0x28   : > { %1043 = vmatprep.subr.bf16.mxu1 %v1148_v2  ;;  %1023 = vmatprep.subr.bf16.mxu0 %v1148_v2 }
  0x2b   : > { %1044 = vmatpush3.bf16.msra.mxu1 %v1113_v20  ;;  %1024 = vmatpush3.bf16.msra.mxu0 %v1114_v21 }
  0x2c   : > { %1049 = vmatprep.subr.bf16.mxu0 %v1148_v2 }
  0x8c   : > { %v354_v26 = vpop.permute.xlu0 %353  ;;  %v359_v48 = vpop.permute.xlu1 %358 }
  0x8d   : > { %v371_v29 = vmul.f32 %v354_v26, %v343_v25  ;;  %v372_v54 = vmul.f32 %v359_v48, %v344_v50 }
  0x8f   : > { %v403_v33 = vcombine.high %v371_v29, %v371_v29 }
  0x90   : > { %v364_v31 = vpop.permute.xlu0 %363  ;;  %v369_v51 = vpop.permute.xlu1 %368 }
  0x91   : > { %v373_v34 = vmul.f32 %v364_v31, %v345_v30  ;;  %v410_v37 = vrot.slane %v403_v33, %v1285_v32  ;;  %v374_v55 = vmul.f32 %v369_v51, %v346_v52 }
  0x93   : > { %v377_v35 = vcombine.low %v371_v29, %v373_v34  ;;  %v411_v36 = vcombine.high %v373_v34, %v373_v34  ;;  %v624_v57 = vcombine.low %v372_v54, %v374_v55 }
  0x95   : > { %v418_v38 = vrot.slane %v411_v36, %v1285_v32  ;;  %v384_v39 = vrot.slane %v377_v35, %v1285_v32  ;;  %v631_v59 = vrot.slane %v624_v57, %v1285_v32 }
  0x97   : > { %v386_v40 = vpack.c.bf16 %v384_v39, %v384_v39  ;;  %v419_v41 = vcombine.low %v410_v37, %v418_v38  ;;  %v633_v60 = vpack.c.bf16 %v631_v59, %v631_v59 }
  0x99   : > { %1046 = vmatmul.mubr.bf16.vlgmr.msra.gmra.mxu1 %v386_v40  ;;  %v426_v42 = vrot.slane %v419_v41, %v1285_v32 }
  0x9b   : > { %v428_v44 = vpack.c.bf16 %v426_v42, %v426_v42 }
  0x9d   : > { %1026 = vmatmul.mubr.bf16.vlgmr.msra.gmra.mxu0 %v428_v44 }
  0x9e   : > { %1050 = vmatpush3.bf16.msra.mxu0 %v1115_v43  ;;  %1065 = vmatprep.mubr.msk.bf16.mxu0 %vm1149_vm0, %v1148_v2 }
  0x9f   : > { %1051 = vmatprep.subr.bf16.mxu0 %v1148_v2 }
  0xa2   : > { %1052 = vmatpush3.bf16.msra.mxu0 %v1116_v45 }
  0xa3   : > { %1053 = vmatprep.subr.bf16.mxu0 %v1148_v2 }
  0xa6   : > { %1054 = vmatpush3.bf16.msra.mxu0 %v1117_v46 }
  0xa7   : > { %1055 = vmatprep.subr.bf16.mxu0 %v1148_v2 }
  0xaa   : > { %1056 = vmatpush3.bf16.msra.mxu0 %v1118_v47 }
  0xab   : > { %1057 = vmatprep.subr.bf16.mxu0 %v1148_v2 }
  0xae   : > { %1058 = vmatpush3.bf16.msra.mxu0 %v1119_v49 }
  0xaf   : > { %1059 = vmatprep.subr.bf16.mxu0 %v1148_v2 }
  0xb2   : > { %1060 = vmatpush3.bf16.msra.mxu0 %v1120_v53 }
  0xb3   : > { %1061 = vmatprep.subr.bf16.mxu0 %v1148_v2 }
  0xb6   : > { %1062 = vmatpush3.bf16.msra.mxu0 %v1121_v56 }
  0xb7   : > { %1063 = vmatprep.subr.bf16.mxu0 %v1148_v2 }
  0xba   : > { %1064 = vmatpush3.bf16.msra.mxu0 %v1122_v58 }
  0xbd   : > { %1066 = vmatmul.mubr.bf16.vlgmr.msra.gmra.mxu0 %v633_v60 }
 0x159   : > { %v616_v61 = vpop.f32.mrf.mxu1 }
 0x15b   : > { %v1047_v62 = vpop.f32.mrf.mxu1 }
 0x15d   : > { %v528_v63 = vpop.f32.mrf.mxu0  ;;  %v619_v0 = vpop.f32.mrf.mxu1 }
 0x15e   : > { %v617_v2 = vadd.f32 %v616_v61, %v528_v63 }
 0x15f   : > { %v1027_v1 = vpop.f32.mrf.mxu0  ;;  %v1048_v3 = vpop.f32.mrf.mxu1 }
 0x161   : > { %v531_v4 = vpop.f32.mrf.mxu0 }
 0x163   : > { %v1028_v5 = vpop.f32.mrf.mxu0 }
 0x17d   : > { %v733_v9 = vpop.f32.mrf.mxu0 }
 0x17e   : > { %v739_v11 = vadd.f32 %v733_v9, %v617_v2 }
 0x17f   : > { %v1067_v13 = vpop.f32.mrf.mxu0 }
 0x180   : > { %v747_v14 = vadd.f32 %v974_v10, %v739_v11 }
 0x181   : > { %v736_v15 = vpop.f32.mrf.mxu0 }
 0x182   : > { %v761_v16 = vadd.f32 %v759_v12, %v747_v14 }
 0x183   : > { %v1068_v17 = vpop.f32.mrf.mxu0 }
 0x184   : > { %v762_v18 = vmax.f32 %v761_v16, 0.0 }
 0x186   : > { %v770_v19 = vrot.slane %v762_v18, %v1285_v32  ;;  %975 = vst.sshfl [vmem:[%s340_s17] sm:$0x3 pattern:$0x76325410] %v762_v18 }
 0x188   : > { %v771_v20 = vcombine.high %v770_v19, %v770_v19 }
 0x18a   : > { %775 = vst [vmem:[%s340_s17 + $0x2] sm:$0x3] %v771_v20 }
 0x18b PF: > { %s15_s20 = sadd.s32 1, %s1145_s20   ;;  %s1354_s18 = smov %s1141_s19 }
 0x18c   : > { %p12_p5 = scmp.ge.s32.totalorder %s15_s20, 4   ;;  %s1355_s19 = smov %s1357_s21 }
 0x18e   :  { %14 = sbr.rel (!%p12_p5) target bundleno = 2 (0x2), region = 78 }

// kernel: _lambda_.88
= control target key start
LH: loop header
LB: loop body
LE: loop exit
PB: predicated region body
PF: predicated region fallthrough
CT: control target
= control target key end

     0   :  { %s1048_s15 = smov 0   ;;  %s1050_s16 = smov 0   ;;  %s1205_s0 = inlined_call_operand.vmem [shape: f32[2,18,2,128], index: 0, kind: input, shape index: {}]   ;;  %s1206_s1 = inlined_call_operand.vmem [shape: f32[2,18,2,1], index: 1, kind: input, shape index: {}]   ;;  %s1207_s2 = inlined_call_operand.vmem [shape: bf16[3,128,128], index: 2, kind: input, shape index: {}]   ;;  %s1208_s3 = inlined_call_operand.vmem [shape: f32[1,128], index: 3, kind: input, shape index: {}]   ;;  %s1209_s4 = inlined_call_operand.vmem [shape: f32[2,2,2,128], index: 4, kind: output, shape index: {}]  }
   0x1   :  { %s1052_s17 = smov 0  }
   0x2 LB: > { %s26_s18 = sadd.s32 1, %s1013_s16  ;;  %p787_p0 = scmp.ge.s32.totalorder %s1017_s17, 1  ;;  %s1017_s17 = sphi %s1052_s17, %s14_s17   ;;  %s1013_s16 = sphi %s1050_s16, %s1211_s16   ;;  %s1009_s15 = sphi %s1048_s15, %s1210_s15  }
   0x3   : > { %p28_p1 = scmp.ge.s32.totalorder %s26_s18, 2  ;;  %p196_p2 = scmp.lt.s32.totalorder %s1017_s17, 3 }
   0x5   : > { %s1213_s18 = smov (%p28_p1, %s26_s18), 0  ;;  %p197_p3 = pnand %p787_p0, %p196_p2 }
   0x6   : > { %p236_p4 = scmp.lt.s32.totalorder (!%p197_p3), %s1009_s15, 1 }
   0x7   : > { %200 = sbr.rel (%p197_p3) target bundleno = 389 (0x185), region = 36 }
   0xc   : > { %v971_v0 = vld [vmem:[%s1207_s2 + $0x78] sm:$0xff]   ;;  %v1019_v1 = vmov 0   ;;  %s1215_s15 = smov (!%p236_p4, %s1009_s15), 1  ;;  %v1020_v2 = vmov 0.0   ;;  %v973_v4 = vld [vmem:[%s1207_s2 + $0x70] sm:$0xff]   ;;  %v975_v8 = vld [vmem:[%s1207_s2 + $0x68] sm:$0xff]   ;;  %v315_v26 = vlaneseq }
   0xd   : > { %970 = vset.pattern.permute.xlu1 %v1019_v1  ;;  %969 = vset.pattern.permute.xlu0 %v1019_v1  ;;  %v972_v3 = vld [vmem:[%s1207_s2 + $0x38] sm:$0xff]   ;;  %s940_s25 = smul.u32 36, %s1215_s15  ;;  %v974_v5 = vld [vmem:[%s1207_s2 + $0x30] sm:$0xff]   ;;  %v976_v10 = vld [vmem:[%s1207_s2 + $0x28] sm:$0xff]   ;;  %vm1021_vm0 = vmmov 0   ;;  %s852_s7 = sshll.u32 %s1215_s15, 2 }
   0xe   : > { %880 = vmatprep.subr.bf16.mxu0 %v1020_v2  ;;  %900 = vmatprep.subr.bf16.mxu1 %v1020_v2  ;;  %v977_v12 = vld [vmem:[%s1207_s2 + $0x60] sm:$0xff]   ;;  %v979_v16 = vld [vmem:[%s1207_s2 + $0x58] sm:$0xff]   ;;  %v981_v18 = vld [vmem:[%s1207_s2 + $0x50] sm:$0xff]   ;;  %v1022_v24 = vmov 1983009808   ;;  %v316_v31 = vshrl.u32 %v315_v26, 7 }
   0xf   : > { %881 = vmatpush3.bf16.msra.mxu0 %v971_v0  ;;  %901 = vmatpush3.bf16.msra.mxu1 %v972_v3  ;;  %s251_s30 = scalar_lea.vmem %s1206_s1, %s940_s25  ;;  %v978_v15 = vld [vmem:[%s1207_s2 + $0x20] sm:$0xff]   ;;  %v980_v17 = vld [vmem:[%s1207_s2 + $0x18] sm:$0xff]   ;;  %v982_v19 = vld [vmem:[%s1207_s2 + $0x10] sm:$0xff]   ;;  %v313_v25 = vunpack.c.l.s4 %v1022_v24  ;;  %s1148_s10 = scalar_lea.vmem %s1205_s0, %s940_s25 }
  0x10   : > { %882 = vmatprep.subr.bf16.mxu0 %v1020_v2  ;;  %902 = vmatprep.subr.bf16.mxu1 %v1020_v2  ;;  %v269_v6 = vld [vmem:[%s251_s30 + $0x10] sm:$0x3]  ;;  %v267_v7 = vld [vmem:[%s251_s30] sm:$0x3]  ;;  %v270_v9 = vld [vmem:[%s251_s30 + $0x12] sm:$0x3] }
  0x11   : > { %285 = vperm.xlu0 %969, %v269_v6   ;;  %275 = vperm.xlu1 %970, %v267_v7   ;;  %v268_v11 = vld [vmem:[%s251_s30 + $0x2] sm:$0x3]  ;;  %v271_v13 = vld [vmem:[%s251_s30 + $0x20] sm:$0x3]  ;;  %v983_v20 = vld [vmem:[%s1207_s2 + $0x48] sm:$0xff]   ;;  %v314_v30 = vunpack.c.0.s8 %v313_v25 }
  0x12   : > { %v272_v14 = vld [vmem:[%s251_s30 + $0x22] sm:$0x3]  ;;  %896 = vmatprep.mubr.msk.bf16.mxu0 %vm1021_vm0, %v1020_v2  ;;  %916 = vmatprep.mubr.msk.bf16.mxu1 %vm1021_vm0, %v1020_v2  ;;  %v984_v21 = vld [vmem:[%s1207_s2 + $0x8] sm:$0xff]   ;;  %v261_v29 = vld [vmem:[%s1148_s10] sm:$0x3] }
  0x13   : > { %883 = vmatpush3.bf16.msra.mxu0 %v973_v4  ;;  %903 = vmatpush3.bf16.msra.mxu1 %v974_v5  ;;  %v985_v22 = vld [vmem:[%s1207_s2 + $0x40] sm:$0xff]   ;;  %v263_v32 = vld [vmem:[%s1148_s10 + $0x10] sm:$0x3]  ;;  %v264_v33 = vld [vmem:[%s1148_s10 + $0x12] sm:$0x3]  ;;  %v317_v41 = vsub.s32 %v314_v30, %v316_v31 }
  0x14   : > { %884 = vmatprep.subr.bf16.mxu0 %v1020_v2  ;;  %904 = vmatprep.subr.bf16.mxu1 %v1020_v2  ;;  %v986_v23 = vld [vmem:[%s1207_s2] sm:$0xff]   ;;  %v987_v46 = vld [vmem:[%s1207_s2 + $0xb8] sm:$0xff]   ;;  %v988_v49 = vld [vmem:[%s1207_s2 + $0xb0] sm:$0xff]  }
  0x15   : > { %290 = vperm.xlu0 %969, %v270_v9   ;;  %280 = vperm.xlu1 %970, %v268_v11   ;;  %v262_v34 = vld [vmem:[%s1148_s10 + $0x2] sm:$0x3]  ;;  %v989_v50 = vld [vmem:[%s1207_s2 + $0xa8] sm:$0xff]   ;;  %v991_v52 = vld [vmem:[%s1207_s2 + $0x98] sm:$0xff]  }
  0x16   : > { %v990_v51 = vld [vmem:[%s1207_s2 + $0xa0] sm:$0xff]   ;;  %v992_v57 = vld [vmem:[%s1207_s2 + $0x90] sm:$0xff]   ;;  %v993_v60 = vld [vmem:[%s1207_s2 + $0x88] sm:$0xff]  }
  0x17   : > { %885 = vmatpush3.bf16.msra.mxu0 %v975_v8  ;;  %905 = vmatpush3.bf16.msra.mxu1 %v976_v10  ;;  %v265_v54 = vld [vmem:[%s1148_s10 + $0x20] sm:$0x3]  ;;  %v266_v56 = vld [vmem:[%s1148_s10 + $0x22] sm:$0x3]  ;;  %s259_s10 = scalar_lea.vmem %s1209_s4, %s852_s7 }
  0x18   : > { %886 = vmatprep.subr.bf16.mxu0 %v1020_v2  ;;  %906 = vmatprep.subr.bf16.mxu1 %v1020_v2  ;;  %v994_v62 = vld [vmem:[%s1207_s2 + $0x80] sm:$0xff]  }
  0x19   : > { %295 = vperm.xlu0 %969, %v271_v13   ;;  %300 = vperm.xlu1 %970, %v272_v14  }
  0x1b   : > { %887 = vmatpush3.bf16.msra.mxu0 %v977_v12  ;;  %907 = vmatpush3.bf16.msra.mxu1 %v978_v15  ;;  %v848_v12 = vld [vmem:[%s1208_s3] ss:$0 sm:$0xff] }
  0x1c   : > { %888 = vmatprep.subr.bf16.mxu0 %v1020_v2  ;;  %908 = vmatprep.subr.bf16.mxu1 %v1020_v2 }
  0x1f   : > { %889 = vmatpush3.bf16.msra.mxu0 %v979_v16  ;;  %909 = vmatpush3.bf16.msra.mxu1 %v980_v17 }
  0x20   : > { %890 = vmatprep.subr.bf16.mxu0 %v1020_v2  ;;  %910 = vmatprep.subr.bf16.mxu1 %v1020_v2 }
  0x23   : > { %891 = vmatpush3.bf16.msra.mxu0 %v981_v18  ;;  %911 = vmatpush3.bf16.msra.mxu1 %v982_v19 }
  0x24   : > { %892 = vmatprep.subr.bf16.mxu0 %v1020_v2  ;;  %912 = vmatprep.subr.bf16.mxu1 %v1020_v2 }
  0x27   : > { %893 = vmatpush3.bf16.msra.mxu0 %v983_v20  ;;  %913 = vmatpush3.bf16.msra.mxu1 %v984_v21 }
  0x28   : > { %894 = vmatprep.subr.bf16.mxu0 %v1020_v2  ;;  %914 = vmatprep.subr.bf16.mxu1 %v1020_v2 }
  0x2b   : > { %895 = vmatpush3.bf16.msra.mxu0 %v985_v22  ;;  %915 = vmatpush3.bf16.msra.mxu1 %v986_v23 }
  0x2c   : > { %920 = vmatprep.subr.bf16.mxu0 %v1020_v2 }
  0x8c   : > { %v286_v27 = vpop.permute.xlu0 %285  ;;  %v276_v28 = vpop.permute.xlu1 %275 }
  0x8d   : > { %v303_v35 = vmul.f32 %v276_v28, %v261_v29  ;;  %v305_v38 = vmul.f32 %v286_v27, %v263_v32 }
  0x90   : > { %v291_v36 = vpop.permute.xlu0 %290  ;;  %v281_v37 = vpop.permute.xlu1 %280 }
  0x91   : > { %v306_v39 = vmul.f32 %v291_v36, %v264_v33  ;;  %v304_v40 = vmul.f32 %v281_v37, %v262_v34 }
  0x93   : > { %v339_v42 = vcombine.low %v305_v38, %v306_v39  ;;  %v311_v43 = vcombine.low %v303_v35, %v304_v40 }
  0x94   : > { %v296_v53 = vpop.permute.xlu0 %295  ;;  %v301_v55 = vpop.permute.xlu1 %300 }
  0x95   : > { %v346_v44 = vrot.slane %v339_v42, %v317_v41  ;;  %v318_v45 = vrot.slane %v311_v43, %v317_v41  ;;  %v307_v58 = vmul.f32 %v296_v53, %v265_v54  ;;  %v308_v59 = vmul.f32 %v301_v55, %v266_v56 }
  0x97   : > { %v348_v47 = vpack.c.bf16 %v346_v44, %v346_v44  ;;  %v320_v48 = vpack.c.bf16 %v318_v45, %v318_v45  ;;  %v544_v61 = vcombine.low %v307_v58, %v308_v59 }
  0x99   : > { %897 = vmatmul.mubr.bf16.vlgmr.msra.gmra.mxu0 %v348_v47  ;;  %917 = vmatmul.mubr.bf16.vlgmr.msra.gmra.mxu1 %v320_v48  ;;  %v551_v63 = vrot.slane %v544_v61, %v317_v41 }
  0x9a   : > { %921 = vmatpush3.bf16.msra.mxu0 %v987_v46  ;;  %936 = vmatprep.mubr.msk.bf16.mxu0 %vm1021_vm0, %v1020_v2 }
  0x9b   : > { %922 = vmatprep.subr.bf16.mxu0 %v1020_v2  ;;  %v553_v0 = vpack.c.bf16 %v551_v63, %v551_v63 }
  0x9e   : > { %923 = vmatpush3.bf16.msra.mxu0 %v988_v49 }
  0x9f   : > { %924 = vmatprep.subr.bf16.mxu0 %v1020_v2 }
  0xa2   : > { %925 = vmatpush3.bf16.msra.mxu0 %v989_v50 }
  0xa3   : > { %926 = vmatprep.subr.bf16.mxu0 %v1020_v2 }
  0xa6   : > { %927 = vmatpush3.bf16.msra.mxu0 %v990_v51 }
  0xa7   : > { %928 = vmatprep.subr.bf16.mxu0 %v1020_v2 }
  0xaa   : > { %929 = vmatpush3.bf16.msra.mxu0 %v991_v52 }
  0xab   : > { %930 = vmatprep.subr.bf16.mxu0 %v1020_v2 }
  0xae   : > { %931 = vmatpush3.bf16.msra.mxu0 %v992_v57 }
  0xaf   : > { %932 = vmatprep.subr.bf16.mxu0 %v1020_v2 }
  0xb2   : > { %933 = vmatpush3.bf16.msra.mxu0 %v993_v60 }
  0xb3   : > { %934 = vmatprep.subr.bf16.mxu0 %v1020_v2 }
  0xb6   : > { %935 = vmatpush3.bf16.msra.mxu0 %v994_v62 }
  0xb9   : > { %937 = vmatmul.mubr.bf16.vlgmr.msra.gmra.mxu0 %v553_v0 }
 0x159   : > { %v448_v1 = vpop.f32.mrf.mxu0  ;;  %v536_v3 = vpop.f32.mrf.mxu1 }
 0x15a   : > { %v537_v10 = vadd.f32 %v536_v3, %v448_v1 }
 0x15b   : > { %v898_v4 = vpop.f32.mrf.mxu0  ;;  %v918_v5 = vpop.f32.mrf.mxu1 }
 0x15d   : > { %v451_v6 = vpop.f32.mrf.mxu0  ;;  %v539_v7 = vpop.f32.mrf.mxu1 }
 0x15f   : > { %v899_v8 = vpop.f32.mrf.mxu0  ;;  %v919_v9 = vpop.f32.mrf.mxu1 }
 0x179   : > { %v653_v11 = vpop.f32.mrf.mxu0 }
 0x17a   : > { %v659_v13 = vadd.f32 %v653_v11, %v537_v10 }
 0x17b   : > { %v938_v2 = vpop.f32.mrf.mxu0 }
 0x17c   : > { %v667_v14 = vadd.f32 %v848_v12, %v659_v13 }
 0x17d   : > { %v656_v15 = vpop.f32.mrf.mxu0 }
 0x17e   : > { %v668_v16 = vmax.f32 %v667_v14, 0.0 }
 0x17f   : > { %v939_v17 = vpop.f32.mrf.mxu0 }
 0x180   : > { %v676_v18 = vrot.slane %v668_v16, %v317_v41  ;;  %849 = vst.sshfl [vmem:[%s259_s10] sm:$0x3 pattern:$0x76325410] %v668_v16 }
 0x182   : > { %v677_v19 = vcombine.high %v676_v18, %v676_v18 }
 0x184   : > { %681 = vst [vmem:[%s259_s10 + $0x2] sm:$0x3] %v677_v19 }
 0x185 PF: > { %s14_s17 = sadd.s32 1, %s1017_s17   ;;  %s1210_s15 = smov %s1013_s16 }
 0x186   : > { %p11_p5 = scmp.ge.s32.totalorder %s14_s17, 4   ;;  %s1211_s16 = smov %s1213_s18 }
 0x188   :  { %13 = sbr.rel (!%p11_p5) target bundleno = 2 (0x2), region = 71 }

// kernel: _lambda_.89
= control target key start
LH: loop header
LB: loop body
LE: loop exit
PB: predicated region body
PF: predicated region fallthrough
CT: control target
= control target key end

     0   :  { %s1180_s18 = smov 0   ;;  %s1182_s19 = smov 0   ;;  %s1347_s0 = inlined_call_operand.vmem [shape: f32[2,2,18,128], index: 0, kind: input, shape index: {}]   ;;  %s1348_s1 = inlined_call_operand.vmem [shape: f32[2,2,18,1], index: 1, kind: input, shape index: {}]   ;;  %s1349_s2 = inlined_call_operand.vmem [shape: bf16[3,128,128], index: 2, kind: input, shape index: {}]   ;;  %s1350_s3 = inlined_call_operand.vmem [shape: f32[1,128], index: 3, kind: input, shape index: {}]   ;;  %s1351_s4 = inlined_call_operand.vmem [shape: f32[2,2,2,128], index: 4, kind: input, shape index: {}]   ;;  %s1352_s5 = inlined_call_operand.vmem [shape: f32[2,2,2,128], index: 5, kind: output, shape index: {}]  }
   0x1   :  { %s1184_s20 = smov 0  }
   0x2 LB: > { %s27_s21 = sadd.s32 1, %s1140_s19  ;;  %p911_p0 = scmp.ge.s32.totalorder %s1144_s20, 1  ;;  %s1144_s20 = sphi %s1184_s20, %s15_s20   ;;  %s1140_s19 = sphi %s1182_s19, %s1354_s19   ;;  %s1136_s18 = sphi %s1180_s18, %s1353_s18  }
   0x3   : > { %p29_p1 = scmp.ge.s32.totalorder %s27_s21, 2  ;;  %p244_p2 = scmp.lt.s32.totalorder %s1144_s20, 3 }
   0x5   : > { %s1356_s21 = smov (%p29_p1, %s27_s21), 0  ;;  %p245_p3 = pnand %p911_p0, %p244_p2 }
   0x6   : > { %p301_p4 = scmp.lt.s32.totalorder (!%p245_p3), %s1136_s18, 1 }
   0x7   : > { %248 = sbr.rel (%p245_p3) target bundleno = 391 (0x187), region = 40 }
   0xc   : > { %v1098_v0 = vld [vmem:[%s1349_s2 + $0x78] sm:$0xff]   ;;  %v1146_v1 = vmov 0   ;;  %s1358_s18 = smov (!%p301_p4, %s1136_s18), 1  ;;  %v1147_v2 = vmov 0.0   ;;  %v1100_v4 = vld [vmem:[%s1349_s2 + $0x70] sm:$0xff]   ;;  %v1102_v8 = vld [vmem:[%s1349_s2 + $0x68] sm:$0xff]   ;;  %v397_v26 = vlaneseq }
   0xd   : > { %1097 = vset.pattern.permute.xlu1 %v1146_v1  ;;  %1096 = vset.pattern.permute.xlu0 %v1146_v1  ;;  %v1099_v3 = vld [vmem:[%s1349_s2 + $0x38] sm:$0xff]   ;;  %s1067_s28 = smul.u32 48, %s1358_s18  ;;  %v1101_v5 = vld [vmem:[%s1349_s2 + $0x30] sm:$0xff]   ;;  %v1103_v10 = vld [vmem:[%s1349_s2 + $0x28] sm:$0xff]   ;;  %vm1148_vm0 = vmmov 0   ;;  %s978_s11 = sshll.u32 %s1358_s18, 2 }
   0xe   : > { %1007 = vmatprep.subr.bf16.mxu0 %v1147_v2  ;;  %1027 = vmatprep.subr.bf16.mxu1 %v1147_v2  ;;  %v1104_v12 = vld [vmem:[%s1349_s2 + $0x60] sm:$0xff]   ;;  %v1106_v16 = vld [vmem:[%s1349_s2 + $0x58] sm:$0xff]   ;;  %v1108_v18 = vld [vmem:[%s1349_s2 + $0x50] sm:$0xff]   ;;  %v1149_v24 = vmov 1983009808   ;;  %v398_v31 = vshrl.u32 %v397_v26, 7  ;;  %s330_s14 = scalar_lea.vmem %s1351_s4, %s978_s11  ;;  %s340_s17 = scalar_lea.vmem %s1352_s5, %s978_s11 }
   0xf   : > { %1008 = vmatpush3.bf16.msra.mxu0 %v1098_v0  ;;  %1028 = vmatpush3.bf16.msra.mxu1 %v1099_v3  ;;  %s320_s8 = scalar_lea.vmem %s1348_s1, %s1067_s28  ;;  %v1105_v15 = vld [vmem:[%s1349_s2 + $0x20] sm:$0xff]   ;;  %v1107_v17 = vld [vmem:[%s1349_s2 + $0x18] sm:$0xff]   ;;  %v1109_v19 = vld [vmem:[%s1349_s2 + $0x10] sm:$0xff]   ;;  %v395_v25 = vunpack.c.l.s4 %v1149_v24  ;;  %s1280_s15 = scalar_lea.vmem %s1347_s0, %s1067_s28 }
  0x10   : > { %1009 = vmatprep.subr.bf16.mxu0 %v1147_v2  ;;  %1029 = vmatprep.subr.bf16.mxu1 %v1147_v2  ;;  %v350_v6 = vld [vmem:[%s320_s8 + $0x8] sm:$0xff]  ;;  %v349_v7 = vld [vmem:[%s320_s8] sm:$0xff]  ;;  %v352_v11 = vld [vmem:[%s320_s8 + $0x18] sm:$0xff] }
  0x11   : > { %362 = vperm.xlu0 %1096, %v350_v6   ;;  %357 = vperm.xlu1 %1097, %v349_v7   ;;  %v353_v9 = vld [vmem:[%s320_s8 + $0x20] sm:$0xff]  ;;  %v351_v13 = vld [vmem:[%s320_s8 + $0x10] sm:$0x3]  ;;  %v354_v14 = vld [vmem:[%s320_s8 + $0x28] sm:$0x3]  ;;  %v396_v30 = vunpack.c.0.s8 %v395_v25 }
  0x12   : > { %1023 = vmatprep.mubr.msk.bf16.mxu0 %vm1148_vm0, %v1147_v2  ;;  %1043 = vmatprep.mubr.msk.bf16.mxu1 %vm1148_vm0, %v1147_v2  ;;  %v1110_v20 = vld [vmem:[%s1349_s2 + $0x48] sm:$0xff]   ;;  %v1112_v22 = vld [vmem:[%s1349_s2 + $0x40] sm:$0xff]   ;;  %v346_v34 = vld [vmem:[%s1280_s15 + $0x18] sm:$0xff] }
  0x13   : > { %1010 = vmatpush3.bf16.msra.mxu0 %v1100_v4  ;;  %1030 = vmatpush3.bf16.msra.mxu1 %v1101_v5  ;;  %v1111_v21 = vld [vmem:[%s1349_s2 + $0x8] sm:$0xff]   ;;  %v1113_v23 = vld [vmem:[%s1349_s2] sm:$0xff]   ;;  %v1286_v41 = vsub.s32 %v396_v30, %v398_v31  ;;  %v1114_v46 = vld [vmem:[%s1349_s2 + $0xb8] sm:$0xff]  }
  0x14   : > { %1011 = vmatprep.subr.bf16.mxu0 %v1147_v2  ;;  %1031 = vmatprep.subr.bf16.mxu1 %v1147_v2  ;;  %v343_v29 = vld [vmem:[%s1280_s15] sm:$0xff]  ;;  %v344_v32 = vld [vmem:[%s1280_s15 + $0x8] sm:$0xff]  ;;  %v1115_v49 = vld [vmem:[%s1349_s2 + $0xb0] sm:$0xff]  }
  0x15   : > { %377 = vperm.xlu0 %1096, %v353_v9   ;;  %372 = vperm.xlu1 %1097, %v352_v11   ;;  %v347_v33 = vld [vmem:[%s1280_s15 + $0x20] sm:$0xff]  ;;  %v1116_v50 = vld [vmem:[%s1349_s2 + $0xa8] sm:$0xff]   ;;  %v1118_v52 = vld [vmem:[%s1349_s2 + $0x98] sm:$0xff]  }
  0x16   : > { %v1117_v51 = vld [vmem:[%s1349_s2 + $0xa0] sm:$0xff]   ;;  %v345_v54 = vld [vmem:[%s1280_s15 + $0x10] sm:$0x3]  ;;  %v348_v56 = vld [vmem:[%s1280_s15 + $0x28] sm:$0x3] }
  0x17   : > { %1012 = vmatpush3.bf16.msra.mxu0 %v1102_v8  ;;  %1032 = vmatpush3.bf16.msra.mxu1 %v1103_v10  ;;  %v1119_v57 = vld [vmem:[%s1349_s2 + $0x90] sm:$0xff]   ;;  %v1120_v60 = vld [vmem:[%s1349_s2 + $0x88] sm:$0xff]   ;;  %v1121_v62 = vld [vmem:[%s1349_s2 + $0x80] sm:$0xff]  }
  0x18   : > { %1013 = vmatprep.subr.bf16.mxu0 %v1147_v2  ;;  %1033 = vmatprep.subr.bf16.mxu1 %v1147_v2  ;;  %v750_v10 = vld [vmem:[%s330_s14] sm:$0x3]  ;;  %v751_v11 = vld [vmem:[%s330_s14 + $0x2] sm:$0x3] }
  0x19   : > { %367 = vperm.xlu0 %1096, %v351_v13   ;;  %382 = vperm.xlu1 %1097, %v354_v14   ;;  %v974_v14 = vld [vmem:[%s1350_s3] ss:$0 sm:$0xff] }
  0x1b   : > { %1014 = vmatpush3.bf16.msra.mxu0 %v1104_v12  ;;  %1034 = vmatpush3.bf16.msra.mxu1 %v1105_v15  ;;  %v754_v12 = vcombine.low %v750_v10, %v751_v11 }
  0x1c   : > { %1015 = vmatprep.subr.bf16.mxu0 %v1147_v2  ;;  %1035 = vmatprep.subr.bf16.mxu1 %v1147_v2 }
  0x1f   : > { %1016 = vmatpush3.bf16.msra.mxu0 %v1106_v16  ;;  %1036 = vmatpush3.bf16.msra.mxu1 %v1107_v17  ;;  %v761_v16 = vrot.slane %v754_v12, %v1286_v41 }
  0x20   : > { %1017 = vmatprep.subr.bf16.mxu0 %v1147_v2  ;;  %1037 = vmatprep.subr.bf16.mxu1 %v1147_v2 }
  0x23   : > { %1018 = vmatpush3.bf16.msra.mxu0 %v1108_v18  ;;  %1038 = vmatpush3.bf16.msra.mxu1 %v1109_v19 }
  0x24   : > { %1019 = vmatprep.subr.bf16.mxu0 %v1147_v2  ;;  %1039 = vmatprep.subr.bf16.mxu1 %v1147_v2 }
  0x27   : > { %1020 = vmatpush3.bf16.msra.mxu0 %v1110_v20  ;;  %1040 = vmatpush3.bf16.msra.mxu1 %v1111_v21 }
  0x28   : > { %1021 = vmatprep.subr.bf16.mxu0 %v1147_v2  ;;  %1041 = vmatprep.subr.bf16.mxu1 %v1147_v2 }
  0x2b   : > { %1022 = vmatpush3.bf16.msra.mxu0 %v1112_v22  ;;  %1042 = vmatpush3.bf16.msra.mxu1 %v1113_v23 }
  0x2c   : > { %1047 = vmatprep.subr.bf16.mxu0 %v1147_v2 }
  0x8c   : > { %v363_v27 = vpop.permute.xlu0 %362  ;;  %v358_v28 = vpop.permute.xlu1 %357 }
  0x8d   : > { %v385_v35 = vmul.f32 %v358_v28, %v343_v29  ;;  %v386_v38 = vmul.f32 %v363_v27, %v344_v32 }
  0x90   : > { %v378_v36 = vpop.permute.xlu0 %377  ;;  %v373_v37 = vpop.permute.xlu1 %372 }
  0x91   : > { %v389_v39 = vmul.f32 %v378_v36, %v347_v33  ;;  %v388_v40 = vmul.f32 %v373_v37, %v346_v34 }
  0x93   : > { %v421_v42 = vcombine.low %v386_v38, %v389_v39  ;;  %v393_v43 = vcombine.low %v385_v35, %v388_v40 }
  0x94   : > { %v368_v53 = vpop.permute.xlu0 %367  ;;  %v383_v55 = vpop.permute.xlu1 %382 }
  0x95   : > { %v428_v44 = vrot.slane %v421_v42, %v1286_v41  ;;  %v400_v45 = vrot.slane %v393_v43, %v1286_v41  ;;  %v387_v58 = vmul.f32 %v368_v53, %v345_v54  ;;  %v390_v59 = vmul.f32 %v383_v55, %v348_v56 }
  0x97   : > { %v430_v47 = vpack.c.bf16 %v428_v44, %v428_v44  ;;  %v402_v48 = vpack.c.bf16 %v400_v45, %v400_v45  ;;  %v626_v61 = vcombine.low %v387_v58, %v390_v59 }
  0x99   : > { %1024 = vmatmul.mubr.bf16.vlgmr.msra.gmra.mxu0 %v430_v47  ;;  %1044 = vmatmul.mubr.bf16.vlgmr.msra.gmra.mxu1 %v402_v48  ;;  %v633_v63 = vrot.slane %v626_v61, %v1286_v41 }
  0x9a   : > { %1048 = vmatpush3.bf16.msra.mxu0 %v1114_v46  ;;  %1063 = vmatprep.mubr.msk.bf16.mxu0 %vm1148_vm0, %v1147_v2 }
  0x9b   : > { %1049 = vmatprep.subr.bf16.mxu0 %v1147_v2  ;;  %v635_v0 = vpack.c.bf16 %v633_v63, %v633_v63 }
  0x9e   : > { %1050 = vmatpush3.bf16.msra.mxu0 %v1115_v49 }
  0x9f   : > { %1051 = vmatprep.subr.bf16.mxu0 %v1147_v2 }
  0xa2   : > { %1052 = vmatpush3.bf16.msra.mxu0 %v1116_v50 }
  0xa3   : > { %1053 = vmatprep.subr.bf16.mxu0 %v1147_v2 }
  0xa6   : > { %1054 = vmatpush3.bf16.msra.mxu0 %v1117_v51 }
  0xa7   : > { %1055 = vmatprep.subr.bf16.mxu0 %v1147_v2 }
  0xaa   : > { %1056 = vmatpush3.bf16.msra.mxu0 %v1118_v52 }
  0xab   : > { %1057 = vmatprep.subr.bf16.mxu0 %v1147_v2 }
  0xae   : > { %1058 = vmatpush3.bf16.msra.mxu0 %v1119_v57 }
  0xaf   : > { %1059 = vmatprep.subr.bf16.mxu0 %v1147_v2 }
  0xb2   : > { %1060 = vmatpush3.bf16.msra.mxu0 %v1120_v60 }
  0xb3   : > { %1061 = vmatprep.subr.bf16.mxu0 %v1147_v2 }
  0xb6   : > { %1062 = vmatpush3.bf16.msra.mxu0 %v1121_v62 }
  0xb9   : > { %1064 = vmatmul.mubr.bf16.vlgmr.msra.gmra.mxu0 %v635_v0 }
 0x159   : > { %v530_v1 = vpop.f32.mrf.mxu0  ;;  %v618_v3 = vpop.f32.mrf.mxu1 }
 0x15a   : > { %v619_v2 = vadd.f32 %v618_v3, %v530_v1 }
 0x15b   : > { %v1025_v4 = vpop.f32.mrf.mxu0  ;;  %v1045_v5 = vpop.f32.mrf.mxu1 }
 0x15d   : > { %v533_v6 = vpop.f32.mrf.mxu0  ;;  %v621_v7 = vpop.f32.mrf.mxu1 }
 0x15f   : > { %v1026_v8 = vpop.f32.mrf.mxu0  ;;  %v1046_v9 = vpop.f32.mrf.mxu1 }
 0x179   : > { %v735_v13 = vpop.f32.mrf.mxu0 }
 0x17a   : > { %v741_v15 = vadd.f32 %v735_v13, %v619_v2 }
 0x17b   : > { %v1065_v17 = vpop.f32.mrf.mxu0 }
 0x17c   : > { %v749_v18 = vadd.f32 %v974_v14, %v741_v15 }
 0x17d   : > { %v738_v19 = vpop.f32.mrf.mxu0 }
 0x17e   : > { %v763_v20 = vadd.f32 %v761_v16, %v749_v18 }
 0x17f   : > { %v1066_v21 = vpop.f32.mrf.mxu0 }
 0x180   : > { %v764_v22 = vmax.f32 %v763_v20, 0.0 }
 0x182   : > { %v772_v23 = vrot.slane %v764_v22, %v1286_v41  ;;  %975 = vst.sshfl [vmem:[%s340_s17] sm:$0x3 pattern:$0x76325410] %v764_v22 }
 0x184   : > { %v773_v24 = vcombine.high %v772_v23, %v772_v23 }
 0x186   : > { %777 = vst [vmem:[%s340_s17 + $0x2] sm:$0x3] %v773_v24 }
 0x187 PF: > { %s15_s20 = sadd.s32 1, %s1144_s20   ;;  %s1353_s18 = smov %s1140_s19 }
 0x188   : > { %p12_p5 = scmp.ge.s32.totalorder %s15_s20, 4   ;;  %s1354_s19 = smov %s1356_s21 }
 0x18a   :  { %14 = sbr.rel (!%p12_p5) target bundleno = 2 (0x2), region = 78 }

// kernel: _lambda_.92
= control target key start
LH: loop header
LB: loop body
LE: loop exit
PB: predicated region body
PF: predicated region fallthrough
CT: control target
= control target key end

     0   :  { %s1048_s15 = smov 0   ;;  %s1050_s16 = smov 0   ;;  %s1205_s0 = inlined_call_operand.vmem [shape: f32[2,34,2,128], index: 0, kind: input, shape index: {}]   ;;  %s1206_s1 = inlined_call_operand.vmem [shape: f32[2,34,2,1], index: 1, kind: input, shape index: {}]   ;;  %s1207_s2 = inlined_call_operand.vmem [shape: bf16[3,128,128], index: 2, kind: input, shape index: {}]   ;;  %s1208_s3 = inlined_call_operand.vmem [shape: f32[1,128], index: 3, kind: input, shape index: {}]   ;;  %s1209_s4 = inlined_call_operand.vmem [shape: f32[2,2,2,128], index: 4, kind: output, shape index: {}]  }
   0x1   :  { %s1052_s17 = smov 0  }
   0x2 LB: > { %s26_s18 = sadd.s32 1, %s1013_s16  ;;  %p787_p0 = scmp.ge.s32.totalorder %s1017_s17, 1  ;;  %s1017_s17 = sphi %s1052_s17, %s14_s17   ;;  %s1013_s16 = sphi %s1050_s16, %s1211_s16   ;;  %s1009_s15 = sphi %s1048_s15, %s1210_s15  }
   0x3   : > { %p28_p1 = scmp.ge.s32.totalorder %s26_s18, 2  ;;  %p196_p2 = scmp.lt.s32.totalorder %s1017_s17, 3 }
   0x5   : > { %s1213_s18 = smov (%p28_p1, %s26_s18), 0  ;;  %p197_p3 = pnand %p787_p0, %p196_p2 }
   0x6   : > { %p236_p4 = scmp.lt.s32.totalorder (!%p197_p3), %s1009_s15, 1 }
   0x7   : > { %200 = sbr.rel (%p197_p3) target bundleno = 389 (0x185), region = 36 }
   0xc   : > { %v971_v0 = vld [vmem:[%s1207_s2 + $0x78] sm:$0xff]   ;;  %v1019_v1 = vmov 0   ;;  %s1215_s15 = smov (!%p236_p4, %s1009_s15), 1  ;;  %v1020_v2 = vmov 0.0   ;;  %v973_v4 = vld [vmem:[%s1207_s2 + $0x70] sm:$0xff]   ;;  %v975_v8 = vld [vmem:[%s1207_s2 + $0x68] sm:$0xff]   ;;  %v315_v26 = vlaneseq }
   0xd   : > { %970 = vset.pattern.permute.xlu1 %v1019_v1  ;;  %969 = vset.pattern.permute.xlu0 %v1019_v1  ;;  %v972_v3 = vld [vmem:[%s1207_s2 + $0x38] sm:$0xff]   ;;  %s940_s25 = smul.u32 68, %s1215_s15  ;;  %v974_v5 = vld [vmem:[%s1207_s2 + $0x30] sm:$0xff]   ;;  %v976_v10 = vld [vmem:[%s1207_s2 + $0x28] sm:$0xff]   ;;  %vm1021_vm0 = vmmov 0   ;;  %s852_s7 = sshll.u32 %s1215_s15, 2 }
   0xe   : > { %880 = vmatprep.subr.bf16.mxu0 %v1020_v2  ;;  %900 = vmatprep.subr.bf16.mxu1 %v1020_v2  ;;  %v977_v12 = vld [vmem:[%s1207_s2 + $0x60] sm:$0xff]   ;;  %v979_v16 = vld [vmem:[%s1207_s2 + $0x58] sm:$0xff]   ;;  %v981_v18 = vld [vmem:[%s1207_s2 + $0x50] sm:$0xff]   ;;  %v1022_v24 = vmov 1983009808   ;;  %v316_v31 = vshrl.u32 %v315_v26, 7 }
   0xf   : > { %881 = vmatpush3.bf16.msra.mxu0 %v971_v0  ;;  %901 = vmatpush3.bf16.msra.mxu1 %v972_v3  ;;  %s251_s30 = scalar_lea.vmem %s1206_s1, %s940_s25  ;;  %v978_v15 = vld [vmem:[%s1207_s2 + $0x20] sm:$0xff]   ;;  %v980_v17 = vld [vmem:[%s1207_s2 + $0x18] sm:$0xff]   ;;  %v982_v19 = vld [vmem:[%s1207_s2 + $0x10] sm:$0xff]   ;;  %v313_v25 = vunpack.c.l.s4 %v1022_v24  ;;  %s1148_s10 = scalar_lea.vmem %s1205_s0, %s940_s25 }
  0x10   : > { %882 = vmatprep.subr.bf16.mxu0 %v1020_v2  ;;  %902 = vmatprep.subr.bf16.mxu1 %v1020_v2  ;;  %v269_v6 = vld [vmem:[%s251_s30 + $0x20] sm:$0x3]  ;;  %v270_v9 = vld [vmem:[%s251_s30 + $0x22] sm:$0x3]  ;;  %v983_v20 = vld [vmem:[%s1207_s2 + $0x48] sm:$0xff]  }
  0x11   : > { %v267_v7 = vld [vmem:[%s251_s30] sm:$0x3]  ;;  %285 = vperm.xlu0 %969, %v269_v6   ;;  %v268_v11 = vld [vmem:[%s251_s30 + $0x2] sm:$0x3]  ;;  %896 = vmatprep.mubr.msk.bf16.mxu0 %vm1021_vm0, %v1020_v2  ;;  %v984_v21 = vld [vmem:[%s1207_s2 + $0x8] sm:$0xff]   ;;  %v314_v30 = vunpack.c.0.s8 %v313_v25 }
  0x12   : > { %275 = vperm.xlu1 %970, %v267_v7   ;;  %v271_v13 = vld [vmem:[%s251_s30 + $0x40] sm:$0x3]  ;;  %v272_v14 = vld [vmem:[%s251_s30 + $0x42] sm:$0x3]  ;;  %916 = vmatprep.mubr.msk.bf16.mxu1 %vm1021_vm0, %v1020_v2  ;;  %v987_v46 = vld [vmem:[%s1207_s2 + $0xb8] sm:$0xff]  }
  0x13   : > { %883 = vmatpush3.bf16.msra.mxu0 %v973_v4  ;;  %903 = vmatpush3.bf16.msra.mxu1 %v974_v5  ;;  %v985_v22 = vld [vmem:[%s1207_s2 + $0x40] sm:$0xff]   ;;  %v317_v41 = vsub.s32 %v314_v30, %v316_v31  ;;  %v988_v49 = vld [vmem:[%s1207_s2 + $0xb0] sm:$0xff]   ;;  %v989_v50 = vld [vmem:[%s1207_s2 + $0xa8] sm:$0xff]  }
  0x14   : > { %884 = vmatprep.subr.bf16.mxu0 %v1020_v2  ;;  %904 = vmatprep.subr.bf16.mxu1 %v1020_v2  ;;  %v986_v23 = vld [vmem:[%s1207_s2] sm:$0xff]   ;;  %v991_v52 = vld [vmem:[%s1207_s2 + $0x98] sm:$0xff]   ;;  %v992_v57 = vld [vmem:[%s1207_s2 + $0x90] sm:$0xff]  }
  0x15   : > { %290 = vperm.xlu0 %969, %v270_v9   ;;  %v261_v29 = vld [vmem:[%s1148_s10] sm:$0x3]  ;;  %v264_v33 = vld [vmem:[%s1148_s10 + $0x22] sm:$0x3]  ;;  %v993_v60 = vld [vmem:[%s1207_s2 + $0x88] sm:$0xff]  }
  0x16   : > { %280 = vperm.xlu1 %970, %v268_v11   ;;  %v263_v32 = vld [vmem:[%s1148_s10 + $0x20] sm:$0x3]  ;;  %v262_v34 = vld [vmem:[%s1148_s10 + $0x2] sm:$0x3] }
  0x17   : > { %885 = vmatpush3.bf16.msra.mxu0 %v975_v8  ;;  %905 = vmatpush3.bf16.msra.mxu1 %v976_v10  ;;  %v990_v51 = vld [vmem:[%s1207_s2 + $0xa0] sm:$0xff]  }
  0x18   : > { %886 = vmatprep.subr.bf16.mxu0 %v1020_v2  ;;  %906 = vmatprep.subr.bf16.mxu1 %v1020_v2  ;;  %v265_v54 = vld [vmem:[%s1148_s10 + $0x40] sm:$0x3]  ;;  %v266_v56 = vld [vmem:[%s1148_s10 + $0x42] sm:$0x3]  ;;  %s259_s10 = scalar_lea.vmem %s1209_s4, %s852_s7 }
  0x19   : > { %295 = vperm.xlu0 %969, %v271_v13   ;;  %v994_v62 = vld [vmem:[%s1207_s2 + $0x80] sm:$0xff]  }
  0x1a   : > { %300 = vperm.xlu1 %970, %v272_v14  }
  0x1b   : > { %887 = vmatpush3.bf16.msra.mxu0 %v977_v12  ;;  %907 = vmatpush3.bf16.msra.mxu1 %v978_v15  ;;  %v848_v12 = vld [vmem:[%s1208_s3] ss:$0 sm:$0xff] }
  0x1c   : > { %888 = vmatprep.subr.bf16.mxu0 %v1020_v2  ;;  %908 = vmatprep.subr.bf16.mxu1 %v1020_v2 }
  0x1f   : > { %889 = vmatpush3.bf16.msra.mxu0 %v979_v16  ;;  %909 = vmatpush3.bf16.msra.mxu1 %v980_v17 }
  0x20   : > { %890 = vmatprep.subr.bf16.mxu0 %v1020_v2  ;;  %910 = vmatprep.subr.bf16.mxu1 %v1020_v2 }
  0x23   : > { %891 = vmatpush3.bf16.msra.mxu0 %v981_v18  ;;  %911 = vmatpush3.bf16.msra.mxu1 %v982_v19 }
  0x24   : > { %892 = vmatprep.subr.bf16.mxu0 %v1020_v2  ;;  %912 = vmatprep.subr.bf16.mxu1 %v1020_v2 }
  0x27   : > { %893 = vmatpush3.bf16.msra.mxu0 %v983_v20  ;;  %913 = vmatpush3.bf16.msra.mxu1 %v984_v21 }
  0x28   : > { %894 = vmatprep.subr.bf16.mxu0 %v1020_v2  ;;  %914 = vmatprep.subr.bf16.mxu1 %v1020_v2 }
  0x2b   : > { %895 = vmatpush3.bf16.msra.mxu0 %v985_v22  ;;  %915 = vmatpush3.bf16.msra.mxu1 %v986_v23 }
  0x2c   : > { %920 = vmatprep.subr.bf16.mxu0 %v1020_v2 }
  0x8c   : > { %v286_v27 = vpop.permute.xlu0 %285 }
  0x8d   : > { %v276_v28 = vpop.permute.xlu1 %275  ;;  %v305_v38 = vmul.f32 %v286_v27, %v263_v32 }
  0x8e   : > { %v303_v35 = vmul.f32 %v276_v28, %v261_v29 }
  0x90   : > { %v291_v36 = vpop.permute.xlu0 %290 }
  0x91   : > { %v281_v37 = vpop.permute.xlu1 %280  ;;  %v306_v39 = vmul.f32 %v291_v36, %v264_v33 }
  0x92   : > { %v304_v40 = vmul.f32 %v281_v37, %v262_v34 }
  0x93   : > { %v339_v42 = vcombine.low %v305_v38, %v306_v39 }
  0x94   : > { %v311_v43 = vcombine.low %v303_v35, %v304_v40  ;;  %v296_v53 = vpop.permute.xlu0 %295 }
  0x95   : > { %v346_v44 = vrot.slane %v339_v42, %v317_v41  ;;  %v301_v55 = vpop.permute.xlu1 %300  ;;  %v307_v58 = vmul.f32 %v296_v53, %v265_v54 }
  0x96   : > { %v318_v45 = vrot.slane %v311_v43, %v317_v41  ;;  %v308_v59 = vmul.f32 %v301_v55, %v266_v56 }
  0x97   : > { %v348_v47 = vpack.c.bf16 %v346_v44, %v346_v44 }
  0x98   : > { %v320_v48 = vpack.c.bf16 %v318_v45, %v318_v45  ;;  %v544_v61 = vcombine.low %v307_v58, %v308_v59 }
  0x99   : > { %897 = vmatmul.mubr.bf16.vlgmr.msra.gmra.mxu0 %v348_v47 }
  0x9a   : > { %917 = vmatmul.mubr.bf16.vlgmr.msra.gmra.mxu1 %v320_v48  ;;  %921 = vmatpush3.bf16.msra.mxu0 %v987_v46  ;;  %v551_v63 = vrot.slane %v544_v61, %v317_v41 }
  0x9b   : > { %936 = vmatprep.mubr.msk.bf16.mxu0 %vm1021_vm0, %v1020_v2  ;;  %922 = vmatprep.subr.bf16.mxu0 %v1020_v2 }
  0x9c   : > { %v553_v0 = vpack.c.bf16 %v551_v63, %v551_v63 }
  0x9e   : > { %923 = vmatpush3.bf16.msra.mxu0 %v988_v49 }
  0x9f   : > { %924 = vmatprep.subr.bf16.mxu0 %v1020_v2 }
  0xa2   : > { %925 = vmatpush3.bf16.msra.mxu0 %v989_v50 }
  0xa3   : > { %926 = vmatprep.subr.bf16.mxu0 %v1020_v2 }
  0xa6   : > { %927 = vmatpush3.bf16.msra.mxu0 %v990_v51 }
  0xa7   : > { %928 = vmatprep.subr.bf16.mxu0 %v1020_v2 }
  0xaa   : > { %929 = vmatpush3.bf16.msra.mxu0 %v991_v52 }
  0xab   : > { %930 = vmatprep.subr.bf16.mxu0 %v1020_v2 }
  0xae   : > { %931 = vmatpush3.bf16.msra.mxu0 %v992_v57 }
  0xaf   : > { %932 = vmatprep.subr.bf16.mxu0 %v1020_v2 }
  0xb2   : > { %933 = vmatpush3.bf16.msra.mxu0 %v993_v60 }
  0xb3   : > { %934 = vmatprep.subr.bf16.mxu0 %v1020_v2 }
  0xb6   : > { %935 = vmatpush3.bf16.msra.mxu0 %v994_v62 }
  0xb9   : > { %937 = vmatmul.mubr.bf16.vlgmr.msra.gmra.mxu0 %v553_v0 }
 0x159   : > { %v448_v1 = vpop.f32.mrf.mxu0 }
 0x15a   : > { %v536_v3 = vpop.f32.mrf.mxu1 }
 0x15b   : > { %v898_v4 = vpop.f32.mrf.mxu0  ;;  %v537_v10 = vadd.f32 %v536_v3, %v448_v1 }
 0x15c   : > { %v918_v5 = vpop.f32.mrf.mxu1 }
 0x15d   : > { %v451_v6 = vpop.f32.mrf.mxu0 }
 0x15e   : > { %v539_v7 = vpop.f32.mrf.mxu1 }
 0x15f   : > { %v899_v8 = vpop.f32.mrf.mxu0 }
 0x160   : > { %v919_v9 = vpop.f32.mrf.mxu1 }
 0x179   : > { %v653_v11 = vpop.f32.mrf.mxu0 }
 0x17a   : > { %v659_v13 = vadd.f32 %v653_v11, %v537_v10 }
 0x17b   : > { %v938_v2 = vpop.f32.mrf.mxu0 }
 0x17c   : > { %v667_v14 = vadd.f32 %v848_v12, %v659_v13 }
 0x17d   : > { %v656_v15 = vpop.f32.mrf.mxu0 }
 0x17e   : > { %v668_v16 = vmax.f32 %v667_v14, 0.0 }
 0x17f   : > { %v939_v17 = vpop.f32.mrf.mxu0 }
 0x180   : > { %v676_v18 = vrot.slane %v668_v16, %v317_v41  ;;  %849 = vst.sshfl [vmem:[%s259_s10] sm:$0x3 pattern:$0x76325410] %v668_v16 }
 0x182   : > { %v677_v19 = vcombine.high %v676_v18, %v676_v18 }
 0x184   : > { %681 = vst [vmem:[%s259_s10 + $0x2] sm:$0x3] %v677_v19 }
 0x185 PF: > { %s14_s17 = sadd.s32 1, %s1017_s17   ;;  %s1210_s15 = smov %s1013_s16 }
 0x186   : > { %p11_p5 = scmp.ge.s32.totalorder %s14_s17, 4   ;;  %s1211_s16 = smov %s1213_s18 }
 0x188   :  { %13 = sbr.rel (!%p11_p5) target bundleno = 2 (0x2), region = 71 }

// kernel: _lambda_.93
= control target key start
LH: loop header
LB: loop body
LE: loop exit
PB: predicated region body
PF: predicated region fallthrough
CT: control target
= control target key end

     0   :  { %s1180_s18 = smov 0   ;;  %s1182_s19 = smov 0   ;;  %s1347_s0 = inlined_call_operand.vmem [shape: f32[2,2,34,128], index: 0, kind: input, shape index: {}]   ;;  %s1348_s1 = inlined_call_operand.vmem [shape: f32[2,2,34,1], index: 1, kind: input, shape index: {}]   ;;  %s1349_s2 = inlined_call_operand.vmem [shape: bf16[3,128,128], index: 2, kind: input, shape index: {}]   ;;  %s1350_s3 = inlined_call_operand.vmem [shape: f32[1,128], index: 3, kind: input, shape index: {}]   ;;  %s1351_s4 = inlined_call_operand.vmem [shape: f32[2,2,2,128], index: 4, kind: input, shape index: {}]   ;;  %s1352_s5 = inlined_call_operand.vmem [shape: f32[2,2,2,128], index: 5, kind: output, shape index: {}]  }
   0x1   :  { %s1184_s20 = smov 0  }
   0x2 LB: > { %s27_s21 = sadd.s32 1, %s1140_s19  ;;  %p911_p0 = scmp.ge.s32.totalorder %s1144_s20, 1  ;;  %s1144_s20 = sphi %s1184_s20, %s15_s20   ;;  %s1140_s19 = sphi %s1182_s19, %s1354_s19   ;;  %s1136_s18 = sphi %s1180_s18, %s1353_s18  }
   0x3   : > { %p29_p1 = scmp.ge.s32.totalorder %s27_s21, 2  ;;  %p244_p2 = scmp.lt.s32.totalorder %s1144_s20, 3 }
   0x5   : > { %s1356_s21 = smov (%p29_p1, %s27_s21), 0  ;;  %p245_p3 = pnand %p911_p0, %p244_p2 }
   0x6   : > { %p301_p4 = scmp.lt.s32.totalorder (!%p245_p3), %s1136_s18, 1 }
   0x7   : > { %248 = sbr.rel (%p245_p3) target bundleno = 391 (0x187), region = 40 }
   0xc   : > { %v1098_v0 = vld [vmem:[%s1349_s2 + $0x78] sm:$0xff]   ;;  %v1146_v1 = vmov 0   ;;  %s1358_s18 = smov (!%p301_p4, %s1136_s18), 1  ;;  %v1147_v2 = vmov 0.0   ;;  %v1100_v4 = vld [vmem:[%s1349_s2 + $0x70] sm:$0xff]   ;;  %v1102_v8 = vld [vmem:[%s1349_s2 + $0x68] sm:$0xff]   ;;  %v397_v26 = vlaneseq }
   0xd   : > { %1097 = vset.pattern.permute.xlu1 %v1146_v1  ;;  %1096 = vset.pattern.permute.xlu0 %v1146_v1  ;;  %v1099_v3 = vld [vmem:[%s1349_s2 + $0x38] sm:$0xff]   ;;  %s1067_s28 = smul.u32 80, %s1358_s18  ;;  %v1101_v5 = vld [vmem:[%s1349_s2 + $0x30] sm:$0xff]   ;;  %v1103_v10 = vld [vmem:[%s1349_s2 + $0x28] sm:$0xff]   ;;  %vm1148_vm0 = vmmov 0   ;;  %s978_s11 = sshll.u32 %s1358_s18, 2 }
   0xe   : > { %1007 = vmatprep.subr.bf16.mxu0 %v1147_v2  ;;  %1027 = vmatprep.subr.bf16.mxu1 %v1147_v2  ;;  %v1104_v12 = vld [vmem:[%s1349_s2 + $0x60] sm:$0xff]   ;;  %v1106_v16 = vld [vmem:[%s1349_s2 + $0x58] sm:$0xff]   ;;  %v1108_v18 = vld [vmem:[%s1349_s2 + $0x50] sm:$0xff]   ;;  %v1149_v24 = vmov 1983009808   ;;  %v398_v31 = vshrl.u32 %v397_v26, 7  ;;  %s330_s14 = scalar_lea.vmem %s1351_s4, %s978_s11  ;;  %s340_s17 = scalar_lea.vmem %s1352_s5, %s978_s11 }
   0xf   : > { %1008 = vmatpush3.bf16.msra.mxu0 %v1098_v0  ;;  %1028 = vmatpush3.bf16.msra.mxu1 %v1099_v3  ;;  %s320_s8 = scalar_lea.vmem %s1348_s1, %s1067_s28  ;;  %v1105_v15 = vld [vmem:[%s1349_s2 + $0x20] sm:$0xff]   ;;  %v1107_v17 = vld [vmem:[%s1349_s2 + $0x18] sm:$0xff]   ;;  %v1109_v19 = vld [vmem:[%s1349_s2 + $0x10] sm:$0xff]   ;;  %v395_v25 = vunpack.c.l.s4 %v1149_v24  ;;  %s1280_s15 = scalar_lea.vmem %s1347_s0, %s1067_s28 }
  0x10   : > { %1009 = vmatprep.subr.bf16.mxu0 %v1147_v2  ;;  %1029 = vmatprep.subr.bf16.mxu1 %v1147_v2  ;;  %v350_v6 = vld [vmem:[%s320_s8 + $0x10] sm:$0xff]  ;;  %v349_v7 = vld [vmem:[%s320_s8] sm:$0xff]  ;;  %v353_v9 = vld [vmem:[%s320_s8 + $0x38] sm:$0xff] }
  0x11   : > { %362 = vperm.xlu0 %1096, %v350_v6   ;;  %357 = vperm.xlu1 %1097, %v349_v7   ;;  %v352_v11 = vld [vmem:[%s320_s8 + $0x28] sm:$0xff]  ;;  %v351_v13 = vld [vmem:[%s320_s8 + $0x20] sm:$0x3]  ;;  %v396_v30 = vunpack.c.0.s8 %v395_v25  ;;  %v344_v32 = vld [vmem:[%s1280_s15 + $0x10] sm:$0xff] }
  0x12   : > { %v354_v14 = vld [vmem:[%s320_s8 + $0x48] sm:$0x3]  ;;  %1023 = vmatprep.mubr.msk.bf16.mxu0 %vm1148_vm0, %v1147_v2  ;;  %1043 = vmatprep.mubr.msk.bf16.mxu1 %vm1148_vm0, %v1147_v2  ;;  %v1112_v22 = vld [vmem:[%s1349_s2 + $0x40] sm:$0xff]   ;;  %v347_v33 = vld [vmem:[%s1280_s15 + $0x38] sm:$0xff] }
  0x13   : > { %1010 = vmatpush3.bf16.msra.mxu0 %v1100_v4  ;;  %1030 = vmatpush3.bf16.msra.mxu1 %v1101_v5  ;;  %v1110_v20 = vld [vmem:[%s1349_s2 + $0x48] sm:$0xff]   ;;  %v1113_v23 = vld [vmem:[%s1349_s2] sm:$0xff]   ;;  %v1286_v41 = vsub.s32 %v396_v30, %v398_v31  ;;  %v1114_v46 = vld [vmem:[%s1349_s2 + $0xb8] sm:$0xff]  }
  0x14   : > { %1011 = vmatprep.subr.bf16.mxu0 %v1147_v2  ;;  %1031 = vmatprep.subr.bf16.mxu1 %v1147_v2  ;;  %v1111_v21 = vld [vmem:[%s1349_s2 + $0x8] sm:$0xff]   ;;  %v343_v29 = vld [vmem:[%s1280_s15] sm:$0xff]  ;;  %v1115_v49 = vld [vmem:[%s1349_s2 + $0xb0] sm:$0xff]  }
  0x15   : > { %377 = vperm.xlu0 %1096, %v353_v9   ;;  %372 = vperm.xlu1 %1097, %v352_v11   ;;  %v346_v34 = vld [vmem:[%s1280_s15 + $0x28] sm:$0xff]  ;;  %v1117_v51 = vld [vmem:[%s1349_s2 + $0xa0] sm:$0xff]   ;;  %v1118_v52 = vld [vmem:[%s1349_s2 + $0x98] sm:$0xff]  }
  0x16   : > { %v1116_v50 = vld [vmem:[%s1349_s2 + $0xa8] sm:$0xff]   ;;  %v345_v54 = vld [vmem:[%s1280_s15 + $0x20] sm:$0x3]  ;;  %v1119_v57 = vld [vmem:[%s1349_s2 + $0x90] sm:$0xff]  }
  0x17   : > { %1012 = vmatpush3.bf16.msra.mxu0 %v1102_v8  ;;  %1032 = vmatpush3.bf16.msra.mxu1 %v1103_v10  ;;  %v348_v56 = vld [vmem:[%s1280_s15 + $0x48] sm:$0x3]  ;;  %v1121_v62 = vld [vmem:[%s1349_s2 + $0x80] sm:$0xff]  }
  0x18   : > { %1013 = vmatprep.subr.bf16.mxu0 %v1147_v2  ;;  %1033 = vmatprep.subr.bf16.mxu1 %v1147_v2  ;;  %v1120_v60 = vld [vmem:[%s1349_s2 + $0x88] sm:$0xff]   ;;  %v750_v10 = vld [vmem:[%s330_s14] sm:$0x3]  ;;  %v751_v11 = vld [vmem:[%s330_s14 + $0x2] sm:$0x3] }
  0x19   : > { %367 = vperm.xlu0 %1096, %v351_v13   ;;  %382 = vperm.xlu1 %1097, %v354_v14   ;;  %v974_v14 = vld [vmem:[%s1350_s3] ss:$0 sm:$0xff] }
  0x1b   : > { %1014 = vmatpush3.bf16.msra.mxu0 %v1104_v12  ;;  %1034 = vmatpush3.bf16.msra.mxu1 %v1105_v15  ;;  %v754_v12 = vcombine.low %v750_v10, %v751_v11 }
  0x1c   : > { %1015 = vmatprep.subr.bf16.mxu0 %v1147_v2  ;;  %1035 = vmatprep.subr.bf16.mxu1 %v1147_v2 }
  0x1f   : > { %1016 = vmatpush3.bf16.msra.mxu0 %v1106_v16  ;;  %1036 = vmatpush3.bf16.msra.mxu1 %v1107_v17  ;;  %v761_v16 = vrot.slane %v754_v12, %v1286_v41 }
  0x20   : > { %1017 = vmatprep.subr.bf16.mxu0 %v1147_v2  ;;  %1037 = vmatprep.subr.bf16.mxu1 %v1147_v2 }
  0x23   : > { %1018 = vmatpush3.bf16.msra.mxu0 %v1108_v18  ;;  %1038 = vmatpush3.bf16.msra.mxu1 %v1109_v19 }
  0x24   : > { %1019 = vmatprep.subr.bf16.mxu0 %v1147_v2  ;;  %1039 = vmatprep.subr.bf16.mxu1 %v1147_v2 }
  0x27   : > { %1020 = vmatpush3.bf16.msra.mxu0 %v1110_v20  ;;  %1040 = vmatpush3.bf16.msra.mxu1 %v1111_v21 }
  0x28   : > { %1021 = vmatprep.subr.bf16.mxu0 %v1147_v2  ;;  %1041 = vmatprep.subr.bf16.mxu1 %v1147_v2 }
  0x2b   : > { %1022 = vmatpush3.bf16.msra.mxu0 %v1112_v22  ;;  %1042 = vmatpush3.bf16.msra.mxu1 %v1113_v23 }
  0x2c   : > { %1047 = vmatprep.subr.bf16.mxu0 %v1147_v2 }
  0x8c   : > { %v363_v27 = vpop.permute.xlu0 %362  ;;  %v358_v28 = vpop.permute.xlu1 %357 }
  0x8d   : > { %v385_v35 = vmul.f32 %v358_v28, %v343_v29  ;;  %v386_v38 = vmul.f32 %v363_v27, %v344_v32 }
  0x90   : > { %v378_v36 = vpop.permute.xlu0 %377  ;;  %v373_v37 = vpop.permute.xlu1 %372 }
  0x91   : > { %v389_v39 = vmul.f32 %v378_v36, %v347_v33  ;;  %v388_v40 = vmul.f32 %v373_v37, %v346_v34 }
  0x93   : > { %v421_v42 = vcombine.low %v386_v38, %v389_v39  ;;  %v393_v43 = vcombine.low %v385_v35, %v388_v40 }
  0x94   : > { %v368_v53 = vpop.permute.xlu0 %367  ;;  %v383_v55 = vpop.permute.xlu1 %382 }
  0x95   : > { %v428_v44 = vrot.slane %v421_v42, %v1286_v41  ;;  %v400_v45 = vrot.slane %v393_v43, %v1286_v41  ;;  %v387_v58 = vmul.f32 %v368_v53, %v345_v54  ;;  %v390_v59 = vmul.f32 %v383_v55, %v348_v56 }
  0x97   : > { %v430_v47 = vpack.c.bf16 %v428_v44, %v428_v44  ;;  %v402_v48 = vpack.c.bf16 %v400_v45, %v400_v45  ;;  %v626_v61 = vcombine.low %v387_v58, %v390_v59 }
  0x99   : > { %1024 = vmatmul.mubr.bf16.vlgmr.msra.gmra.mxu0 %v430_v47  ;;  %1044 = vmatmul.mubr.bf16.vlgmr.msra.gmra.mxu1 %v402_v48  ;;  %v633_v63 = vrot.slane %v626_v61, %v1286_v41 }
  0x9a   : > { %1048 = vmatpush3.bf16.msra.mxu0 %v1114_v46  ;;  %1063 = vmatprep.mubr.msk.bf16.mxu0 %vm1148_vm0, %v1147_v2 }
  0x9b   : > { %1049 = vmatprep.subr.bf16.mxu0 %v1147_v2  ;;  %v635_v0 = vpack.c.bf16 %v633_v63, %v633_v63 }
  0x9e   : > { %1050 = vmatpush3.bf16.msra.mxu0 %v1115_v49 }
  0x9f   : > { %1051 = vmatprep.subr.bf16.mxu0 %v1147_v2 }
  0xa2   : > { %1052 = vmatpush3.bf16.msra.mxu0 %v1116_v50 }
  0xa3   : > { %1053 = vmatprep.subr.bf16.mxu0 %v1147_v2 }
  0xa6   : > { %1054 = vmatpush3.bf16.msra.mxu0 %v1117_v51 }
  0xa7   : > { %1055 = vmatprep.subr.bf16.mxu0 %v1147_v2 }
  0xaa   : > { %1056 = vmatpush3.bf16.msra.mxu0 %v1118_v52 }
  0xab   : > { %1057 = vmatprep.subr.bf16.mxu0 %v1147_v2 }
  0xae   : > { %1058 = vmatpush3.bf16.msra.mxu0 %v1119_v57 }
  0xaf   : > { %1059 = vmatprep.subr.bf16.mxu0 %v1147_v2 }
  0xb2   : > { %1060 = vmatpush3.bf16.msra.mxu0 %v1120_v60 }
  0xb3   : > { %1061 = vmatprep.subr.bf16.mxu0 %v1147_v2 }
  0xb6   : > { %1062 = vmatpush3.bf16.msra.mxu0 %v1121_v62 }
  0xb9   : > { %1064 = vmatmul.mubr.bf16.vlgmr.msra.gmra.mxu0 %v635_v0 }
 0x159   : > { %v530_v1 = vpop.f32.mrf.mxu0  ;;  %v618_v3 = vpop.f32.mrf.mxu1 }
 0x15a   : > { %v619_v2 = vadd.f32 %v618_v3, %v530_v1 }
 0x15b   : > { %v1025_v4 = vpop.f32.mrf.mxu0  ;;  %v1045_v5 = vpop.f32.mrf.mxu1 }
 0x15d   : > { %v533_v6 = vpop.f32.mrf.mxu0  ;;  %v621_v7 = vpop.f32.mrf.mxu1 }
 0x15f   : > { %v1026_v8 = vpop.f32.mrf.mxu0  ;;  %v1046_v9 = vpop.f32.mrf.mxu1 }
 0x179   : > { %v735_v13 = vpop.f32.mrf.mxu0 }
 0x17a   : > { %v741_v15 = vadd.f32 %v735_v13, %v619_v2 }
 0x17b   : > { %v1065_v17 = vpop.f32.mrf.mxu0 }
 0x17c   : > { %v749_v18 = vadd.f32 %v974_v14, %v741_v15 }
 0x17d   : > { %v738_v19 = vpop.f32.mrf.mxu0 }
 0x17e   : > { %v763_v20 = vadd.f32 %v761_v16, %v749_v18 }
 0x17f   : > { %v1066_v21 = vpop.f32.mrf.mxu0 }
 0x180   : > { %v764_v22 = vmax.f32 %v763_v20, 0.0 }
 0x182   : > { %v772_v23 = vrot.slane %v764_v22, %v1286_v41  ;;  %975 = vst.sshfl [vmem:[%s340_s17] sm:$0x3 pattern:$0x76325410] %v764_v22 }
 0x184   : > { %v773_v24 = vcombine.high %v772_v23, %v772_v23 }
 0x186   : > { %777 = vst [vmem:[%s340_s17 + $0x2] sm:$0x3] %v773_v24 }
 0x187 PF: > { %s15_s20 = sadd.s32 1, %s1144_s20   ;;  %s1353_s18 = smov %s1140_s19 }
 0x188   : > { %p12_p5 = scmp.ge.s32.totalorder %s15_s20, 4   ;;  %s1354_s19 = smov %s1356_s21 }
 0x18a   :  { %14 = sbr.rel (!%p12_p5) target bundleno = 2 (0x2), region = 78 }

// kernel: _lambda_.109
= control target key start
LH: loop header
LB: loop body
LE: loop exit
PB: predicated region body
PF: predicated region fallthrough
CT: control target
= control target key end

     0   :  { %10 = vsyncpa [#allocation3], 0  ;;  %s1518_s0 = inlined_call_operand.vmem [shape: f32[2,2,34,128], index: 0, kind: input, shape index: {}]   ;;  %s1519_s1 = inlined_call_operand.vmem [shape: f32[2,2,34,1], index: 1, kind: input, shape index: {}]   ;;  %s1520_s2 = inlined_call_operand.vmem [shape: bf16[3,128,128], index: 2, kind: input, shape index: {}]   ;;  %s1521_s3 = inlined_call_operand.vmem [shape: f32[1,128], index: 3, kind: input, shape index: {}]   ;;  %s1522_s4 = inlined_call_operand.vmem [shape: f32[2,2,2,128], index: 4, kind: input, shape index: {}]   ;;  %s1523_s5 = inlined_call_operand.hbm [shape: f32[2,2,2,128], index: 5, kind: output, shape index: {}]  }
   0x1   :  { %12 = vsyncpa [#allocation3 + $0x1], 0  ;;  %s1270_s18 = smov 0   ;;  %s1272_s19 = smov 0  }
   0x2   :  { %s1274_s20 = smov 0   ;;  %s1276_s21 = smov 0  }
   0x3   :  { %s1278_s22 = smov 0   ;;  %s1280_s23 = smov 0  }
   0x4 LB: > { %s905_s24 = sadd.s32 4294967295, %s1231_s23   ;;  %s906_s25 = sadd.s32 4294967294, %s1231_s23   ;;  %s1231_s23 = sphi %s1280_s23, %s18_s23   ;;  %s1227_s22 = sphi %s1278_s22, %s1530_s22   ;;  %s1223_s21 = sphi %s1276_s21, %s1529_s21   ;;  %s1219_s20 = sphi %s1274_s20, %s1528_s20   ;;  %s1215_s19 = sphi %s1272_s19, %s1527_s19   ;;  %s1211_s18 = sphi %s1270_s18, %s1526_s18  }
   0x5   : > { %s30_s26 = sadd.s32 1, %s1227_s22  ;;  %s165_s27 = sadd.s32 1, %s1219_s20 }
   0x6   : > { %p32_p0 = scmp.ge.s32.totalorder %s30_s26, 2  ;;  %p175_p1 = scmp.ne.s32.totalorder %s1219_s20, %s1215_s19 }
   0x7   : > { %p176_p2 = scmp.eq.s32.totalorder %s905_s24, 1  ;;  %p181_p3 = scmp.ne.s32.totalorder %s1215_s19, %s1211_s18 }
   0x8   : > { %s1532_s26 = smov (%p32_p0, %s30_s26), 0  ;;  %p182_p5 = scmp.eq.s32.totalorder %s906_s25, 1 }
   0x9   : > { %p1310_p4 = por %p176_p2, %p175_p1  ;;  %s160_s29 = ssub.s32 %s1227_s22, %s1532_s26 }
   0xa   : > { %p909_p6 = scmp.ge.s32.totalorder %s1231_s23, 1  ;;  %p163_p7 = scmp.eq.s32.totalorder %s160_s29, 0 }
   0xb   : > { %p1317_p8 = por %p182_p5, %p181_p3  ;;  %p247_p9 = scmp.lt.s32.totalorder %s1231_s23, 3 }
   0xc   : > { %s1323_s6 = scalar_select %p163_p7, %s1219_s20, %s165_s27  }
   0xd   : > { %p248_p10 = pnand %p909_p6, %p247_p9 }
   0xe   : > { %p300_p11 = scmp.lt.s32.totalorder (!%p248_p10), %s1223_s21, 1  ;;  %s296_s12 = sand.u32 (!%p248_p10), 1, %s1215_s19  }
   0xf   : > { %251 = sbr.rel (%p248_p10) target bundleno = 413 (0x19d), region = 40  ;;  %s979_s24 = sshll.u32 (!%p248_p10), %s1223_s21, 6 }
  0x10   : > { %s1473_s29 = scalar_lea.sflag (!%p248_p10), [#allocation3], %s296_s12 }
  0x14   : > { %v1131_v0 = vld [vmem:[%s1520_s2 + $0x78] sm:$0xff]   ;;  %v1233_v1 = vmov 0   ;;  %s1330_s9 = scalar_select %p300_p11, %s1223_s21, 1  ;;  %v1234_v2 = vmov 0.0   ;;  %v1133_v4 = vld [vmem:[%s1520_s2 + $0x70] sm:$0xff]   ;;  %v1135_v8 = vld [vmem:[%s1520_s2 + $0x68] sm:$0xff]   ;;  %v387_v26 = vlaneseq }
  0x15   : > { %1130 = vset.pattern.permute.xlu1 %v1233_v1  ;;  %1129 = vset.pattern.permute.xlu0 %v1233_v1  ;;  %v1132_v3 = vld [vmem:[%s1520_s2 + $0x38] sm:$0xff]   ;;  %v1134_v5 = vld [vmem:[%s1520_s2 + $0x30] sm:$0xff]   ;;  %v1136_v10 = vld [vmem:[%s1520_s2 + $0x28] sm:$0xff]   ;;  %vm1235_vm0 = vmmov 0   ;;  %v1236_v24 = vmov 1983009808  }
  0x16   : > { %1007 = vmatprep.subr.bf16.mxu0 %v1234_v2  ;;  %1027 = vmatprep.subr.bf16.mxu1 %v1234_v2  ;;  %s1067_s14 = smul.u32 80, %s1330_s9  ;;  %v1137_v12 = vld [vmem:[%s1520_s2 + $0x60] sm:$0xff]   ;;  %v1139_v16 = vld [vmem:[%s1520_s2 + $0x58] sm:$0xff]   ;;  %v1141_v18 = vld [vmem:[%s1520_s2 + $0x50] sm:$0xff]   ;;  %v385_v25 = vunpack.c.l.s4 %v1236_v24  ;;  %v388_v31 = vshrl.u32 %v387_v26, 7  ;;  %s978_s7 = sshll.u32 %s1330_s9, 2 }
  0x17   : > { %1008 = vmatpush3.bf16.msra.mxu0 %v1131_v0  ;;  %1028 = vmatpush3.bf16.msra.mxu1 %v1132_v3  ;;  %v1138_v15 = vld [vmem:[%s1520_s2 + $0x20] sm:$0xff]   ;;  %v1140_v17 = vld [vmem:[%s1520_s2 + $0x18] sm:$0xff]   ;;  %v1142_v19 = vld [vmem:[%s1520_s2 + $0x10] sm:$0xff]   ;;  %s329_s11 = scalar_lea.vmem %s1522_s4, %s978_s7  ;;  %s910_s9 = sshll.u32 %s296_s12, 2 }
  0x18   : > { %1009 = vmatprep.subr.bf16.mxu0 %v1234_v2  ;;  %1029 = vmatprep.subr.bf16.mxu1 %v1234_v2  ;;  %s319_s25 = scalar_lea.vmem %s1519_s1, %s1067_s14  ;;  %v1143_v20 = vld [vmem:[%s1520_s2 + $0x48] sm:$0xff]   ;;  %v1145_v22 = vld [vmem:[%s1520_s2 + $0x40] sm:$0xff]   ;;  %s1409_s27 = scalar_lea.vmem %s1518_s0, %s1067_s14  ;;  %v386_v30 = vunpack.c.0.s8 %v385_v25  ;;  %v1147_v46 = vld [vmem:[%s1520_s2 + $0xb8] sm:$0xff]  }
  0x19   : > { %v340_v6 = vld [vmem:[%s319_s25 + $0x10] sm:$0xff]  ;;  %v339_v7 = vld [vmem:[%s319_s25] sm:$0xff]  ;;  %v343_v9 = vld [vmem:[%s319_s25 + $0x38] sm:$0xff]  ;;  %1023 = vmatprep.mubr.msk.bf16.mxu0 %vm1235_vm0, %v1234_v2  ;;  %1043 = vmatprep.mubr.msk.bf16.mxu1 %vm1235_vm0, %v1234_v2  ;;  %s298_s16 = scalar_lea.vmem [#allocation2], %s910_s9  ;;  %s1237_s21 = smov [#allocation2]  }
  0x1a   : > { %352 = vperm.xlu0 %1129, %v340_v6   ;;  %347 = vperm.xlu1 %1130, %v339_v7   ;;  %v342_v11 = vld [vmem:[%s319_s25 + $0x28] sm:$0xff]  ;;  %v341_v13 = vld [vmem:[%s319_s25 + $0x20] sm:$0x3]  ;;  %v334_v32 = vld [vmem:[%s1409_s27 + $0x10] sm:$0xff]  ;;  %v1415_v41 = vsub.s32 %v386_v30, %v388_v31  ;;  %s784_s17 = sshll.u32 %s298_s16, 4  ;;  %s1159_s8 = sshll.u32 %s1237_s21, 4  ;;  %s1471_s17 = int_to_ptr.vmem [resolvable:$true] %s784_s17  ;;  %s1160_s8 = int_to_ptr.vmem [resolvable:$false] %s1159_s8 }
  0x1b   : > { %1010 = vmatpush3.bf16.msra.mxu0 %v1133_v4  ;;  %1030 = vmatpush3.bf16.msra.mxu1 %v1134_v5  ;;  %v344_v14 = vld [vmem:[%s319_s25 + $0x48] sm:$0x3]  ;;  %v1146_v23 = vld [vmem:[%s1520_s2] sm:$0xff]   ;;  %v337_v33 = vld [vmem:[%s1409_s27 + $0x38] sm:$0xff]  ;;  %s1155_s7 = scalar_lea.vmem %s1471_s17, 64  ;;  %s1161_s10 = scalar_lea.vmem %s1160_s8, 128 }
  0x1c   : > { %1011 = vmatprep.subr.bf16.mxu0 %v1234_v2  ;;  %1031 = vmatprep.subr.bf16.mxu1 %v1234_v2  ;;  %v1144_v21 = vld [vmem:[%s1520_s2 + $0x8] sm:$0xff]   ;;  %v333_v29 = vld [vmem:[%s1409_s27] sm:$0xff]  ;;  %v1148_v49 = vld [vmem:[%s1520_s2 + $0xb0] sm:$0xff]   ;;  %p1156_p12 = scmp.ne.s32.totalorder %s1471_s17, %s1155_s7  ;;  %p1162_p1 = scmp.lt.s32.totalorder %s1471_s17, %s1160_s8 }
  0x1d   : > { %v336_v34 = vld [vmem:[%s1409_s27 + $0x28] sm:$0xff]  ;;  %v1150_v51 = vld [vmem:[%s1520_s2 + $0xa0] sm:$0xff]   ;;  %v1151_v52 = vld [vmem:[%s1520_s2 + $0x98] sm:$0xff]   ;;  %p1163_p2 = scmp.lt.s32.totalorder %s1161_s10, %s1155_s7 }
  0x1e   : > { %367 = vperm.xlu0 %1129, %v343_v9   ;;  %362 = vperm.xlu1 %1130, %v342_v11   ;;  %v1149_v50 = vld [vmem:[%s1520_s2 + $0xa8] sm:$0xff]   ;;  %v335_v54 = vld [vmem:[%s1409_s27 + $0x20] sm:$0x3]  ;;  %v1152_v57 = vld [vmem:[%s1520_s2 + $0x90] sm:$0xff]   ;;  %p1157_p13 = pnand %p1156_p12, %p1310_p4 }
  0x1f   : > { %1012 = vmatpush3.bf16.msra.mxu0 %v1135_v8  ;;  %1032 = vmatpush3.bf16.msra.mxu1 %v1136_v10  ;;  %v338_v56 = vld [vmem:[%s1409_s27 + $0x48] sm:$0x3]  ;;  %v1154_v62 = vld [vmem:[%s1520_s2 + $0x80] sm:$0xff]   ;;  %s1469_s27 = scalar_lea.hbm %s1523_s5, %s979_s24  ;;  %p1164_p3 = por %p1163_p2, %p1162_p1 }
  0x20   : > { %1013 = vmatprep.subr.bf16.mxu0 %v1234_v2  ;;  %1033 = vmatprep.subr.bf16.mxu1 %v1234_v2  ;;  %v1153_v60 = vld [vmem:[%s1520_s2 + $0x88] sm:$0xff]   ;;  %v740_v10 = vld [vmem:[%s329_s11] sm:$0x3]  ;;  %v741_v11 = vld [vmem:[%s329_s11 + $0x2] sm:$0x3]  ;;  %p1158_p0 = pneg %p1157_p13 }
  0x22   : > { %357 = vperm.xlu0 %1129, %v341_v13   ;;  %372 = vperm.xlu1 %1130, %v344_v14   ;;  %v971_v14 = vld [vmem:[%s1521_s3] ss:$0 sm:$0xff]  ;;  %p1165_p5 = pnand %p1164_p3, %p1158_p0 }
  0x23   : > { %1014 = vmatpush3.bf16.msra.mxu0 %v1137_v12  ;;  %1034 = vmatpush3.bf16.msra.mxu1 %v1138_v15 }
  0x24   : > { %1015 = vmatprep.subr.bf16.mxu0 %v1234_v2  ;;  %1035 = vmatprep.subr.bf16.mxu1 %v1234_v2 }
  0x27   : > { %1016 = vmatpush3.bf16.msra.mxu0 %v1139_v16  ;;  %1036 = vmatpush3.bf16.msra.mxu1 %v1140_v17 }
  0x28   : > { %1017 = vmatprep.subr.bf16.mxu0 %v1234_v2  ;;  %1037 = vmatprep.subr.bf16.mxu1 %v1234_v2 }
  0x2b   : > { %1018 = vmatpush3.bf16.msra.mxu0 %v1141_v18  ;;  %1038 = vmatpush3.bf16.msra.mxu1 %v1142_v19 }
  0x2c   : > { %1019 = vmatprep.subr.bf16.mxu0 %v1234_v2  ;;  %1039 = vmatprep.subr.bf16.mxu1 %v1234_v2 }
  0x2f   : > { %1020 = vmatpush3.bf16.msra.mxu0 %v1143_v20  ;;  %1040 = vmatpush3.bf16.msra.mxu1 %v1144_v21 }
  0x30   : > { %1021 = vmatprep.subr.bf16.mxu0 %v1234_v2  ;;  %1041 = vmatprep.subr.bf16.mxu1 %v1234_v2 }
  0x33   : > { %1022 = vmatpush3.bf16.msra.mxu0 %v1145_v22  ;;  %1042 = vmatpush3.bf16.msra.mxu1 %v1146_v23 }
  0x34   : > { %1047 = vmatprep.subr.bf16.mxu0 %v1234_v2 }
  0x95   : > { %v353_v27 = vpop.permute.xlu0 %352  ;;  %v348_v28 = vpop.permute.xlu1 %347 }
  0x96   : > { %v375_v35 = vmul.f32 %v348_v28, %v333_v29  ;;  %v376_v38 = vmul.f32 %v353_v27, %v334_v32 }
  0x99   : > { %v368_v36 = vpop.permute.xlu0 %367  ;;  %v363_v37 = vpop.permute.xlu1 %362 }
  0x9a   : > { %v379_v39 = vmul.f32 %v368_v36, %v337_v33  ;;  %v378_v40 = vmul.f32 %v363_v37, %v336_v34 }
  0x9c   : > { %v411_v42 = vcombine.low %v376_v38, %v379_v39  ;;  %v383_v43 = vcombine.low %v375_v35, %v378_v40 }
  0x9d   : > { %v358_v53 = vpop.permute.xlu0 %357  ;;  %v373_v55 = vpop.permute.xlu1 %372 }
  0x9e   : > { %v418_v44 = vrot.slane %v411_v42, %v1415_v41  ;;  %v390_v45 = vrot.slane %v383_v43, %v1415_v41  ;;  %v377_v58 = vmul.f32 %v358_v53, %v335_v54  ;;  %v380_v59 = vmul.f32 %v373_v55, %v338_v56 }
  0xa0   : > { %v420_v47 = vpack.c.bf16 %v418_v44, %v418_v44  ;;  %v392_v48 = vpack.c.bf16 %v390_v45, %v390_v45  ;;  %v616_v61 = vcombine.low %v377_v58, %v380_v59 }
  0xa2   : > { %1024 = vmatmul.mubr.bf16.vlgmr.msra.gmra.mxu0 %v420_v47  ;;  %1044 = vmatmul.mubr.bf16.vlgmr.msra.gmra.mxu1 %v392_v48  ;;  %v623_v63 = vrot.slane %v616_v61, %v1415_v41 }
  0xa3   : > { %1048 = vmatpush3.bf16.msra.mxu0 %v1147_v46  ;;  %1063 = vmatprep.mubr.msk.bf16.mxu0 %vm1235_vm0, %v1234_v2 }
  0xa4   : > { %1049 = vmatprep.subr.bf16.mxu0 %v1234_v2  ;;  %v625_v0 = vpack.c.bf16 %v623_v63, %v623_v63 }
  0xa7   : > { %1050 = vmatpush3.bf16.msra.mxu0 %v1148_v49 }
  0xa8   : > { %1051 = vmatprep.subr.bf16.mxu0 %v1234_v2 }
  0xab   : > { %1052 = vmatpush3.bf16.msra.mxu0 %v1149_v50 }
  0xac   : > { %1053 = vmatprep.subr.bf16.mxu0 %v1234_v2 }
  0xaf   : > { %1054 = vmatpush3.bf16.msra.mxu0 %v1150_v51 }
  0xb0   : > { %1055 = vmatprep.subr.bf16.mxu0 %v1234_v2 }
  0xb3   : > { %1056 = vmatpush3.bf16.msra.mxu0 %v1151_v52 }
  0xb4   : > { %1057 = vmatprep.subr.bf16.mxu0 %v1234_v2 }
  0xb7   : > { %1058 = vmatpush3.bf16.msra.mxu0 %v1152_v57 }
  0xb8   : > { %1059 = vmatprep.subr.bf16.mxu0 %v1234_v2 }
  0xbb   : > { %1060 = vmatpush3.bf16.msra.mxu0 %v1153_v60 }
  0xbc   : > { %1061 = vmatprep.subr.bf16.mxu0 %v1234_v2  ;;  %v744_v2 = vcombine.low %v740_v10, %v741_v11 }
  0xbe   : > { %v751_v16 = vrot.slane %v744_v2, %v1415_v41 }
  0xbf   : > { %1062 = vmatpush3.bf16.msra.mxu0 %v1154_v62 }
  0xc2   : > { %1064 = vmatmul.mubr.bf16.vlgmr.msra.gmra.mxu0 %v625_v0 }
 0x162   : > { %v520_v1 = vpop.f32.mrf.mxu0  ;;  %v608_v3 = vpop.f32.mrf.mxu1 }
 0x163   : > { %v609_v12 = vadd.f32 %v608_v3, %v520_v1 }
 0x164   : > { %v1025_v4 = vpop.f32.mrf.mxu0  ;;  %v1045_v5 = vpop.f32.mrf.mxu1 }
 0x166   : > { %v523_v6 = vpop.f32.mrf.mxu0  ;;  %v611_v7 = vpop.f32.mrf.mxu1 }
 0x168   : > { %v1026_v8 = vpop.f32.mrf.mxu0  ;;  %v1046_v9 = vpop.f32.mrf.mxu1 }
 0x182   : > { %v725_v13 = vpop.f32.mrf.mxu0 }
 0x183   : > { %v731_v15 = vadd.f32 %v725_v13, %v609_v12 }
 0x184   : > { %v1065_v17 = vpop.f32.mrf.mxu0 }
 0x185   : > { %v739_v18 = vadd.f32 %v971_v14, %v731_v15 }
 0x186   : > { %v728_v19 = vpop.f32.mrf.mxu0 }
 0x187   : > { %v753_v20 = vadd.f32 %v751_v16, %v739_v18 }
 0x188   : > { %v1066_v21 = vpop.f32.mrf.mxu0 }
 0x189   : > { %v754_v22 = vmax.f32 %v753_v20, 0.0 }
 0x18b   : > { %v762_v23 = vrot.slane %v754_v22, %v1415_v41  ;;  %972 = vst.sshfl [vmem:[%s298_s16] sm:$0x3 pattern:$0x76325410] %v754_v22 }
 0x18d   : > { %v763_v24 = vcombine.high %v762_v23, %v762_v23 }
 0x18f   : > { %767 = vst [vmem:[%s298_s16 + $0x2] sm:$0x3] %v763_v24 }
 0x190   : > { %1168 = shalt.err (!%p1165_p5)
}
 0x191   : > { %s1169_s11 = scalar_lea.hbm %s1469_s27, 64  ;;  %s1173_s15 = scalar_lea.hbm %s1523_s5, 128 }
 0x192   : > { %p1170_p6 = scmp.ne.s32.totalorder %s1469_s27, %s1169_s11  ;;  %p1174_p10 = scmp.lt.s32.totalorder %s1469_s27, %s1523_s5 }
 0x193   : > { %p1175_p11 = scmp.lt.s32.totalorder %s1173_s15, %s1169_s11 }
 0x194   : > { %p1171_p7 = pnand %p1170_p6, %p1310_p4 }
 0x195   : > { %p1176_p12 = por %p1175_p11, %p1174_p10 }
 0x196   : > { %p1172_p9 = pneg %p1171_p7 }
 0x198   : > { %p1177_p13 = pnand %p1176_p12, %p1172_p9 }
 0x19a   : > { %1180 = shalt.err (!%p1177_p13)
}
 0x19b   : > { %s1238_s24 = smov 32   ;;  %s1239_s25 = smov 2  }
 0x19c   : > { %1068 = dma.vmem_to_hbm [thread:$0]  (%p1310_p4), %s1471_s17, 64, %s1469_s27, %s1473_s29, %s1238_s24, %s1238_s24, %s1239_s25  }
 0x19d PF: > { %p1074_p0 = scmp.ge.s32.totalorder %s1231_s23, 2  ;;  %s799_s14 = sand.u32 1, %s1211_s18  }
 0x19e   : > { %s800_s7 = scalar_lea.sflag [#allocation3], %s799_s14 }
 0x19f   : > { %p1071_p1 = pnand %p1074_p0, %p1317_p8 }
 0x1a1   : > { %p1072_p2 = pneg %p1071_p1 }
 0x1a3   : > { %1206 = dma.done.wait (%p1072_p2), %s800_s7, 64  }
 0x1a4   : > { %1208 = vsyncadd (%p1072_p2), %s800_s7, 4294967232  ;;  %s18_s23 = sadd.s32 1, %s1231_s23   ;;  %s1526_s18 = smov %s1215_s19 }
 0x1a5   : > { %p15_p3 = scmp.ge.s32.totalorder %s18_s23, 4   ;;  %s1527_s19 = smov %s1219_s20 }
 0x1a6   : > { %s1528_s20 = smov %s1323_s6  ;;  %s1529_s21 = smov %s1227_s22 }
 0x1a7   : > { %s1530_s22 = smov %s1532_s26  ;;  %17 = sbr.rel (!%p15_p3) target bundleno = 4 (0x4), region = 83 }
 0x1ac   :  { %805 = vsyncpa [#allocation3], 1 }
 0x1ad   :  { %807 = vsyncpa [#allocation3 + $0x1], 1 }

</bundles_post_ra>
